<compile_context>
chip_gen: v7x
topology: tpu7x:2x2x1
jax: 0.10.0
libtpu: 0.0.40
codegen_flags: <defaults>
</compile_context>

<pallas_src>
import functools

import jax
import jax.numpy as jnp
from jax import lax
from jax.experimental import pallas as pl
from jax.experimental.pallas import tpu as pltpu

D_MODEL = 512
N_HEADS = 8
HEAD_DIM = D_MODEL // N_HEADS
D_FF = 2048
N_LAYERS = 6
NUM_CLASSES = 10
EPS = 1e-5


# ------------------------------ kernel helpers ------------------------------ #

def _layernorm(y, gamma, beta):
    mean = jnp.mean(y, axis=-1, keepdims=True)
    c = y - mean
    var = jnp.mean(c * c, axis=-1, keepdims=True)
    return (c * lax.rsqrt(var + EPS)) * gamma + beta


# ------------------------------ fused kernel -------------------------------- #

def _encoder_stack_kernel(
    x_ref,
    in_proj_w_ref, in_proj_b_ref,
    out_proj_w_ref, out_proj_b_ref,
    ln1_g_ref, ln1_b_ref,
    ff1_w_ref, ff1_b_ref,
    ff2_w_ref, ff2_b_ref,
    ln2_g_ref, ln2_b_ref,
    fc_w_ref, fc_b_ref,
    out_ref,
    act_ref,
    *, seq_len, batch,
):
    layer = pl.program_id(0)

    # Load the input activation into the VMEM carry on the first layer only.
    @pl.when(layer == 0)
    def _():
        act_ref[...] = x_ref[...]

    x = act_ref[...]                                     # (M, E) f32
    x_bf = x.astype(jnp.bfloat16)

    # ------------------------------ self-attention ------------------------------
    qkv = jnp.dot(x_bf, in_proj_w_ref[0],
                  preferred_element_type=jnp.float32) + in_proj_b_ref[0]   # (M, 3E) f32
    q = qkv[:, 0:D_MODEL]
    k = qkv[:, D_MODEL:2 * D_MODEL]
    v = qkv[:, 2 * D_MODEL:3 * D_MODEL]
    scale = 1.0 / (HEAD_DIM ** 0.5)

    batch_outs = []
    for n in range(batch):                               # unrolled (static, tiny)
        r0 = n * seq_len
        qn = q[r0:r0 + seq_len, :]                       # (S, E)
        kn = k[r0:r0 + seq_len, :]
        vn = v[r0:r0 + seq_len, :]
        head_outs = []
        for h in range(N_HEADS):                         # unrolled (8 heads)
            c0 = h * HEAD_DIM
            qh = qn[:, c0:c0 + HEAD_DIM]                 # (S, Dh)
            kh = kn[:, c0:c0 + HEAD_DIM]
            vh = vn[:, c0:c0 + HEAD_DIM]
            # scores = qh @ kh^T  (contraction over the head dim, no explicit transpose)
            s = lax.dot_general(qh, kh, (((1,), (1,)), ((), ())),
                                preferred_element_type=jnp.float32) * scale   # (S, S)
            m = jnp.max(s, axis=-1, keepdims=True)
            p = jnp.exp(s - m)
            denom = jnp.sum(p, axis=-1, keepdims=True)
            p = p * pl.reciprocal(denom, approx=True)
            head_outs.append(jnp.dot(p, vh, preferred_element_type=jnp.float32))
        batch_outs.append(jnp.concatenate(head_outs, axis=-1))   # (S, E)
    attn = jnp.concatenate(batch_outs, axis=0)                   # (M, E)

    attn_out = jnp.dot(attn.astype(jnp.bfloat16), out_proj_w_ref[0],
                       preferred_element_type=jnp.float32) + out_proj_b_ref[0]

    # residual + LayerNorm1 (dropout is identity in eval mode)
    x1 = _layernorm(x + attn_out, ln1_g_ref[0], ln1_b_ref[0])

    # ------------------------------ feed-forward --------------------------------
    h1 = jnp.dot(x1.astype(jnp.bfloat16), ff1_w_ref[0],
                 preferred_element_type=jnp.float32) + ff1_b_ref[0]          # (M, 2048)
    h1 = jnp.maximum(h1, 0.0)
    ff = jnp.dot(h1.astype(jnp.bfloat16), ff2_w_ref[0],
                 preferred_element_type=jnp.float32) + ff2_b_ref[0]          # (M, E)

    # residual + LayerNorm2
    x2 = _layernorm(x1 + ff, ln2_g_ref[0], ln2_b_ref[0])
    act_ref[...] = x2

    # ----------------------- classifier head (last layer) -----------------------
    @pl.when(layer == pl.num_programs(0) - 1)
    def _():
        # Batch-major layout: rows 0..S-1 are batch element 0 at seq positions 0..S-1,
        # i.e. exactly x[:, 0, :] of the original (S, N, E) tensor.
        cls = x2[0:seq_len, :]                                                # (S, E)
        logits = jnp.dot(cls, fc_w_ref[...],
                         preferred_element_type=jnp.float32) + fc_b_ref[...]  # (S, C)
        out_ref[...] = logits


# ------------------------------ model wrapper -------------------------------- #

def transformer_forward(x, params):
    """x: (S, N, D_MODEL) float32 -> logits (S, NUM_CLASSES) float32."""
    S, N, E = x.shape
    assert E == D_MODEL
    M = S * N
    # batch-major flatten: each batch's sequence is a contiguous sublane block.
    xf = jnp.transpose(x, (1, 0, 2)).reshape(M, E)

    kernel = functools.partial(_encoder_stack_kernel, seq_len=S, batch=N)

    def layer_spec(shape):          # one layer slice per grid step (pipelined weights)
        return pl.BlockSpec((1,) + shape, lambda l: (l, 0, 0))

    def const_spec(shape):          # fetched once, resident across the grid
        return pl.BlockSpec(shape, lambda l: (0, 0))

    grid_spec = pltpu.PrefetchScalarGridSpec(
        num_scalar_prefetch=0,
        grid=(N_LAYERS,),
        in_specs=[
            const_spec((M, E)),                    # x (flattened tokens)
            layer_spec((E, 3 * E)),                # in_proj_w   (bf16)
            layer_spec((1, 3 * E)),                # in_proj_b
            layer_spec((E, E)),                    # out_proj_w  (bf16)
            layer_spec((1, E)),                    # out_proj_b
            layer_spec((1, E)),                    # ln1_g
            layer_spec((1, E)),                    # ln1_b
            layer_spec((E, D_FF)),                 # ff1_w       (bf16)
            layer_spec((1, D_FF)),                 # ff1_b
            layer_spec((D_FF, E)),                 # ff2_w       (bf16)
            layer_spec((1, E)),                    # ff2_b
            layer_spec((1, E)),                    # ln2_g
            layer_spec((1, E)),                    # ln2_b
            const_spec((E, NUM_CLASSES)),          # fc_w
            const_spec((1, NUM_CLASSES)),          # fc_b
        ],
        out_specs=pl.BlockSpec((S, NUM_CLASSES), lambda l: (0, 0)),
        scratch_shapes=[pltpu.VMEM((M, E), jnp.float32)],     # activation carry
    )

    return pl.pallas_call(
        kernel,
        out_shape=jax.ShapeDtypeStruct((S, NUM_CLASSES), jnp.float32),
        grid_spec=grid_spec,
        compiler_params=pltpu.CompilerParams(
            dimension_semantics=("arbitrary",),           # layers are sequential
            vmem_limit_bytes=48 * 1024 * 1024,            # ~12 MiB double-buffered bf16 weights
        ),
    )(
        xf,
        params["in_proj_w"], params["in_proj_b"],
        params["out_proj_w"], params["out_proj_b"],
        params["ln1_g"], params["ln1_b"],
        params["ff1_w"], params["ff1_b"],
        params["ff2_w"], params["ff2_b"],
        params["ln2_g"], params["ln2_b"],
        params["fc_w"], params["fc_b"],
    )


# --------------------------------- params ------------------------------------ #

def init_params(key):
    """All 6 layers stacked along a leading L axis. Big matrices stored bf16."""
    ks = jax.random.split(key, 5)

    def w(k, shape, scale=0.02):
        return (scale * jax.random.normal(k, shape, jnp.float32)).astype(jnp.bfloat16)

    return {
        "in_proj_w": w(ks[0], (N_LAYERS, D_MODEL, 3 * D_MODEL)),
        "in_proj_b": jnp.zeros((N_LAYERS, 1, 3 * D_MODEL), jnp.float32),
        "out_proj_w": w(ks[1], (N_LAYERS, D_MODEL, D_MODEL)),
        "out_proj_b": jnp.zeros((N_LAYERS, 1, D_MODEL), jnp.float32),
        "ln1_g": jnp.ones((N_LAYERS, 1, D_MODEL), jnp.float32),
        "ln1_b": jnp.zeros((N_LAYERS, 1, D_MODEL), jnp.float32),
        "ff1_w": w(ks[2], (N_LAYERS, D_MODEL, D_FF)),
        "ff1_b": jnp.zeros((N_LAYERS, 1, D_FF), jnp.float32),
        "ff2_w": w(ks[3], (N_LAYERS, D_FF, D_MODEL)),
        "ff2_b": jnp.zeros((N_LAYERS, 1, D_MODEL), jnp.float32),
        "ln2_g": jnp.ones((N_LAYERS, 1, D_MODEL), jnp.float32),
        "ln2_b": jnp.zeros((N_LAYERS, 1, D_MODEL), jnp.float32),
        "fc_w": 0.02 * jax.random.normal(ks[4], (D_MODEL, NUM_CLASSES), jnp.float32),
        "fc_b": jnp.zeros((1, NUM_CLASSES), jnp.float32),
    }


# ---------------------------------- main -------------------------------------- #

if __name__ == "__main__":
    key = jax.random.PRNGKey(0)
    key, kx = jax.random.split(key)

    S, N = 8, 2                                   # seq=8, batch=2 (S, N, E) layout
    x = jax.random.normal(kx, (S, N, D_MODEL), jnp.float32)

    params = init_params(key)

    fwd = jax.jit(transformer_forward)
    out = jax.block_until_ready(fwd(x, params))

    assert out.shape == (S, NUM_CLASSES), out.shape
    assert out.dtype == jnp.float32
    print("KERNEL_OK")
</pallas_src>

<mosaic_0001>
module attributes {stable_mosaic.version = 11 : i64} {
  func.func @_encoder_stack_kernel(%arg0: i32, %arg1: memref<16x512xf32, #tpu.memory_space<vmem>>, %arg2: memref<1x512x1536xbf16, #tpu.memory_space<vmem>>, %arg3: memref<1x1x1536xf32, #tpu.memory_space<vmem>>, %arg4: memref<1x512x512xbf16, #tpu.memory_space<vmem>>, %arg5: memref<1x1x512xf32, #tpu.memory_space<vmem>>, %arg6: memref<1x1x512xf32, #tpu.memory_space<vmem>>, %arg7: memref<1x1x512xf32, #tpu.memory_space<vmem>>, %arg8: memref<1x512x2048xbf16, #tpu.memory_space<vmem>>, %arg9: memref<1x1x2048xf32, #tpu.memory_space<vmem>>, %arg10: memref<1x2048x512xbf16, #tpu.memory_space<vmem>>, %arg11: memref<1x1x512xf32, #tpu.memory_space<vmem>>, %arg12: memref<1x1x512xf32, #tpu.memory_space<vmem>>, %arg13: memref<1x1x512xf32, #tpu.memory_space<vmem>>, %arg14: memref<512x10xf32, #tpu.memory_space<vmem>>, %arg15: memref<1x10xf32, #tpu.memory_space<vmem>>, %arg16: memref<8x10xf32, #tpu.memory_space<vmem>>, %arg17: memref<16x512xf32, #tpu.memory_space<vmem>>) attributes {dimension_semantics = [#tpu.dimension_semantics<arbitrary>], iteration_bounds = array<i64: 6>, scalar_prefetch = 0 : i64, scratch_operands = 1 : i64, tpu.core_type = #tpu.core_type<tc>, window_params = [{pipeline_mode = #tpu.pipeline_mode<synchronous>, transform_indices = @transform_0, window_bounds = array<i64: 16, 512>}, {transform_indices = @transform_1, window_bounds = array<i64: 1, 512, 1536>}, {transform_indices = @transform_2, window_bounds = array<i64: 1, 1, 1536>}, {transform_indices = @transform_3, window_bounds = array<i64: 1, 512, 512>}, {transform_indices = @transform_4, window_bounds = array<i64: 1, 1, 512>}, {transform_indices = @transform_5, window_bounds = array<i64: 1, 1, 512>}, {transform_indices = @transform_6, window_bounds = array<i64: 1, 1, 512>}, {transform_indices = @transform_7, window_bounds = array<i64: 1, 512, 2048>}, {transform_indices = @transform_8, window_bounds = array<i64: 1, 1, 2048>}, {transform_indices = @transform_9, window_bounds = array<i64: 1, 2048, 512>}, {transform_indices = @transform_10, window_bounds = array<i64: 1, 1, 512>}, {transform_indices = @transform_11, window_bounds = array<i64: 1, 1, 512>}, {transform_indices = @transform_12, window_bounds = array<i64: 1, 1, 512>}, {pipeline_mode = #tpu.pipeline_mode<synchronous>, transform_indices = @transform_13, window_bounds = array<i64: 512, 10>}, {pipeline_mode = #tpu.pipeline_mode<synchronous>, transform_indices = @transform_14, window_bounds = array<i64: 1, 10>}, {pipeline_mode = #tpu.pipeline_mode<synchronous>, transform_indices = @transform_15, window_bounds = array<i64: 8, 10>}]} {
    %c0_i32 = arith.constant 0 : i32
    %0 = arith.cmpi eq, %arg0, %c0_i32 : i32
    %1 = arith.extui %0 : i1 to i32
    %c0_i32_0 = arith.constant 0 : i32
    %2 = arith.cmpi ne, %1, %c0_i32_0 : i32
    scf.if %2 {
      %c0_135 = arith.constant 0 : index
      %c0_136 = arith.constant 0 : index
      %376 = vector.load %arg1[%c0_135, %c0_136] : memref<16x512xf32, #tpu.memory_space<vmem>>, vector<16x512xf32>
      %c0_137 = arith.constant 0 : index
      %c0_138 = arith.constant 0 : index
      %377 = vector.load %arg17[%c0_137, %c0_138] : memref<16x512xf32, #tpu.memory_space<vmem>>, vector<16x512xf32>
      tpu.vector_store %arg17[%c0_137, %c0_138], %376 {strides = array<i32>} : memref<16x512xf32, #tpu.memory_space<vmem>>, vector<16x512xf32>,
    } else {
    }
    %c0 = arith.constant 0 : index
    %c0_1 = arith.constant 0 : index
    %3 = vector.load %arg17[%c0, %c0_1] : memref<16x512xf32, #tpu.memory_space<vmem>>, vector<16x512xf32>
    %4 = arith.truncf %3 : vector<16x512xf32> to vector<16x512xbf16>
    %c0_2 = arith.constant 0 : index
    %c0_3 = arith.constant 0 : index
    %c0_4 = arith.constant 0 : index
    %5 = vector.load %arg2[%c0_2, %c0_3, %c0_4] : memref<1x512x1536xbf16, #tpu.memory_space<vmem>>, vector<1x512x1536xbf16>
    %6 = vector.shape_cast %5 : vector<1x512x1536xbf16> to vector<512x1536xbf16>
    %cst = arith.constant dense<0.000000e+00> : vector<16x1536xf32>
    %7 = tpu.matmul %4, %6, %cst {dimension_numbers = #tpu.dot_dimension_numbers<[1], [0], [0], [1], [0, 0, 1, 1], [], []>} : vector<16x512xbf16>, vector<512x1536xbf16>, vector<16x1536xf32> -> vector<16x1536xf32>
    %c0_5 = arith.constant 0 : index
    %c0_6 = arith.constant 0 : index
    %c0_7 = arith.constant 0 : index
    %8 = vector.load %arg3[%c0_5, %c0_6, %c0_7] : memref<1x1x1536xf32, #tpu.memory_space<vmem>>, vector<1x1x1536xf32>
    %9 = vector.shape_cast %8 : vector<1x1x1536xf32> to vector<1x1536xf32>
    %10 = vector.broadcast %9 : vector<1x1536xf32> to vector<16x1536xf32>
    %11 = arith.addf %7, %10 : vector<16x1536xf32>
    %12 = vector.extract_strided_slice %11 {offsets = [0, 0], sizes = [16, 512], strides = [1, 1]} : vector<16x1536xf32> to vector<16x512xf32>
    %13 = vector.extract_strided_slice %11 {offsets = [0, 512], sizes = [16, 512], strides = [1, 1]} : vector<16x1536xf32> to vector<16x512xf32>
    %14 = vector.extract_strided_slice %11 {offsets = [0, 1024], sizes = [16, 512], strides = [1, 1]} : vector<16x1536xf32> to vector<16x512xf32>
    %15 = vector.extract_strided_slice %12 {offsets = [0, 0], sizes = [8, 512], strides = [1, 1]} : vector<16x512xf32> to vector<8x512xf32>
    %16 = vector.extract_strided_slice %13 {offsets = [0, 0], sizes = [8, 512], strides = [1, 1]} : vector<16x512xf32> to vector<8x512xf32>
    %17 = vector.extract_strided_slice %14 {offsets = [0, 0], sizes = [8, 512], strides = [1, 1]} : vector<16x512xf32> to vector<8x512xf32>
    %18 = vector.extract_strided_slice %15 {offsets = [0, 0], sizes = [8, 64], strides = [1, 1]} : vector<8x512xf32> to vector<8x64xf32>
    %19 = vector.extract_strided_slice %16 {offsets = [0, 0], sizes = [8, 64], strides = [1, 1]} : vector<8x512xf32> to vector<8x64xf32>
    %20 = vector.extract_strided_slice %17 {offsets = [0, 0], sizes = [8, 64], strides = [1, 1]} : vector<8x512xf32> to vector<8x64xf32>
    %cst_8 = arith.constant dense<0.000000e+00> : vector<8x8xf32>
    %21 = tpu.matmul %18, %19, %cst_8 {dimension_numbers = #tpu.dot_dimension_numbers<[1], [1], [0], [0], [0, 0, 1, 0], [], []>} : vector<8x64xf32>, vector<8x64xf32>, vector<8x8xf32> -> vector<8x8xf32>
    %cst_9 = arith.constant 1.250000e-01 : f32
    %22 = vector.broadcast %cst_9 : f32 to vector<8x8xf32>
    %23 = arith.mulf %21, %22 : vector<8x8xf32>
    %cst_10 = arith.constant dense<0xFF800000> : vector<8xf32>
    %24 = vector.multi_reduction <maximumf>, %23, %cst_10 [1] : vector<8x8xf32> to vector<8xf32>
    %25 = vector.shape_cast %24 : vector<8xf32> to vector<8x1xf32>
    %26 = vector.broadcast %25 : vector<8x1xf32> to vector<8x8xf32>
    %27 = arith.subf %23, %26 : vector<8x8xf32>
    %28 = math.exp %27 : vector<8x8xf32>
    %cst_11 = arith.constant dense<0.000000e+00> : vector<8xf32>
    %29 = vector.multi_reduction <add>, %28, %cst_11 [1] : vector<8x8xf32> to vector<8xf32>
    %30 = vector.shape_cast %29 : vector<8xf32> to vector<8x1xf32>
    %31 = tpu.reciprocal %30 {approx = true} : vector<8x1xf32> -> vector<8x1xf32>
    %32 = vector.broadcast %31 : vector<8x1xf32> to vector<8x8xf32>
    %33 = arith.mulf %28, %32 : vector<8x8xf32>
    %cst_12 = arith.constant dense<0.000000e+00> : vector<8x64xf32>
    %34 = tpu.matmul %33, %20, %cst_12 {dimension_numbers = #tpu.dot_dimension_numbers<[1], [0], [0], [1], [0, 0, 1, 1], [], []>} : vector<8x8xf32>, vector<8x64xf32>, vector<8x64xf32> -> vector<8x64xf32>
    %35 = vector.extract_strided_slice %15 {offsets = [0, 64], sizes = [8, 64], strides = [1, 1]} : vector<8x512xf32> to vector<8x64xf32>
    %36 = vector.extract_strided_slice %16 {offsets = [0, 64], sizes = [8, 64], strides = [1, 1]} : vector<8x512xf32> to vector<8x64xf32>
    %37 = vector.extract_strided_slice %17 {offsets = [0, 64], sizes = [8, 64], strides = [1, 1]} : vector<8x512xf32> to vector<8x64xf32>
    %cst_13 = arith.constant dense<0.000000e+00> : vector<8x8xf32>
    %38 = tpu.matmul %35, %36, %cst_13 {dimension_numbers = #tpu.dot_dimension_numbers<[1], [1], [0], [0], [0, 0, 1, 0], [], []>} : vector<8x64xf32>, vector<8x64xf32>, vector<8x8xf32> -> vector<8x8xf32>
    %cst_14 = arith.constant 1.250000e-01 : f32
    %39 = vector.broadcast %cst_14 : f32 to vector<8x8xf32>
    %40 = arith.mulf %38, %39 : vector<8x8xf32>
    %cst_15 = arith.constant dense<0xFF800000> : vector<8xf32>
    %41 = vector.multi_reduction <maximumf>, %40, %cst_15 [1] : vector<8x8xf32> to vector<8xf32>
    %42 = vector.shape_cast %41 : vector<8xf32> to vector<8x1xf32>
    %43 = vector.broadcast %42 : vector<8x1xf32> to vector<8x8xf32>
    %44 = arith.subf %40, %43 : vector<8x8xf32>
    %45 = math.exp %44 : vector<8x8xf32>
    %cst_16 = arith.constant dense<0.000000e+00> : vector<8xf32>
    %46 = vector.multi_reduction <add>, %45, %cst_16 [1] : vector<8x8xf32> to vector<8xf32>
    %47 = vector.shape_cast %46 : vector<8xf32> to vector<8x1xf32>
    %48 = tpu.reciprocal %47 {approx = true} : vector<8x1xf32> -> vector<8x1xf32>
    %49 = vector.broadcast %48 : vector<8x1xf32> to vector<8x8xf32>
    %50 = arith.mulf %45, %49 : vector<8x8xf32>
    %cst_17 = arith.constant dense<0.000000e+00> : vector<8x64xf32>
    %51 = tpu.matmul %50, %37, %cst_17 {dimension_numbers = #tpu.dot_dimension_numbers<[1], [0], [0], [1], [0, 0, 1, 1], [], []>} : vector<8x8xf32>, vector<8x64xf32>, vector<8x64xf32> -> vector<8x64xf32>
    %52 = vector.extract_strided_slice %15 {offsets = [0, 128], sizes = [8, 64], strides = [1, 1]} : vector<8x512xf32> to vector<8x64xf32>
    %53 = vector.extract_strided_slice %16 {offsets = [0, 128], sizes = [8, 64], strides = [1, 1]} : vector<8x512xf32> to vector<8x64xf32>
    %54 = vector.extract_strided_slice %17 {offsets = [0, 128], sizes = [8, 64], strides = [1, 1]} : vector<8x512xf32> to vector<8x64xf32>
    %cst_18 = arith.constant dense<0.000000e+00> : vector<8x8xf32>
    %55 = tpu.matmul %52, %53, %cst_18 {dimension_numbers = #tpu.dot_dimension_numbers<[1], [1], [0], [0], [0, 0, 1, 0], [], []>} : vector<8x64xf32>, vector<8x64xf32>, vector<8x8xf32> -> vector<8x8xf32>
    %cst_19 = arith.constant 1.250000e-01 : f32
    %56 = vector.broadcast %cst_19 : f32 to vector<8x8xf32>
    %57 = arith.mulf %55, %56 : vector<8x8xf32>
    %cst_20 = arith.constant dense<0xFF800000> : vector<8xf32>
    %58 = vector.multi_reduction <maximumf>, %57, %cst_20 [1] : vector<8x8xf32> to vector<8xf32>
    %59 = vector.shape_cast %58 : vector<8xf32> to vector<8x1xf32>
    %60 = vector.broadcast %59 : vector<8x1xf32> to vector<8x8xf32>
    %61 = arith.subf %57, %60 : vector<8x8xf32>
    %62 = math.exp %61 : vector<8x8xf32>
    %cst_21 = arith.constant dense<0.000000e+00> : vector<8xf32>
    %63 = vector.multi_reduction <add>, %62, %cst_21 [1] : vector<8x8xf32> to vector<8xf32>
    %64 = vector.shape_cast %63 : vector<8xf32> to vector<8x1xf32>
    %65 = tpu.reciprocal %64 {approx = true} : vector<8x1xf32> -> vector<8x1xf32>
    %66 = vector.broadcast %65 : vector<8x1xf32> to vector<8x8xf32>
    %67 = arith.mulf %62, %66 : vector<8x8xf32>
    %cst_22 = arith.constant dense<0.000000e+00> : vector<8x64xf32>
    %68 = tpu.matmul %67, %54, %cst_22 {dimension_numbers = #tpu.dot_dimension_numbers<[1], [0], [0], [1], [0, 0, 1, 1], [], []>} : vector<8x8xf32>, vector<8x64xf32>, vector<8x64xf32> -> vector<8x64xf32>
    %69 = vector.extract_strided_slice %15 {offsets = [0, 192], sizes = [8, 64], strides = [1, 1]} : vector<8x512xf32> to vector<8x64xf32>
    %70 = vector.extract_strided_slice %16 {offsets = [0, 192], sizes = [8, 64], strides = [1, 1]} : vector<8x512xf32> to vector<8x64xf32>
    %71 = vector.extract_strided_slice %17 {offsets = [0, 192], sizes = [8, 64], strides = [1, 1]} : vector<8x512xf32> to vector<8x64xf32>
    %cst_23 = arith.constant dense<0.000000e+00> : vector<8x8xf32>
    %72 = tpu.matmul %69, %70, %cst_23 {dimension_numbers = #tpu.dot_dimension_numbers<[1], [1], [0], [0], [0, 0, 1, 0], [], []>} : vector<8x64xf32>, vector<8x64xf32>, vector<8x8xf32> -> vector<8x8xf32>
    %cst_24 = arith.constant 1.250000e-01 : f32
    %73 = vector.broadcast %cst_24 : f32 to vector<8x8xf32>
    %74 = arith.mulf %72, %73 : vector<8x8xf32>
    %cst_25 = arith.constant dense<0xFF800000> : vector<8xf32>
    %75 = vector.multi_reduction <maximumf>, %74, %cst_25 [1] : vector<8x8xf32> to vector<8xf32>
    %76 = vector.shape_cast %75 : vector<8xf32> to vector<8x1xf32>
    %77 = vector.broadcast %76 : vector<8x1xf32> to vector<8x8xf32>
    %78 = arith.subf %74, %77 : vector<8x8xf32>
    %79 = math.exp %78 : vector<8x8xf32>
    %cst_26 = arith.constant dense<0.000000e+00> : vector<8xf32>
    %80 = vector.multi_reduction <add>, %79, %cst_26 [1] : vector<8x8xf32> to vector<8xf32>
    %81 = vector.shape_cast %80 : vector<8xf32> to vector<8x1xf32>
    %82 = tpu.reciprocal %81 {approx = true} : vector<8x1xf32> -> vector<8x1xf32>
    %83 = vector.broadcast %82 : vector<8x1xf32> to vector<8x8xf32>
    %84 = arith.mulf %79, %83 : vector<8x8xf32>
    %cst_27 = arith.constant dense<0.000000e+00> : vector<8x64xf32>
    %85 = tpu.matmul %84, %71, %cst_27 {dimension_numbers = #tpu.dot_dimension_numbers<[1], [0], [0], [1], [0, 0, 1, 1], [], []>} : vector<8x8xf32>, vector<8x64xf32>, vector<8x64xf32> -> vector<8x64xf32>
    %86 = vector.extract_strided_slice %15 {offsets = [0, 256], sizes = [8, 64], strides = [1, 1]} : vector<8x512xf32> to vector<8x64xf32>
    %87 = vector.extract_strided_slice %16 {offsets = [0, 256], sizes = [8, 64], strides = [1, 1]} : vector<8x512xf32> to vector<8x64xf32>
    %88 = vector.extract_strided_slice %17 {offsets = [0, 256], sizes = [8, 64], strides = [1, 1]} : vector<8x512xf32> to vector<8x64xf32>
    %cst_28 = arith.constant dense<0.000000e+00> : vector<8x8xf32>
    %89 = tpu.matmul %86, %87, %cst_28 {dimension_numbers = #tpu.dot_dimension_numbers<[1], [1], [0], [0], [0, 0, 1, 0], [], []>} : vector<8x64xf32>, vector<8x64xf32>, vector<8x8xf32> -> vector<8x8xf32>
    %cst_29 = arith.constant 1.250000e-01 : f32
    %90 = vector.broadcast %cst_29 : f32 to vector<8x8xf32>
    %91 = arith.mulf %89, %90 : vector<8x8xf32>
    %cst_30 = arith.constant dense<0xFF800000> : vector<8xf32>
    %92 = vector.multi_reduction <maximumf>, %91, %cst_30 [1] : vector<8x8xf32> to vector<8xf32>
    %93 = vector.shape_cast %92 : vector<8xf32> to vector<8x1xf32>
    %94 = vector.broadcast %93 : vector<8x1xf32> to vector<8x8xf32>
    %95 = arith.subf %91, %94 : vector<8x8xf32>
    %96 = math.exp %95 : vector<8x8xf32>
    %cst_31 = arith.constant dense<0.000000e+00> : vector<8xf32>
    %97 = vector.multi_reduction <add>, %96, %cst_31 [1] : vector<8x8xf32> to vector<8xf32>
    %98 = vector.shape_cast %97 : vector<8xf32> to vector<8x1xf32>
    %99 = tpu.reciprocal %98 {approx = true} : vector<8x1xf32> -> vector<8x1xf32>
    %100 = vector.broadcast %99 : vector<8x1xf32> to vector<8x8xf32>
    %101 = arith.mulf %96, %100 : vector<8x8xf32>
    %cst_32 = arith.constant dense<0.000000e+00> : vector<8x64xf32>
    %102 = tpu.matmul %101, %88, %cst_32 {dimension_numbers = #tpu.dot_dimension_numbers<[1], [0], [0], [1], [0, 0, 1, 1], [], []>} : vector<8x8xf32>, vector<8x64xf32>, vector<8x64xf32> -> vector<8x64xf32>
    %103 = vector.extract_strided_slice %15 {offsets = [0, 320], sizes = [8, 64], strides = [1, 1]} : vector<8x512xf32> to vector<8x64xf32>
    %104 = vector.extract_strided_slice %16 {offsets = [0, 320], sizes = [8, 64], strides = [1, 1]} : vector<8x512xf32> to vector<8x64xf32>
    %105 = vector.extract_strided_slice %17 {offsets = [0, 320], sizes = [8, 64], strides = [1, 1]} : vector<8x512xf32> to vector<8x64xf32>
    %cst_33 = arith.constant dense<0.000000e+00> : vector<8x8xf32>
    %106 = tpu.matmul %103, %104, %cst_33 {dimension_numbers = #tpu.dot_dimension_numbers<[1], [1], [0], [0], [0, 0, 1, 0], [], []>} : vector<8x64xf32>, vector<8x64xf32>, vector<8x8xf32> -> vector<8x8xf32>
    %cst_34 = arith.constant 1.250000e-01 : f32
    %107 = vector.broadcast %cst_34 : f32 to vector<8x8xf32>
    %108 = arith.mulf %106, %107 : vector<8x8xf32>
    %cst_35 = arith.constant dense<0xFF800000> : vector<8xf32>
    %109 = vector.multi_reduction <maximumf>, %108, %cst_35 [1] : vector<8x8xf32> to vector<8xf32>
    %110 = vector.shape_cast %109 : vector<8xf32> to vector<8x1xf32>
    %111 = vector.broadcast %110 : vector<8x1xf32> to vector<8x8xf32>
    %112 = arith.subf %108, %111 : vector<8x8xf32>
    %113 = math.exp %112 : vector<8x8xf32>
    %cst_36 = arith.constant dense<0.000000e+00> : vector<8xf32>
    %114 = vector.multi_reduction <add>, %113, %cst_36 [1] : vector<8x8xf32> to vector<8xf32>
    %115 = vector.shape_cast %114 : vector<8xf32> to vector<8x1xf32>
    %116 = tpu.reciprocal %115 {approx = true} : vector<8x1xf32> -> vector<8x1xf32>
    %117 = vector.broadcast %116 : vector<8x1xf32> to vector<8x8xf32>
    %118 = arith.mulf %113, %117 : vector<8x8xf32>
    %cst_37 = arith.constant dense<0.000000e+00> : vector<8x64xf32>
    %119 = tpu.matmul %118, %105, %cst_37 {dimension_numbers = #tpu.dot_dimension_numbers<[1], [0], [0], [1], [0, 0, 1, 1], [], []>} : vector<8x8xf32>, vector<8x64xf32>, vector<8x64xf32> -> vector<8x64xf32>
    %120 = vector.extract_strided_slice %15 {offsets = [0, 384], sizes = [8, 64], strides = [1, 1]} : vector<8x512xf32> to vector<8x64xf32>
    %121 = vector.extract_strided_slice %16 {offsets = [0, 384], sizes = [8, 64], strides = [1, 1]} : vector<8x512xf32> to vector<8x64xf32>
    %122 = vector.extract_strided_slice %17 {offsets = [0, 384], sizes = [8, 64], strides = [1, 1]} : vector<8x512xf32> to vector<8x64xf32>
    %cst_38 = arith.constant dense<0.000000e+00> : vector<8x8xf32>
    %123 = tpu.matmul %120, %121, %cst_38 {dimension_numbers = #tpu.dot_dimension_numbers<[1], [1], [0], [0], [0, 0, 1, 0], [], []>} : vector<8x64xf32>, vector<8x64xf32>, vector<8x8xf32> -> vector<8x8xf32>
    %cst_39 = arith.constant 1.250000e-01 : f32
    %124 = vector.broadcast %cst_39 : f32 to vector<8x8xf32>
    %125 = arith.mulf %123, %124 : vector<8x8xf32>
    %cst_40 = arith.constant dense<0xFF800000> : vector<8xf32>
    %126 = vector.multi_reduction <maximumf>, %125, %cst_40 [1] : vector<8x8xf32> to vector<8xf32>
    %127 = vector.shape_cast %126 : vector<8xf32> to vector<8x1xf32>
    %128 = vector.broadcast %127 : vector<8x1xf32> to vector<8x8xf32>
    %129 = arith.subf %125, %128 : vector<8x8xf32>
    %130 = math.exp %129 : vector<8x8xf32>
    %cst_41 = arith.constant dense<0.000000e+00> : vector<8xf32>
    %131 = vector.multi_reduction <add>, %130, %cst_41 [1] : vector<8x8xf32> to vector<8xf32>
    %132 = vector.shape_cast %131 : vector<8xf32> to vector<8x1xf32>
    %133 = tpu.reciprocal %132 {approx = true} : vector<8x1xf32> -> vector<8x1xf32>
    %134 = vector.broadcast %133 : vector<8x1xf32> to vector<8x8xf32>
    %135 = arith.mulf %130, %134 : vector<8x8xf32>
    %cst_42 = arith.constant dense<0.000000e+00> : vector<8x64xf32>
    %136 = tpu.matmul %135, %122, %cst_42 {dimension_numbers = #tpu.dot_dimension_numbers<[1], [0], [0], [1], [0, 0, 1, 1], [], []>} : vector<8x8xf32>, vector<8x64xf32>, vector<8x64xf32> -> vector<8x64xf32>
    %137 = vector.extract_strided_slice %15 {offsets = [0, 448], sizes = [8, 64], strides = [1, 1]} : vector<8x512xf32> to vector<8x64xf32>
    %138 = vector.extract_strided_slice %16 {offsets = [0, 448], sizes = [8, 64], strides = [1, 1]} : vector<8x512xf32> to vector<8x64xf32>
    %139 = vector.extract_strided_slice %17 {offsets = [0, 448], sizes = [8, 64], strides = [1, 1]} : vector<8x512xf32> to vector<8x64xf32>
    %cst_43 = arith.constant dense<0.000000e+00> : vector<8x8xf32>
    %140 = tpu.matmul %137, %138, %cst_43 {dimension_numbers = #tpu.dot_dimension_numbers<[1], [1], [0], [0], [0, 0, 1, 0], [], []>} : vector<8x64xf32>, vector<8x64xf32>, vector<8x8xf32> -> vector<8x8xf32>
    %cst_44 = arith.constant 1.250000e-01 : f32
    %141 = vector.broadcast %cst_44 : f32 to vector<8x8xf32>
    %142 = arith.mulf %140, %141 : vector<8x8xf32>
    %cst_45 = arith.constant dense<0xFF800000> : vector<8xf32>
    %143 = vector.multi_reduction <maximumf>, %142, %cst_45 [1] : vector<8x8xf32> to vector<8xf32>
    %144 = vector.shape_cast %143 : vector<8xf32> to vector<8x1xf32>
    %145 = vector.broadcast %144 : vector<8x1xf32> to vector<8x8xf32>
    %146 = arith.subf %142, %145 : vector<8x8xf32>
    %147 = math.exp %146 : vector<8x8xf32>
    %cst_46 = arith.constant dense<0.000000e+00> : vector<8xf32>
    %148 = vector.multi_reduction <add>, %147, %cst_46 [1] : vector<8x8xf32> to vector<8xf32>
    %149 = vector.shape_cast %148 : vector<8xf32> to vector<8x1xf32>
    %150 = tpu.reciprocal %149 {approx = true} : vector<8x1xf32> -> vector<8x1xf32>
    %151 = vector.broadcast %150 : vector<8x1xf32> to vector<8x8xf32>
    %152 = arith.mulf %147, %151 : vector<8x8xf32>
    %cst_47 = arith.constant dense<0.000000e+00> : vector<8x64xf32>
    %153 = tpu.matmul %152, %139, %cst_47 {dimension_numbers = #tpu.dot_dimension_numbers<[1], [0], [0], [1], [0, 0, 1, 1], [], []>} : vector<8x8xf32>, vector<8x64xf32>, vector<8x64xf32> -> vector<8x64xf32>
    %154 = tpu.concatenate %34, %51, %68, %85, %102, %119, %136, %153 in 1 : vector<8x64xf32>, vector<8x64xf32>, vector<8x64xf32>, vector<8x64xf32>, vector<8x64xf32>, vector<8x64xf32>, vector<8x64xf32>, vector<8x64xf32> -> vector<8x512xf32>
    %155 = vector.extract_strided_slice %12 {offsets = [8, 0], sizes = [8, 512], strides = [1, 1]} : vector<16x512xf32> to vector<8x512xf32>
    %156 = vector.extract_strided_slice %13 {offsets = [8, 0], sizes = [8, 512], strides = [1, 1]} : vector<16x512xf32> to vector<8x512xf32>
    %157 = vector.extract_strided_slice %14 {offsets = [8, 0], sizes = [8, 512], strides = [1, 1]} : vector<16x512xf32> to vector<8x512xf32>
    %158 = vector.extract_strided_slice %155 {offsets = [0, 0], sizes = [8, 64], strides = [1, 1]} : vector<8x512xf32> to vector<8x64xf32>
    %159 = vector.extract_strided_slice %156 {offsets = [0, 0], sizes = [8, 64], strides = [1, 1]} : vector<8x512xf32> to vector<8x64xf32>
    %160 = vector.extract_strided_slice %157 {offsets = [0, 0], sizes = [8, 64], strides = [1, 1]} : vector<8x512xf32> to vector<8x64xf32>
    %cst_48 = arith.constant dense<0.000000e+00> : vector<8x8xf32>
    %161 = tpu.matmul %158, %159, %cst_48 {dimension_numbers = #tpu.dot_dimension_numbers<[1], [1], [0], [0], [0, 0, 1, 0], [], []>} : vector<8x64xf32>, vector<8x64xf32>, vector<8x8xf32> -> vector<8x8xf32>
    %cst_49 = arith.constant 1.250000e-01 : f32
    %162 = vector.broadcast %cst_49 : f32 to vector<8x8xf32>
    %163 = arith.mulf %161, %162 : vector<8x8xf32>
    %cst_50 = arith.constant dense<0xFF800000> : vector<8xf32>
    %164 = vector.multi_reduction <maximumf>, %163, %cst_50 [1] : vector<8x8xf32> to vector<8xf32>
    %165 = vector.shape_cast %164 : vector<8xf32> to vector<8x1xf32>
    %166 = vector.broadcast %165 : vector<8x1xf32> to vector<8x8xf32>
    %167 = arith.subf %163, %166 : vector<8x8xf32>
    %168 = math.exp %167 : vector<8x8xf32>
    %cst_51 = arith.constant dense<0.000000e+00> : vector<8xf32>
    %169 = vector.multi_reduction <add>, %168, %cst_51 [1] : vector<8x8xf32> to vector<8xf32>
    %170 = vector.shape_cast %169 : vector<8xf32> to vector<8x1xf32>
    %171 = tpu.reciprocal %170 {approx = true} : vector<8x1xf32> -> vector<8x1xf32>
    %172 = vector.broadcast %171 : vector<8x1xf32> to vector<8x8xf32>
    %173 = arith.mulf %168, %172 : vector<8x8xf32>
    %cst_52 = arith.constant dense<0.000000e+00> : vector<8x64xf32>
    %174 = tpu.matmul %173, %160, %cst_52 {dimension_numbers = #tpu.dot_dimension_numbers<[1], [0], [0], [1], [0, 0, 1, 1], [], []>} : vector<8x8xf32>, vector<8x64xf32>, vector<8x64xf32> -> vector<8x64xf32>
    %175 = vector.extract_strided_slice %155 {offsets = [0, 64], sizes = [8, 64], strides = [1, 1]} : vector<8x512xf32> to vector<8x64xf32>
    %176 = vector.extract_strided_slice %156 {offsets = [0, 64], sizes = [8, 64], strides = [1, 1]} : vector<8x512xf32> to vector<8x64xf32>
    %177 = vector.extract_strided_slice %157 {offsets = [0, 64], sizes = [8, 64], strides = [1, 1]} : vector<8x512xf32> to vector<8x64xf32>
    %cst_53 = arith.constant dense<0.000000e+00> : vector<8x8xf32>
    %178 = tpu.matmul %175, %176, %cst_53 {dimension_numbers = #tpu.dot_dimension_numbers<[1], [1], [0], [0], [0, 0, 1, 0], [], []>} : vector<8x64xf32>, vector<8x64xf32>, vector<8x8xf32> -> vector<8x8xf32>
    %cst_54 = arith.constant 1.250000e-01 : f32
    %179 = vector.broadcast %cst_54 : f32 to vector<8x8xf32>
    %180 = arith.mulf %178, %179 : vector<8x8xf32>
    %cst_55 = arith.constant dense<0xFF800000> : vector<8xf32>
    %181 = vector.multi_reduction <maximumf>, %180, %cst_55 [1] : vector<8x8xf32> to vector<8xf32>
    %182 = vector.shape_cast %181 : vector<8xf32> to vector<8x1xf32>
    %183 = vector.broadcast %182 : vector<8x1xf32> to vector<8x8xf32>
    %184 = arith.subf %180, %183 : vector<8x8xf32>
    %185 = math.exp %184 : vector<8x8xf32>
    %cst_56 = arith.constant dense<0.000000e+00> : vector<8xf32>
    %186 = vector.multi_reduction <add>, %185, %cst_56 [1] : vector<8x8xf32> to vector<8xf32>
    %187 = vector.shape_cast %186 : vector<8xf32> to vector<8x1xf32>
    %188 = tpu.reciprocal %187 {approx = true} : vector<8x1xf32> -> vector<8x1xf32>
    %189 = vector.broadcast %188 : vector<8x1xf32> to vector<8x8xf32>
    %190 = arith.mulf %185, %189 : vector<8x8xf32>
    %cst_57 = arith.constant dense<0.000000e+00> : vector<8x64xf32>
    %191 = tpu.matmul %190, %177, %cst_57 {dimension_numbers = #tpu.dot_dimension_numbers<[1], [0], [0], [1], [0, 0, 1, 1], [], []>} : vector<8x8xf32>, vector<8x64xf32>, vector<8x64xf32> -> vector<8x64xf32>
    %192 = vector.extract_strided_slice %155 {offsets = [0, 128], sizes = [8, 64], strides = [1, 1]} : vector<8x512xf32> to vector<8x64xf32>
    %193 = vector.extract_strided_slice %156 {offsets = [0, 128], sizes = [8, 64], strides = [1, 1]} : vector<8x512xf32> to vector<8x64xf32>
    %194 = vector.extract_strided_slice %157 {offsets = [0, 128], sizes = [8, 64], strides = [1, 1]} : vector<8x512xf32> to vector<8x64xf32>
    %cst_58 = arith.constant dense<0.000000e+00> : vector<8x8xf32>
    %195 = tpu.matmul %192, %193, %cst_58 {dimension_numbers = #tpu.dot_dimension_numbers<[1], [1], [0], [0], [0, 0, 1, 0], [], []>} : vector<8x64xf32>, vector<8x64xf32>, vector<8x8xf32> -> vector<8x8xf32>
    %cst_59 = arith.constant 1.250000e-01 : f32
    %196 = vector.broadcast %cst_59 : f32 to vector<8x8xf32>
    %197 = arith.mulf %195, %196 : vector<8x8xf32>
    %cst_60 = arith.constant dense<0xFF800000> : vector<8xf32>
    %198 = vector.multi_reduction <maximumf>, %197, %cst_60 [1] : vector<8x8xf32> to vector<8xf32>
    %199 = vector.shape_cast %198 : vector<8xf32> to vector<8x1xf32>
    %200 = vector.broadcast %199 : vector<8x1xf32> to vector<8x8xf32>
    %201 = arith.subf %197, %200 : vector<8x8xf32>
    %202 = math.exp %201 : vector<8x8xf32>
    %cst_61 = arith.constant dense<0.000000e+00> : vector<8xf32>
    %203 = vector.multi_reduction <add>, %202, %cst_61 [1] : vector<8x8xf32> to vector<8xf32>
    %204 = vector.shape_cast %203 : vector<8xf32> to vector<8x1xf32>
    %205 = tpu.reciprocal %204 {approx = true} : vector<8x1xf32> -> vector<8x1xf32>
    %206 = vector.broadcast %205 : vector<8x1xf32> to vector<8x8xf32>
    %207 = arith.mulf %202, %206 : vector<8x8xf32>
    %cst_62 = arith.constant dense<0.000000e+00> : vector<8x64xf32>
    %208 = tpu.matmul %207, %194, %cst_62 {dimension_numbers = #tpu.dot_dimension_numbers<[1], [0], [0], [1], [0, 0, 1, 1], [], []>} : vector<8x8xf32>, vector<8x64xf32>, vector<8x64xf32> -> vector<8x64xf32>
    %209 = vector.extract_strided_slice %155 {offsets = [0, 192], sizes = [8, 64], strides = [1, 1]} : vector<8x512xf32> to vector<8x64xf32>
    %210 = vector.extract_strided_slice %156 {offsets = [0, 192], sizes = [8, 64], strides = [1, 1]} : vector<8x512xf32> to vector<8x64xf32>
    %211 = vector.extract_strided_slice %157 {offsets = [0, 192], sizes = [8, 64], strides = [1, 1]} : vector<8x512xf32> to vector<8x64xf32>
    %cst_63 = arith.constant dense<0.000000e+00> : vector<8x8xf32>
    %212 = tpu.matmul %209, %210, %cst_63 {dimension_numbers = #tpu.dot_dimension_numbers<[1], [1], [0], [0], [0, 0, 1, 0], [], []>} : vector<8x64xf32>, vector<8x64xf32>, vector<8x8xf32> -> vector<8x8xf32>
    %cst_64 = arith.constant 1.250000e-01 : f32
    %213 = vector.broadcast %cst_64 : f32 to vector<8x8xf32>
    %214 = arith.mulf %212, %213 : vector<8x8xf32>
    %cst_65 = arith.constant dense<0xFF800000> : vector<8xf32>
    %215 = vector.multi_reduction <maximumf>, %214, %cst_65 [1] : vector<8x8xf32> to vector<8xf32>
    %216 = vector.shape_cast %215 : vector<8xf32> to vector<8x1xf32>
    %217 = vector.broadcast %216 : vector<8x1xf32> to vector<8x8xf32>
    %218 = arith.subf %214, %217 : vector<8x8xf32>
    %219 = math.exp %218 : vector<8x8xf32>
    %cst_66 = arith.constant dense<0.000000e+00> : vector<8xf32>
    %220 = vector.multi_reduction <add>, %219, %cst_66 [1] : vector<8x8xf32> to vector<8xf32>
    %221 = vector.shape_cast %220 : vector<8xf32> to vector<8x1xf32>
    %222 = tpu.reciprocal %221 {approx = true} : vector<8x1xf32> -> vector<8x1xf32>
    %223 = vector.broadcast %222 : vector<8x1xf32> to vector<8x8xf32>
    %224 = arith.mulf %219, %223 : vector<8x8xf32>
    %cst_67 = arith.constant dense<0.000000e+00> : vector<8x64xf32>
    %225 = tpu.matmul %224, %211, %cst_67 {dimension_numbers = #tpu.dot_dimension_numbers<[1], [0], [0], [1], [0, 0, 1, 1], [], []>} : vector<8x8xf32>, vector<8x64xf32>, vector<8x64xf32> -> vector<8x64xf32>
    %226 = vector.extract_strided_slice %155 {offsets = [0, 256], sizes = [8, 64], strides = [1, 1]} : vector<8x512xf32> to vector<8x64xf32>
    %227 = vector.extract_strided_slice %156 {offsets = [0, 256], sizes = [8, 64], strides = [1, 1]} : vector<8x512xf32> to vector<8x64xf32>
    %228 = vector.extract_strided_slice %157 {offsets = [0, 256], sizes = [8, 64], strides = [1, 1]} : vector<8x512xf32> to vector<8x64xf32>
    %cst_68 = arith.constant dense<0.000000e+00> : vector<8x8xf32>
    %229 = tpu.matmul %226, %227, %cst_68 {dimension_numbers = #tpu.dot_dimension_numbers<[1], [1], [0], [0], [0, 0, 1, 0], [], []>} : vector<8x64xf32>, vector<8x64xf32>, vector<8x8xf32> -> vector<8x8xf32>
    %cst_69 = arith.constant 1.250000e-01 : f32
    %230 = vector.broadcast %cst_69 : f32 to vector<8x8xf32>
    %231 = arith.mulf %229, %230 : vector<8x8xf32>
    %cst_70 = arith.constant dense<0xFF800000> : vector<8xf32>
    %232 = vector.multi_reduction <maximumf>, %231, %cst_70 [1] : vector<8x8xf32> to vector<8xf32>
    %233 = vector.shape_cast %232 : vector<8xf32> to vector<8x1xf32>
    %234 = vector.broadcast %233 : vector<8x1xf32> to vector<8x8xf32>
    %235 = arith.subf %231, %234 : vector<8x8xf32>
    %236 = math.exp %235 : vector<8x8xf32>
    %cst_71 = arith.constant dense<0.000000e+00> : vector<8xf32>
    %237 = vector.multi_reduction <add>, %236, %cst_71 [1] : vector<8x8xf32> to vector<8xf32>
    %238 = vector.shape_cast %237 : vector<8xf32> to vector<8x1xf32>
    %239 = tpu.reciprocal %238 {approx = true} : vector<8x1xf32> -> vector<8x1xf32>
    %240 = vector.broadcast %239 : vector<8x1xf32> to vector<8x8xf32>
    %241 = arith.mulf %236, %240 : vector<8x8xf32>
    %cst_72 = arith.constant dense<0.000000e+00> : vector<8x64xf32>
    %242 = tpu.matmul %241, %228, %cst_72 {dimension_numbers = #tpu.dot_dimension_numbers<[1], [0], [0], [1], [0, 0, 1, 1], [], []>} : vector<8x8xf32>, vector<8x64xf32>, vector<8x64xf32> -> vector<8x64xf32>
    %243 = vector.extract_strided_slice %155 {offsets = [0, 320], sizes = [8, 64], strides = [1, 1]} : vector<8x512xf32> to vector<8x64xf32>
    %244 = vector.extract_strided_slice %156 {offsets = [0, 320], sizes = [8, 64], strides = [1, 1]} : vector<8x512xf32> to vector<8x64xf32>
    %245 = vector.extract_strided_slice %157 {offsets = [0, 320], sizes = [8, 64], strides = [1, 1]} : vector<8x512xf32> to vector<8x64xf32>
    %cst_73 = arith.constant dense<0.000000e+00> : vector<8x8xf32>
    %246 = tpu.matmul %243, %244, %cst_73 {dimension_numbers = #tpu.dot_dimension_numbers<[1], [1], [0], [0], [0, 0, 1, 0], [], []>} : vector<8x64xf32>, vector<8x64xf32>, vector<8x8xf32> -> vector<8x8xf32>
    %cst_74 = arith.constant 1.250000e-01 : f32
    %247 = vector.broadcast %cst_74 : f32 to vector<8x8xf32>
    %248 = arith.mulf %246, %247 : vector<8x8xf32>
    %cst_75 = arith.constant dense<0xFF800000> : vector<8xf32>
    %249 = vector.multi_reduction <maximumf>, %248, %cst_75 [1] : vector<8x8xf32> to vector<8xf32>
    %250 = vector.shape_cast %249 : vector<8xf32> to vector<8x1xf32>
    %251 = vector.broadcast %250 : vector<8x1xf32> to vector<8x8xf32>
    %252 = arith.subf %248, %251 : vector<8x8xf32>
    %253 = math.exp %252 : vector<8x8xf32>
    %cst_76 = arith.constant dense<0.000000e+00> : vector<8xf32>
    %254 = vector.multi_reduction <add>, %253, %cst_76 [1] : vector<8x8xf32> to vector<8xf32>
    %255 = vector.shape_cast %254 : vector<8xf32> to vector<8x1xf32>
    %256 = tpu.reciprocal %255 {approx = true} : vector<8x1xf32> -> vector<8x1xf32>
    %257 = vector.broadcast %256 : vector<8x1xf32> to vector<8x8xf32>
    %258 = arith.mulf %253, %257 : vector<8x8xf32>
    %cst_77 = arith.constant dense<0.000000e+00> : vector<8x64xf32>
    %259 = tpu.matmul %258, %245, %cst_77 {dimension_numbers = #tpu.dot_dimension_numbers<[1], [0], [0], [1], [0, 0, 1, 1], [], []>} : vector<8x8xf32>, vector<8x64xf32>, vector<8x64xf32> -> vector<8x64xf32>
    %260 = vector.extract_strided_slice %155 {offsets = [0, 384], sizes = [8, 64], strides = [1, 1]} : vector<8x512xf32> to vector<8x64xf32>
    %261 = vector.extract_strided_slice %156 {offsets = [0, 384], sizes = [8, 64], strides = [1, 1]} : vector<8x512xf32> to vector<8x64xf32>
    %262 = vector.extract_strided_slice %157 {offsets = [0, 384], sizes = [8, 64], strides = [1, 1]} : vector<8x512xf32> to vector<8x64xf32>
    %cst_78 = arith.constant dense<0.000000e+00> : vector<8x8xf32>
    %263 = tpu.matmul %260, %261, %cst_78 {dimension_numbers = #tpu.dot_dimension_numbers<[1], [1], [0], [0], [0, 0, 1, 0], [], []>} : vector<8x64xf32>, vector<8x64xf32>, vector<8x8xf32> -> vector<8x8xf32>
    %cst_79 = arith.constant 1.250000e-01 : f32
    %264 = vector.broadcast %cst_79 : f32 to vector<8x8xf32>
    %265 = arith.mulf %263, %264 : vector<8x8xf32>
    %cst_80 = arith.constant dense<0xFF800000> : vector<8xf32>
    %266 = vector.multi_reduction <maximumf>, %265, %cst_80 [1] : vector<8x8xf32> to vector<8xf32>
    %267 = vector.shape_cast %266 : vector<8xf32> to vector<8x1xf32>
    %268 = vector.broadcast %267 : vector<8x1xf32> to vector<8x8xf32>
    %269 = arith.subf %265, %268 : vector<8x8xf32>
    %270 = math.exp %269 : vector<8x8xf32>
    %cst_81 = arith.constant dense<0.000000e+00> : vector<8xf32>
    %271 = vector.multi_reduction <add>, %270, %cst_81 [1] : vector<8x8xf32> to vector<8xf32>
    %272 = vector.shape_cast %271 : vector<8xf32> to vector<8x1xf32>
    %273 = tpu.reciprocal %272 {approx = true} : vector<8x1xf32> -> vector<8x1xf32>
    %274 = vector.broadcast %273 : vector<8x1xf32> to vector<8x8xf32>
    %275 = arith.mulf %270, %274 : vector<8x8xf32>
    %cst_82 = arith.constant dense<0.000000e+00> : vector<8x64xf32>
    %276 = tpu.matmul %275, %262, %cst_82 {dimension_numbers = #tpu.dot_dimension_numbers<[1], [0], [0], [1], [0, 0, 1, 1], [], []>} : vector<8x8xf32>, vector<8x64xf32>, vector<8x64xf32> -> vector<8x64xf32>
    %277 = vector.extract_strided_slice %155 {offsets = [0, 448], sizes = [8, 64], strides = [1, 1]} : vector<8x512xf32> to vector<8x64xf32>
    %278 = vector.extract_strided_slice %156 {offsets = [0, 448], sizes = [8, 64], strides = [1, 1]} : vector<8x512xf32> to vector<8x64xf32>
    %279 = vector.extract_strided_slice %157 {offsets = [0, 448], sizes = [8, 64], strides = [1, 1]} : vector<8x512xf32> to vector<8x64xf32>
    %cst_83 = arith.constant dense<0.000000e+00> : vector<8x8xf32>
    %280 = tpu.matmul %277, %278, %cst_83 {dimension_numbers = #tpu.dot_dimension_numbers<[1], [1], [0], [0], [0, 0, 1, 0], [], []>} : vector<8x64xf32>, vector<8x64xf32>, vector<8x8xf32> -> vector<8x8xf32>
    %cst_84 = arith.constant 1.250000e-01 : f32
    %281 = vector.broadcast %cst_84 : f32 to vector<8x8xf32>
    %282 = arith.mulf %280, %281 : vector<8x8xf32>
    %cst_85 = arith.constant dense<0xFF800000> : vector<8xf32>
    %283 = vector.multi_reduction <maximumf>, %282, %cst_85 [1] : vector<8x8xf32> to vector<8xf32>
    %284 = vector.shape_cast %283 : vector<8xf32> to vector<8x1xf32>
    %285 = vector.broadcast %284 : vector<8x1xf32> to vector<8x8xf32>
    %286 = arith.subf %282, %285 : vector<8x8xf32>
    %287 = math.exp %286 : vector<8x8xf32>
    %cst_86 = arith.constant dense<0.000000e+00> : vector<8xf32>
    %288 = vector.multi_reduction <add>, %287, %cst_86 [1] : vector<8x8xf32> to vector<8xf32>
    %289 = vector.shape_cast %288 : vector<8xf32> to vector<8x1xf32>
    %290 = tpu.reciprocal %289 {approx = true} : vector<8x1xf32> -> vector<8x1xf32>
    %291 = vector.broadcast %290 : vector<8x1xf32> to vector<8x8xf32>
    %292 = arith.mulf %287, %291 : vector<8x8xf32>
    %cst_87 = arith.constant dense<0.000000e+00> : vector<8x64xf32>
    %293 = tpu.matmul %292, %279, %cst_87 {dimension_numbers = #tpu.dot_dimension_numbers<[1], [0], [0], [1], [0, 0, 1, 1], [], []>} : vector<8x8xf32>, vector<8x64xf32>, vector<8x64xf32> -> vector<8x64xf32>
    %294 = tpu.concatenate %174, %191, %208, %225, %242, %259, %276, %293 in 1 : vector<8x64xf32>, vector<8x64xf32>, vector<8x64xf32>, vector<8x64xf32>, vector<8x64xf32>, vector<8x64xf32>, vector<8x64xf32>, vector<8x64xf32> -> vector<8x512xf32>
    %295 = tpu.concatenate %154, %294 in 0 : vector<8x512xf32>, vector<8x512xf32> -> vector<16x512xf32>
    %296 = arith.truncf %295 : vector<16x512xf32> to vector<16x512xbf16>
    %c0_88 = arith.constant 0 : index
    %c0_89 = arith.constant 0 : index
    %c0_90 = arith.constant 0 : index
    %297 = vector.load %arg4[%c0_88, %c0_89, %c0_90] : memref<1x512x512xbf16, #tpu.memory_space<vmem>>, vector<1x512x512xbf16>
    %298 = vector.shape_cast %297 : vector<1x512x512xbf16> to vector<512x512xbf16>
    %cst_91 = arith.constant dense<0.000000e+00> : vector<16x512xf32>
    %299 = tpu.matmul %296, %298, %cst_91 {dimension_numbers = #tpu.dot_dimension_numbers<[1], [0], [0], [1], [0, 0, 1, 1], [], []>} : vector<16x512xbf16>, vector<512x512xbf16>, vector<16x512xf32> -> vector<16x512xf32>
    %c0_92 = arith.constant 0 : index
    %c0_93 = arith.constant 0 : index
    %c0_94 = arith.constant 0 : index
    %300 = vector.load %arg5[%c0_92, %c0_93, %c0_94] : memref<1x1x512xf32, #tpu.memory_space<vmem>>, vector<1x1x512xf32>
    %301 = vector.shape_cast %300 : vector<1x1x512xf32> to vector<1x512xf32>
    %302 = vector.broadcast %301 : vector<1x512xf32> to vector<16x512xf32>
    %303 = arith.addf %299, %302 : vector<16x512xf32>
    %304 = arith.addf %3, %303 : vector<16x512xf32>
    %c0_95 = arith.constant 0 : index
    %c0_96 = arith.constant 0 : index
    %c0_97 = arith.constant 0 : index
    %305 = vector.load %arg6[%c0_95, %c0_96, %c0_97] : memref<1x1x512xf32, #tpu.memory_space<vmem>>, vector<1x1x512xf32>
    %306 = vector.shape_cast %305 : vector<1x1x512xf32> to vector<1x512xf32>
    %c0_98 = arith.constant 0 : index
    %c0_99 = arith.constant 0 : index
    %c0_100 = arith.constant 0 : index
    %307 = vector.load %arg7[%c0_98, %c0_99, %c0_100] : memref<1x1x512xf32, #tpu.memory_space<vmem>>, vector<1x1x512xf32>
    %308 = vector.shape_cast %307 : vector<1x1x512xf32> to vector<1x512xf32>
    %cst_101 = arith.constant dense<0.000000e+00> : vector<16xf32>
    %309 = vector.multi_reduction <add>, %304, %cst_101 [1] : vector<16x512xf32> to vector<16xf32>
    %310 = vector.shape_cast %309 : vector<16xf32> to vector<16x1xf32>
    %cst_102 = arith.constant 5.120000e+02 : f32
    %311 = vector.broadcast %cst_102 : f32 to vector<16x1xf32>
    %312 = arith.divf %310, %311 : vector<16x1xf32>
    %313 = vector.broadcast %312 : vector<16x1xf32> to vector<16x512xf32>
    %314 = arith.subf %304, %313 : vector<16x512xf32>
    %315 = arith.mulf %314, %314 : vector<16x512xf32>
    %cst_103 = arith.constant dense<0.000000e+00> : vector<16xf32>
    %316 = vector.multi_reduction <add>, %315, %cst_103 [1] : vector<16x512xf32> to vector<16xf32>
    %317 = vector.shape_cast %316 : vector<16xf32> to vector<16x1xf32>
    %cst_104 = arith.constant 5.120000e+02 : f32
    %318 = vector.broadcast %cst_104 : f32 to vector<16x1xf32>
    %319 = arith.divf %317, %318 : vector<16x1xf32>
    %cst_105 = arith.constant 9.99999974E-6 : f32
    %320 = vector.broadcast %cst_105 : f32 to vector<16x1xf32>
    %321 = arith.addf %319, %320 : vector<16x1xf32>
    %322 = math.rsqrt %321 : vector<16x1xf32>
    %323 = vector.broadcast %322 : vector<16x1xf32> to vector<16x512xf32>
    %324 = arith.mulf %314, %323 : vector<16x512xf32>
    %325 = vector.broadcast %306 : vector<1x512xf32> to vector<16x512xf32>
    %326 = arith.mulf %324, %325 : vector<16x512xf32>
    %327 = vector.broadcast %308 : vector<1x512xf32> to vector<16x512xf32>
    %328 = arith.addf %326, %327 : vector<16x512xf32>
    %329 = arith.truncf %328 : vector<16x512xf32> to vector<16x512xbf16>
    %c0_106 = arith.constant 0 : index
    %c0_107 = arith.constant 0 : index
    %c0_108 = arith.constant 0 : index
    %330 = vector.load %arg8[%c0_106, %c0_107, %c0_108] : memref<1x512x2048xbf16, #tpu.memory_space<vmem>>, vector<1x512x2048xbf16>
    %331 = vector.shape_cast %330 : vector<1x512x2048xbf16> to vector<512x2048xbf16>
    %cst_109 = arith.constant dense<0.000000e+00> : vector<16x2048xf32>
    %332 = tpu.matmul %329, %331, %cst_109 {dimension_numbers = #tpu.dot_dimension_numbers<[1], [0], [0], [1], [0, 0, 1, 1], [], []>} : vector<16x512xbf16>, vector<512x2048xbf16>, vector<16x2048xf32> -> vector<16x2048xf32>
    %c0_110 = arith.constant 0 : index
    %c0_111 = arith.constant 0 : index
    %c0_112 = arith.constant 0 : index
    %333 = vector.load %arg9[%c0_110, %c0_111, %c0_112] : memref<1x1x2048xf32, #tpu.memory_space<vmem>>, vector<1x1x2048xf32>
    %334 = vector.shape_cast %333 : vector<1x1x2048xf32> to vector<1x2048xf32>
    %335 = vector.broadcast %334 : vector<1x2048xf32> to vector<16x2048xf32>
    %336 = arith.addf %332, %335 : vector<16x2048xf32>
    %cst_113 = arith.constant 0.000000e+00 : f32
    %337 = vector.broadcast %cst_113 : f32 to vector<16x2048xf32>
    %338 = arith.maximumf %336, %337 : vector<16x2048xf32>
    %339 = arith.truncf %338 : vector<16x2048xf32> to vector<16x2048xbf16>
    %c0_114 = arith.constant 0 : index
    %c0_115 = arith.constant 0 : index
    %c0_116 = arith.constant 0 : index
    %340 = vector.load %arg10[%c0_114, %c0_115, %c0_116] : memref<1x2048x512xbf16, #tpu.memory_space<vmem>>, vector<1x2048x512xbf16>
    %341 = vector.shape_cast %340 : vector<1x2048x512xbf16> to vector<2048x512xbf16>
    %cst_117 = arith.constant dense<0.000000e+00> : vector<16x512xf32>
    %342 = tpu.matmul %339, %341, %cst_117 {dimension_numbers = #tpu.dot_dimension_numbers<[1], [0], [0], [1], [0, 0, 1, 1], [], []>} : vector<16x2048xbf16>, vector<2048x512xbf16>, vector<16x512xf32> -> vector<16x512xf32>
    %c0_118 = arith.constant 0 : index
    %c0_119 = arith.constant 0 : index
    %c0_120 = arith.constant 0 : index
    %343 = vector.load %arg11[%c0_118, %c0_119, %c0_120] : memref<1x1x512xf32, #tpu.memory_space<vmem>>, vector<1x1x512xf32>
    %344 = vector.shape_cast %343 : vector<1x1x512xf32> to vector<1x512xf32>
    %345 = vector.broadcast %344 : vector<1x512xf32> to vector<16x512xf32>
    %346 = arith.addf %342, %345 : vector<16x512xf32>
    %347 = arith.addf %328, %346 : vector<16x512xf32>
    %c0_121 = arith.constant 0 : index
    %c0_122 = arith.constant 0 : index
    %c0_123 = arith.constant 0 : index
    %348 = vector.load %arg12[%c0_121, %c0_122, %c0_123] : memref<1x1x512xf32, #tpu.memory_space<vmem>>, vector<1x1x512xf32>
    %349 = vector.shape_cast %348 : vector<1x1x512xf32> to vector<1x512xf32>
    %c0_124 = arith.constant 0 : index
    %c0_125 = arith.constant 0 : index
    %c0_126 = arith.constant 0 : index
    %350 = vector.load %arg13[%c0_124, %c0_125, %c0_126] : memref<1x1x512xf32, #tpu.memory_space<vmem>>, vector<1x1x512xf32>
    %351 = vector.shape_cast %350 : vector<1x1x512xf32> to vector<1x512xf32>
    %cst_127 = arith.constant dense<0.000000e+00> : vector<16xf32>
    %352 = vector.multi_reduction <add>, %347, %cst_127 [1] : vector<16x512xf32> to vector<16xf32>
    %353 = vector.shape_cast %352 : vector<16xf32> to vector<16x1xf32>
    %cst_128 = arith.constant 5.120000e+02 : f32
    %354 = vector.broadcast %cst_128 : f32 to vector<16x1xf32>
    %355 = arith.divf %353, %354 : vector<16x1xf32>
    %356 = vector.broadcast %355 : vector<16x1xf32> to vector<16x512xf32>
    %357 = arith.subf %347, %356 : vector<16x512xf32>
    %358 = arith.mulf %357, %357 : vector<16x512xf32>
    %cst_129 = arith.constant dense<0.000000e+00> : vector<16xf32>
    %359 = vector.multi_reduction <add>, %358, %cst_129 [1] : vector<16x512xf32> to vector<16xf32>
    %360 = vector.shape_cast %359 : vector<16xf32> to vector<16x1xf32>
    %cst_130 = arith.constant 5.120000e+02 : f32
    %361 = vector.broadcast %cst_130 : f32 to vector<16x1xf32>
    %362 = arith.divf %360, %361 : vector<16x1xf32>
    %cst_131 = arith.constant 9.99999974E-6 : f32
    %363 = vector.broadcast %cst_131 : f32 to vector<16x1xf32>
    %364 = arith.addf %362, %363 : vector<16x1xf32>
    %365 = math.rsqrt %364 : vector<16x1xf32>
    %366 = vector.broadcast %365 : vector<16x1xf32> to vector<16x512xf32>
    %367 = arith.mulf %357, %366 : vector<16x512xf32>
    %368 = vector.broadcast %349 : vector<1x512xf32> to vector<16x512xf32>
    %369 = arith.mulf %367, %368 : vector<16x512xf32>
    %370 = vector.broadcast %351 : vector<1x512xf32> to vector<16x512xf32>
    %371 = arith.addf %369, %370 : vector<16x512xf32>
    %c0_132 = arith.constant 0 : index
    %c0_133 = arith.constant 0 : index
    %372 = vector.load %arg17[%c0_132, %c0_133] : memref<16x512xf32, #tpu.memory_space<vmem>>, vector<16x512xf32>
    tpu.vector_store %arg17[%c0_132, %c0_133], %371 {strides = array<i32>} : memref<16x512xf32, #tpu.memory_space<vmem>>, vector<16x512xf32>,
    %c5_i32 = arith.constant 5 : i32
    %373 = arith.cmpi eq, %arg0, %c5_i32 : i32
    %374 = arith.extui %373 : i1 to i32
    %c0_i32_134 = arith.constant 0 : i32
    %375 = arith.cmpi ne, %374, %c0_i32_134 : i32
    scf.if %375 {
      %376 = vector.extract_strided_slice %371 {offsets = [0, 0], sizes = [8, 512], strides = [1, 1]} : vector<16x512xf32> to vector<8x512xf32>
      %c0_135 = arith.constant 0 : index
      %c0_136 = arith.constant 0 : index
      %377 = vector.load %arg14[%c0_135, %c0_136] : memref<512x10xf32, #tpu.memory_space<vmem>>, vector<512x10xf32>
      %cst_137 = arith.constant dense<0.000000e+00> : vector<8x10xf32>
      %378 = tpu.matmul %376, %377, %cst_137 {dimension_numbers = #tpu.dot_dimension_numbers<[1], [0], [0], [1], [0, 0, 1, 1], [], []>} : vector<8x512xf32>, vector<512x10xf32>, vector<8x10xf32> -> vector<8x10xf32>
      %c0_138 = arith.constant 0 : index
      %c0_139 = arith.constant 0 : index
      %379 = vector.load %arg15[%c0_138, %c0_139] : memref<1x10xf32, #tpu.memory_space<vmem>>, vector<1x10xf32>
      %380 = vector.broadcast %379 : vector<1x10xf32> to vector<8x10xf32>
      %381 = arith.addf %378, %380 : vector<8x10xf32>
      %c0_140 = arith.constant 0 : index
      %c0_141 = arith.constant 0 : index
      %382 = vector.load %arg16[%c0_140, %c0_141] : memref<8x10xf32, #tpu.memory_space<vmem>>, vector<8x10xf32>
      tpu.vector_store %arg16[%c0_140, %c0_141], %381 {strides = array<i32>} : memref<8x10xf32, #tpu.memory_space<vmem>>, vector<8x10xf32>,
    } else {
    }
    return
  }
  func.func @transform_0(%arg0: i32) -> (i32, i32) {
    %c0_i32 = arith.constant 0 : i32
    %c0_i32_0 = arith.constant 0 : i32
    %c0_i32_1 = arith.constant 0 : i32
    return %c0_i32, %c0_i32_0 : i32, i32
  }
  func.func @transform_1(%arg0: i32) -> (i32, i32, i32) {
    %c0_i32 = arith.constant 0 : i32
    %c0_i32_0 = arith.constant 0 : i32
    %c0_i32_1 = arith.constant 0 : i32
    return %arg0, %c0_i32, %c0_i32_0 : i32, i32, i32
  }
  func.func @transform_2(%arg0: i32) -> (i32, i32, i32) {
    %c0_i32 = arith.constant 0 : i32
    %c0_i32_0 = arith.constant 0 : i32
    %c0_i32_1 = arith.constant 0 : i32
    return %arg0, %c0_i32, %c0_i32_0 : i32, i32, i32
  }
  func.func @transform_3(%arg0: i32) -> (i32, i32, i32) {
    %c0_i32 = arith.constant 0 : i32
    %c0_i32_0 = arith.constant 0 : i32
    %c0_i32_1 = arith.constant 0 : i32
    return %arg0, %c0_i32, %c0_i32_0 : i32, i32, i32
  }
  func.func @transform_4(%arg0: i32) -> (i32, i32, i32) {
    %c0_i32 = arith.constant 0 : i32
    %c0_i32_0 = arith.constant 0 : i32
    %c0_i32_1 = arith.constant 0 : i32
    return %arg0, %c0_i32, %c0_i32_0 : i32, i32, i32
  }
  func.func @transform_5(%arg0: i32) -> (i32, i32, i32) {
    %c0_i32 = arith.constant 0 : i32
    %c0_i32_0 = arith.constant 0 : i32
    %c0_i32_1 = arith.constant 0 : i32
    return %arg0, %c0_i32, %c0_i32_0 : i32, i32, i32
  }
  func.func @transform_6(%arg0: i32) -> (i32, i32, i32) {
    %c0_i32 = arith.constant 0 : i32
    %c0_i32_0 = arith.constant 0 : i32
    %c0_i32_1 = arith.constant 0 : i32
    return %arg0, %c0_i32, %c0_i32_0 : i32, i32, i32
  }
  func.func @transform_7(%arg0: i32) -> (i32, i32, i32) {
    %c0_i32 = arith.constant 0 : i32
    %c0_i32_0 = arith.constant 0 : i32
    %c0_i32_1 = arith.constant 0 : i32
    return %arg0, %c0_i32, %c0_i32_0 : i32, i32, i32
  }
  func.func @transform_8(%arg0: i32) -> (i32, i32, i32) {
    %c0_i32 = arith.constant 0 : i32
    %c0_i32_0 = arith.constant 0 : i32
    %c0_i32_1 = arith.constant 0 : i32
    return %arg0, %c0_i32, %c0_i32_0 : i32, i32, i32
  }
  func.func @transform_9(%arg0: i32) -> (i32, i32, i32) {
    %c0_i32 = arith.constant 0 : i32
    %c0_i32_0 = arith.constant 0 : i32
    %c0_i32_1 = arith.constant 0 : i32
    return %arg0, %c0_i32, %c0_i32_0 : i32, i32, i32
  }
  func.func @transform_10(%arg0: i32) -> (i32, i32, i32) {
    %c0_i32 = arith.constant 0 : i32
    %c0_i32_0 = arith.constant 0 : i32
    %c0_i32_1 = arith.constant 0 : i32
    return %arg0, %c0_i32, %c0_i32_0 : i32, i32, i32
  }
  func.func @transform_11(%arg0: i32) -> (i32, i32, i32) {
    %c0_i32 = arith.constant 0 : i32
    %c0_i32_0 = arith.constant 0 : i32
    %c0_i32_1 = arith.constant 0 : i32
    return %arg0, %c0_i32, %c0_i32_0 : i32, i32, i32
  }
  func.func @transform_12(%arg0: i32) -> (i32, i32, i32) {
    %c0_i32 = arith.constant 0 : i32
    %c0_i32_0 = arith.constant 0 : i32
    %c0_i32_1 = arith.constant 0 : i32
    return %arg0, %c0_i32, %c0_i32_0 : i32, i32, i32
  }
  func.func @transform_13(%arg0: i32) -> (i32, i32) {
    %c0_i32 = arith.constant 0 : i32
    %c0_i32_0 = arith.constant 0 : i32
    %c0_i32_1 = arith.constant 0 : i32
    return %c0_i32, %c0_i32_0 : i32, i32
  }
  func.func @transform_14(%arg0: i32) -> (i32, i32) {
    %c0_i32 = arith.constant 0 : i32
    %c0_i32_0 = arith.constant 0 : i32
    %c0_i32_1 = arith.constant 0 : i32
    return %c0_i32, %c0_i32_0 : i32, i32
  }
  func.func @transform_15(%arg0: i32) -> (i32, i32) {
    %c0_i32 = arith.constant 0 : i32
    %c0_i32_0 = arith.constant 0 : i32
    %c0_i32_1 = arith.constant 0 : i32
    return %c0_i32, %c0_i32_0 : i32, i32
  }
}

</mosaic_0001>

<bundles_post_ra>
// kernel: transformer_forward.1
= control target key start
LH: loop header
LB: loop body
LE: loop exit
PB: predicated region body
PF: predicated region fallthrough
CT: control target
= control target key end

     0   :  { %s23707_s0 = inlined_call_operand.vmem [shape: f32[16,512], index: 0, kind: input, shape index: {}]   ;;  %s23708_s1 = inlined_call_operand.hbm [shape: bf16[6,512,1536], index: 1, kind: input, shape index: {}]   ;;  %s23709_s2 = inlined_call_operand.hbm [shape: f32[6,1,1536], index: 2, kind: input, shape index: {}]   ;;  %s23710_s3 = inlined_call_operand.hbm [shape: bf16[6,512,512], index: 3, kind: input, shape index: {}]   ;;  %s23711_s4 = inlined_call_operand.hbm [shape: f32[6,1,512], index: 4, kind: input, shape index: {}]   ;;  %s23712_s5 = inlined_call_operand.hbm [shape: f32[6,1,512], index: 5, kind: input, shape index: {}]   ;;  %s23713_s6 = inlined_call_operand.hbm [shape: f32[6,1,512], index: 6, kind: input, shape index: {}]   ;;  %s23714_s7 = inlined_call_operand.hbm [shape: bf16[6,512,2048], index: 7, kind: input, shape index: {}]   ;;  %s23715_s8 = inlined_call_operand.hbm [shape: f32[6,1,2048], index: 8, kind: input, shape index: {}]   ;;  %s23716_s9 = inlined_call_operand.hbm [shape: bf16[6,2048,512], index: 9, kind: input, shape index: {}]   ;;  %s23717_s10 = inlined_call_operand.hbm [shape: f32[6,1,512], index: 10, kind: input, shape index: {}]   ;;  %s23718_s11 = inlined_call_operand.hbm [shape: f32[6,1,512], index: 11, kind: input, shape index: {}]   ;;  %s23719_s12 = inlined_call_operand.hbm [shape: f32[6,1,512], index: 12, kind: input, shape index: {}]   ;;  %s23720_s13 = inlined_call_operand.vmem [shape: f32[512,10], index: 13, kind: input, shape index: {}]   ;;  %s23721_s14 = inlined_call_operand.hbm [shape: f32[1,10], index: 14, kind: input, shape index: {}]   ;;  %s23722_s15 = inlined_call_operand.hbm [shape: f32[8,10], index: 15, kind: output, shape index: {}]  }
   0x1   :  { %23747 = sst [smem:[#allocation39_spill]] %s23707_s0 }
   0x2   :  { %23748 = sst [smem:[#allocation40_spill]] %s23709_s2 }
   0x3   :  { %23749 = sst [smem:[#allocation41_spill]] %s23711_s4 }
   0x4   :  { %23750 = sst [smem:[#allocation42_spill]] %s23713_s6 }
   0x5   :  { %23751 = sst [smem:[#allocation43_spill]] %s23720_s13 }
   0x6   :  { %23752 = sst [smem:[#allocation44_spill]] %s23721_s14 }
   0x7   :  { %23753 = sst [smem:[#allocation45_spill]] %s23722_s15 }
   0x8   :  { %20 = vsyncpa [#allocation4], 0 }
   0x9   :  { %22 = vsyncpa [#allocation4 + $0x1], 0 }
   0xa   :  { %23 = vsyncpa [#allocation7], 0 }
   0xb   :  { %25 = vsyncpa [#allocation7 + $0x1], 0 }
   0xc   :  { %26 = vsyncpa [#allocation10], 0 }
   0xd   :  { %28 = vsyncpa [#allocation10 + $0x1], 0 }
   0xe   :  { %29 = vsyncpa [#allocation13], 0 }
   0xf   :  { %31 = vsyncpa [#allocation13 + $0x1], 0 }
  0x10   :  { %32 = vsyncpa [#allocation16], 0 }
  0x11   :  { %34 = vsyncpa [#allocation16 + $0x1], 0 }
  0x12   :  { %35 = vsyncpa [#allocation19], 0 }
  0x13   :  { %37 = vsyncpa [#allocation19 + $0x1], 0 }
  0x14   :  { %38 = vsyncpa [#allocation22], 0 }
  0x15   :  { %40 = vsyncpa [#allocation22 + $0x1], 0 }
  0x16   :  { %41 = vsyncpa [#allocation5], 0  ;;  %s20465_s18 = smov 0   ;;  %s20467_s19 = smov 0  }
  0x17   :  { %s20469_s20 = smov 0   ;;  %s20471_s21 = smov 0  }
  0x18 LB: > { %23754 = sst [smem:[#allocation34_spill]] %s20356_s20  ;;  %s20484_s22 = sadd.s32 4294967295, %s20360_s21   ;;  %s20360_s21 = sphi %s20471_s21, %s23799_s21   ;;  %s20356_s20 = sphi %s20469_s20, %s23801_s20   ;;  %s20352_s19 = sphi %s20467_s19, %s23803_s19   ;;  %s20348_s18 = sphi %s20465_s18, %s23802_s18  }
  0x19   : > { %23755 = sst [smem:[#allocation35_spill]] %s20484_s22  ;;  %s20487_s23 = sadd.s32 1, %s20360_s21  }
  0x1a   : > { %23756 = sst [smem:[#allocation36_spill]] %s20487_s23  ;;  %s72_s24 = ssub.s32 %s20360_s21, %s20487_s23 }
  0x1b   : > { %s75_s25 = sadd.s32 1, %s20356_s20  ;;  %p73_p0 = scmp.eq.s32.totalorder %s72_s24, 0 }
  0x1c   : > { %p82_p1 = scmp.ne.s32.totalorder %s20356_s20, %s20352_s19  ;;  %p83_p2 = scmp.eq.s32.totalorder %s20360_s21, 0 }
  0x1d   : > { %p88_p3 = scmp.ne.s32.totalorder %s20352_s19, %s20348_s18  ;;  %p23732_p5 = scmp.eq.s32.totalorder %s20484_s22, 0 }
  0x1e   : > { %s20497_s26 = scalar_select %p73_p0, %s20356_s20, %s75_s25  }
  0x1f   : > { %p20499_p4 = por %p83_p2, %p82_p1  ;;  %p15919_p6 = scmp.ge.s32.totalorder %s20360_s21, 1 }
  0x20   : > { %23757 = sst [smem:[#allocation37_spill]] %s20497_s26  ;;  %p448_p7 = scmp.lt.s32.totalorder %s20360_s21, 7 }
  0x21   : > { %p20508_p8 = por %p23732_p5, %p88_p3  ;;  %s20362_s30 = smov [#allocation23]  }
  0x22   : > { %p20513_p10 = pnand %p15919_p6, %p448_p7  ;;  %s467_s16 = sshll.u32 %s20362_s30, 4  ;;  %s468_s16 = int_to_ptr.vmem [resolvable:$true] %s467_s16 }
  0x23   : > { %s23759_s28 = scalar_select %p20508_p8, 1, 0 }
  0x24   : > { %s23761_s29 = scalar_select %p20513_p10, 1, 0 }
  0x25   : > { %23760 = sst [smem:[#allocation38_spill]] %s23759_s28  ;;  %p18155_p11 = pneg %p20513_p10 }
  0x26   : > { %p18197_p12 = scmp.lt.s32.totalorder %s20360_s21, 6  ;;  %s20521_s17 = sand.u32 1, %s20356_s20  }
  0x27   : > { %p20525_p13 = pnand %p18155_p11, %p23732_p5  ;;  %s20530_s24 = sand.u32 1, %s20360_s21  }
  0x28   : > { %p20534_p0 = pnand %p18197_p12, %p20499_p4  ;;  %s18119_s30 = smul.u32 12, %s20521_s17 }
  0x29   : > { %s23764_s14 = sld [smem:[#allocation44_spill]]  ;;  %p19882_p2 = pneg %p20525_p13 }
  0x2a   : > { %s23763_s25 = scalar_select %p20534_p0, 1, 0 }
  0x2f   : > { %s19880_s20 = scalar_lea.hbm %s23764_s14, 16 }
  0x30   : > { %p19881_p1 = scmp.ne.s32.totalorder %s23764_s14, %s19880_s20  ;;  %p19887_p4 = scmp.lt.u32.totalorder %s19880_s20, %s23764_s14 }
  0x32   : > { %p19883_p3 = pnand %p19882_p2, %p19881_p1 }
  0x34   : > { %p19884_p6 = pneg %p19883_p3 }
  0x36   : > { %p19889_p7 = pnand %p19887_p4, %p19884_p6 }
  0x38   : > { %19892 = shalt.err (!%p19889_p7)
}
  0x39   : > { %s19893_s27 = scalar_lea.vmem %s468_s16, 16  ;;  %s19900_s23 = scalar_lea.vmem %s468_s16, 32 }
  0x3a   : > { %p19894_p11 = scmp.ne.s32.totalorder %s468_s16, %s19893_s27  ;;  %p19901_p5 = scmp.lt.s32.totalorder %s468_s16, %s468_s16 }
  0x3b   : > { %p19902_p8 = scmp.lt.s32.totalorder %s19900_s23, %s19893_s27 }
  0x3c   : > { %p19896_p12 = pnand %p19894_p11, %p19882_p2 }
  0x3d   : > { %p19903_p10 = por %p19902_p8, %p19901_p5 }
  0x3e   : > { %p19897_p9 = pneg %p19896_p12 }
  0x40   : > { %p19904_p0 = pnand %p19903_p10, %p19897_p9 }
  0x42   : > { %19907 = shalt.err (!%p19904_p0)
}
  0x43   : > { %18158 = dma.hbm_to_vmem [thread:$0]  (!%p20525_p13), %s23764_s14, 16, %s468_s16, [#allocation22]  }
  0x44   : > { %s18120_s0 = smul.u32 192, %s20360_s21  ;;  %s503_s20 = scalar_lea.vmem [#allocation6], %s18119_s30 }
  0x45   : > { %s511_s22 = sshll.u32 %s503_s20, 4  ;;  %s23765_s2 = sld [smem:[#allocation40_spill]]  ;;  %s20556_s22 = int_to_ptr.vmem [resolvable:$true] %s511_s22 }
  0x46   : > { %s20564_s18 = sshll.u32 %s20521_s17, 2  ;;  %p23766_p8 = scmp.ne.s32.totalorder %s23763_s25, 0 }
  0x48   : > { %p20571_p9 = pneg %p23766_p8 }
  0x4b   : > { %s20561_s23 = scalar_lea.hbm %s23765_s2, %s18120_s0  ;;  %s19913_s20 = scalar_lea.hbm %s23765_s2, 1152 }
  0x4c   : > { %s19908_s15 = scalar_lea.hbm %s20561_s23, 192  ;;  %p19914_p0 = scmp.lt.u32.totalorder %s20561_s23, %s23765_s2 }
  0x4d   : > { %p19909_p5 = scmp.ne.s32.totalorder %s20561_s23, %s19908_s15  ;;  %p19915_p1 = scmp.lt.u32.totalorder %s19913_s20, %s19908_s15 }
  0x4e   : > { %p19917_p3 = scmp.lt.u32.totalorder %s19908_s15, %s20561_s23 }
  0x4f   : > { %p19911_p10 = pnand %p20571_p9, %p19909_p5  ;;  %p19916_p2 = por %p19915_p1, %p19914_p0 }
  0x51   : > { %p19912_p13 = pneg %p19911_p10  ;;  %p19918_p6 = por %p19917_p3, %p19916_p2 }
  0x53   : > { %p19919_p4 = pnand %p19918_p6, %p19912_p13 }
  0x55   : > { %19922 = shalt.err (!%p19919_p4)
}
  0x56   : > { %s19923_s13 = scalar_lea.vmem %s20556_s22, 192  ;;  %s20363_s30 = smov [#allocation6]  }
  0x57   : > { %p19924_p7 = scmp.ne.s32.totalorder %s20556_s22, %s19923_s13  ;;  %s19928_s0 = sshll.u32 %s20363_s30, 4  ;;  %s19929_s0 = int_to_ptr.vmem [resolvable:$false] %s19928_s0 }
  0x58   : > { %s19930_s26 = scalar_lea.vmem %s19929_s0, 384  ;;  %p19931_p5 = scmp.lt.s32.totalorder %s20556_s22, %s19929_s0 }
  0x59   : > { %p19926_p11 = pnand %p19924_p7, %p20571_p9  ;;  %p19932_p10 = scmp.lt.s32.totalorder %s19930_s26, %s19923_s13 }
  0x5b   : > { %p19927_p12 = pneg %p19926_p11  ;;  %p19933_p0 = por %p19932_p10, %p19931_p5 }
  0x5d   : > { %p19934_p1 = pnand %p19933_p0, %p19927_p12 }
  0x5f   : > { %19937 = shalt.err (!%p19934_p1)
}
  0x60   : > { %s23768_s15 = scalar_lea.sflag [#allocation7], %s20530_s24  ;;  %s20597_s20 = sshll.u32 %s20360_s21, 6 }
  0x61   : > { %18165 = dma.hbm_to_vmem [thread:$0]  (!%p23766_p8), %s20561_s23, 192, %s20556_s22, %s23768_s15  }
  0x62   : > { %s23769_s4 = sld [smem:[#allocation41_spill]]  ;;  %s543_s0 = scalar_lea.vmem [#allocation9], %s20564_s18 }
  0x63   : > { %s551_s26 = sshll.u32 %s543_s0, 4  ;;  %s552_s26 = int_to_ptr.vmem [resolvable:$true] %s551_s26 }
  0x68   : > { %s20603_s13 = scalar_lea.hbm %s23769_s4, %s20597_s20  ;;  %s19943_s15 = scalar_lea.hbm %s23769_s4, 384 }
  0x69   : > { %s19938_s14 = scalar_lea.hbm %s20603_s13, 64  ;;  %p19944_p6 = scmp.lt.u32.totalorder %s20603_s13, %s23769_s4 }
  0x6a   : > { %p19939_p13 = scmp.ne.s32.totalorder %s20603_s13, %s19938_s14  ;;  %p19945_p4 = scmp.lt.u32.totalorder %s19943_s15, %s19938_s14 }
  0x6b   : > { %p19947_p11 = scmp.lt.u32.totalorder %s19938_s14, %s20603_s13 }
  0x6c   : > { %p19941_p2 = pnand %p19939_p13, %p20571_p9  ;;  %p19946_p7 = por %p19945_p4, %p19944_p6 }
  0x6e   : > { %p19942_p3 = pneg %p19941_p2  ;;  %p19948_p12 = por %p19947_p11, %p19946_p7 }
  0x70   : > { %p19949_p5 = pnand %p19948_p12, %p19942_p3 }
  0x72   : > { %19952 = shalt.err (!%p19949_p5)
}
  0x73   : > { %s19953_s0 = scalar_lea.vmem %s552_s26, 64  ;;  %s20364_s2 = smov [#allocation9]  }
  0x74   : > { %p19954_p10 = scmp.ne.s32.totalorder %s552_s26, %s19953_s0  ;;  %s19958_s28 = sshll.u32 %s20364_s2, 4  ;;  %s19959_s28 = int_to_ptr.vmem [resolvable:$false] %s19958_s28 }
  0x75   : > { %s19960_s22 = scalar_lea.vmem %s19959_s28, 128  ;;  %p19961_p13 = scmp.lt.s32.totalorder %s552_s26, %s19959_s28 }
  0x76   : > { %p19956_p0 = pnand %p19954_p10, %p20571_p9  ;;  %p19962_p2 = scmp.lt.s32.totalorder %s19960_s22, %s19953_s0 }
  0x78   : > { %p19957_p1 = pneg %p19956_p0  ;;  %p19963_p8 = por %p19962_p2, %p19961_p13 }
  0x7a   : > { %p19964_p4 = pnand %p19963_p8, %p19957_p1 }
  0x7c   : > { %19967 = shalt.err (!%p19964_p4)
}
  0x7d   : > { %p23770_p6 = scmp.ne.s32.totalorder %s23763_s25, 0  ;;  %s23771_s14 = scalar_lea.sflag [#allocation10], %s20530_s24 }
  0x7e   : > { %s23772_s6 = sld [smem:[#allocation42_spill]]  ;;  %s581_s28 = scalar_lea.vmem [#allocation12], %s20564_s18 }
  0x7f   : > { %18171 = dma.hbm_to_vmem [thread:$0]  (!%p23770_p6), %s20603_s13, 64, %s552_s26, %s23771_s14  }
  0x80   : > { %s589_s27 = sshll.u32 %s581_s28, 4  ;;  %s15939_s30 = sshll.u32 %s20521_s17, 4  ;;  %s20633_s27 = int_to_ptr.vmem [resolvable:$true] %s589_s27 }
  0x81   : > { %s23739_s0 = scalar_lea.sflag [#allocation13], %s20530_s24 }
  0x84   : > { %s20630_s15 = scalar_lea.hbm %s23772_s6, %s20597_s20  ;;  %s19973_s14 = scalar_lea.hbm %s23772_s6, 384 }
  0x85   : > { %s19968_s22 = scalar_lea.hbm %s20630_s15, 64  ;;  %p19974_p11 = scmp.lt.u32.totalorder %s20630_s15, %s23772_s6 }
  0x86   : > { %p19969_p8 = scmp.ne.s32.totalorder %s20630_s15, %s19968_s22  ;;  %p19975_p12 = scmp.lt.u32.totalorder %s19973_s14, %s19968_s22 }
  0x87   : > { %p19977_p10 = scmp.lt.u32.totalorder %s19968_s22, %s20630_s15 }
  0x88   : > { %p19971_p3 = pnand %p19969_p8, %p20571_p9  ;;  %p19976_p5 = por %p19975_p12, %p19974_p11 }
  0x8a   : > { %p19972_p7 = pneg %p19971_p3  ;;  %p19978_p0 = por %p19977_p10, %p19976_p5 }
  0x8c   : > { %p19979_p1 = pnand %p19978_p0, %p19972_p7 }
  0x8e   : > { %19982 = shalt.err (!%p19979_p1)
}
  0x8f   : > { %s19983_s28 = scalar_lea.vmem %s20633_s27, 64  ;;  %s20365_s13 = smov [#allocation12]  }
  0x90   : > { %p19984_p13 = scmp.ne.s32.totalorder %s20633_s27, %s19983_s28  ;;  %s19988_s26 = sshll.u32 %s20365_s13, 4  ;;  %s19989_s26 = int_to_ptr.vmem [resolvable:$false] %s19988_s26 }
  0x91   : > { %s19990_s23 = scalar_lea.vmem %s19989_s26, 128  ;;  %p19991_p8 = scmp.lt.s32.totalorder %s20633_s27, %s19989_s26 }
  0x92   : > { %p19986_p2 = pnand %p19984_p13, %p20571_p9  ;;  %p19992_p3 = scmp.lt.s32.totalorder %s19990_s23, %s19983_s28 }
  0x94   : > { %p19987_p4 = pneg %p19986_p2  ;;  %p19993_p11 = por %p19992_p3, %p19991_p8 }
  0x96   : > { %p19994_p12 = pnand %p19993_p11, %p19987_p4 }
  0x98   : > { %19997 = shalt.err (!%p19994_p12)
}
  0x99   : > { %18177 = dma.hbm_to_vmem [thread:$0]  (!%p23770_p6), %s20630_s15, 64, %s20633_s27, %s23739_s0  }
  0x9a   : > { %s17562_s22 = sshll.u32 %s20360_s21, 8  ;;  %s621_s28 = scalar_lea.vmem [#allocation15], %s15939_s30 }
  0x9b   : > { %s20664_s13 = scalar_lea.hbm %s23715_s8, %s17562_s22  ;;  %s629_s26 = sshll.u32 %s621_s28, 4  ;;  %s630_s26 = int_to_ptr.vmem [resolvable:$true] %s629_s26 }
  0x9c   : > { %s23741_s23 = scalar_lea.sflag [#allocation16], %s20530_s24  ;;  %s19998_s4 = scalar_lea.hbm %s20664_s13, 256 }
  0x9d   : > { %p19999_p7 = scmp.ne.s32.totalorder %s20664_s13, %s19998_s4  ;;  %s20003_s14 = scalar_lea.hbm %s23715_s8, 1536 }
  0x9e   : > { %p20004_p0 = scmp.lt.u32.totalorder %s20664_s13, %s23715_s8  ;;  %p20005_p1 = scmp.lt.u32.totalorder %s20003_s14, %s19998_s4 }
  0x9f   : > { %p20001_p5 = pnand %p19999_p7, %p20571_p9  ;;  %p20007_p2 = scmp.lt.u32.totalorder %s19998_s4, %s20664_s13 }
  0xa0   : > { %p20006_p13 = por %p20005_p1, %p20004_p0 }
  0xa1   : > { %p20002_p10 = pneg %p20001_p5 }
  0xa2   : > { %p20008_p4 = por %p20007_p2, %p20006_p13 }
  0xa4   : > { %p20009_p8 = pnand %p20008_p4, %p20002_p10 }
  0xa6   : > { %20012 = shalt.err (!%p20009_p8)
}
  0xa7   : > { %s20013_s30 = scalar_lea.vmem %s630_s26, 256  ;;  %s20366_s28 = smov [#allocation15]  }
  0xa8   : > { %p20014_p3 = scmp.ne.s32.totalorder %s630_s26, %s20013_s30  ;;  %s20018_s0 = sshll.u32 %s20366_s28, 4  ;;  %s20019_s0 = int_to_ptr.vmem [resolvable:$false] %s20018_s0 }
  0xa9   : > { %s20020_s15 = scalar_lea.vmem %s20019_s0, 512  ;;  %p20021_p7 = scmp.lt.s32.totalorder %s630_s26, %s20019_s0 }
  0xaa   : > { %p20016_p11 = pnand %p20014_p3, %p20571_p9  ;;  %p20022_p5 = scmp.lt.s32.totalorder %s20020_s15, %s20013_s30 }
  0xac   : > { %p20017_p12 = pneg %p20016_p11  ;;  %p20023_p6 = por %p20022_p5, %p20021_p7 }
  0xae   : > { %p20024_p0 = pnand %p20023_p6, %p20017_p12 }
  0xb0   : > { %20027 = shalt.err (!%p20024_p0)
}
  0xb1   : > { %p23773_p1 = scmp.ne.s32.totalorder %s23763_s25, 0  ;;  %s20692_s14 = scalar_lea.hbm %s23717_s10, %s20597_s20 }
  0xb2   : > { %s661_s0 = scalar_lea.vmem [#allocation18], %s20564_s18  ;;  %s18117_s2 = smul.u32 3072, %s20521_s17 }
  0xb3   : > { %18183 = dma.hbm_to_vmem [thread:$0]  (!%p23773_p1), %s20664_s13, 256, %s630_s26, %s23741_s23  }
  0xb4   : > { %s669_s22 = sshll.u32 %s661_s0, 4  ;;  %s23742_s30 = scalar_lea.sflag [#allocation19], %s20530_s24  ;;  %s20695_s22 = int_to_ptr.vmem [resolvable:$true] %s669_s22 }
  0xb5   : > { %s20028_s28 = scalar_lea.hbm %s20692_s14, 64  ;;  %s20033_s15 = scalar_lea.hbm %s23717_s10, 384 }
  0xb6   : > { %p20029_p6 = scmp.ne.s32.totalorder %s20692_s14, %s20028_s28  ;;  %p20034_p2 = scmp.lt.u32.totalorder %s20692_s14, %s23717_s10 }
  0xb7   : > { %p20035_p4 = scmp.lt.u32.totalorder %s20033_s15, %s20028_s28  ;;  %p20037_p3 = scmp.lt.u32.totalorder %s20028_s28, %s20692_s14 }
  0xb8   : > { %p20031_p10 = pnand %p20029_p6, %p20571_p9 }
  0xb9   : > { %p20036_p8 = por %p20035_p4, %p20034_p2 }
  0xba   : > { %p20032_p13 = pneg %p20031_p10 }
  0xbb   : > { %p20038_p11 = por %p20037_p3, %p20036_p8 }
  0xbd   : > { %p20039_p12 = pnand %p20038_p11, %p20032_p13 }
  0xbf   : > { %20042 = shalt.err (!%p20039_p12)
}
  0xc0   : > { %s20043_s0 = scalar_lea.vmem %s20695_s22, 64  ;;  %s20367_s13 = smov [#allocation18]  }
  0xc1   : > { %p20044_p7 = scmp.ne.s32.totalorder %s20695_s22, %s20043_s0  ;;  %s20048_s26 = sshll.u32 %s20367_s13, 4  ;;  %s20049_s26 = int_to_ptr.vmem [resolvable:$false] %s20048_s26 }
  0xc2   : > { %s20050_s4 = scalar_lea.vmem %s20049_s26, 128  ;;  %p20051_p6 = scmp.lt.s32.totalorder %s20695_s22, %s20049_s26 }
  0xc3   : > { %p20046_p5 = pnand %p20044_p7, %p20571_p9  ;;  %p20052_p10 = scmp.lt.s32.totalorder %s20050_s4, %s20043_s0 }
  0xc5   : > { %p20047_p0 = pneg %p20046_p5  ;;  %p20053_p2 = por %p20052_p10, %p20051_p6 }
  0xc7   : > { %p20054_p4 = pnand %p20053_p2, %p20047_p0 }
  0xc9   : > { %20057 = shalt.err (!%p20054_p4)
}
  0xca   : > { %18189 = dma.hbm_to_vmem [thread:$0]  (!%p23773_p1), %s20692_s14, 64, %s20695_s22, %s23742_s30  }
  0xcb   : > { %s18118_s28 = smul.u32 49152, %s20360_s21  ;;  %s482_s15 = scalar_lea.vmem [#allocation3], %s18117_s2 }
  0xcc   : > { %s489_s27 = sshll.u32 %s482_s15, 4  ;;  %s15924_s4 = sshll.u32 %s20521_s17, 10  ;;  %s20730_s27 = int_to_ptr.vmem [resolvable:$true] %s489_s27 }
  0xcd   : > { %s20728_s26 = scalar_lea.hbm %s23708_s1, %s18118_s28  ;;  %s479_s23 = scalar_lea.sflag [#allocation4], %s20521_s17 }
  0xce   : > { %s20058_s6 = scalar_lea.hbm %s20728_s26, 49152  ;;  %s20063_s2 = scalar_lea.hbm %s23708_s1, 294912 }
  0xcf   : > { %p20059_p13 = scmp.ne.s32.totalorder %s20728_s26, %s20058_s6  ;;  %p20064_p11 = scmp.lt.u32.totalorder %s20728_s26, %s23708_s1 }
  0xd0   : > { %p20065_p12 = scmp.lt.u32.totalorder %s20063_s2, %s20058_s6  ;;  %p20067_p5 = scmp.lt.u32.totalorder %s20058_s6, %s20728_s26 }
  0xd1   : > { %p20061_p8 = pnand %p20059_p13, %p20571_p9 }
  0xd2   : > { %p20066_p7 = por %p20065_p12, %p20064_p11 }
  0xd3   : > { %p20062_p3 = pneg %p20061_p8 }
  0xd4   : > { %p20068_p0 = por %p20067_p5, %p20066_p7 }
  0xd6   : > { %p20069_p6 = pnand %p20068_p0, %p20062_p3 }
  0xd8   : > { %20072 = shalt.err (!%p20069_p6)
}
  0xd9   : > { %s20073_s0 = scalar_lea.vmem %s20730_s27, 49152  ;;  %s20368_s13 = smov [#allocation3]  }
  0xda   : > { %p20074_p10 = scmp.ne.s32.totalorder %s20730_s27, %s20073_s0  ;;  %s20078_s14 = sshll.u32 %s20368_s13, 4  ;;  %s20079_s14 = int_to_ptr.vmem [resolvable:$false] %s20078_s14 }
  0xdb   : > { %s20080_s22 = scalar_lea.vmem %s20079_s14, 98304  ;;  %p20081_p13 = scmp.lt.s32.totalorder %s20730_s27, %s20079_s14 }
  0xdc   : > { %p20076_p2 = pnand %p20074_p10, %p20571_p9  ;;  %p20082_p8 = scmp.lt.s32.totalorder %s20080_s22, %s20073_s0 }
  0xde   : > { %p20077_p4 = pneg %p20076_p2  ;;  %p20083_p11 = por %p20082_p8, %p20081_p13 }
  0xe0   : > { %p20084_p12 = pnand %p20083_p11, %p20077_p4 }
  0xe2   : > { %20087 = shalt.err (!%p20084_p12)
}
  0xe3   : > { %s20369_s6 = smov 768   ;;  %s20370_s2 = smov 48  }
  0xe4   : > { %18162 = dma.hbm_to_vmem [thread:$0]  (!%p23773_p1), %s20728_s26, 49152, %s20730_s27, %s479_s23, %s20369_s6, %s20369_s6, %s20370_s2  }
  0xe5   : > { %s17557_s15 = sshll.u32 %s20360_s21, 14  ;;  %s522_s14 = scalar_lea.vmem [#allocation8], %s15924_s4 }
  0xe6   : > { %s20761_s0 = scalar_lea.hbm %s23710_s3, %s17557_s15  ;;  %s529_s22 = sshll.u32 %s522_s14, 4  ;;  %s20765_s22 = int_to_ptr.vmem [resolvable:$true] %s529_s22 }
  0xe7   : > { %s20088_s30 = scalar_lea.hbm %s20761_s0, 16384  ;;  %s20093_s26 = scalar_lea.hbm %s23710_s3, 98304 }
  0xe8   : > { %p20089_p3 = scmp.ne.s32.totalorder %s20761_s0, %s20088_s30  ;;  %p20094_p0 = scmp.lt.u32.totalorder %s20761_s0, %s23710_s3 }
  0xe9   : > { %p20095_p6 = scmp.lt.u32.totalorder %s20093_s26, %s20088_s30  ;;  %p20097_p2 = scmp.lt.u32.totalorder %s20088_s30, %s20761_s0 }
  0xea   : > { %p20091_p7 = pnand %p20089_p3, %p20571_p9 }
  0xeb   : > { %p20096_p10 = por %p20095_p6, %p20094_p0 }
  0xec   : > { %p20092_p5 = pneg %p20091_p7 }
  0xed   : > { %p20098_p4 = por %p20097_p2, %p20096_p10 }
  0xef   : > { %p20099_p13 = pnand %p20098_p4, %p20092_p5 }
  0xf1   : > { %20102 = shalt.err (!%p20099_p13)
}
  0xf2   : > { %s20103_s4 = scalar_lea.vmem %s20765_s22, 16384  ;;  %s20371_s15 = smov [#allocation8]  }
  0xf3   : > { %p20104_p8 = scmp.ne.s32.totalorder %s20765_s22, %s20103_s4  ;;  %s20108_s28 = sshll.u32 %s20371_s15, 4  ;;  %s20109_s28 = int_to_ptr.vmem [resolvable:$false] %s20108_s28 }
  0xf4   : > { %s20110_s13 = scalar_lea.vmem %s20109_s28, 32768  ;;  %p20111_p3 = scmp.lt.s32.totalorder %s20765_s22, %s20109_s28 }
  0xf5   : > { %p20106_p11 = pnand %p20104_p8, %p20571_p9  ;;  %p20112_p7 = scmp.lt.s32.totalorder %s20110_s13, %s20103_s4 }
  0xf7   : > { %p20107_p12 = pneg %p20106_p11  ;;  %p20113_p0 = por %p20112_p7, %p20111_p3 }
  0xf9   : > { %p20114_p6 = pnand %p20113_p0, %p20107_p12 }
  0xfb   : > { %20117 = shalt.err (!%p20114_p6)
}
  0xfc   : > { %s23743_s30 = smov 256   ;;  %s23745_s14 = smov 16  }
  0xfd   : > { %s23774_s23 = scalar_lea.sflag [#allocation7], %s20530_s24  ;;  %s20797_s6 = scalar_lea.hbm %s23712_s5, %s20597_s20 }
  0xfe   : > { %18168 = dma.hbm_to_vmem [thread:$0]  (!%p23773_p1), %s20761_s0, 16384, %s20765_s22, %s23774_s23, %s23743_s30, %s23743_s30, %s23745_s14  }
  0xff   : > { %s562_s2 = scalar_lea.vmem [#allocation11], %s20564_s18  ;;  %s15936_s15 = sshll.u32 %s20521_s17, 12 }
 0x100   : > { %s570_s4 = sshll.u32 %s562_s2, 4  ;;  %s20118_s28 = scalar_lea.hbm %s20797_s6, 64  ;;  %s571_s4 = int_to_ptr.vmem [resolvable:$true] %s570_s4 }
 0x101   : > { %p20119_p5 = scmp.ne.s32.totalorder %s20797_s6, %s20118_s28  ;;  %s20123_s22 = scalar_lea.hbm %s23712_s5, 384 }
 0x102   : > { %p20124_p4 = scmp.lt.u32.totalorder %s20797_s6, %s23712_s5  ;;  %p20125_p13 = scmp.lt.u32.totalorder %s20123_s22, %s20118_s28 }
 0x103   : > { %p20121_p10 = pnand %p20119_p5, %p20571_p9  ;;  %p20127_p11 = scmp.lt.u32.totalorder %s20118_s28, %s20797_s6 }
 0x104   : > { %p20126_p8 = por %p20125_p13, %p20124_p4 }
 0x105   : > { %p20122_p2 = pneg %p20121_p10 }
 0x106   : > { %p20128_p12 = por %p20127_p11, %p20126_p8 }
 0x108   : > { %p20129_p3 = pnand %p20128_p12, %p20122_p2 }
 0x10a   : > { %20132 = shalt.err (!%p20129_p3)
}
 0x10b   : > { %s20133_s26 = scalar_lea.vmem %s571_s4, 64  ;;  %s20374_s2 = smov [#allocation11]  }
 0x10c   : > { %p20134_p7 = scmp.ne.s32.totalorder %s571_s4, %s20133_s26  ;;  %s20138_s30 = sshll.u32 %s20374_s2, 4  ;;  %s20139_s30 = int_to_ptr.vmem [resolvable:$false] %s20138_s30 }
 0x10d   : > { %s20140_s13 = scalar_lea.vmem %s20139_s30, 128  ;;  %p20141_p5 = scmp.lt.s32.totalorder %s571_s4, %s20139_s30 }
 0x10e   : > { %p20136_p0 = pnand %p20134_p7, %p20571_p9  ;;  %p20142_p10 = scmp.lt.s32.totalorder %s20140_s13, %s20133_s26 }
 0x110   : > { %p20137_p6 = pneg %p20136_p0  ;;  %p20143_p1 = por %p20142_p10, %p20141_p5 }
 0x112   : > { %p20144_p4 = pnand %p20143_p1, %p20137_p6 }
 0x114   : > { %20147 = shalt.err (!%p20144_p4)
}
 0x115   : > { %p23775_p13 = scmp.ne.s32.totalorder %s23763_s25, 0  ;;  %s23776_s28 = scalar_lea.sflag [#allocation10], %s20530_s24 }
 0x116   : > { %s17561_s0 = sshll.u32 %s20360_s21, 16  ;;  %s600_s27 = scalar_lea.vmem [#allocation14], %s15936_s15 }
 0x117   : > { %18174 = dma.hbm_to_vmem [thread:$0]  (!%p23775_p13), %s20797_s6, 64, %s571_s4, %s23776_s28  }
 0x118   : > { %s20826_s30 = scalar_lea.hbm %s23714_s7, %s17561_s0  ;;  %s607_s26 = sshll.u32 %s600_s27, 4  ;;  %s20830_s26 = int_to_ptr.vmem [resolvable:$true] %s607_s26 }
 0x119   : > { %s20148_s2 = scalar_lea.hbm %s20826_s30, 65536  ;;  %s20153_s13 = scalar_lea.hbm %s23714_s7, 393216 }
 0x11a   : > { %p20149_p1 = scmp.ne.s32.totalorder %s20826_s30, %s20148_s2  ;;  %p20154_p11 = scmp.lt.u32.totalorder %s20826_s30, %s23714_s7 }
 0x11b   : > { %p20155_p12 = scmp.lt.u32.totalorder %s20153_s13, %s20148_s2  ;;  %p20157_p7 = scmp.lt.u32.totalorder %s20148_s2, %s20826_s30 }
 0x11c   : > { %p20151_p2 = pnand %p20149_p1, %p20571_p9 }
 0x11d   : > { %p20156_p3 = por %p20155_p12, %p20154_p11 }
 0x11e   : > { %p20152_p8 = pneg %p20151_p2 }
 0x11f   : > { %p20158_p0 = por %p20157_p7, %p20156_p3 }
 0x121   : > { %p20159_p6 = pnand %p20158_p0, %p20152_p8 }
 0x123   : > { %20162 = shalt.err (!%p20159_p6)
}
 0x124   : > { %s20163_s23 = scalar_lea.vmem %s20830_s26, 65536  ;;  %s20375_s27 = smov [#allocation14]  }
 0x125   : > { %p20164_p5 = scmp.ne.s32.totalorder %s20830_s26, %s20163_s23  ;;  %s20168_s6 = sshll.u32 %s20375_s27, 4  ;;  %s20169_s6 = int_to_ptr.vmem [resolvable:$false] %s20168_s6 }
 0x126   : > { %s20170_s4 = scalar_lea.vmem %s20169_s6, 131072  ;;  %p20171_p1 = scmp.lt.s32.totalorder %s20830_s26, %s20169_s6 }
 0x127   : > { %p20166_p10 = pnand %p20164_p5, %p20571_p9  ;;  %p20172_p2 = scmp.lt.s32.totalorder %s20170_s4, %s20163_s23 }
 0x129   : > { %p20167_p4 = pneg %p20166_p10  ;;  %p20173_p11 = por %p20172_p2, %p20171_p1 }
 0x12b   : > { %p20174_p12 = pnand %p20173_p11, %p20167_p4 }
 0x12d   : > { %20177 = shalt.err (!%p20174_p12)
}
 0x12e   : > { %s20376_s2 = smov 1024   ;;  %s20377_s13 = smov 64  }
 0x12f   : > { %s23777_s28 = scalar_lea.sflag [#allocation13], %s20530_s24  ;;  %s20860_s23 = scalar_lea.hbm %s23716_s9, %s17561_s0 }
 0x130   : > { %18180 = dma.hbm_to_vmem [thread:$0]  (!%p23775_p13), %s20826_s30, 65536, %s20830_s26, %s23777_s28, %s20376_s2, %s20376_s2, %s20377_s13  }
 0x131   : > { %s640_s6 = scalar_lea.vmem [#allocation17], %s15936_s15  ;;  %s20178_s14 = scalar_lea.hbm %s20860_s23, 65536 }
 0x132   : > { %s647_s4 = sshll.u32 %s640_s6, 4  ;;  %p20179_p8 = scmp.ne.s32.totalorder %s20860_s23, %s20178_s14  ;;  %s20864_s4 = int_to_ptr.vmem [resolvable:$true] %s647_s4 }
 0x133   : > { %s20183_s26 = scalar_lea.hbm %s23716_s9, 393216  ;;  %p20184_p0 = scmp.lt.u32.totalorder %s20860_s23, %s23716_s9 }
 0x134   : > { %p20181_p3 = pnand %p20179_p8, %p20571_p9  ;;  %p20185_p6 = scmp.lt.u32.totalorder %s20183_s26, %s20178_s14 }
 0x135   : > { %p20187_p10 = scmp.lt.u32.totalorder %s20178_s14, %s20860_s23 }
 0x136   : > { %p20182_p7 = pneg %p20181_p3  ;;  %p20186_p5 = por %p20185_p6, %p20184_p0 }
 0x138   : > { %p20188_p4 = por %p20187_p10, %p20186_p5 }
 0x13a   : > { %p20189_p1 = pnand %p20188_p4, %p20182_p7 }
 0x13c   : > { %20192 = shalt.err (!%p20189_p1)
}
 0x13d   : > { %s20193_s17 = scalar_lea.vmem %s20864_s4, 65536  ;;  %s20378_s15 = smov [#allocation17]  }
 0x13e   : > { %p20194_p2 = scmp.ne.s32.totalorder %s20864_s4, %s20193_s17  ;;  %s20198_s13 = sshll.u32 %s20378_s15, 4  ;;  %s20199_s13 = int_to_ptr.vmem [resolvable:$false] %s20198_s13 }
 0x13f   : > { %s20200_s28 = scalar_lea.vmem %s20199_s13, 131072  ;;  %p20201_p8 = scmp.lt.s32.totalorder %s20864_s4, %s20199_s13 }
 0x140   : > { %p20196_p11 = pnand %p20194_p2, %p20571_p9  ;;  %p20202_p3 = scmp.lt.s32.totalorder %s20200_s28, %s20193_s17 }
 0x142   : > { %p20197_p12 = pneg %p20196_p11  ;;  %p20203_p0 = por %p20202_p3, %p20201_p8 }
 0x144   : > { %p20204_p6 = pnand %p20203_p0, %p20197_p12 }
 0x146   : > { %20207 = shalt.err (!%p20204_p6)
}
 0x147   : > { %s23778_s14 = smov 16   ;;  %s23779_s22 = smov 256  }
 0x148   : > { %s23780_s27 = scalar_lea.sflag [#allocation16], %s20530_s24  ;;  %s20896_s30 = scalar_lea.hbm %s23718_s11, %s20597_s20 }
 0x149   : > { %18186 = dma.hbm_to_vmem [thread:$0]  (!%p23775_p13), %s20860_s23, 65536, %s20864_s4, %s23780_s27, %s23779_s22, %s23779_s22, %s23778_s14  }
 0x14a   : > { %s680_s26 = scalar_lea.vmem [#allocation20], %s20564_s18  ;;  %s20208_s2 = scalar_lea.hbm %s20896_s30, 64 }
 0x14b   : > { %s688_s0 = sshll.u32 %s680_s26, 4  ;;  %p20209_p7 = scmp.ne.s32.totalorder %s20896_s30, %s20208_s2  ;;  %s689_s0 = int_to_ptr.vmem [resolvable:$true] %s688_s0 }
 0x14c   : > { %s20213_s23 = scalar_lea.hbm %s23718_s11, 384  ;;  %p20214_p4 = scmp.lt.u32.totalorder %s20896_s30, %s23718_s11 }
 0x14d   : > { %p20211_p5 = pnand %p20209_p7, %p20571_p9  ;;  %p20215_p1 = scmp.lt.u32.totalorder %s20213_s23, %s20208_s2 }
 0x14e   : > { %p20217_p11 = scmp.lt.u32.totalorder %s20208_s2, %s20896_s30 }
 0x14f   : > { %p20212_p10 = pneg %p20211_p5  ;;  %p20216_p2 = por %p20215_p1, %p20214_p4 }
 0x151   : > { %p20218_p12 = por %p20217_p11, %p20216_p2 }
 0x153   : > { %p20219_p8 = pnand %p20218_p12, %p20212_p10 }
 0x155   : > { %20222 = shalt.err (!%p20219_p8)
}
 0x156   : > { %s20223_s28 = scalar_lea.vmem %s689_s0, 64  ;;  %s20379_s14 = smov [#allocation20]  }
 0x157   : > { %p20224_p3 = scmp.ne.s32.totalorder %s689_s0, %s20223_s28  ;;  %s20228_s22 = sshll.u32 %s20379_s14, 4  ;;  %s20229_s22 = int_to_ptr.vmem [resolvable:$false] %s20228_s22 }
 0x158   : > { %s20230_s27 = scalar_lea.vmem %s20229_s22, 128  ;;  %p20231_p7 = scmp.lt.s32.totalorder %s689_s0, %s20229_s22 }
 0x159   : > { %p20226_p0 = pnand %p20224_p3, %p20571_p9  ;;  %p20232_p5 = scmp.lt.s32.totalorder %s20230_s27, %s20223_s28 }
 0x15b   : > { %p20227_p6 = pneg %p20226_p0  ;;  %p20233_p13 = por %p20232_p5, %p20231_p7 }
 0x15d   : > { %p20234_p1 = pnand %p20233_p13, %p20227_p6 }
 0x15f   : > { %20237 = shalt.err (!%p20234_p1)
}
 0x160   : > { %p23781_p4 = scmp.ne.s32.totalorder %s23763_s25, 0  ;;  %s23782_s6 = scalar_lea.sflag [#allocation19], %s20530_s24 }
 0x161   : > { %s20922_s2 = scalar_lea.hbm %s23719_s12, %s20597_s20  ;;  %s699_s17 = scalar_lea.vmem [#allocation21], %s20564_s18 }
 0x162   : > { %18192 = dma.hbm_to_vmem [thread:$0]  (!%p23781_p4), %s20896_s30, 64, %s689_s0, %s23782_s6  }
 0x163   : > { %s707_s15 = sshll.u32 %s699_s17, 4  ;;  %s696_s23 = scalar_lea.sflag [#allocation22], %s20530_s24  ;;  %s708_s15 = int_to_ptr.vmem [resolvable:$true] %s707_s15 }
 0x164   : > { %s20238_s4 = scalar_lea.hbm %s20922_s2, 64  ;;  %s20243_s0 = scalar_lea.hbm %s23719_s12, 384 }
 0x165   : > { %p20239_p13 = scmp.ne.s32.totalorder %s20922_s2, %s20238_s4  ;;  %p20244_p11 = scmp.lt.u32.totalorder %s20922_s2, %s23719_s12 }
 0x166   : > { %p20245_p12 = scmp.lt.u32.totalorder %s20243_s0, %s20238_s4  ;;  %p20247_p3 = scmp.lt.u32.totalorder %s20238_s4, %s20922_s2 }
 0x167   : > { %p20241_p10 = pnand %p20239_p13, %p20571_p9 }
 0x168   : > { %p20246_p8 = por %p20245_p12, %p20244_p11 }
 0x169   : > { %p20242_p2 = pneg %p20241_p10 }
 0x16a   : > { %p20248_p0 = por %p20247_p3, %p20246_p8 }
 0x16c   : > { %p20249_p6 = pnand %p20248_p0, %p20242_p2 }
 0x16e   : > { %20252 = shalt.err (!%p20249_p6)
}
 0x16f   : > { %s20253_s24 = scalar_lea.vmem %s708_s15, 64  ;;  %s20380_s18 = smov [#allocation21]  }
 0x170   : > { %p20254_p7 = scmp.ne.s32.totalorder %s708_s15, %s20253_s24  ;;  %s20258_s14 = sshll.u32 %s20380_s18, 4  ;;  %s20259_s14 = int_to_ptr.vmem [resolvable:$false] %s20258_s14 }
 0x171   : > { %s20260_s22 = scalar_lea.vmem %s20259_s14, 128  ;;  %p20261_p13 = scmp.lt.s32.totalorder %s708_s15, %s20259_s14 }
 0x172   : > { %p20256_p5 = pnand %p20254_p7, %p20571_p9  ;;  %p20262_p10 = scmp.lt.s32.totalorder %s20260_s22, %s20253_s24 }
 0x174   : > { %p20257_p1 = pneg %p20256_p5  ;;  %p20263_p4 = por %p20262_p10, %p20261_p13 }
 0x176   : > { %p20264_p11 = pnand %p20263_p4, %p20257_p1 }
 0x178   : > { %20267 = shalt.err (!%p20264_p11)
}
 0x179   : > { %p23783_p12 = scmp.ne.s32.totalorder %s23763_s25, 0  ;;  %p23784_p2 = scmp.ne.s32.totalorder %s23761_s29, 0 }
 0x17a   : > { %s23785_s16 = sld [smem:[#allocation38_spill]] (!%p23784_p2)  ;;  %s20946_s27 = sand.u32 (!%p23784_p2), 1, %s20352_s19  }
 0x17b   : > { %18195 = dma.hbm_to_vmem [thread:$0]  (!%p23783_p12), %s20922_s2, 64, %s708_s15, %s696_s23  }
 0x17c   : > { %716 = sbr.rel (%p23784_p2) target bundleno = 4366 (0x110e), region = 80  ;;  %s719_s21 = scalar_lea.sflag (!%p23784_p2), [#allocation4], %s20946_s27 }
 0x17d   : > { %s18121_s6 = smul.u32 (!%p23784_p2), 3072, %s20946_s27 }
 0x17f   : > { %s20950_s26 = scalar_lea.vmem (!%p23784_p2), [#allocation3], %s18121_s6 }
 0x180   : > { %p23786_p9 = scmp.ne.s32.totalorder (!%p23784_p2), %s23785_s16, 0 }
 0x183   : > { %20311 = dma.done.wait (%p23786_p9), %s719_s21, 49152  }
 0x184   : > { %20313 = vsyncadd (%p23786_p9), %s719_s21, 4294918144  ;;  %s23787_s25 = sld [smem:[#allocation35_spill]]  ;;  %s18122_s2 = smul.u32 12, %s20946_s27 }
 0x186   : > { %s20961_s15 = scalar_lea.vmem [#allocation6], %s18122_s2 }
 0x18a   : > { %s20957_s29 = sand.u32 1, %s23787_s25  }
 0x18b   : > { %s728_s17 = scalar_lea.sflag [#allocation7], %s20957_s29 }
 0x18c   : > { %20315 = dma.done.wait (%p23786_p9), %s728_s17, 16576  }
 0x18d   : > { %20317 = vsyncadd (%p23786_p9), %s728_s17, 4294950720  ;;  %s15955_s23 = sshll.u32 %s20946_s27, 10  ;;  %s20969_s4 = sshll.u32 %s20946_s27, 2 }
 0x18e   : > { %s20971_s13 = scalar_lea.vmem [#allocation8], %s15955_s23  ;;  %s746_s30 = scalar_lea.sflag [#allocation10], %s20957_s29 }
 0x18f   : > { %s749_s0 = scalar_lea.vmem [#allocation9], %s20969_s4 }
 0x190   : > { %20319 = dma.done.wait (%p23786_p9), %s746_s30, 128  }
 0x191   : > { %20321 = vsyncadd (%p23786_p9), %s746_s30, 4294967168  ;;  %s758_s28 = scalar_lea.vmem [#allocation11], %s20969_s4  ;;  %s764_s20 = scalar_lea.sflag [#allocation13], %s20957_s29 }
 0x192   : > { %s767_s24 = scalar_lea.vmem [#allocation12], %s20969_s4 }
 0x193   : > { %20323 = dma.done.wait (%p23786_p9), %s764_s20, 65600  }
 0x194   : > { %20325 = vsyncadd (%p23786_p9), %s764_s20, 4294901696  ;;  %s15959_s18 = sshll.u32 %s20946_s27, 12  ;;  %s15960_s14 = sshll.u32 %s20946_s27, 4 }
 0x195   : > { %s20988_s22 = scalar_lea.vmem [#allocation14], %s15959_s18  ;;  %s782_s6 = scalar_lea.sflag [#allocation16], %s20957_s29 }
 0x196   : > { %s20991_s21 = scalar_lea.vmem [#allocation15], %s15960_s14 }
 0x197   : > { %20327 = dma.done.wait (%p23786_p9), %s782_s6, 65792  }
 0x198   : > { %20329 = vsyncadd (%p23786_p9), %s782_s6, 4294901504  ;;  %s20997_s2 = scalar_lea.vmem [#allocation17], %s15959_s18  ;;  %s800_s17 = scalar_lea.sflag [#allocation19], %s20957_s29 }
 0x199   : > { %20331 = dma.done.wait (%p23786_p9), %s800_s17, 128  }
 0x19a   : > { %20333 = vsyncadd (%p23786_p9), %s800_s17, 4294967168  ;;  %s818_s30 = scalar_lea.sflag [#allocation22], %s20957_s29 }
 0x19b   : > { %20335 = dma.done.wait (%p23786_p9), %s818_s30, 64  }
 0x19c   : > { %20337 = vsyncadd (%p23786_p9), %s818_s30, 4294967232  ;;  %p23788_p4 = scmp.eq.s32.totalorder %s23787_s25, 0 }
 0x19e   : > { %20339 = dma.done.wait (%p23788_p4), [#allocation22], 16   ;;  %p23789_p8 = pmov %p23788_p4 }
 0x19f   : > { %p23790_p3 = scmp.ne.s32.totalorder %s23787_s25, 0 }
 0x1a0   : > { %20341 = vsyncadd (%p23789_p8), [#allocation22], 4294967280  ;;  %s23791_s6 = sld [smem:[#allocation39_spill]] (!%p23790_p3) }
 0x1a1   : > { %925 = sbr.rel (%p23790_p3) target bundleno = 427 (0x1ab), region = 136 }
 0x1a6   : > { %v926_v0 = vld [vmem:[%s23791_s6] sm:$0xff] (!%p23790_p3)  ;;  %v927_v1 = vld [vmem:[%s23791_s6 + $0x8] sm:$0xff] (!%p23790_p3)  ;;  %v928_v2 = vld [vmem:[%s23791_s6 + $0x10] sm:$0xff] (!%p23790_p3) }
 0x1a7   : > { %934 = vst [vmem:[#allocation2] sm:$0xff] (!%p23790_p3), %v926_v0  ;;  %935 = vst [vmem:[#allocation2 + $0x8] sm:$0xff] (!%p23790_p3), %v927_v1  ;;  %v929_v3 = vld [vmem:[%s23791_s6 + $0x18] sm:$0xff] (!%p23790_p3)  ;;  %v930_v4 = vld [vmem:[%s23791_s6 + $0x20] sm:$0xff] (!%p23790_p3) }
 0x1a8   : > { %936 = vst [vmem:[#allocation2 + $0x10] sm:$0xff] %v928_v2  ;;  %v931_v5 = vld [vmem:[%s23791_s6 + $0x28] sm:$0xff]  ;;  %937 = vst [vmem:[#allocation2 + $0x18] sm:$0xff] %v929_v3  ;;  %v932_v6 = vld [vmem:[%s23791_s6 + $0x30] sm:$0xff] }
 0x1a9   : > { %938 = vst [vmem:[#allocation2 + $0x20] sm:$0xff] %v930_v4  ;;  %939 = vst [vmem:[#allocation2 + $0x28] sm:$0xff] %v931_v5  ;;  %v933_v7 = vld [vmem:[%s23791_s6 + $0x38] sm:$0xff] }
 0x1aa   : > { %940 = vst [vmem:[#allocation2 + $0x30] sm:$0xff] %v932_v6  ;;  %941 = vst [vmem:[#allocation2 + $0x38] sm:$0xff] %v933_v7 }
 0x1ab PF: > { %v18264_v8 = vld [vmem:[%s20950_s26 + $0x4] ss:$48 sps:$4 sm:$0xff]   ;;  %v18266_v9 = vld [vmem:[%s20950_s26 + $0xc] ss:$48 sps:$4 sm:$0xff]   ;;  %v18268_v10 = vld [vmem:[%s20950_s26] ss:$48 sps:$4 sm:$0xff]  }
 0x1ac   : > { %3322 = vmatprep.subr.bf16.mxu0 %v18264_v8  ;;  %v18269_v11 = vld [vmem:[%s20950_s26 + $0x8] ss:$48 sps:$4 sm:$0xff]   ;;  %3408 = vmatprep.subr.bf16.mxu1 %v18266_v9  ;;  %v18270_v12 = vld [vmem:[%s20950_s26 + $0x64] ss:$48 sps:$4 sm:$0xff]   ;;  %v18272_v13 = vld [vmem:[%s20950_s26 + $0x6c] ss:$48 sps:$4 sm:$0xff]  }
 0x1ad   : > { %3323 = vmatpush1.bf16.msra.mxu0 %v18268_v10  ;;  %3409 = vmatpush1.bf16.msra.mxu1 %v18269_v11  ;;  %v18274_v14 = vld [vmem:[%s20950_s26 + $0x60] ss:$48 sps:$4 sm:$0xff]   ;;  %v18275_v15 = vld [vmem:[%s20950_s26 + $0x68] ss:$48 sps:$4 sm:$0xff]   ;;  %v18276_v16 = vld [vmem:[%s20950_s26 + $0xc4] ss:$48 sps:$4 sm:$0xff]  }
 0x1ae   : > { %3324 = vmatprep.subr.bf16.mxu0 %v18270_v12  ;;  %3410 = vmatprep.subr.bf16.mxu1 %v18272_v13  ;;  %v18278_v17 = vld [vmem:[%s20950_s26 + $0xcc] ss:$48 sps:$4 sm:$0xff]   ;;  %v18280_v18 = vld [vmem:[%s20950_s26 + $0xc0] ss:$48 sps:$4 sm:$0xff]   ;;  %v18281_v19 = vld [vmem:[%s20950_s26 + $0xc8] ss:$48 sps:$4 sm:$0xff]  }
 0x1af   : > { %v18282_v20 = vld [vmem:[%s20950_s26 + $0x124] ss:$48 sps:$4 sm:$0xff]   ;;  %v18284_v21 = vld [vmem:[%s20950_s26 + $0x12c] ss:$48 sps:$4 sm:$0xff]   ;;  %v18286_v22 = vld [vmem:[%s20950_s26 + $0x120] ss:$48 sps:$4 sm:$0xff]  }
 0x1b0   : > { %v18287_v23 = vld [vmem:[%s20950_s26 + $0x128] ss:$48 sps:$4 sm:$0xff]   ;;  %v18288_v24 = vld [vmem:[%s20950_s26 + $0x184] ss:$48 sps:$4 sm:$0xff]   ;;  %v18290_v25 = vld [vmem:[%s20950_s26 + $0x18c] ss:$48 sps:$4 sm:$0xff]  }
 0x1b1   : > { %3325 = vmatpush1.bf16.msra.mxu0 %v18274_v14  ;;  %3411 = vmatpush1.bf16.msra.mxu1 %v18275_v15  ;;  %v18292_v26 = vld [vmem:[%s20950_s26 + $0x180] ss:$48 sps:$4 sm:$0xff]   ;;  %v18293_v27 = vld [vmem:[%s20950_s26 + $0x188] ss:$48 sps:$4 sm:$0xff]   ;;  %v18294_v28 = vld [vmem:[%s20950_s26 + $0x1e4] ss:$48 sps:$4 sm:$0xff]  }
 0x1b2   : > { %3326 = vmatprep.subr.bf16.mxu0 %v18276_v16  ;;  %3412 = vmatprep.subr.bf16.mxu1 %v18278_v17  ;;  %v18296_v29 = vld [vmem:[%s20950_s26 + $0x1ec] ss:$48 sps:$4 sm:$0xff]   ;;  %v18298_v30 = vld [vmem:[%s20950_s26 + $0x1e0] ss:$48 sps:$4 sm:$0xff]   ;;  %v18299_v31 = vld [vmem:[%s20950_s26 + $0x1e8] ss:$48 sps:$4 sm:$0xff]  }
 0x1b3   : > { %v18300_v32 = vld [vmem:[%s20950_s26 + $0x244] ss:$48 sps:$4 sm:$0xff]   ;;  %v18302_v33 = vld [vmem:[%s20950_s26 + $0x24c] ss:$48 sps:$4 sm:$0xff]   ;;  %v18304_v34 = vld [vmem:[%s20950_s26 + $0x240] ss:$48 sps:$4 sm:$0xff]  }
 0x1b4   : > { %v18305_v35 = vld [vmem:[%s20950_s26 + $0x248] ss:$48 sps:$4 sm:$0xff]   ;;  %v18306_v36 = vld [vmem:[%s20950_s26 + $0x2a4] ss:$48 sps:$4 sm:$0xff]   ;;  %v18308_v37 = vld [vmem:[%s20950_s26 + $0x2ac] ss:$48 sps:$4 sm:$0xff]  }
 0x1b5   : > { %3327 = vmatpush1.bf16.msra.mxu0 %v18280_v18  ;;  %3413 = vmatpush1.bf16.msra.mxu1 %v18281_v19  ;;  %v18310_v38 = vld [vmem:[%s20950_s26 + $0x2a0] ss:$48 sps:$4 sm:$0xff]   ;;  %v18311_v39 = vld [vmem:[%s20950_s26 + $0x2a8] ss:$48 sps:$4 sm:$0xff]   ;;  %v18312_v40 = vld [vmem:[%s20950_s26 + $0x304] ss:$48 sps:$4 sm:$0xff]  }
 0x1b6   : > { %3328 = vmatprep.subr.bf16.mxu0 %v18282_v20  ;;  %3414 = vmatprep.subr.bf16.mxu1 %v18284_v21  ;;  %v18314_v41 = vld [vmem:[%s20950_s26 + $0x30c] ss:$48 sps:$4 sm:$0xff]   ;;  %v18316_v42 = vld [vmem:[%s20950_s26 + $0x300] ss:$48 sps:$4 sm:$0xff]   ;;  %v18317_v43 = vld [vmem:[%s20950_s26 + $0x308] ss:$48 sps:$4 sm:$0xff]  }
 0x1b7   : > { %v18318_v44 = vld [vmem:[%s20950_s26 + $0x364] ss:$48 sps:$4 sm:$0xff]   ;;  %v18320_v45 = vld [vmem:[%s20950_s26 + $0x36c] ss:$48 sps:$4 sm:$0xff]   ;;  %v18322_v46 = vld [vmem:[%s20950_s26 + $0x360] ss:$48 sps:$4 sm:$0xff]  }
 0x1b8   : > { %v18323_v47 = vld [vmem:[%s20950_s26 + $0x368] ss:$48 sps:$4 sm:$0xff]   ;;  %v18324_v48 = vld [vmem:[%s20950_s26 + $0x3c4] ss:$48 sps:$4 sm:$0xff]   ;;  %v18326_v49 = vld [vmem:[%s20950_s26 + $0x3cc] ss:$48 sps:$4 sm:$0xff]  }
 0x1b9   : > { %3329 = vmatpush1.bf16.msra.mxu0 %v18286_v22  ;;  %3415 = vmatpush1.bf16.msra.mxu1 %v18287_v23  ;;  %v18328_v50 = vld [vmem:[%s20950_s26 + $0x3c0] ss:$48 sps:$4 sm:$0xff]   ;;  %v18329_v51 = vld [vmem:[%s20950_s26 + $0x3c8] ss:$48 sps:$4 sm:$0xff]   ;;  %v18330_v52 = vld [vmem:[%s20950_s26 + $0x424] ss:$48 sps:$4 sm:$0xff]  }
 0x1ba   : > { %3330 = vmatprep.subr.bf16.mxu0 %v18288_v24  ;;  %3416 = vmatprep.subr.bf16.mxu1 %v18290_v25  ;;  %v18332_v53 = vld [vmem:[%s20950_s26 + $0x42c] ss:$48 sps:$4 sm:$0xff]   ;;  %v18334_v56 = vld [vmem:[%s20950_s26 + $0x420] ss:$48 sps:$4 sm:$0xff]   ;;  %v18335_v57 = vld [vmem:[%s20950_s26 + $0x428] ss:$48 sps:$4 sm:$0xff]  }
 0x1bb   : > { %v943_v54 = vld [vmem:[#allocation2 + $0x8] sm:$0xff]  ;;  %v18336_v59 = vld [vmem:[%s20950_s26 + $0x484] ss:$48 sps:$4 sm:$0xff]   ;;  %v18340_v61 = vld [vmem:[%s20950_s26 + $0x480] ss:$48 sps:$4 sm:$0xff]   ;;  %vm20382_vm0 = vmmov 0  }
 0x1bc   : > { %v947_v55 = vld [vmem:[#allocation2 + $0x28] sm:$0xff]  ;;  %v18342_v63 = vld [vmem:[%s20950_s26 + $0x4e4] ss:$48 sps:$4 sm:$0xff]   ;;  %v18346_v1 = vld [vmem:[%s20950_s26 + $0x4e0] ss:$48 sps:$4 sm:$0xff]   ;;  %vm3838_vm1 = vcmask 523264  }
 0x1bd   : > { %3331 = vmatpush1.bf16.msra.mxu0 %v18292_v26  ;;  %3417 = vmatpush1.bf16.msra.mxu1 %v18293_v27  ;;  %v21090_v58 = vpack.c.bf16 %v947_v55, %v943_v54  ;;  %v18338_v60 = vld [vmem:[%s20950_s26 + $0x48c] ss:$48 sps:$4 sm:$0xff]   ;;  %v18341_v62 = vld [vmem:[%s20950_s26 + $0x488] ss:$48 sps:$4 sm:$0xff]   ;;  %v18348_v3 = vld [vmem:[%s20950_s26 + $0x544] ss:$48 sps:$4 sm:$0xff]  }
 0x1be   : > { %3332 = vmatprep.subr.bf16.mxu0 %v18294_v28  ;;  %3418 = vmatprep.subr.bf16.mxu1 %v18296_v29  ;;  %v18344_v0 = vld [vmem:[%s20950_s26 + $0x4ec] ss:$48 sps:$4 sm:$0xff]   ;;  %v18347_v2 = vld [vmem:[%s20950_s26 + $0x4e8] ss:$48 sps:$4 sm:$0xff]   ;;  %v18352_v5 = vld [vmem:[%s20950_s26 + $0x540] ss:$48 sps:$4 sm:$0xff]  }
 0x1bf   : > { %3354 = vmatprep.mubr.bf16.mxu0 %v21090_v58  ;;  %3440 = vmatprep.mubr.bf16.mxu1 %v21090_v58  ;;  %v18350_v4 = vld [vmem:[%s20950_s26 + $0x54c] ss:$48 sps:$4 sm:$0xff]   ;;  %v18353_v6 = vld [vmem:[%s20950_s26 + $0x548] ss:$48 sps:$4 sm:$0xff]   ;;  %v18354_v7 = vld [vmem:[%s20950_s26 + $0x5a4] ss:$48 sps:$4 sm:$0xff]  }
 0x1c0   : > { %v18356_v8 = vld [vmem:[%s20950_s26 + $0x5ac] ss:$48 sps:$4 sm:$0xff]   ;;  %v18358_v9 = vld [vmem:[%s20950_s26 + $0x5a0] ss:$48 sps:$4 sm:$0xff]   ;;  %v18359_v10 = vld [vmem:[%s20950_s26 + $0x5a8] ss:$48 sps:$4 sm:$0xff]  }
 0x1c1   : > { %3333 = vmatpush1.bf16.msra.mxu0 %v18298_v30  ;;  %3419 = vmatpush1.bf16.msra.mxu1 %v18299_v31  ;;  %v18362_v11 = vld [vmem:[%s20950_s26 + $0x604] ss:$48 sps:$4 sm:$0xff]   ;;  %v18365_v14 = vld [vmem:[%s20950_s26 + $0x60c] ss:$48 sps:$4 sm:$0xff]   ;;  %v18360_v15 = vld [vmem:[%s20950_s26 + $0x600] ss:$48 sps:$4 sm:$0xff]  }
 0x1c2   : > { %3334 = vmatprep.subr.bf16.mxu0 %v18300_v32  ;;  %3420 = vmatprep.subr.bf16.mxu1 %v18302_v33  ;;  %v942_v12 = vld [vmem:[#allocation2] sm:$0xff]  ;;  %v18363_v16 = vld [vmem:[%s20950_s26 + $0x608] ss:$48 sps:$4 sm:$0xff]   ;;  %v18371_v19 = vld [vmem:[%s20950_s26 + $0x66c] ss:$48 sps:$4 sm:$0xff]   ;;  %s20383_s23 = smov 64  }
 0x1c3   : > { %v946_v13 = vld [vmem:[#allocation2 + $0x20] sm:$0xff]  ;;  %v18369_v21 = vld [vmem:[%s20950_s26 + $0x668] ss:$48 sps:$4 sm:$0xff]   ;;  %v18377_v23 = vld [vmem:[%s20950_s26 + $0x6cc] ss:$48 sps:$4 sm:$0xff]   ;;  %vm3916_vm2 = vcmask 64512  }
 0x1c4   : > { %v21114_v17 = vpack.c.bf16 %v946_v13, %v942_v12  ;;  %v18368_v18 = vld [vmem:[%s20950_s26 + $0x664] ss:$48 sps:$4 sm:$0xff]   ;;  %v18366_v20 = vld [vmem:[%s20950_s26 + $0x660] ss:$48 sps:$4 sm:$0xff]   ;;  %v18375_v25 = vld [vmem:[%s20950_s26 + $0x6c8] ss:$48 sps:$4 sm:$0xff]  }
 0x1c5   : > { %3335 = vmatpush1.bf16.msra.mxu0 %v18304_v34  ;;  %3421 = vmatpush1.bf16.msra.mxu1 %v18305_v35  ;;  %v18374_v22 = vld [vmem:[%s20950_s26 + $0x6c4] ss:$48 sps:$4 sm:$0xff]   ;;  %v18372_v24 = vld [vmem:[%s20950_s26 + $0x6c0] ss:$48 sps:$4 sm:$0xff]   ;;  %v18383_v27 = vld [vmem:[%s20950_s26 + $0x72c] ss:$48 sps:$4 sm:$0xff]  }
 0x1c6   : > { %3336 = vmatprep.subr.bf16.mxu0 %v18306_v36  ;;  %3422 = vmatprep.subr.bf16.mxu1 %v18308_v37  ;;  %v18380_v26 = vld [vmem:[%s20950_s26 + $0x724] ss:$48 sps:$4 sm:$0xff]   ;;  %v18378_v28 = vld [vmem:[%s20950_s26 + $0x720] ss:$48 sps:$4 sm:$0xff]   ;;  %v18381_v29 = vld [vmem:[%s20950_s26 + $0x728] ss:$48 sps:$4 sm:$0xff]  }
 0x1c7   : > { %v18386_v30 = vld [vmem:[%s20950_s26 + $0x784] ss:$48 sps:$4 sm:$0xff]   ;;  %v18389_v31 = vld [vmem:[%s20950_s26 + $0x78c] ss:$48 sps:$4 sm:$0xff]   ;;  %v18384_v32 = vld [vmem:[%s20950_s26 + $0x780] ss:$48 sps:$4 sm:$0xff]  }
 0x1c8   : > { %v18387_v33 = vld [vmem:[%s20950_s26 + $0x788] ss:$48 sps:$4 sm:$0xff]   ;;  %v18392_v34 = vld [vmem:[%s20950_s26 + $0x7e4] ss:$48 sps:$4 sm:$0xff]   ;;  %v18395_v35 = vld [vmem:[%s20950_s26 + $0x7ec] ss:$48 sps:$4 sm:$0xff]  }
 0x1c9   : > { %3337 = vmatpush1.bf16.msra.mxu0 %v18310_v38  ;;  %3423 = vmatpush1.bf16.msra.mxu1 %v18311_v39  ;;  %v18390_v36 = vld [vmem:[%s20950_s26 + $0x7e0] ss:$48 sps:$4 sm:$0xff]   ;;  %v18393_v37 = vld [vmem:[%s20950_s26 + $0x7e8] ss:$48 sps:$4 sm:$0xff]   ;;  %v18398_v38 = vld [vmem:[%s20950_s26 + $0x844] ss:$48 sps:$4 sm:$0xff]  }
 0x1ca   : > { %3338 = vmatprep.subr.bf16.mxu0 %v18312_v40  ;;  %3424 = vmatprep.subr.bf16.mxu1 %v18314_v41  ;;  %v18401_v39 = vld [vmem:[%s20950_s26 + $0x84c] ss:$48 sps:$4 sm:$0xff]   ;;  %v18396_v41 = vld [vmem:[%s20950_s26 + $0x840] ss:$48 sps:$4 sm:$0xff]   ;;  %v18447_v13 = vld [vmem:[%s20950_s26 + $0xb48] ss:$48 sps:$4 sm:$0xff]  }
 0x1cb   : > { %v945_v40 = vld [vmem:[#allocation2 + $0x18] sm:$0xff]  ;;  %v18414_v55 = vld [vmem:[%s20950_s26 + $0x960] ss:$48 sps:$4 sm:$0xff]  }
 0x1cc   : > { %v18419_v54 = vld [vmem:[%s20950_s26 + $0x96c] ss:$48 sps:$4 sm:$0xff]   ;;  %v18444_v12 = vld [vmem:[%s20950_s26 + $0xb40] ss:$48 sps:$4 sm:$0xff]  }
 0x1cd   : > { %3339 = vmatpush1.bf16.msra.mxu0 %v18316_v42  ;;  %3425 = vmatpush1.bf16.msra.mxu1 %v18317_v43  ;;  %v18399_v42 = vld [vmem:[%s20950_s26 + $0x848] ss:$48 sps:$4 sm:$0xff]  }
 0x1ce   : > { %3340 = vmatprep.subr.bf16.mxu0 %v18318_v44  ;;  %3426 = vmatprep.subr.bf16.mxu1 %v18320_v45  ;;  %v949_v43 = vld [vmem:[#allocation2 + $0x38] sm:$0xff]  ;;  %v18404_v44 = vld [vmem:[%s20950_s26 + $0x8a4] ss:$48 sps:$4 sm:$0xff]  }
 0x1cf   : > { %v21143_v45 = vpack.c.bf16 %v949_v43, %v945_v40  ;;  %v18480_v40 = vld [vmem:[%s20950_s26 + $0x190] ss:$48 sps:$4 sm:$0xff]   ;;  %v18491_v43 = vld [vmem:[%s20950_s26 + $0x1fc] ss:$48 sps:$4 sm:$0xff]  }
 0x1d1   : > { %3341 = vmatpush1.bf16.msra.mxu0 %v18322_v46  ;;  %3427 = vmatpush1.bf16.msra.mxu1 %v18323_v47  ;;  %v18407_v46 = vld [vmem:[%s20950_s26 + $0x8ac] ss:$48 sps:$4 sm:$0xff]   ;;  %v18402_v47 = vld [vmem:[%s20950_s26 + $0x8a0] ss:$48 sps:$4 sm:$0xff]  }
 0x1d2   : > { %3342 = vmatprep.subr.bf16.mxu0 %v18324_v48  ;;  %3428 = vmatprep.subr.bf16.mxu1 %v18326_v49  ;;  %v18405_v48 = vld [vmem:[%s20950_s26 + $0x8a8] ss:$48 sps:$4 sm:$0xff]   ;;  %v18410_v49 = vld [vmem:[%s20950_s26 + $0x904] ss:$48 sps:$4 sm:$0xff]  }
 0x1d5   : > { %3343 = vmatpush1.bf16.msra.mxu0 %v18328_v50  ;;  %3429 = vmatpush1.bf16.msra.mxu1 %v18329_v51  ;;  %v18413_v50 = vld [vmem:[%s20950_s26 + $0x90c] ss:$48 sps:$4 sm:$0xff]   ;;  %v18408_v51 = vld [vmem:[%s20950_s26 + $0x900] ss:$48 sps:$4 sm:$0xff]  }
 0x1d6   : > { %3344 = vmatprep.subr.bf16.mxu0 %v18330_v52  ;;  %3430 = vmatprep.subr.bf16.mxu1 %v18332_v53  ;;  %v18411_v52 = vld [vmem:[%s20950_s26 + $0x908] ss:$48 sps:$4 sm:$0xff]   ;;  %v18416_v53 = vld [vmem:[%s20950_s26 + $0x964] ss:$48 sps:$4 sm:$0xff]  }
 0x1d9   : > { %3345 = vmatpush1.bf16.msra.mxu0 %v18334_v56  ;;  %3431 = vmatpush1.bf16.msra.mxu1 %v18335_v57  ;;  %v18417_v56 = vld [vmem:[%s20950_s26 + $0x968] ss:$48 sps:$4 sm:$0xff]   ;;  %v18422_v57 = vld [vmem:[%s20950_s26 + $0x9c4] ss:$48 sps:$4 sm:$0xff]  }
 0x1da   : > { %3346 = vmatprep.subr.bf16.mxu0 %v18336_v59  ;;  %3432 = vmatprep.subr.bf16.mxu1 %v18338_v60  ;;  %v18425_v59 = vld [vmem:[%s20950_s26 + $0x9cc] ss:$48 sps:$4 sm:$0xff]   ;;  %v18420_v60 = vld [vmem:[%s20950_s26 + $0x9c0] ss:$48 sps:$4 sm:$0xff]  }
 0x1dd   : > { %3347 = vmatpush1.bf16.msra.mxu0 %v18340_v61  ;;  %3433 = vmatpush1.bf16.msra.mxu1 %v18341_v62  ;;  %v18423_v61 = vld [vmem:[%s20950_s26 + $0x9c8] ss:$48 sps:$4 sm:$0xff]   ;;  %v18428_v62 = vld [vmem:[%s20950_s26 + $0xa24] ss:$48 sps:$4 sm:$0xff]  }
 0x1de   : > { %3348 = vmatprep.subr.bf16.mxu0 %v18342_v63  ;;  %3434 = vmatprep.subr.bf16.mxu1 %v18344_v0  ;;  %v18431_v63 = vld [vmem:[%s20950_s26 + $0xa2c] ss:$48 sps:$4 sm:$0xff]   ;;  %v18426_v0 = vld [vmem:[%s20950_s26 + $0xa20] ss:$48 sps:$4 sm:$0xff]  }
 0x1e1   : > { %3349 = vmatpush1.bf16.msra.mxu0 %v18346_v1  ;;  %3435 = vmatpush1.bf16.msra.mxu1 %v18347_v2  ;;  %v18429_v1 = vld [vmem:[%s20950_s26 + $0xa28] ss:$48 sps:$4 sm:$0xff]   ;;  %v18434_v2 = vld [vmem:[%s20950_s26 + $0xa84] ss:$48 sps:$4 sm:$0xff]  }
 0x1e2   : > { %3350 = vmatprep.subr.bf16.mxu0 %v18348_v3  ;;  %3436 = vmatprep.subr.bf16.mxu1 %v18350_v4  ;;  %v18437_v3 = vld [vmem:[%s20950_s26 + $0xa8c] ss:$48 sps:$4 sm:$0xff]   ;;  %v18432_v4 = vld [vmem:[%s20950_s26 + $0xa80] ss:$48 sps:$4 sm:$0xff]  }
 0x1e5   : > { %3351 = vmatpush1.bf16.msra.mxu0 %v18352_v5  ;;  %3437 = vmatpush1.bf16.msra.mxu1 %v18353_v6  ;;  %v18435_v5 = vld [vmem:[%s20950_s26 + $0xa88] ss:$48 sps:$4 sm:$0xff]   ;;  %v18440_v6 = vld [vmem:[%s20950_s26 + $0xae4] ss:$48 sps:$4 sm:$0xff]  }
 0x1e6   : > { %3352 = vmatprep.subr.bf16.mxu0 %v18354_v7  ;;  %3438 = vmatprep.subr.bf16.mxu1 %v18356_v8  ;;  %v18443_v7 = vld [vmem:[%s20950_s26 + $0xaec] ss:$48 sps:$4 sm:$0xff]   ;;  %v18438_v8 = vld [vmem:[%s20950_s26 + $0xae0] ss:$48 sps:$4 sm:$0xff]  }
 0x1e9   : > { %3353 = vmatpush1.bf16.msra.mxu0 %v18358_v9  ;;  %3439 = vmatpush1.bf16.msra.mxu1 %v18359_v10  ;;  %v18441_v9 = vld [vmem:[%s20950_s26 + $0xae8] ss:$48 sps:$4 sm:$0xff]   ;;  %v18446_v10 = vld [vmem:[%s20950_s26 + $0xb44] ss:$48 sps:$4 sm:$0xff]  }
 0x1ea   : > { %3365 = vmatprep.subr.bf16.mxu0 %v18362_v11  ;;  %3451 = vmatprep.subr.bf16.mxu1 %v18365_v14  ;;  %v18449_v11 = vld [vmem:[%s20950_s26 + $0xb4c] ss:$48 sps:$4 sm:$0xff]   ;;  %v18452_v14 = vld [vmem:[%s20950_s26 + $0xba4] ss:$48 sps:$4 sm:$0xff]  }
 0x1ec   : > { %3355 = vmatmul.mubr.bf16.vlgmr.msra.gmra.mrb[0].mxu0 %v21114_v17  ;;  %3441 = vmatmul.mubr.bf16.vlgmr.msra.gmra.mrb[0].mxu1 %v21114_v17 }
 0x1ed   : > { %3366 = vmatpush1.bf16.msra.mxu0 %v18360_v15  ;;  %3452 = vmatpush1.bf16.msra.mxu1 %v18363_v16  ;;  %v18455_v15 = vld [vmem:[%s20950_s26 + $0xbac] ss:$48 sps:$4 sm:$0xff]   ;;  %v18450_v16 = vld [vmem:[%s20950_s26 + $0xba0] ss:$48 sps:$4 sm:$0xff]  }
 0x1ee   : > { %3367 = vmatprep.subr.bf16.mxu0 %v18368_v18  ;;  %3453 = vmatprep.subr.bf16.mxu1 %v18371_v19  ;;  %v18453_v18 = vld [vmem:[%s20950_s26 + $0xba8] ss:$48 sps:$4 sm:$0xff]   ;;  %v944_v19 = vld [vmem:[#allocation2 + $0x10] sm:$0xff] }
 0x1ef   : > { %3397 = vmatprep.mubr.bf16.mxu0 %v21143_v45  ;;  %3483 = vmatprep.mubr.bf16.mxu1 %v21143_v45 }
 0x1f1   : > { %3368 = vmatpush1.bf16.msra.mxu0 %v18366_v20  ;;  %3454 = vmatpush1.bf16.msra.mxu1 %v18369_v21  ;;  %v948_v20 = vld [vmem:[#allocation2 + $0x30] sm:$0xff] }
 0x1f2   : > { %3369 = vmatprep.subr.bf16.mxu0 %v18374_v22  ;;  %3455 = vmatprep.subr.bf16.mxu1 %v18377_v23  ;;  %v18458_v21 = vld [vmem:[%s20950_s26 + $0x14] ss:$48 sps:$4 sm:$0xff]   ;;  %v18461_v22 = vld [vmem:[%s20950_s26 + $0x1c] ss:$48 sps:$4 sm:$0xff]   ;;  %v21184_v23 = vpack.c.bf16 %v948_v20, %v944_v19  ;;  %v18540_v19 = vld [vmem:[%s20950_s26 + $0x550] ss:$48 sps:$4 sm:$0xff]  }
 0x1f3   : > { %v18543_v20 = vld [vmem:[%s20950_s26 + $0x558] ss:$48 sps:$4 sm:$0xff]  }
 0x1f5   : > { %3370 = vmatpush1.bf16.msra.mxu0 %v18372_v24  ;;  %3456 = vmatpush1.bf16.msra.mxu1 %v18375_v25  ;;  %v18456_v24 = vld [vmem:[%s20950_s26 + $0x10] ss:$48 sps:$4 sm:$0xff]   ;;  %v18459_v25 = vld [vmem:[%s20950_s26 + $0x18] ss:$48 sps:$4 sm:$0xff]  }
 0x1f6   : > { %3371 = vmatprep.subr.bf16.mxu0 %v18380_v26  ;;  %3457 = vmatprep.subr.bf16.mxu1 %v18383_v27  ;;  %v18464_v26 = vld [vmem:[%s20950_s26 + $0x74] ss:$48 sps:$4 sm:$0xff]   ;;  %v18467_v27 = vld [vmem:[%s20950_s26 + $0x7c] ss:$48 sps:$4 sm:$0xff]  }
 0x1f9   : > { %3372 = vmatpush1.bf16.msra.mxu0 %v18378_v28  ;;  %3458 = vmatpush1.bf16.msra.mxu1 %v18381_v29  ;;  %v18462_v28 = vld [vmem:[%s20950_s26 + $0x70] ss:$48 sps:$4 sm:$0xff]   ;;  %v18465_v29 = vld [vmem:[%s20950_s26 + $0x78] ss:$48 sps:$4 sm:$0xff]  }
 0x1fa   : > { %3373 = vmatprep.subr.bf16.mxu0 %v18386_v30  ;;  %3459 = vmatprep.subr.bf16.mxu1 %v18389_v31  ;;  %v18470_v30 = vld [vmem:[%s20950_s26 + $0xd4] ss:$48 sps:$4 sm:$0xff]   ;;  %v18473_v31 = vld [vmem:[%s20950_s26 + $0xdc] ss:$48 sps:$4 sm:$0xff]  }
 0x1fd   : > { %3374 = vmatpush1.bf16.msra.mxu0 %v18384_v32  ;;  %3460 = vmatpush1.bf16.msra.mxu1 %v18387_v33  ;;  %v18468_v32 = vld [vmem:[%s20950_s26 + $0xd0] ss:$48 sps:$4 sm:$0xff]   ;;  %v18471_v33 = vld [vmem:[%s20950_s26 + $0xd8] ss:$48 sps:$4 sm:$0xff]  }
 0x1fe   : > { %3375 = vmatprep.subr.bf16.mxu0 %v18392_v34  ;;  %3461 = vmatprep.subr.bf16.mxu1 %v18395_v35  ;;  %v18476_v34 = vld [vmem:[%s20950_s26 + $0x134] ss:$48 sps:$4 sm:$0xff]   ;;  %v18479_v35 = vld [vmem:[%s20950_s26 + $0x13c] ss:$48 sps:$4 sm:$0xff]  }
 0x201   : > { %3376 = vmatpush1.bf16.msra.mxu0 %v18390_v36  ;;  %3462 = vmatpush1.bf16.msra.mxu1 %v18393_v37  ;;  %v18474_v36 = vld [vmem:[%s20950_s26 + $0x130] ss:$48 sps:$4 sm:$0xff]   ;;  %v18477_v37 = vld [vmem:[%s20950_s26 + $0x138] ss:$48 sps:$4 sm:$0xff]  }
 0x202   : > { %3377 = vmatprep.subr.bf16.mxu0 %v18398_v38  ;;  %3463 = vmatprep.subr.bf16.mxu1 %v18401_v39  ;;  %v18482_v38 = vld [vmem:[%s20950_s26 + $0x194] ss:$48 sps:$4 sm:$0xff]   ;;  %v18485_v39 = vld [vmem:[%s20950_s26 + $0x19c] ss:$48 sps:$4 sm:$0xff]  }
 0x205   : > { %3378 = vmatpush1.bf16.msra.mxu0 %v18396_v41  ;;  %3464 = vmatpush1.bf16.msra.mxu1 %v18399_v42  ;;  %v18483_v41 = vld [vmem:[%s20950_s26 + $0x198] ss:$48 sps:$4 sm:$0xff]   ;;  %v18488_v42 = vld [vmem:[%s20950_s26 + $0x1f4] ss:$48 sps:$4 sm:$0xff]  }
 0x206   : > { %3379 = vmatprep.subr.bf16.mxu0 %v18404_v44  ;;  %3465 = vmatprep.subr.bf16.mxu1 %v18407_v46  ;;  %v18486_v44 = vld [vmem:[%s20950_s26 + $0x1f0] ss:$48 sps:$4 sm:$0xff]   ;;  %v18489_v46 = vld [vmem:[%s20950_s26 + $0x1f8] ss:$48 sps:$4 sm:$0xff]  }
 0x209   : > { %3380 = vmatpush1.bf16.msra.mxu0 %v18402_v47  ;;  %3466 = vmatpush1.bf16.msra.mxu1 %v18405_v48  ;;  %v18494_v47 = vld [vmem:[%s20950_s26 + $0x254] ss:$48 sps:$4 sm:$0xff]   ;;  %v18497_v48 = vld [vmem:[%s20950_s26 + $0x25c] ss:$48 sps:$4 sm:$0xff]  }
 0x20a   : > { %3381 = vmatprep.subr.bf16.mxu0 %v18410_v49  ;;  %3467 = vmatprep.subr.bf16.mxu1 %v18413_v50  ;;  %v18492_v49 = vld [vmem:[%s20950_s26 + $0x250] ss:$48 sps:$4 sm:$0xff]   ;;  %v18495_v50 = vld [vmem:[%s20950_s26 + $0x258] ss:$48 sps:$4 sm:$0xff]  }
 0x20d   : > { %3382 = vmatpush1.bf16.msra.mxu0 %v18408_v51  ;;  %3468 = vmatpush1.bf16.msra.mxu1 %v18411_v52  ;;  %v18500_v51 = vld [vmem:[%s20950_s26 + $0x2b4] ss:$48 sps:$4 sm:$0xff]   ;;  %v18503_v52 = vld [vmem:[%s20950_s26 + $0x2bc] ss:$48 sps:$4 sm:$0xff]  }
 0x20e   : > { %3383 = vmatprep.subr.bf16.mxu0 %v18416_v53  ;;  %3469 = vmatprep.subr.bf16.mxu1 %v18419_v54  ;;  %v18498_v53 = vld [vmem:[%s20950_s26 + $0x2b0] ss:$48 sps:$4 sm:$0xff]   ;;  %v18501_v54 = vld [vmem:[%s20950_s26 + $0x2b8] ss:$48 sps:$4 sm:$0xff]  }
 0x211   : > { %3384 = vmatpush1.bf16.msra.mxu0 %v18414_v55  ;;  %3470 = vmatpush1.bf16.msra.mxu1 %v18417_v56  ;;  %v18506_v55 = vld [vmem:[%s20950_s26 + $0x314] ss:$48 sps:$4 sm:$0xff]   ;;  %v18509_v56 = vld [vmem:[%s20950_s26 + $0x31c] ss:$48 sps:$4 sm:$0xff]  }
 0x212   : > { %3385 = vmatprep.subr.bf16.mxu0 %v18422_v57  ;;  %3471 = vmatprep.subr.bf16.mxu1 %v18425_v59  ;;  %v18504_v57 = vld [vmem:[%s20950_s26 + $0x310] ss:$48 sps:$4 sm:$0xff]   ;;  %v18507_v59 = vld [vmem:[%s20950_s26 + $0x318] ss:$48 sps:$4 sm:$0xff]  }
 0x215   : > { %3386 = vmatpush1.bf16.msra.mxu0 %v18420_v60  ;;  %3472 = vmatpush1.bf16.msra.mxu1 %v18423_v61  ;;  %v18512_v60 = vld [vmem:[%s20950_s26 + $0x374] ss:$48 sps:$4 sm:$0xff]   ;;  %v18515_v61 = vld [vmem:[%s20950_s26 + $0x37c] ss:$48 sps:$4 sm:$0xff]  }
 0x216   : > { %3387 = vmatprep.subr.bf16.mxu0 %v18428_v62  ;;  %3473 = vmatprep.subr.bf16.mxu1 %v18431_v63  ;;  %v18510_v62 = vld [vmem:[%s20950_s26 + $0x370] ss:$48 sps:$4 sm:$0xff]   ;;  %v18513_v63 = vld [vmem:[%s20950_s26 + $0x378] ss:$48 sps:$4 sm:$0xff]  }
 0x219   : > { %3388 = vmatpush1.bf16.msra.mxu0 %v18426_v0  ;;  %3474 = vmatpush1.bf16.msra.mxu1 %v18429_v1  ;;  %v18518_v0 = vld [vmem:[%s20950_s26 + $0x3d4] ss:$48 sps:$4 sm:$0xff]   ;;  %v18521_v1 = vld [vmem:[%s20950_s26 + $0x3dc] ss:$48 sps:$4 sm:$0xff]  }
 0x21a   : > { %3389 = vmatprep.subr.bf16.mxu0 %v18434_v2  ;;  %3475 = vmatprep.subr.bf16.mxu1 %v18437_v3  ;;  %v18516_v2 = vld [vmem:[%s20950_s26 + $0x3d0] ss:$48 sps:$4 sm:$0xff]   ;;  %v18519_v3 = vld [vmem:[%s20950_s26 + $0x3d8] ss:$48 sps:$4 sm:$0xff]  }
 0x21d   : > { %3390 = vmatpush1.bf16.msra.mxu0 %v18432_v4  ;;  %3476 = vmatpush1.bf16.msra.mxu1 %v18435_v5  ;;  %v18524_v4 = vld [vmem:[%s20950_s26 + $0x434] ss:$48 sps:$4 sm:$0xff]   ;;  %v18527_v5 = vld [vmem:[%s20950_s26 + $0x43c] ss:$48 sps:$4 sm:$0xff]  }
 0x21e   : > { %3391 = vmatprep.subr.bf16.mxu0 %v18440_v6  ;;  %3477 = vmatprep.subr.bf16.mxu1 %v18443_v7  ;;  %v18522_v6 = vld [vmem:[%s20950_s26 + $0x430] ss:$48 sps:$4 sm:$0xff]   ;;  %v18525_v7 = vld [vmem:[%s20950_s26 + $0x438] ss:$48 sps:$4 sm:$0xff]  }
 0x221   : > { %3392 = vmatpush1.bf16.msra.mxu0 %v18438_v8  ;;  %3478 = vmatpush1.bf16.msra.mxu1 %v18441_v9  ;;  %v18530_v8 = vld [vmem:[%s20950_s26 + $0x494] ss:$48 sps:$4 sm:$0xff]   ;;  %v18533_v9 = vld [vmem:[%s20950_s26 + $0x49c] ss:$48 sps:$4 sm:$0xff]  }
 0x222   : > { %3393 = vmatprep.subr.bf16.mxu0 %v18446_v10  ;;  %3479 = vmatprep.subr.bf16.mxu1 %v18449_v11  ;;  %v18528_v10 = vld [vmem:[%s20950_s26 + $0x490] ss:$48 sps:$4 sm:$0xff]   ;;  %v18531_v11 = vld [vmem:[%s20950_s26 + $0x498] ss:$48 sps:$4 sm:$0xff]  }
 0x225   : > { %3394 = vmatpush1.bf16.msra.mxu0 %v18444_v12  ;;  %3480 = vmatpush1.bf16.msra.mxu1 %v18447_v13  ;;  %v18536_v12 = vld [vmem:[%s20950_s26 + $0x4f4] ss:$48 sps:$4 sm:$0xff]   ;;  %v18539_v13 = vld [vmem:[%s20950_s26 + $0x4fc] ss:$48 sps:$4 sm:$0xff]  }
 0x226   : > { %3395 = vmatprep.subr.bf16.mxu0 %v18452_v14  ;;  %3481 = vmatprep.subr.bf16.mxu1 %v18455_v15  ;;  %v18534_v14 = vld [vmem:[%s20950_s26 + $0x4f0] ss:$48 sps:$4 sm:$0xff]   ;;  %v18537_v15 = vld [vmem:[%s20950_s26 + $0x4f8] ss:$48 sps:$4 sm:$0xff]  }
 0x229   : > { %3396 = vmatpush1.bf16.msra.mxu0 %v18450_v16  ;;  %3482 = vmatpush1.bf16.msra.mxu1 %v18453_v18  ;;  %v18542_v16 = vld [vmem:[%s20950_s26 + $0x554] ss:$48 sps:$4 sm:$0xff]   ;;  %v18545_v18 = vld [vmem:[%s20950_s26 + $0x55c] ss:$48 sps:$4 sm:$0xff]  }
 0x22a   : > { %3494 = vmatprep.subr.bf16.mxu0 %v18458_v21  ;;  %3580 = vmatprep.subr.bf16.mxu1 %v18461_v22  ;;  %v18548_v21 = vld [vmem:[%s20950_s26 + $0x5b4] ss:$48 sps:$4 sm:$0xff]   ;;  %v18551_v22 = vld [vmem:[%s20950_s26 + $0x5bc] ss:$48 sps:$4 sm:$0xff]  }
 0x22c   : > { %3398 = vmatmul.mubr.bf16.vlgmr.msra.gmra.mrb[0].mxu0 %v21184_v23  ;;  %3484 = vmatmul.mubr.bf16.vlgmr.msra.gmra.mrb[0].mxu1 %v21184_v23 }
 0x22d   : > { %3495 = vmatpush1.bf16.msra.mxu0 %v18456_v24  ;;  %3581 = vmatpush1.bf16.msra.mxu1 %v18459_v25  ;;  %v18546_v24 = vld [vmem:[%s20950_s26 + $0x5b0] ss:$48 sps:$4 sm:$0xff]   ;;  %v18549_v25 = vld [vmem:[%s20950_s26 + $0x5b8] ss:$48 sps:$4 sm:$0xff]  }
 0x22e   : > { %3496 = vmatprep.subr.bf16.mxu0 %v18464_v26  ;;  %3582 = vmatprep.subr.bf16.mxu1 %v18467_v27  ;;  %v18554_v26 = vld [vmem:[%s20950_s26 + $0x614] ss:$48 sps:$4 sm:$0xff]   ;;  %v18557_v27 = vld [vmem:[%s20950_s26 + $0x61c] ss:$48 sps:$4 sm:$0xff]  }
 0x22f   : > { %3526 = vmatprep.mubr.bf16.mxu0 %v21090_v58  ;;  %3612 = vmatprep.mubr.bf16.mxu1 %v21090_v58 }
 0x231   : > { %3497 = vmatpush1.bf16.msra.mxu0 %v18462_v28  ;;  %3583 = vmatpush1.bf16.msra.mxu1 %v18465_v29  ;;  %v18552_v28 = vld [vmem:[%s20950_s26 + $0x610] ss:$48 sps:$4 sm:$0xff]   ;;  %v18555_v29 = vld [vmem:[%s20950_s26 + $0x618] ss:$48 sps:$4 sm:$0xff]  }
 0x232   : > { %3498 = vmatprep.subr.bf16.mxu0 %v18470_v30  ;;  %3584 = vmatprep.subr.bf16.mxu1 %v18473_v31  ;;  %v18560_v30 = vld [vmem:[%s20950_s26 + $0x674] ss:$48 sps:$4 sm:$0xff]   ;;  %v18563_v31 = vld [vmem:[%s20950_s26 + $0x67c] ss:$48 sps:$4 sm:$0xff]  }
 0x235   : > { %3499 = vmatpush1.bf16.msra.mxu0 %v18468_v32  ;;  %3585 = vmatpush1.bf16.msra.mxu1 %v18471_v33  ;;  %v18558_v32 = vld [vmem:[%s20950_s26 + $0x670] ss:$48 sps:$4 sm:$0xff]   ;;  %v18561_v33 = vld [vmem:[%s20950_s26 + $0x678] ss:$48 sps:$4 sm:$0xff]  }
 0x236   : > { %3500 = vmatprep.subr.bf16.mxu0 %v18476_v34  ;;  %3586 = vmatprep.subr.bf16.mxu1 %v18479_v35  ;;  %v18566_v34 = vld [vmem:[%s20950_s26 + $0x6d4] ss:$48 sps:$4 sm:$0xff]   ;;  %v18569_v35 = vld [vmem:[%s20950_s26 + $0x6dc] ss:$48 sps:$4 sm:$0xff]  }
 0x239   : > { %3501 = vmatpush1.bf16.msra.mxu0 %v18474_v36  ;;  %3587 = vmatpush1.bf16.msra.mxu1 %v18477_v37  ;;  %v18564_v36 = vld [vmem:[%s20950_s26 + $0x6d0] ss:$48 sps:$4 sm:$0xff]   ;;  %v18567_v37 = vld [vmem:[%s20950_s26 + $0x6d8] ss:$48 sps:$4 sm:$0xff]  }
 0x23a   : > { %3502 = vmatprep.subr.bf16.mxu0 %v18482_v38  ;;  %3588 = vmatprep.subr.bf16.mxu1 %v18485_v39  ;;  %v18572_v38 = vld [vmem:[%s20950_s26 + $0x734] ss:$48 sps:$4 sm:$0xff]   ;;  %v18575_v39 = vld [vmem:[%s20950_s26 + $0x73c] ss:$48 sps:$4 sm:$0xff]  }
 0x23d   : > { %3503 = vmatpush1.bf16.msra.mxu0 %v18480_v40  ;;  %3589 = vmatpush1.bf16.msra.mxu1 %v18483_v41  ;;  %v18570_v40 = vld [vmem:[%s20950_s26 + $0x730] ss:$48 sps:$4 sm:$0xff]   ;;  %v18573_v41 = vld [vmem:[%s20950_s26 + $0x738] ss:$48 sps:$4 sm:$0xff]  }
 0x23e   : > { %3504 = vmatprep.subr.bf16.mxu0 %v18488_v42  ;;  %3590 = vmatprep.subr.bf16.mxu1 %v18491_v43  ;;  %v18578_v42 = vld [vmem:[%s20950_s26 + $0x794] ss:$48 sps:$4 sm:$0xff]   ;;  %v18581_v43 = vld [vmem:[%s20950_s26 + $0x79c] ss:$48 sps:$4 sm:$0xff]  }
 0x241   : > { %3505 = vmatpush1.bf16.msra.mxu0 %v18486_v44  ;;  %3591 = vmatpush1.bf16.msra.mxu1 %v18489_v46  ;;  %v18576_v44 = vld [vmem:[%s20950_s26 + $0x790] ss:$48 sps:$4 sm:$0xff]   ;;  %v18579_v46 = vld [vmem:[%s20950_s26 + $0x798] ss:$48 sps:$4 sm:$0xff]  }
 0x242   : > { %3506 = vmatprep.subr.bf16.mxu0 %v18494_v47  ;;  %3592 = vmatprep.subr.bf16.mxu1 %v18497_v48  ;;  %v18584_v47 = vld [vmem:[%s20950_s26 + $0x7f4] ss:$48 sps:$4 sm:$0xff]   ;;  %v18587_v48 = vld [vmem:[%s20950_s26 + $0x7fc] ss:$48 sps:$4 sm:$0xff]  }
 0x245   : > { %3507 = vmatpush1.bf16.msra.mxu0 %v18492_v49  ;;  %3593 = vmatpush1.bf16.msra.mxu1 %v18495_v50  ;;  %v18582_v49 = vld [vmem:[%s20950_s26 + $0x7f0] ss:$48 sps:$4 sm:$0xff]   ;;  %v18585_v50 = vld [vmem:[%s20950_s26 + $0x7f8] ss:$48 sps:$4 sm:$0xff]  }
 0x246   : > { %3508 = vmatprep.subr.bf16.mxu0 %v18500_v51  ;;  %3594 = vmatprep.subr.bf16.mxu1 %v18503_v52  ;;  %v18590_v51 = vld [vmem:[%s20950_s26 + $0x854] ss:$48 sps:$4 sm:$0xff]   ;;  %v18593_v52 = vld [vmem:[%s20950_s26 + $0x85c] ss:$48 sps:$4 sm:$0xff]  }
 0x249   : > { %3509 = vmatpush1.bf16.msra.mxu0 %v18498_v53  ;;  %3595 = vmatpush1.bf16.msra.mxu1 %v18501_v54  ;;  %v18588_v53 = vld [vmem:[%s20950_s26 + $0x850] ss:$48 sps:$4 sm:$0xff]   ;;  %v18591_v54 = vld [vmem:[%s20950_s26 + $0x858] ss:$48 sps:$4 sm:$0xff]  }
 0x24a   : > { %3510 = vmatprep.subr.bf16.mxu0 %v18506_v55  ;;  %3596 = vmatprep.subr.bf16.mxu1 %v18509_v56  ;;  %v18596_v55 = vld [vmem:[%s20950_s26 + $0x8b4] ss:$48 sps:$4 sm:$0xff]   ;;  %v18599_v56 = vld [vmem:[%s20950_s26 + $0x8bc] ss:$48 sps:$4 sm:$0xff]  }
 0x24d   : > { %3511 = vmatpush1.bf16.msra.mxu0 %v18504_v57  ;;  %3597 = vmatpush1.bf16.msra.mxu1 %v18507_v59  ;;  %v18594_v57 = vld [vmem:[%s20950_s26 + $0x8b0] ss:$48 sps:$4 sm:$0xff]   ;;  %v18597_v59 = vld [vmem:[%s20950_s26 + $0x8b8] ss:$48 sps:$4 sm:$0xff]  }
 0x24e   : > { %3512 = vmatprep.subr.bf16.mxu0 %v18512_v60  ;;  %3598 = vmatprep.subr.bf16.mxu1 %v18515_v61  ;;  %v18602_v60 = vld [vmem:[%s20950_s26 + $0x914] ss:$48 sps:$4 sm:$0xff]   ;;  %v18605_v61 = vld [vmem:[%s20950_s26 + $0x91c] ss:$48 sps:$4 sm:$0xff]  }
 0x251   : > { %3513 = vmatpush1.bf16.msra.mxu0 %v18510_v62  ;;  %3599 = vmatpush1.bf16.msra.mxu1 %v18513_v63  ;;  %v18600_v62 = vld [vmem:[%s20950_s26 + $0x910] ss:$48 sps:$4 sm:$0xff]   ;;  %v18603_v63 = vld [vmem:[%s20950_s26 + $0x918] ss:$48 sps:$4 sm:$0xff]  }
 0x252   : > { %3514 = vmatprep.subr.bf16.mxu0 %v18518_v0  ;;  %3600 = vmatprep.subr.bf16.mxu1 %v18521_v1  ;;  %v18608_v0 = vld [vmem:[%s20950_s26 + $0x974] ss:$48 sps:$4 sm:$0xff]   ;;  %v18611_v1 = vld [vmem:[%s20950_s26 + $0x97c] ss:$48 sps:$4 sm:$0xff]  }
 0x255   : > { %3515 = vmatpush1.bf16.msra.mxu0 %v18516_v2  ;;  %3601 = vmatpush1.bf16.msra.mxu1 %v18519_v3  ;;  %v18606_v2 = vld [vmem:[%s20950_s26 + $0x970] ss:$48 sps:$4 sm:$0xff]   ;;  %v18609_v3 = vld [vmem:[%s20950_s26 + $0x978] ss:$48 sps:$4 sm:$0xff]  }
 0x256   : > { %3516 = vmatprep.subr.bf16.mxu0 %v18524_v4  ;;  %3602 = vmatprep.subr.bf16.mxu1 %v18527_v5  ;;  %v18614_v4 = vld [vmem:[%s20950_s26 + $0x9d4] ss:$48 sps:$4 sm:$0xff]   ;;  %v18617_v5 = vld [vmem:[%s20950_s26 + $0x9dc] ss:$48 sps:$4 sm:$0xff]  }
 0x259   : > { %3517 = vmatpush1.bf16.msra.mxu0 %v18522_v6  ;;  %3603 = vmatpush1.bf16.msra.mxu1 %v18525_v7  ;;  %v18612_v6 = vld [vmem:[%s20950_s26 + $0x9d0] ss:$48 sps:$4 sm:$0xff]   ;;  %v18615_v7 = vld [vmem:[%s20950_s26 + $0x9d8] ss:$48 sps:$4 sm:$0xff]  }
 0x25a   : > { %3518 = vmatprep.subr.bf16.mxu0 %v18530_v8  ;;  %3604 = vmatprep.subr.bf16.mxu1 %v18533_v9  ;;  %v18620_v8 = vld [vmem:[%s20950_s26 + $0xa34] ss:$48 sps:$4 sm:$0xff]   ;;  %v18623_v9 = vld [vmem:[%s20950_s26 + $0xa3c] ss:$48 sps:$4 sm:$0xff]  }
 0x25d   : > { %3519 = vmatpush1.bf16.msra.mxu0 %v18528_v10  ;;  %3605 = vmatpush1.bf16.msra.mxu1 %v18531_v11  ;;  %v18618_v10 = vld [vmem:[%s20950_s26 + $0xa30] ss:$48 sps:$4 sm:$0xff]   ;;  %v18621_v11 = vld [vmem:[%s20950_s26 + $0xa38] ss:$48 sps:$4 sm:$0xff]  }
 0x25e   : > { %3520 = vmatprep.subr.bf16.mxu0 %v18536_v12  ;;  %3606 = vmatprep.subr.bf16.mxu1 %v18539_v13  ;;  %v18626_v12 = vld [vmem:[%s20950_s26 + $0xa94] ss:$48 sps:$4 sm:$0xff]   ;;  %v18629_v13 = vld [vmem:[%s20950_s26 + $0xa9c] ss:$48 sps:$4 sm:$0xff]  }
 0x261   : > { %3521 = vmatpush1.bf16.msra.mxu0 %v18534_v14  ;;  %3607 = vmatpush1.bf16.msra.mxu1 %v18537_v15  ;;  %v18624_v14 = vld [vmem:[%s20950_s26 + $0xa90] ss:$48 sps:$4 sm:$0xff]   ;;  %v18627_v15 = vld [vmem:[%s20950_s26 + $0xa98] ss:$48 sps:$4 sm:$0xff]  }
 0x262   : > { %3522 = vmatprep.subr.bf16.mxu0 %v18542_v16  ;;  %3608 = vmatprep.subr.bf16.mxu1 %v18545_v18  ;;  %v18632_v16 = vld [vmem:[%s20950_s26 + $0xaf4] ss:$48 sps:$4 sm:$0xff]   ;;  %v18635_v18 = vld [vmem:[%s20950_s26 + $0xafc] ss:$48 sps:$4 sm:$0xff]  }
 0x265   : > { %3523 = vmatpush1.bf16.msra.mxu0 %v18540_v19  ;;  %3609 = vmatpush1.bf16.msra.mxu1 %v18543_v20  ;;  %v18630_v19 = vld [vmem:[%s20950_s26 + $0xaf0] ss:$48 sps:$4 sm:$0xff]   ;;  %v18633_v20 = vld [vmem:[%s20950_s26 + $0xaf8] ss:$48 sps:$4 sm:$0xff]  }
 0x266   : > { %3524 = vmatprep.subr.bf16.mxu0 %v18548_v21  ;;  %3610 = vmatprep.subr.bf16.mxu1 %v18551_v22  ;;  %v18638_v21 = vld [vmem:[%s20950_s26 + $0xb54] ss:$48 sps:$4 sm:$0xff]   ;;  %v18641_v22 = vld [vmem:[%s20950_s26 + $0xb5c] ss:$48 sps:$4 sm:$0xff]  }
 0x269   : > { %3525 = vmatpush1.bf16.msra.mxu0 %v18546_v24  ;;  %3611 = vmatpush1.bf16.msra.mxu1 %v18549_v25  ;;  %v18636_v24 = vld [vmem:[%s20950_s26 + $0xb50] ss:$48 sps:$4 sm:$0xff]   ;;  %v18639_v25 = vld [vmem:[%s20950_s26 + $0xb58] ss:$48 sps:$4 sm:$0xff]  }
 0x26a   : > { %3537 = vmatprep.subr.bf16.mxu0 %v18554_v26  ;;  %3623 = vmatprep.subr.bf16.mxu1 %v18557_v27  ;;  %v18644_v26 = vld [vmem:[%s20950_s26 + $0xbb4] ss:$48 sps:$4 sm:$0xff]   ;;  %v18647_v27 = vld [vmem:[%s20950_s26 + $0xbbc] ss:$48 sps:$4 sm:$0xff]  }
 0x26c   : > { %3527 = vmatmul.mubr.bf16.vlgmr.msra.gmra.mrb[4].mxu0 %v21114_v17  ;;  %3613 = vmatmul.mubr.bf16.vlgmr.msra.gmra.mrb[4].mxu1 %v21114_v17 }
 0x26d   : > { %3538 = vmatpush1.bf16.msra.mxu0 %v18552_v28  ;;  %3624 = vmatpush1.bf16.msra.mxu1 %v18555_v29  ;;  %v18642_v28 = vld [vmem:[%s20950_s26 + $0xbb0] ss:$48 sps:$4 sm:$0xff]   ;;  %v18645_v29 = vld [vmem:[%s20950_s26 + $0xbb8] ss:$48 sps:$4 sm:$0xff]  }
 0x26e   : > { %3539 = vmatprep.subr.bf16.mxu0 %v18560_v30  ;;  %3625 = vmatprep.subr.bf16.mxu1 %v18563_v31  ;;  %v18650_v30 = vld [vmem:[%s20950_s26 + $0x24] ss:$48 sps:$4 sm:$0xff]   ;;  %v18648_v31 = vld [vmem:[%s20950_s26 + $0x20] ss:$48 sps:$4 sm:$0xff]  }
 0x26f   : > { %3569 = vmatprep.mubr.bf16.mxu0 %v21143_v45  ;;  %3655 = vmatprep.mubr.bf16.mxu1 %v21143_v45 }
 0x271   : > { %3540 = vmatpush1.bf16.msra.mxu0 %v18558_v32  ;;  %3626 = vmatpush1.bf16.msra.mxu1 %v18561_v33  ;;  %v18653_v32 = vld [vmem:[%s20950_s26 + $0x84] ss:$48 sps:$4 sm:$0xff]   ;;  %v18651_v33 = vld [vmem:[%s20950_s26 + $0x80] ss:$48 sps:$4 sm:$0xff]  }
 0x272   : > { %3541 = vmatprep.subr.bf16.mxu0 %v18566_v34  ;;  %3627 = vmatprep.subr.bf16.mxu1 %v18569_v35  ;;  %v18656_v34 = vld [vmem:[%s20950_s26 + $0xe4] ss:$48 sps:$4 sm:$0xff]   ;;  %v18654_v35 = vld [vmem:[%s20950_s26 + $0xe0] ss:$48 sps:$4 sm:$0xff]  }
 0x275   : > { %3542 = vmatpush1.bf16.msra.mxu0 %v18564_v36  ;;  %3628 = vmatpush1.bf16.msra.mxu1 %v18567_v37  ;;  %v18659_v36 = vld [vmem:[%s20950_s26 + $0x144] ss:$48 sps:$4 sm:$0xff]   ;;  %v18657_v37 = vld [vmem:[%s20950_s26 + $0x140] ss:$48 sps:$4 sm:$0xff]  }
 0x276   : > { %3543 = vmatprep.subr.bf16.mxu0 %v18572_v38  ;;  %3629 = vmatprep.subr.bf16.mxu1 %v18575_v39  ;;  %v18662_v38 = vld [vmem:[%s20950_s26 + $0x1a4] ss:$48 sps:$4 sm:$0xff]   ;;  %v18660_v39 = vld [vmem:[%s20950_s26 + $0x1a0] ss:$48 sps:$4 sm:$0xff]  }
 0x279   : > { %3544 = vmatpush1.bf16.msra.mxu0 %v18570_v40  ;;  %3630 = vmatpush1.bf16.msra.mxu1 %v18573_v41  ;;  %v18665_v40 = vld [vmem:[%s20950_s26 + $0x204] ss:$48 sps:$4 sm:$0xff]   ;;  %v18663_v41 = vld [vmem:[%s20950_s26 + $0x200] ss:$48 sps:$4 sm:$0xff]  }
 0x27a   : > { %3545 = vmatprep.subr.bf16.mxu0 %v18578_v42  ;;  %3631 = vmatprep.subr.bf16.mxu1 %v18581_v43  ;;  %v18666_v42 = vld [vmem:[%s20950_s26 + $0x260] ss:$48 sps:$4 sm:$0xff]   ;;  %v18671_v43 = vld [vmem:[%s20950_s26 + $0x2c4] ss:$48 sps:$4 sm:$0xff]  }
 0x27d   : > { %3546 = vmatpush1.bf16.msra.mxu0 %v18576_v44  ;;  %3632 = vmatpush1.bf16.msra.mxu1 %v18579_v46  ;;  %v18669_v44 = vld [vmem:[%s20950_s26 + $0x2c0] ss:$48 sps:$4 sm:$0xff]   ;;  %v18674_v46 = vld [vmem:[%s20950_s26 + $0x324] ss:$48 sps:$4 sm:$0xff]  }
 0x27e   : > { %3547 = vmatprep.subr.bf16.mxu0 %v18584_v47  ;;  %3633 = vmatprep.subr.bf16.mxu1 %v18587_v48  ;;  %v18672_v47 = vld [vmem:[%s20950_s26 + $0x320] ss:$48 sps:$4 sm:$0xff]   ;;  %v18677_v48 = vld [vmem:[%s20950_s26 + $0x384] ss:$48 sps:$4 sm:$0xff]  }
 0x281   : > { %3548 = vmatpush1.bf16.msra.mxu0 %v18582_v49  ;;  %3634 = vmatpush1.bf16.msra.mxu1 %v18585_v50  ;;  %v18675_v49 = vld [vmem:[%s20950_s26 + $0x380] ss:$48 sps:$4 sm:$0xff]   ;;  %v18680_v50 = vld [vmem:[%s20950_s26 + $0x3e4] ss:$48 sps:$4 sm:$0xff]  }
 0x282   : > { %3549 = vmatprep.subr.bf16.mxu0 %v18590_v51  ;;  %3635 = vmatprep.subr.bf16.mxu1 %v18593_v52  ;;  %v18678_v51 = vld [vmem:[%s20950_s26 + $0x3e0] ss:$48 sps:$4 sm:$0xff]   ;;  %v18683_v52 = vld [vmem:[%s20950_s26 + $0x444] ss:$48 sps:$4 sm:$0xff]  }
 0x285   : > { %3550 = vmatpush1.bf16.msra.mxu0 %v18588_v53  ;;  %3636 = vmatpush1.bf16.msra.mxu1 %v18591_v54  ;;  %v18681_v53 = vld [vmem:[%s20950_s26 + $0x440] ss:$48 sps:$4 sm:$0xff]   ;;  %v18686_v54 = vld [vmem:[%s20950_s26 + $0x4a4] ss:$48 sps:$4 sm:$0xff]  }
 0x286   : > { %3551 = vmatprep.subr.bf16.mxu0 %v18596_v55  ;;  %3637 = vmatprep.subr.bf16.mxu1 %v18599_v56  ;;  %v18684_v55 = vld [vmem:[%s20950_s26 + $0x4a0] ss:$48 sps:$4 sm:$0xff]   ;;  %v18689_v56 = vld [vmem:[%s20950_s26 + $0x504] ss:$48 sps:$4 sm:$0xff]  }
 0x289   : > { %3552 = vmatpush1.bf16.msra.mxu0 %v18594_v57  ;;  %3638 = vmatpush1.bf16.msra.mxu1 %v18597_v59  ;;  %v18687_v57 = vld [vmem:[%s20950_s26 + $0x500] ss:$48 sps:$4 sm:$0xff]   ;;  %v18692_v59 = vld [vmem:[%s20950_s26 + $0x564] ss:$48 sps:$4 sm:$0xff]  }
 0x28a   : > { %3553 = vmatprep.subr.bf16.mxu0 %v18602_v60  ;;  %3639 = vmatprep.subr.bf16.mxu1 %v18605_v61  ;;  %v18690_v60 = vld [vmem:[%s20950_s26 + $0x560] ss:$48 sps:$4 sm:$0xff]   ;;  %v18695_v61 = vld [vmem:[%s20950_s26 + $0x5c4] ss:$48 sps:$4 sm:$0xff]  }
 0x28d   : > { %3554 = vmatpush1.bf16.msra.mxu0 %v18600_v62  ;;  %3640 = vmatpush1.bf16.msra.mxu1 %v18603_v63  ;;  %v18693_v62 = vld [vmem:[%s20950_s26 + $0x5c0] ss:$48 sps:$4 sm:$0xff]   ;;  %v18698_v63 = vld [vmem:[%s20950_s26 + $0x624] ss:$48 sps:$4 sm:$0xff]  }
 0x28e   : > { %3555 = vmatprep.subr.bf16.mxu0 %v18608_v0  ;;  %3641 = vmatprep.subr.bf16.mxu1 %v18611_v1  ;;  %v18696_v0 = vld [vmem:[%s20950_s26 + $0x620] ss:$48 sps:$4 sm:$0xff]   ;;  %v18701_v1 = vld [vmem:[%s20950_s26 + $0x684] ss:$48 sps:$4 sm:$0xff]  }
 0x291   : > { %3556 = vmatpush1.bf16.msra.mxu0 %v18606_v2  ;;  %3642 = vmatpush1.bf16.msra.mxu1 %v18609_v3  ;;  %v18699_v2 = vld [vmem:[%s20950_s26 + $0x680] ss:$48 sps:$4 sm:$0xff]   ;;  %v18704_v3 = vld [vmem:[%s20950_s26 + $0x6e4] ss:$48 sps:$4 sm:$0xff]  }
 0x292   : > { %3557 = vmatprep.subr.bf16.mxu0 %v18614_v4  ;;  %3643 = vmatprep.subr.bf16.mxu1 %v18617_v5  ;;  %v18702_v4 = vld [vmem:[%s20950_s26 + $0x6e0] ss:$48 sps:$4 sm:$0xff]   ;;  %v18707_v5 = vld [vmem:[%s20950_s26 + $0x744] ss:$48 sps:$4 sm:$0xff]  }
 0x295   : > { %3558 = vmatpush1.bf16.msra.mxu0 %v18612_v6  ;;  %3644 = vmatpush1.bf16.msra.mxu1 %v18615_v7  ;;  %v18705_v6 = vld [vmem:[%s20950_s26 + $0x740] ss:$48 sps:$4 sm:$0xff]   ;;  %v18710_v7 = vld [vmem:[%s20950_s26 + $0x7a4] ss:$48 sps:$4 sm:$0xff]  }
 0x296   : > { %3559 = vmatprep.subr.bf16.mxu0 %v18620_v8  ;;  %3645 = vmatprep.subr.bf16.mxu1 %v18623_v9  ;;  %v18708_v8 = vld [vmem:[%s20950_s26 + $0x7a0] ss:$48 sps:$4 sm:$0xff]   ;;  %v18713_v9 = vld [vmem:[%s20950_s26 + $0x804] ss:$48 sps:$4 sm:$0xff]  }
 0x299   : > { %3560 = vmatpush1.bf16.msra.mxu0 %v18618_v10  ;;  %3646 = vmatpush1.bf16.msra.mxu1 %v18621_v11  ;;  %v18711_v10 = vld [vmem:[%s20950_s26 + $0x800] ss:$48 sps:$4 sm:$0xff]   ;;  %v18716_v11 = vld [vmem:[%s20950_s26 + $0x864] ss:$48 sps:$4 sm:$0xff]  }
 0x29a   : > { %3561 = vmatprep.subr.bf16.mxu0 %v18626_v12  ;;  %3647 = vmatprep.subr.bf16.mxu1 %v18629_v13 }
 0x29d   : > { %3562 = vmatpush1.bf16.msra.mxu0 %v18624_v14  ;;  %3648 = vmatpush1.bf16.msra.mxu1 %v18627_v15  ;;  %v18714_v14 = vld [vmem:[%s20950_s26 + $0x860] ss:$48 sps:$4 sm:$0xff]  }
 0x29e   : > { %3563 = vmatprep.subr.bf16.mxu0 %v18632_v16  ;;  %3649 = vmatprep.subr.bf16.mxu1 %v18635_v18 }
 0x2a1   : > { %3564 = vmatpush1.bf16.msra.mxu0 %v18630_v19  ;;  %3650 = vmatpush1.bf16.msra.mxu1 %v18633_v20  ;;  %v18719_v20 = vld [vmem:[%s20950_s26 + $0x8c4] ss:$48 sps:$4 sm:$0xff]  }
 0x2a2   : > { %3565 = vmatprep.subr.bf16.mxu0 %v18638_v21  ;;  %3651 = vmatprep.subr.bf16.mxu1 %v18641_v22 }
 0x2a5   : > { %3566 = vmatpush1.bf16.msra.mxu0 %v18636_v24  ;;  %3652 = vmatpush1.bf16.msra.mxu1 %v18639_v25  ;;  %v18717_v24 = vld [vmem:[%s20950_s26 + $0x8c0] ss:$48 sps:$4 sm:$0xff]   ;;  %v18722_v25 = vld [vmem:[%s20950_s26 + $0x924] ss:$48 sps:$4 sm:$0xff]  }
 0x2a6   : > { %3567 = vmatprep.subr.bf16.mxu0 %v18644_v26  ;;  %3653 = vmatprep.subr.bf16.mxu1 %v18647_v27  ;;  %v18720_v26 = vld [vmem:[%s20950_s26 + $0x920] ss:$48 sps:$4 sm:$0xff]   ;;  %v18725_v27 = vld [vmem:[%s20950_s26 + $0x984] ss:$48 sps:$4 sm:$0xff]  }
 0x2a9   : > { %3568 = vmatpush1.bf16.msra.mxu0 %v18642_v28  ;;  %3654 = vmatpush1.bf16.msra.mxu1 %v18645_v29  ;;  %v18723_v28 = vld [vmem:[%s20950_s26 + $0x980] ss:$48 sps:$4 sm:$0xff]   ;;  %v18728_v29 = vld [vmem:[%s20950_s26 + $0x9e4] ss:$48 sps:$4 sm:$0xff]  }
 0x2aa   : > { %3666 = vmatprep.subr.bf16.mxu0 %v18650_v30  ;;  %v18726_v30 = vld [vmem:[%s20950_s26 + $0x9e0] ss:$48 sps:$4 sm:$0xff]  }
 0x2ac   : > { %3570 = vmatmul.mubr.bf16.vlgmr.msra.gmra.mrb[4].mxu0 %v21184_v23  ;;  %3656 = vmatmul.mubr.bf16.vlgmr.msra.gmra.mrb[4].mxu1 %v21184_v23 }
 0x2ad   : > { %3667 = vmatpush1.bf16.msra.mxu0 %v18648_v31  ;;  %3698 = vmatprep.mubr.bf16.mxu0 %v21090_v58  ;;  %v18731_v31 = vld [vmem:[%s20950_s26 + $0xa44] ss:$48 sps:$4 sm:$0xff]  }
 0x2ae   : > { %3668 = vmatprep.subr.bf16.mxu0 %v18653_v32  ;;  %3784 = vmatprep.mubr.bf16.mxu1 %v21090_v58  ;;  %v18668_v58 = vld [vmem:[%s20950_s26 + $0x264] ss:$48 sps:$4 sm:$0xff]   ;;  %v18729_v32 = vld [vmem:[%s20950_s26 + $0xa40] ss:$48 sps:$4 sm:$0xff]  }
 0x2b1   : > { %3669 = vmatpush1.bf16.msra.mxu0 %v18651_v33  ;;  %v18734_v33 = vld [vmem:[%s20950_s26 + $0xaa4] ss:$48 sps:$4 sm:$0xff]  }
 0x2b2   : > { %3670 = vmatprep.subr.bf16.mxu0 %v18656_v34  ;;  %v18732_v34 = vld [vmem:[%s20950_s26 + $0xaa0] ss:$48 sps:$4 sm:$0xff]  }
 0x2b5   : > { %3671 = vmatpush1.bf16.msra.mxu0 %v18654_v35  ;;  %v18737_v35 = vld [vmem:[%s20950_s26 + $0xb04] ss:$48 sps:$4 sm:$0xff]  }
 0x2b6   : > { %3672 = vmatprep.subr.bf16.mxu0 %v18659_v36  ;;  %v18735_v36 = vld [vmem:[%s20950_s26 + $0xb00] ss:$48 sps:$4 sm:$0xff]  }
 0x2b9   : > { %3673 = vmatpush1.bf16.msra.mxu0 %v18657_v37  ;;  %v18740_v37 = vld [vmem:[%s20950_s26 + $0xb64] ss:$48 sps:$4 sm:$0xff]  }
 0x2ba   : > { %3674 = vmatprep.subr.bf16.mxu0 %v18662_v38  ;;  %v18746_v38 = vld [vmem:[%s20950_s26 + $0x2c] ss:$48 sps:$4 sm:$0xff]  }
 0x2bb   : > { %3752 = vmatprep.subr.bf16.mxu1 %v18746_v38  ;;  %v18813_v38 = vld [vmem:[%s20950_s26 + $0x8c8] ss:$48 sps:$4 sm:$0xff]  }
 0x2bd   : > { %3675 = vmatpush1.bf16.msra.mxu0 %v18660_v39  ;;  %v18744_v39 = vld [vmem:[%s20950_s26 + $0x28] ss:$48 sps:$4 sm:$0xff]  }
 0x2be   : > { %3676 = vmatprep.subr.bf16.mxu0 %v18665_v40  ;;  %v18749_v40 = vld [vmem:[%s20950_s26 + $0x8c] ss:$48 sps:$4 sm:$0xff]   ;;  %3753 = vmatpush1.bf16.msra.mxu1 %v18744_v39 }
 0x2bf   : > { %3754 = vmatprep.subr.bf16.mxu1 %v18749_v40  ;;  %v18815_v39 = vld [vmem:[%s20950_s26 + $0x8cc] ss:$48 sps:$4 sm:$0xff]  }
 0x2c1   : > { %3677 = vmatpush1.bf16.msra.mxu0 %v18663_v41  ;;  %v18747_v41 = vld [vmem:[%s20950_s26 + $0x88] ss:$48 sps:$4 sm:$0xff]  }
 0x2c2   : > { %3678 = vmatprep.subr.bf16.mxu0 %v18668_v58  ;;  %v18738_v58 = vld [vmem:[%s20950_s26 + $0xb60] ss:$48 sps:$4 sm:$0xff]   ;;  %3755 = vmatpush1.bf16.msra.mxu1 %v18747_v41 }
 0x2c5   : > { %3679 = vmatpush1.bf16.msra.mxu0 %v18666_v42  ;;  %v18752_v42 = vld [vmem:[%s20950_s26 + $0xec] ss:$48 sps:$4 sm:$0xff]  }
 0x2c6   : > { %3680 = vmatprep.subr.bf16.mxu0 %v18671_v43  ;;  %v18743_v43 = vld [vmem:[%s20950_s26 + $0xbc4] ss:$48 sps:$4 sm:$0xff]   ;;  %3756 = vmatprep.subr.bf16.mxu1 %v18752_v42 }
 0x2c9   : > { %3681 = vmatpush1.bf16.msra.mxu0 %v18669_v44  ;;  %v18750_v44 = vld [vmem:[%s20950_s26 + $0xe8] ss:$48 sps:$4 sm:$0xff]  }
 0x2ca   : > { %3682 = vmatprep.subr.bf16.mxu0 %v18674_v46  ;;  %v18741_v46 = vld [vmem:[%s20950_s26 + $0xbc0] ss:$48 sps:$4 sm:$0xff]   ;;  %3757 = vmatpush1.bf16.msra.mxu1 %v18750_v44  ;;  %v18818_v44 = vld [vmem:[%s20950_s26 + $0x92c] ss:$48 sps:$4 sm:$0xff]  }
 0x2cd   : > { %3683 = vmatpush1.bf16.msra.mxu0 %v18672_v47  ;;  %v18755_v47 = vld [vmem:[%s20950_s26 + $0x14c] ss:$48 sps:$4 sm:$0xff]  }
 0x2ce   : > { %3684 = vmatprep.subr.bf16.mxu0 %v18677_v48  ;;  %v18753_v48 = vld [vmem:[%s20950_s26 + $0x148] ss:$48 sps:$4 sm:$0xff]   ;;  %3758 = vmatprep.subr.bf16.mxu1 %v18755_v47 }
 0x2cf   : > { %3759 = vmatpush1.bf16.msra.mxu1 %v18753_v48 }
 0x2d1   : > { %3685 = vmatpush1.bf16.msra.mxu0 %v18675_v49  ;;  %v18758_v49 = vld [vmem:[%s20950_s26 + $0x1ac] ss:$48 sps:$4 sm:$0xff]  }
 0x2d2   : > { %3686 = vmatprep.subr.bf16.mxu0 %v18680_v50  ;;  %v20381_v50 = vmov 0.0   ;;  %3760 = vmatprep.subr.bf16.mxu1 %v18758_v49 }
 0x2d5   : > { %3687 = vmatpush1.bf16.msra.mxu0 %v18678_v51  ;;  %v18756_v51 = vld [vmem:[%s20950_s26 + $0x1a8] ss:$48 sps:$4 sm:$0xff]  }
 0x2d6   : > { %3688 = vmatprep.subr.bf16.mxu0 %v18683_v52  ;;  %v18761_v52 = vld [vmem:[%s20950_s26 + $0x20c] ss:$48 sps:$4 sm:$0xff]   ;;  %3761 = vmatpush1.bf16.msra.mxu1 %v18756_v51 }
 0x2d7   : > { %3762 = vmatprep.subr.bf16.mxu1 %v18761_v52 }
 0x2d9   : > { %3689 = vmatpush1.bf16.msra.mxu0 %v18681_v53  ;;  %v18759_v53 = vld [vmem:[%s20950_s26 + $0x208] ss:$48 sps:$4 sm:$0xff]  }
 0x2da   : > { %3690 = vmatprep.subr.bf16.mxu0 %v18686_v54  ;;  %v18764_v54 = vld [vmem:[%s20950_s26 + $0x26c] ss:$48 sps:$4 sm:$0xff]   ;;  %3763 = vmatpush1.bf16.msra.mxu1 %v18759_v53 }
 0x2db   : > { %3764 = vmatprep.subr.bf16.mxu1 %v18764_v54 }
 0x2dd   : > { %3691 = vmatpush1.bf16.msra.mxu0 %v18684_v55  ;;  %v18762_v55 = vld [vmem:[%s20950_s26 + $0x268] ss:$48 sps:$4 sm:$0xff]  }
 0x2de   : > { %3692 = vmatprep.subr.bf16.mxu0 %v18689_v56  ;;  %v18767_v56 = vld [vmem:[%s20950_s26 + $0x2cc] ss:$48 sps:$4 sm:$0xff]   ;;  %3765 = vmatpush1.bf16.msra.mxu1 %v18762_v55 }
 0x2df   : > { %3766 = vmatprep.subr.bf16.mxu1 %v18767_v56 }
 0x2e1   : > { %3693 = vmatpush1.bf16.msra.mxu0 %v18687_v57  ;;  %v18765_v57 = vld [vmem:[%s20950_s26 + $0x2c8] ss:$48 sps:$4 sm:$0xff]  }
 0x2e2   : > { %3694 = vmatprep.subr.bf16.mxu0 %v18692_v59  ;;  %v18770_v59 = vld [vmem:[%s20950_s26 + $0x32c] ss:$48 sps:$4 sm:$0xff]   ;;  %3767 = vmatpush1.bf16.msra.mxu1 %v18765_v57 }
 0x2e3   : > { %3768 = vmatprep.subr.bf16.mxu1 %v18770_v59 }
 0x2e5   : > { %3695 = vmatpush1.bf16.msra.mxu0 %v18690_v60  ;;  %v18768_v60 = vld [vmem:[%s20950_s26 + $0x328] ss:$48 sps:$4 sm:$0xff]  }
 0x2e6   : > { %3696 = vmatprep.subr.bf16.mxu0 %v18695_v61  ;;  %v18773_v61 = vld [vmem:[%s20950_s26 + $0x38c] ss:$48 sps:$4 sm:$0xff]   ;;  %3769 = vmatpush1.bf16.msra.mxu1 %v18768_v60 }
 0x2e7   : > { %3770 = vmatprep.subr.bf16.mxu1 %v18773_v61 }
 0x2e9   : > { %3697 = vmatpush1.bf16.msra.mxu0 %v18693_v62  ;;  %v18771_v62 = vld [vmem:[%s20950_s26 + $0x388] ss:$48 sps:$4 sm:$0xff]  }
 0x2ea   : > { %3709 = vmatprep.subr.bf16.mxu0 %v18698_v63  ;;  %v18776_v63 = vld [vmem:[%s20950_s26 + $0x3ec] ss:$48 sps:$4 sm:$0xff]   ;;  %3771 = vmatpush1.bf16.msra.mxu1 %v18771_v62  ;;  %v18819_v62 = vld [vmem:[%s20950_s26 + $0x988] ss:$48 sps:$4 sm:$0xff]  }
 0x2eb   : > { %3772 = vmatprep.subr.bf16.mxu1 %v18776_v63  ;;  %v18821_v63 = vld [vmem:[%s20950_s26 + $0x98c] ss:$48 sps:$4 sm:$0xff]  }
 0x2ec   : > { %3699 = vmatmul.mubr.bf16.vlgmr.msra.gmra.mrb[8].mxu0 %v21114_v17 }
 0x2ed   : > { %3710 = vmatpush1.bf16.msra.mxu0 %v18696_v0  ;;  %3741 = vmatprep.mubr.bf16.mxu0 %v21143_v45  ;;  %v18774_v0 = vld [vmem:[%s20950_s26 + $0x3e8] ss:$48 sps:$4 sm:$0xff]  }
 0x2ee   : > { %3711 = vmatprep.subr.bf16.mxu0 %v18701_v1  ;;  %v18779_v1 = vld [vmem:[%s20950_s26 + $0x44c] ss:$48 sps:$4 sm:$0xff]   ;;  %3773 = vmatpush1.bf16.msra.mxu1 %v18774_v0 }
 0x2ef   : > { %3774 = vmatprep.subr.bf16.mxu1 %v18779_v1 }
 0x2f1   : > { %3712 = vmatpush1.bf16.msra.mxu0 %v18699_v2  ;;  %v18777_v2 = vld [vmem:[%s20950_s26 + $0x448] ss:$48 sps:$4 sm:$0xff]  }
 0x2f2   : > { %3713 = vmatprep.subr.bf16.mxu0 %v18704_v3  ;;  %v18782_v3 = vld [vmem:[%s20950_s26 + $0x4ac] ss:$48 sps:$4 sm:$0xff]   ;;  %3775 = vmatpush1.bf16.msra.mxu1 %v18777_v2 }
 0x2f3   : > { %3776 = vmatprep.subr.bf16.mxu1 %v18782_v3 }
 0x2f5   : > { %3714 = vmatpush1.bf16.msra.mxu0 %v18702_v4  ;;  %v18780_v4 = vld [vmem:[%s20950_s26 + $0x4a8] ss:$48 sps:$4 sm:$0xff]  }
 0x2f6   : > { %3715 = vmatprep.subr.bf16.mxu0 %v18707_v5  ;;  %v18785_v5 = vld [vmem:[%s20950_s26 + $0x50c] ss:$48 sps:$4 sm:$0xff]   ;;  %3777 = vmatpush1.bf16.msra.mxu1 %v18780_v4 }
 0x2f7   : > { %3778 = vmatprep.subr.bf16.mxu1 %v18785_v5 }
 0x2f9   : > { %3716 = vmatpush1.bf16.msra.mxu0 %v18705_v6  ;;  %v18783_v6 = vld [vmem:[%s20950_s26 + $0x508] ss:$48 sps:$4 sm:$0xff]  }
 0x2fa   : > { %3717 = vmatprep.subr.bf16.mxu0 %v18710_v7  ;;  %v18788_v7 = vld [vmem:[%s20950_s26 + $0x56c] ss:$48 sps:$4 sm:$0xff]   ;;  %3779 = vmatpush1.bf16.msra.mxu1 %v18783_v6 }
 0x2fb   : > { %3780 = vmatprep.subr.bf16.mxu1 %v18788_v7  ;;  %v18824_v6 = vld [vmem:[%s20950_s26 + $0x9ec] ss:$48 sps:$4 sm:$0xff]  }
 0x2fd   : > { %3718 = vmatpush1.bf16.msra.mxu0 %v18708_v8  ;;  %v18786_v8 = vld [vmem:[%s20950_s26 + $0x568] ss:$48 sps:$4 sm:$0xff]  }
 0x2fe   : > { %3719 = vmatprep.subr.bf16.mxu0 %v18713_v9  ;;  %v18791_v9 = vld [vmem:[%s20950_s26 + $0x5cc] ss:$48 sps:$4 sm:$0xff]   ;;  %3781 = vmatpush1.bf16.msra.mxu1 %v18786_v8 }
 0x2ff   : > { %v21371_v12 = vpop.f32.mrb[0].mxu0  ;;  %v21373_v13 = vpop.f32.mrb[0].mxu1  ;;  %3782 = vmatprep.subr.bf16.mxu1 %v18791_v9 }
 0x300   : > { %v21376_v15 = vpop.f32.mrb[1].mxu0  ;;  %v21378_v16 = vpop.f32.mrb[1].mxu1 }
 0x301   : > { %v21380_v18 = vpop.f32.mrb[2].mxu0  ;;  %v21382_v19 = vpop.f32.mrb[2].mxu1  ;;  %3720 = vmatpush1.bf16.msra.mxu0 %v18711_v10  ;;  %v18789_v10 = vld [vmem:[%s20950_s26 + $0x5c8] ss:$48 sps:$4 sm:$0xff]  }
 0x302   : > { %v21385_v21 = vpop.f32.mrb[3].mxu0  ;;  %v21387_v22 = vpop.f32.mrb[3].mxu1  ;;  %3721 = vmatprep.subr.bf16.mxu0 %v18716_v11  ;;  %v18794_v11 = vld [vmem:[%s20950_s26 + $0x62c] ss:$48 sps:$4 sm:$0xff]   ;;  %3783 = vmatpush1.bf16.msra.mxu1 %v18789_v10  ;;  %v18825_v10 = vld [vmem:[%s20950_s26 + $0xa48] ss:$48 sps:$4 sm:$0xff]  }
 0x303   : > { %3795 = vmatprep.subr.bf16.mxu1 %v18794_v11  ;;  %v18827_v11 = vld [vmem:[%s20950_s26 + $0xa4c] ss:$48 sps:$4 sm:$0xff]  }
 0x305   : > { %3722 = vmatpush1.bf16.msra.mxu0 %v18714_v14  ;;  %v18792_v14 = vld [vmem:[%s20950_s26 + $0x628] ss:$48 sps:$4 sm:$0xff]   ;;  %3785 = vmatmul.mubr.bf16.vlgmr.msra.gmra.mrb[8].mxu1 %v21114_v17 }
 0x306   : > { %3723 = vmatprep.subr.bf16.mxu0 %v18719_v20  ;;  %v18797_v20 = vld [vmem:[%s20950_s26 + $0x68c] ss:$48 sps:$4 sm:$0xff]   ;;  %3796 = vmatpush1.bf16.msra.mxu1 %v18792_v14  ;;  %v18807_v17 = vld [vmem:[%s20950_s26 + $0x808] ss:$48 sps:$4 sm:$0xff]  }
 0x307   : > { %3827 = vmatprep.mubr.bf16.mxu1 %v21143_v45  ;;  %3797 = vmatprep.subr.bf16.mxu1 %v18797_v20  ;;  %v1342_v45 = vlaneseq }
 0x309   : > { %3724 = vmatpush1.bf16.msra.mxu0 %v18717_v24  ;;  %v18795_v24 = vld [vmem:[%s20950_s26 + $0x688] ss:$48 sps:$4 sm:$0xff]  }
 0x30a   : > { %3725 = vmatprep.subr.bf16.mxu0 %v18722_v25  ;;  %v18800_v25 = vld [vmem:[%s20950_s26 + $0x6ec] ss:$48 sps:$4 sm:$0xff]   ;;  %3798 = vmatpush1.bf16.msra.mxu1 %v18795_v24 }
 0x30b   : > { %3799 = vmatprep.subr.bf16.mxu1 %v18800_v25  ;;  %v18830_v24 = vld [vmem:[%s20950_s26 + $0xaac] ss:$48 sps:$4 sm:$0xff]  }
 0x30d   : > { %3726 = vmatpush1.bf16.msra.mxu0 %v18720_v26  ;;  %v18798_v26 = vld [vmem:[%s20950_s26 + $0x6e8] ss:$48 sps:$4 sm:$0xff]  }
 0x30e   : > { %3727 = vmatprep.subr.bf16.mxu0 %v18725_v27  ;;  %v18803_v27 = vld [vmem:[%s20950_s26 + $0x74c] ss:$48 sps:$4 sm:$0xff]   ;;  %3800 = vmatpush1.bf16.msra.mxu1 %v18798_v26 }
 0x30f   : > { %3801 = vmatprep.subr.bf16.mxu1 %v18803_v27  ;;  %v18833_v27 = vld [vmem:[%s20950_s26 + $0xb0c] ss:$48 sps:$4 sm:$0xff]  }
 0x311   : > { %3728 = vmatpush1.bf16.msra.mxu0 %v18723_v28  ;;  %v18801_v28 = vld [vmem:[%s20950_s26 + $0x748] ss:$48 sps:$4 sm:$0xff]  }
 0x312   : > { %3729 = vmatprep.subr.bf16.mxu0 %v18728_v29  ;;  %v18806_v29 = vld [vmem:[%s20950_s26 + $0x7ac] ss:$48 sps:$4 sm:$0xff]   ;;  %3802 = vmatpush1.bf16.msra.mxu1 %v18801_v28 }
 0x313   : > { %3803 = vmatprep.subr.bf16.mxu1 %v18806_v29 }
 0x315   : > { %3730 = vmatpush1.bf16.msra.mxu0 %v18726_v30  ;;  %v18804_v30 = vld [vmem:[%s20950_s26 + $0x7a8] ss:$48 sps:$4 sm:$0xff]  }
 0x316   : > { %3731 = vmatprep.subr.bf16.mxu0 %v18731_v31  ;;  %v18809_v31 = vld [vmem:[%s20950_s26 + $0x80c] ss:$48 sps:$4 sm:$0xff]   ;;  %3804 = vmatpush1.bf16.msra.mxu1 %v18804_v30 }
 0x317   : > { %3805 = vmatprep.subr.bf16.mxu1 %v18809_v31  ;;  %v18836_v30 = vld [vmem:[%s20950_s26 + $0xb6c] ss:$48 sps:$4 sm:$0xff]  }
 0x319   : > { %3732 = vmatpush1.bf16.msra.mxu0 %v18729_v32  ;;  %v18810_v32 = vld [vmem:[%s20950_s26 + $0x868] ss:$48 sps:$4 sm:$0xff]  }
 0x31a   : > { %3733 = vmatprep.subr.bf16.mxu0 %v18734_v33  ;;  %3806 = vmatpush1.bf16.msra.mxu1 %v18807_v17  ;;  %v18812_v33 = vld [vmem:[%s20950_s26 + $0x86c] ss:$48 sps:$4 sm:$0xff]  }
 0x31b   : > { %3807 = vmatprep.subr.bf16.mxu1 %v18812_v33 }
 0x31d   : > { %3734 = vmatpush1.bf16.msra.mxu0 %v18732_v34  ;;  %v1343_v34 = vshrl.u32 %v1342_v45, 7  ;;  %v18839_v45 = vld [vmem:[%s20950_s26 + $0xbcc] ss:$48 sps:$4 sm:$0xff]  }
 0x31e   : > { %3735 = vmatprep.subr.bf16.mxu0 %v18737_v35  ;;  %3808 = vmatpush1.bf16.msra.mxu1 %v18810_v32 }
 0x31f   : > { %v21458_v35 = vsub.s32 4, %v1343_v34  ;;  %v21465_v40 = vsub.s32 0, %v1343_v34  ;;  %3809 = vmatprep.subr.bf16.mxu1 %v18815_v39  ;;  %v21479_v51 = vsub.s32 6, %v1343_v34  ;;  %v21481_v54 = vsub.s32 2, %v1343_v34 }
 0x320   : > { %v21498_v2 = vsub.s32 7, %v1343_v34  ;;  %v21504_v5 = vsub.s32 3, %v1343_v34 }
 0x321   : > { %3736 = vmatpush1.bf16.msra.mxu0 %v18735_v36  ;;  %v1338_v36 = vld [vmem:[%s20961_s15] sm:$0xff] }
 0x322   : > { %3737 = vmatprep.subr.bf16.mxu0 %v18740_v37  ;;  %v21461_v37 = vsub.s32 5, %v1343_v34  ;;  %v21468_v41 = vrot.slane %v1338_v36, %v21458_v35  ;;  %3810 = vmatpush1.bf16.msra.mxu1 %v18813_v38  ;;  %v1369_v1 = vrot.slane %v1338_v36, %v21479_v51  ;;  %v1353_v3 = vrot.slane %v1338_v36, %v21481_v54 }
 0x323   : > { %3811 = vmatprep.subr.bf16.mxu1 %v18818_v44  ;;  %v1373_v7 = vrot.slane %v1338_v36, %v21498_v2  ;;  %v1357_v9 = vrot.slane %v1338_v36, %v21504_v5 }
 0x324   : > { %v21473_v42 = vrot.slane %v1338_v36, %v21461_v37  ;;  %v21518_v8 = vadd.f32 %v21373_v13, %v1353_v3  ;;  %v18828_v13 = vld [vmem:[%s20950_s26 + $0xaa8] ss:$48 sps:$4 sm:$0xff]   ;;  %v21565_v17 = vadd.f32 %v21382_v19, %v1353_v3 }
 0x325   : > { %3738 = vmatpush1.bf16.msra.mxu0 %v18738_v58  ;;  %v21470_v58 = vsub.s32 1, %v1343_v34  ;;  %v21530_v20 = vadd.f32 %v21378_v16, %v1357_v9  ;;  %v18831_v16 = vld [vmem:[%s20950_s26 + $0xb08] ss:$48 sps:$4 sm:$0xff]   ;;  %v21577_v33 = vadd.f32 %v21387_v22, %v1357_v9 }
 0x326   : > { %3739 = vmatprep.subr.bf16.mxu0 %v18743_v43  ;;  %v18816_v43 = vld [vmem:[%s20950_s26 + $0x928] ss:$48 sps:$4 sm:$0xff]  }
 0x327   : > { %v1349_v55 = vrot.slane %v1338_v36, %v21470_v58  ;;  %3812 = vmatpush1.bf16.msra.mxu1 %v18816_v43  ;;  %v21591_v34 = vld [vmem:[%s20961_s15 + $0x8] sm:$0xf]  ;;  %s23793_s15 = scalar_lea.vmem [#allocation20], %s20969_s4 }
 0x328   : > { %3813 = vmatprep.subr.bf16.mxu1 %v18821_v63  ;;  %v21608_v39 = vrot.slane %v21591_v34, %v21470_v58 }
 0x329   : > { %3740 = vmatpush1.bf16.msra.mxu0 %v18741_v46  ;;  %v1345_v46 = vrot.slane %v1338_v36, %v21465_v40  ;;  %v21502_v4 = vadd.f32 %v21376_v15, %v1349_v55  ;;  %v21554_v29 = vadd.f32 %v21385_v21, %v1349_v55  ;;  %v18837_v21 = vld [vmem:[%s20950_s26 + $0xbc8] ss:$48 sps:$4 sm:$0xff]  }
 0x32a   : > { %17701 = vmatprep.subr.mxu0 %v20381_v50 }
 0x32b   : > { %v17925_v0 = vadd.f32 %v21371_v12, %v1345_v46  ;;  %3814 = vmatpush1.bf16.msra.mxu1 %v18819_v62  ;;  %v18822_v12 = vld [vmem:[%s20950_s26 + $0x9e8] ss:$48 sps:$4 sm:$0xff]   ;;  %v21542_v26 = vadd.f32 %v21380_v18, %v1345_v46 }
 0x32c   : > { %3742 = vmatmul.mubr.bf16.vlgmr.msra.gmra.mrb[8].mxu0 %v21184_v23  ;;  %3815 = vmatprep.subr.bf16.mxu1 %v18824_v6  ;;  %v18834_v18 = vld [vmem:[%s20950_s26 + $0xb68] ss:$48 sps:$4 sm:$0xff]   ;;  %v21699_v6 = vrot.slane %v21591_v34, %v21481_v54  ;;  %s23792_s26 = scalar_lea.vmem [#allocation18], %s20969_s4 }
 0x32d   : > { %17703 = vmatprep.mubr.msk.f32.mxu0 %vm20382_vm0, %v20381_v50 }
 0x32f   : > { %3816 = vmatpush1.bf16.msra.mxu1 %v18822_v12 }
 0x330   : > { %3817 = vmatprep.subr.bf16.mxu1 %v18827_v11 }
 0x333   : > { %3818 = vmatpush1.bf16.msra.mxu1 %v18825_v10 }
 0x334   : > { %3819 = vmatprep.subr.bf16.mxu1 %v18830_v24 }
 0x337   : > { %3820 = vmatpush1.bf16.msra.mxu1 %v18828_v13 }
 0x338   : > { %3821 = vmatprep.subr.bf16.mxu1 %v18833_v27 }
 0x33b   : > { %3822 = vmatpush1.bf16.msra.mxu1 %v18831_v16 }
 0x33c   : > { %3823 = vmatprep.subr.bf16.mxu1 %v18836_v30 }
 0x33f   : > { %3824 = vmatpush1.bf16.msra.mxu1 %v18834_v18 }
 0x340   : > { %3825 = vmatprep.subr.bf16.mxu1 %v18839_v45 }
 0x343   : > { %3826 = vmatpush1.bf16.msra.mxu1 %v18837_v21 }
 0x344   : > { %17706 = vmatprep.subr.mxu1 %v20381_v50 }
 0x346   : > { %3828 = vmatmul.mubr.bf16.vlgmr.msra.gmra.mrb[8].mxu1 %v21184_v23  ;;  %v1377_v23 = vrot.slane %v21591_v34, %v21465_v40 }
 0x347   : > { %17708 = vmatprep.mubr.msk.f32.mxu1 %vm20382_vm0, %v20381_v50 }
 0x37f   : > { %v3571_v47 = vpop.f32.mrb[4].mxu0  ;;  %v3657_v48 = vpop.f32.mrb[4].mxu1 }
 0x380   : > { %v17933_v49 = vadd.f32 %v3571_v47, %v21468_v41  ;;  %v3573_v52 = vpop.f32.mrb[5].mxu0  ;;  %v3659_v53 = vpop.f32.mrb[5].mxu1  ;;  %v21514_v15 = vadd.f32 %v3657_v48, %v1369_v1 }
 0x381   : > { %v21485_v56 = vadd.f32 %v3573_v52, %v21473_v42  ;;  %v3575_v57 = vpop.f32.mrb[6].mxu0  ;;  %v3661_v59 = vpop.f32.mrb[6].mxu1  ;;  %v21527_v14 = vadd.f32 %v3659_v53, %v1373_v7 }
 0x382   : > { %v3577_v60 = vpop.f32.mrb[7].mxu0  ;;  %v21487_v61 = vpop.f32.mrb[7].mxu1  ;;  %4003 = vrot.lane.b32.xlu0 %v17933_v49, %s20383_s23  ;;  %17702 = vmatpush3.xpose.msk.msra.mxu0 %vm3838_vm1, %v17933_v49  ;;  %v21539_v25 = vadd.f32 %v3575_v57, %v21468_v41  ;;  %v21562_v31 = vadd.f32 %v3661_v59, %v1369_v1 }
 0x383   : > { %4331 = vrot.lane.b32.xlu1 %v21485_v56, %s20383_s23  ;;  %17711 = vmatprep.subr.mxu0 %v20381_v50  ;;  %v21551_v28 = vadd.f32 %v3577_v60, %v21473_v42  ;;  %v21574_v32 = vadd.f32 %v21487_v61, %v1373_v7  ;;  %v21705_v7 = vrot.slane %v21591_v34, %v21504_v5 }
 0x385   : > { %17704 = vmatmul.mubr.msk.f32.vlgmr.msra.gmra.mrb[12].mxu0 %vm3838_vm1, %v17925_v0 }
 0x386   : > { %4001 = vrot.lane.b32.xlu0 %v17925_v0, %s20383_s23  ;;  %17713 = vmatprep.mubr.msk.f32.mxu0 %vm20382_vm0, %v20381_v50 }
 0x387   : > { %4329 = vrot.lane.b32.xlu1 %v21502_v4, %s20383_s23 }
 0x38a   : > { %4659 = vrot.lane.b32.xlu0 %v21514_v15, %s20383_s23 }
 0x38b   : > { %4657 = vrot.lane.b32.xlu1 %v21518_v8, %s20383_s23 }
 0x38e   : > { %4987 = vrot.lane.b32.xlu0 %v21527_v14, %s20383_s23 }
 0x38f   : > { %4985 = vrot.lane.b32.xlu1 %v21530_v20, %s20383_s23 }
 0x392   : > { %5335 = vrot.lane.b32.xlu0 %v21539_v25, %s20383_s23 }
 0x393   : > { %5333 = vrot.lane.b32.xlu1 %v21542_v26, %s20383_s23 }
 0x396   : > { %5663 = vrot.lane.b32.xlu0 %v21551_v28, %s20383_s23 }
 0x397   : > { %5661 = vrot.lane.b32.xlu1 %v21554_v29, %s20383_s23 }
 0x39a   : > { %5991 = vrot.lane.b32.xlu0 %v21562_v31, %s20383_s23 }
 0x39b   : > { %5989 = vrot.lane.b32.xlu1 %v21565_v17, %s20383_s23 }
 0x39e   : > { %6319 = vrot.lane.b32.xlu0 %v21574_v32, %s20383_s23 }
 0x39f   : > { %6317 = vrot.lane.b32.xlu1 %v21577_v33, %s20383_s23 }
 0x3f4   : > { %v4004_v19 = vpop.permute.xlu0 %4003 }
 0x3f5   : > { %17712 = vmatpush3.xpose.msk.msra.mxu0 %vm3838_vm1, %v4004_v19  ;;  %v4332_v36 = vpop.permute.xlu1 %4331 }
 0x3f6   : > { %17721 = vmatprep.subr.mxu0 %v20381_v50 }
 0x3f8   : > { %v4002_v22 = vpop.permute.xlu0 %4001 }
 0x3f9   : > { %17714 = vmatmul.mubr.msk.f32.vlgmr.msra.gmra.mrb[14].mxu0 %vm3838_vm1, %v4002_v22  ;;  %v4330_v41 = vpop.permute.xlu1 %4329 }
 0x3fa   : > { %17722 = vmatpush3.xpose.msk.msra.mxu0 %vm3838_vm1, %v21485_v56  ;;  %17723 = vmatprep.mubr.msk.f32.mxu0 %vm20382_vm0, %v20381_v50 }
 0x3fb   : > { %17731 = vmatprep.subr.mxu0 %v20381_v50 }
 0x3fc   : > { %v4660_v49 = vpop.permute.xlu0 %4659 }
 0x3fd   : > { %17724 = vmatmul.mubr.msk.f32.vlgmr.msra.gmra.mrb[16].mxu0 %vm3838_vm1, %v21502_v4  ;;  %v4658_v52 = vpop.permute.xlu1 %4657 }
 0x3fe   : > { %17732 = vmatpush3.xpose.msk.msra.mxu0 %vm3838_vm1, %v4332_v36  ;;  %17733 = vmatprep.mubr.msk.f32.mxu0 %vm20382_vm0, %v20381_v50 }
 0x3ff   : > { %17741 = vmatprep.subr.mxu0 %v20381_v50  ;;  %v3743_v38 = vpop.f32.mrb[8].mxu0 }
 0x400   : > { %v21610_v42 = vadd.f32 %v3743_v38, %v1377_v23  ;;  %v21612_v43 = vpop.f32.mrb[9].mxu0  ;;  %v4988_v53 = vpop.permute.xlu0 %4987 }
 0x401   : > { %17734 = vmatmul.mubr.msk.f32.vlgmr.msra.gmra.mrb[18].mxu0 %vm3838_vm1, %v4330_v41  ;;  %v3747_v44 = vpop.f32.mrb[10].mxu0  ;;  %v4986_v55 = vpop.permute.xlu1 %4985 }
 0x402   : > { %17742 = vmatpush3.xpose.msk.msra.mxu0 %vm3838_vm1, %v21514_v15  ;;  %17743 = vmatprep.mubr.msk.f32.mxu0 %vm20382_vm0, %v20381_v50  ;;  %v21619_v46 = vadd.f32 %v3747_v44, %v1377_v23  ;;  %v3749_v47 = vpop.f32.mrb[11].mxu0 }
 0x403   : > { %17751 = vmatprep.subr.mxu0 %v20381_v50  ;;  %v21623_v48 = vadd.f32 %v3749_v47, %v21608_v39  ;;  %17707 = vmatpush3.msra.mxu1 %v21610_v42 }
 0x404   : > { %17716 = vmatprep.subr.mxu1 %v20381_v50  ;;  %v5336_v56 = vpop.permute.xlu0 %5335 }
 0x405   : > { %17744 = vmatmul.mubr.msk.f32.vlgmr.msra.gmra.mrb[20].mxu0 %vm3838_vm1, %v21518_v8  ;;  %v5334_v57 = vpop.permute.xlu1 %5333 }
 0x406   : > { %17752 = vmatpush3.xpose.msk.msra.mxu0 %vm3838_vm1, %v4660_v49  ;;  %17753 = vmatprep.mubr.msk.f32.mxu0 %vm20382_vm0, %v20381_v50 }
 0x407   : > { %17761 = vmatprep.subr.mxu0 %v20381_v50 }
 0x408   : > { %v5664_v59 = vpop.permute.xlu0 %5663 }
 0x409   : > { %17754 = vmatmul.mubr.msk.f32.vlgmr.msra.gmra.mrb[22].mxu0 %vm3838_vm1, %v4658_v52  ;;  %v5662_v60 = vpop.permute.xlu1 %5661 }
 0x40a   : > { %17762 = vmatpush3.xpose.msk.msra.mxu0 %vm3838_vm1, %v21527_v14  ;;  %17763 = vmatprep.mubr.msk.f32.mxu0 %vm20382_vm0, %v20381_v50 }
 0x40b   : > { %17771 = vmatprep.subr.mxu0 %v20381_v50 }
 0x40c   : > { %v5992_v61 = vpop.permute.xlu0 %5991 }
 0x40d   : > { %17764 = vmatmul.mubr.msk.f32.vlgmr.msra.gmra.mrb[24].mxu0 %vm3838_vm1, %v21530_v20  ;;  %v5990_v62 = vpop.permute.xlu1 %5989 }
 0x40e   : > { %17772 = vmatpush3.xpose.msk.msra.mxu0 %vm3838_vm1, %v4988_v53  ;;  %17773 = vmatprep.mubr.msk.f32.mxu0 %vm20382_vm0, %v20381_v50 }
 0x40f   : > { %17781 = vmatprep.subr.mxu0 %v20381_v50 }
 0x410   : > { %v6320_v63 = vpop.permute.xlu0 %6319 }
 0x411   : > { %17774 = vmatmul.mubr.msk.f32.vlgmr.msra.gmra.mrb[26].mxu0 %vm3838_vm1, %v4986_v55  ;;  %v6318_v0 = vpop.permute.xlu1 %6317 }
 0x412   : > { %17782 = vmatpush3.xpose.msk.msra.mxu0 %vm3838_vm1, %v21539_v25  ;;  %17783 = vmatprep.mubr.msk.f32.mxu0 %vm20382_vm0, %v20381_v50 }
 0x413   : > { %17791 = vmatprep.subr.mxu0 %v20381_v50 }
 0x415   : > { %17784 = vmatmul.mubr.msk.f32.vlgmr.msra.gmra.mrb[28].mxu0 %vm3838_vm1, %v21542_v26 }
 0x416   : > { %17792 = vmatpush3.xpose.msk.msra.mxu0 %vm3838_vm1, %v5336_v56  ;;  %17793 = vmatprep.mubr.msk.f32.mxu0 %vm20382_vm0, %v20381_v50 }
 0x417   : > { %17801 = vmatprep.subr.mxu0 %v20381_v50 }
 0x419   : > { %17794 = vmatmul.mubr.msk.f32.vlgmr.msra.gmra.mrb[30].mxu0 %vm3838_vm1, %v5334_v57  ;;  %v21701_v15 = vpop.f32.mrb[8].mxu1 }
 0x41a   : > { %17802 = vmatpush3.xpose.msk.msra.mxu0 %vm3838_vm1, %v21551_v28  ;;  %17803 = vmatprep.mubr.msk.f32.mxu0 %vm20382_vm0, %v20381_v50  ;;  %v21707_v8 = vpop.f32.mrb[9].mxu1 }
 0x41b   : > { %17811 = vmatprep.subr.mxu0 %v20381_v50  ;;  %v3833_v9 = vpop.f32.mrb[10].mxu1 }
 0x41c   : > { %v21710_v10 = vadd.f32 %v3833_v9, %v21699_v6  ;;  %v3835_v11 = vpop.f32.mrb[11].mxu1 }
 0x41d   : > { %17804 = vmatmul.mubr.msk.f32.vlgmr.msra.gmra.mrb[32].mxu0 %vm3838_vm1, %v21554_v29  ;;  %v21713_v14 = vadd.f32 %v3835_v11, %v21705_v7 }
 0x41e   : > { %17812 = vmatpush3.xpose.msk.msra.mxu0 %vm3838_vm1, %v5664_v59  ;;  %17813 = vmatprep.mubr.msk.f32.mxu0 %vm20382_vm0, %v20381_v50 }
 0x41f   : > { %17821 = vmatprep.subr.mxu0 %v20381_v50 }
 0x421   : > { %17814 = vmatmul.mubr.msk.f32.vlgmr.msra.gmra.mrb[34].mxu0 %vm3838_vm1, %v5662_v60 }
 0x422   : > { %17822 = vmatpush3.xpose.msk.msra.mxu0 %vm3838_vm1, %v21562_v31  ;;  %17823 = vmatprep.mubr.msk.f32.mxu0 %vm20382_vm0, %v20381_v50 }
 0x423   : > { %17831 = vmatprep.subr.mxu0 %v20381_v50 }
 0x425   : > { %17824 = vmatmul.mubr.msk.f32.vlgmr.msra.gmra.mrb[36].mxu0 %vm3838_vm1, %v21565_v17 }
 0x426   : > { %17832 = vmatpush3.xpose.msk.msra.mxu0 %vm3838_vm1, %v5992_v61  ;;  %17833 = vmatprep.mubr.msk.f32.mxu0 %vm20382_vm0, %v20381_v50 }
 0x427   : > { %17841 = vmatprep.subr.mxu0 %v20381_v50 }
 0x429   : > { %17834 = vmatmul.mubr.msk.f32.vlgmr.msra.gmra.mrb[38].mxu0 %vm3838_vm1, %v5990_v62 }
 0x42a   : > { %17842 = vmatpush3.xpose.msk.msra.mxu0 %vm3838_vm1, %v21574_v32  ;;  %17843 = vmatprep.mubr.msk.f32.mxu0 %vm20382_vm0, %v20381_v50 }
 0x42b   : > { %17851 = vmatprep.subr.mxu0 %v20381_v50 }
 0x42d   : > { %17844 = vmatmul.mubr.msk.f32.vlgmr.msra.gmra.mrb[40].mxu0 %vm3838_vm1, %v21577_v33 }
 0x42e   : > { %17852 = vmatpush3.xpose.msk.msra.mxu0 %vm3838_vm1, %v6320_v63  ;;  %17853 = vmatprep.mubr.msk.f32.mxu0 %vm20382_vm0, %v20381_v50 }
 0x431   : > { %17854 = vmatmul.mubr.msk.f32.vlgmr.msra.gmra.mrb[42].mxu0 %vm3838_vm1, %v6318_v0 }
 0x458   : > { %v3911_v1 = vpop.f32.mrb[12].mxu0 }
 0x459   : > { %v21693_v3 = vmul.f32 0.125, %v3911_v1  ;;  %v17705_v4 = vpop.f32.mrb[13].mxu0 }
 0x45b   : > { %v3917_v12 = vsel %vm3916_vm2, %v21693_v3, -inf }
 0x45c   : > { %3918 = vmax.xlane.f32.xlu0 %v3917_v12 }
 0x4cc   : > { %v4075_v20 = vpop.f32.mrb[14].mxu0 }
 0x4cd   : > { %v21715_v13 = vmul.f32 0.125, %v4075_v20  ;;  %v17715_v24 = vpop.f32.mrb[15].mxu0 }
 0x4cf   : > { %v4080_v25 = vsel %vm3916_vm2, %v21715_v13, -inf }
 0x4d0   : > { %4081 = vmax.xlane.f32.xlu1 %v4080_v25  ;;  %v4240_v26 = vpop.f32.mrb[16].mxu0 }
 0x4d1   : > { %v21719_v16 = vmul.f32 0.125, %v4240_v26  ;;  %v17725_v27 = vpop.f32.mrb[17].mxu0 }
 0x4d3   : > { %v4245_v28 = vsel %vm3916_vm2, %v21719_v16, -inf }
 0x4d4   : > { %4246 = vmax.xlane.f32.xlu0 %v4245_v28  ;;  %v4403_v29 = vpop.f32.mrb[18].mxu0 }
 0x4d5   : > { %v21723_v18 = vmul.f32 0.125, %v4403_v29  ;;  %v17735_v30 = vpop.f32.mrb[19].mxu0 }
 0x4d6   : > { %v21759_v30 = vadd.f32 %v21612_v43, %v21608_v39  ;;  %v21774_v43 = vadd.f32 %v21701_v15, %v21699_v6 }
 0x4d7   : > { %v4408_v31 = vsel %vm3916_vm2, %v21723_v18, -inf }
 0x4d8   : > { %4409 = vmax.xlane.f32.xlu0 %v4408_v31  ;;  %v4568_v17 = vpop.f32.mrb[20].mxu0 }
 0x4d9   : > { %v21727_v21 = vmul.f32 0.125, %v4568_v17  ;;  %v17745_v45 = vpop.f32.mrb[21].mxu0 }
 0x4db   : > { %v4573_v32 = vsel %vm3916_vm2, %v21727_v21, -inf }
 0x4dc   : > { %4574 = vmax.xlane.f32.xlu1 %v4573_v32  ;;  %v4731_v33 = vpop.f32.mrb[22].mxu0 }
 0x4dd   : > { %v21731_v19 = vmul.f32 0.125, %v4731_v33  ;;  %v17755_v22 = vpop.f32.mrb[23].mxu0 }
 0x4df   : > { %v4736_v34 = vsel %vm3916_vm2, %v21731_v19, -inf }
 0x4e0   : > { %4737 = vmax.xlane.f32.xlu0 %v4736_v34  ;;  %v4896_v36 = vpop.f32.mrb[24].mxu0 }
 0x4e1   : > { %v21735_v23 = vmul.f32 0.125, %v4896_v36  ;;  %v17765_v38 = vpop.f32.mrb[25].mxu0 }
 0x4e3   : > { %v4901_v41 = vsel %vm3916_vm2, %v21735_v23, -inf }
 0x4e4   : > { %4902 = vmax.xlane.f32.xlu1 %v4901_v41  ;;  %v5059_v44 = vpop.f32.mrb[26].mxu0 }
 0x4e5   : > { %v21739_v47 = vmul.f32 0.125, %v5059_v44  ;;  %v17775_v49 = vpop.f32.mrb[27].mxu0 }
 0x4e7   : > { %v5064_v52 = vsel %vm3916_vm2, %v21739_v47, -inf }
 0x4e8   : > { %5065 = vmax.xlane.f32.xlu0 %v5064_v52  ;;  %v5244_v53 = vpop.f32.mrb[28].mxu0 }
 0x4e9   : > { %v21743_v55 = vmul.f32 0.125, %v5244_v53  ;;  %v17785_v56 = vpop.f32.mrb[29].mxu0  ;;  %v3919_v31 = vpop.xlane.xlu0 %3918 }
 0x4ea   : > { %v3920_v17 = vsub.f32 %v21693_v3, %v3919_v31 }
 0x4eb   : > { %v5249_v57 = vsel %vm3916_vm2, %v21743_v55, -inf }
 0x4ec   : > { %5250 = vmax.xlane.f32.xlu1 %v5249_v57  ;;  %v5407_v59 = vpop.f32.mrb[30].mxu0  ;;  %v3921_v45 = vmul.f32 1.442695, %v3920_v17 }
 0x4ed   : > { %v21747_v60 = vmul.f32 0.125, %v5407_v59  ;;  %v17795_v61 = vpop.f32.mrb[31].mxu0 }
 0x4ee   : > { %19800 = vpow2.f32 %v3921_v45 }
 0x4ef   : > { %v5412_v62 = vsel %vm3916_vm2, %v21747_v60, -inf }
 0x4f0   : > { %5413 = vmax.xlane.f32.xlu0 %v5412_v62  ;;  %v5572_v63 = vpop.f32.mrb[32].mxu0 }
 0x4f1   : > { %v17805_v0 = vpop.f32.mrb[33].mxu0  ;;  %v21764_v32 = vmul.f32 0.125, %v5572_v63 }
 0x4f4   : > { %v5735_v1 = vpop.f32.mrb[34].mxu0 }
 0x4f5   : > { %v21751_v4 = vmul.f32 0.125, %v5735_v1  ;;  %v17815_v12 = vpop.f32.mrb[35].mxu0 }
 0x4f7   : > { %v5740_v9 = vsel %vm3916_vm2, %v21751_v4, -inf }
 0x4f8   : > { %5741 = vmax.xlane.f32.xlu0 %v5740_v9  ;;  %v5900_v11 = vpop.f32.mrb[36].mxu0  ;;  %v21768_v33 = vpop.eup %19800 }
 0x4f9   : > { %v17825_v20 = vpop.f32.mrb[37].mxu0  ;;  %v3923_v39 = vsel %vm3916_vm2, %v21768_v33, 0.0  ;;  %v21778_v3 = vmul.f32 0.125, %v5900_v11 }
 0x4fb   : > { %v5905_v34 = vsel %vm3916_vm2, %v21778_v3, -inf }
 0x4fc   : > { %v6063_v24 = vpop.f32.mrb[38].mxu0 }
 0x4fd   : > { %4092 = vrot.lane.b32.xlu1 %v21610_v42, %s20383_s23  ;;  %v17835_v25 = vpop.f32.mrb[39].mxu0  ;;  %v5577_v42 = vsel %vm3916_vm2, %v21764_v32, -inf  ;;  %v21780_v22 = vmul.f32 0.125, %v6063_v24 }
 0x4ff   : > { %v6068_v41 = vsel %vm3916_vm2, %v21780_v22, -inf }
 0x500   : > { %v6228_v26 = vpop.f32.mrb[40].mxu0 }
 0x501   : > { %v17845_v27 = vpop.f32.mrb[41].mxu0  ;;  %v21784_v36 = vmul.f32 0.125, %v6228_v26 }
 0x503   : > { %v6233_v52 = vsel %vm3916_vm2, %v21784_v36, -inf }
 0x504   : > { %v6391_v28 = vpop.f32.mrb[42].mxu0 }
 0x505   : > { %v17855_v29 = vpop.f32.mrb[43].mxu0  ;;  %v21789_v44 = vmul.f32 0.125, %v6391_v28 }
 0x507   : > { %v6396_v59 = vsel %vm3916_vm2, %v21789_v44, -inf }
 0x50e   : > { %4420 = vrot.lane.b32.xlu0 %v21759_v30, %s20383_s23 }
 0x521   : > { %5578 = vmax.xlane.f32.xlu1 %v5577_v42 }
 0x525   : > { %3924 = vadd.xlane.f32.xlu1 %v3923_v39 }
 0x536   : > { %4748 = vrot.lane.b32.xlu1 %v21774_v43, %s20383_s23 }
 0x55a   : > { %5906 = vmax.xlane.f32.xlu1 %v5905_v34 }
 0x55d   : > { %v4082_v38 = vpop.xlane.xlu1 %4081 }
 0x55e   : > { %v4083_v6 = vsub.f32 %v21715_v13, %v4082_v38  ;;  %6069 = vmax.xlane.f32.xlu1 %v6068_v41 }
 0x560   : > { %v4084_v15 = vmul.f32 1.442695, %v4083_v6 }
 0x561   : > { %v4247_v49 = vpop.xlane.xlu0 %4246 }
 0x562   : > { %19802 = vpow2.f32 %v4084_v15  ;;  %v4248_v53 = vsub.f32 %v21719_v16, %v4247_v49  ;;  %6234 = vmax.xlane.f32.xlu1 %v6233_v52 }
 0x564   : > { %v4249_v56 = vmul.f32 1.442695, %v4248_v53 }
 0x565   : > { %v4410_v57 = vpop.xlane.xlu0 %4409 }
 0x566   : > { %19804 = vpow2.f32 %v4249_v56  ;;  %v4411_v13 = vsub.f32 %v21723_v18, %v4410_v57  ;;  %6397 = vmax.xlane.f32.xlu1 %v6396_v59 }
 0x568   : > { %v4412_v61 = vmul.f32 1.442695, %v4411_v13 }
 0x569   : > { %v4575_v62 = vpop.xlane.xlu1 %4574 }
 0x56a   : > { %19806 = vpow2.f32 %v4412_v61  ;;  %v4576_v63 = vsub.f32 %v21727_v21, %v4575_v62  ;;  %v21846_v62 = vadd.f32 %v21707_v8, %v21705_v7 }
 0x56c   : > { %v21798_v0 = vpop.eup %19802  ;;  %v4577_v1 = vmul.f32 1.442695, %v4576_v63 }
 0x56d   : > { %v4738_v12 = vpop.xlane.xlu0 %4737  ;;  %v4086_v16 = vsel %vm3916_vm2, %v21798_v0, 0.0 }
 0x56e   : > { %19808 = vpow2.f32 %v4577_v1  ;;  %v4739_v9 = vsub.f32 %v21731_v19, %v4738_v12  ;;  %4087 = vadd.xlane.f32.xlu0 %v4086_v16 }
 0x570   : > { %v21803_v11 = vpop.eup %19804  ;;  %v4740_v18 = vmul.f32 1.442695, %v4739_v9 }
 0x571   : > { %v4903_v20 = vpop.xlane.xlu1 %4902  ;;  %v4251_v24 = vsel %vm3916_vm2, %v21803_v11, 0.0 }
 0x572   : > { %19810 = vpow2.f32 %v4740_v18  ;;  %v4904_v21 = vsub.f32 %v21735_v23, %v4903_v20  ;;  %4252 = vadd.xlane.f32.xlu0 %v4251_v24 }
 0x574   : > { %v21808_v25 = vpop.eup %19806  ;;  %v4905_v26 = vmul.f32 1.442695, %v4904_v21 }
 0x575   : > { %v5066_v27 = vpop.xlane.xlu0 %5065  ;;  %v4414_v28 = vsel %vm3916_vm2, %v21808_v25, 0.0 }
 0x576   : > { %19812 = vpow2.f32 %v4905_v26  ;;  %v5067_v19 = vsub.f32 %v21739_v47, %v5066_v27  ;;  %4415 = vadd.xlane.f32.xlu0 %v4414_v28 }
 0x578   : > { %v21813_v29 = vpop.eup %19808  ;;  %v5068_v31 = vmul.f32 1.442695, %v5067_v19 }
 0x579   : > { %v5251_v17 = vpop.xlane.xlu1 %5250  ;;  %v4579_v45 = vsel %vm3916_vm2, %v21813_v29, 0.0 }
 0x57a   : > { %19814 = vpow2.f32 %v5068_v31  ;;  %v5252_v23 = vsub.f32 %v21743_v55, %v5251_v17  ;;  %4580 = vadd.xlane.f32.xlu0 %v4579_v45 }
 0x57c   : > { %v21818_v42 = vpop.eup %19810  ;;  %v5253_v39 = vmul.f32 1.442695, %v5252_v23 }
 0x57d   : > { %v5414_v34 = vpop.xlane.xlu0 %5413  ;;  %v4742_v38 = vsel %vm3916_vm2, %v21818_v42, 0.0  ;;  %v4093_v63 = vpop.permute.xlu1 %4092 }
 0x57e   : > { %19816 = vpow2.f32 %v5253_v39  ;;  %v5415_v47 = vsub.f32 %v21747_v60, %v5414_v34  ;;  %4743 = vadd.xlane.f32.xlu0 %v4742_v38 }
 0x580   : > { %v21823_v41 = vpop.eup %19812  ;;  %v5416_v6 = vmul.f32 1.442695, %v5415_v47 }
 0x581   : > { %v4907_v15 = vsel %vm3916_vm2, %v21823_v41, 0.0 }
 0x582   : > { %19818 = vpow2.f32 %v5416_v6  ;;  %4908 = vadd.xlane.f32.xlu1 %v4907_v15 }
 0x584   : > { %v21827_v55 = vpop.eup %19814 }
 0x585   : > { %v5742_v49 = vpop.xlane.xlu0 %5741  ;;  %v5070_v52 = vsel %vm3916_vm2, %v21827_v55, 0.0 }
 0x586   : > { %v5743_v53 = vsub.f32 %v21751_v4, %v5742_v49  ;;  %5071 = vadd.xlane.f32.xlu0 %v5070_v52 }
 0x588   : > { %v21832_v56 = vpop.eup %19816  ;;  %v5744_v60 = vmul.f32 1.442695, %v5743_v53 }
 0x589   : > { %v5255_v57 = vsel %vm3916_vm2, %v21832_v56, 0.0  ;;  %v4421_v38 = vpop.permute.xlu0 %4420 }
 0x58a   : > { %19820 = vpow2.f32 %v5744_v60  ;;  %5256 = vadd.xlane.f32.xlu0 %v5255_v57 }
 0x58c   : > { %v21836_v59 = vpop.eup %19818 }
 0x58d   : > { %v5418_v13 = vsel %vm3916_vm2, %v21836_v59, 0.0 }
 0x58e   : > { %5419 = vadd.xlane.f32.xlu0 %v5418_v13 }
 0x594   : > { %v21840_v61 = vpop.eup %19820 }
 0x595   : > { %v5746_v4 = vsel %vm3916_vm2, %v21840_v61, 0.0 }
 0x596   : > { %5747 = vadd.xlane.f32.xlu0 %v5746_v4 }
 0x5ac   : > { %5076 = vrot.lane.b32.xlu0 %v21846_v62, %s20383_s23 }
 0x5ae   : > { %v5579_v1 = vpop.xlane.xlu1 %5578 }
 0x5af   : > { %v5580_v12 = vsub.f32 %v21764_v32, %v5579_v1 }
 0x5b1   : > { %v5581_v16 = vmul.f32 1.442695, %v5580_v12 }
 0x5b2   : > { %v3925_v9 = vpop.xlane.xlu1 %3924 }
 0x5b3   : > { %19822 = vpow2.f32 %v5581_v16 }
 0x5b4   : > { %19824 = vrcp.f32 %v3925_v9 }
 0x5b6   : > { %v21864_v8 = vpop.permute.xlu1 %4748 }
 0x5bd   : > { %v21851_v18 = vpop.eup %19822 }
 0x5be   : > { %v19825_v20 = vpop.eup %19824  ;;  %v5583_v24 = vsel %vm3916_vm2, %v21851_v18, 0.0 }
 0x5bf   : > { %v3927_v7 = vmul.f32 %v19825_v20, %v21768_v33  ;;  %5584 = vadd.xlane.f32.xlu1 %v5583_v24 }
 0x5c1   : > { %17709 = vmatmul.mubr.msk.f32.vlgmr.msra.gmra.mrb[12].mxu1 %vm3916_vm2, %v3927_v7 }
 0x5c2   : > { %17717 = vmatpush3.msra.mxu1 %v4093_v63  ;;  %17718 = vmatprep.mubr.msk.f32.mxu1 %vm20382_vm0, %v20381_v50 }
 0x5c3   : > { %17726 = vmatprep.subr.mxu1 %v20381_v50 }
 0x5d0   : > { %5424 = vrot.lane.b32.xlu1 %v21619_v46, %s20383_s23 }
 0x5d4   : > { %5752 = vrot.lane.b32.xlu1 %v21623_v48, %s20383_s23 }
 0x5e7   : > { %v5907_v32 = vpop.xlane.xlu1 %5906 }
 0x5e8   : > { %v5908_v33 = vsub.f32 %v21778_v3, %v5907_v32 }
 0x5ea   : > { %v5909_v21 = vmul.f32 1.442695, %v5908_v33 }
 0x5eb   : > { %v6070_v26 = vpop.xlane.xlu1 %6069 }
 0x5ec   : > { %19826 = vpow2.f32 %v5909_v21  ;;  %v6071_v27 = vsub.f32 %v21780_v22, %v6070_v26 }
 0x5ee   : > { %v6072_v28 = vmul.f32 1.442695, %v6071_v27 }
 0x5ef   : > { %v6235_v19 = vpop.xlane.xlu1 %6234 }
 0x5f0   : > { %19828 = vpow2.f32 %v6072_v28  ;;  %v6236_v31 = vsub.f32 %v21784_v36, %v6235_v19 }
 0x5f2   : > { %v6237_v17 = vmul.f32 1.442695, %v6236_v31 }
 0x5f3   : > { %v6398_v45 = vpop.xlane.xlu1 %6397 }
 0x5f4   : > { %19830 = vpow2.f32 %v6237_v17  ;;  %v6399_v23 = vsub.f32 %v21789_v44, %v6398_v45 }
 0x5f6   : > { %v21870_v39 = vpop.eup %19826  ;;  %v6400_v34 = vmul.f32 1.442695, %v6399_v23 }
 0x5f7   : > { %v5911_v3 = vsel %vm3916_vm2, %v21870_v39, 0.0 }
 0x5f8   : > { %19832 = vpow2.f32 %v6400_v34  ;;  %5912 = vadd.xlane.f32.xlu1 %v5911_v3 }
 0x5fa   : > { %v21874_v22 = vpop.eup %19828 }
 0x5fb   : > { %v4088_v47 = vpop.xlane.xlu0 %4087  ;;  %v6074_v36 = vsel %vm3916_vm2, %v21874_v22, 0.0 }
 0x5fc   : > { %19834 = vrcp.f32 %v4088_v47  ;;  %6075 = vadd.xlane.f32.xlu0 %v6074_v36 }
 0x5fe   : > { %v21878_v6 = vpop.eup %19830 }
 0x5ff   : > { %v4253_v44 = vpop.xlane.xlu0 %4252  ;;  %v6239_v15 = vsel %vm3916_vm2, %v21878_v6, 0.0 }
 0x600   : > { %19836 = vrcp.f32 %v4253_v44  ;;  %6240 = vadd.xlane.f32.xlu1 %v6239_v15 }
 0x602   : > { %v21882_v49 = vpop.eup %19832 }
 0x603   : > { %v4416_v52 = vpop.xlane.xlu0 %4415  ;;  %v6402_v53 = vsel %vm3916_vm2, %v21882_v49, 0.0 }
 0x604   : > { %19838 = vrcp.f32 %v4416_v52  ;;  %6403 = vadd.xlane.f32.xlu0 %v6402_v53 }
 0x606   : > { %v19835_v60 = vpop.eup %19834 }
 0x607   : > { %v4090_v57 = vmul.f32 %v19835_v60, %v21798_v0  ;;  %v4581_v13 = vpop.xlane.xlu0 %4580 }
 0x608   : > { %19840 = vrcp.f32 %v4581_v13 }
 0x609   : > { %17719 = vmatmul.mubr.msk.f32.vlgmr.msra.gmra.mrb[14].mxu1 %vm3916_vm2, %v4090_v57 }
 0x60a   : > { %v19837_v4 = vpop.eup %19836  ;;  %17727 = vmatpush3.msra.mxu1 %v21759_v30  ;;  %17728 = vmatprep.mubr.msk.f32.mxu1 %vm20382_vm0, %v20381_v50 }
 0x60b   : > { %v4255_v63 = vmul.f32 %v19837_v4, %v21803_v11  ;;  %v4744_v1 = vpop.xlane.xlu0 %4743  ;;  %17736 = vmatprep.subr.mxu1 %v20381_v50  ;;  %v18840_v4 = vld [vmem:[%s20971_s13] ss:$16 sps:$4 sm:$0xff]  }
 0x60c   : > { %19842 = vrcp.f32 %v4744_v1  ;;  %v18843_v1 = vld [vmem:[%s20971_s13 + $0x8] ss:$16 sps:$4 sm:$0xff]  }
 0x60d   : > { %17729 = vmatmul.mubr.msk.f32.vlgmr.msra.gmra.mrb[16].mxu1 %vm3916_vm2, %v4255_v63  ;;  %v18842_v63 = vld [vmem:[%s20971_s13 + $0x4] ss:$16 sps:$4 sm:$0xff]  }
 0x60e   : > { %v19839_v12 = vpop.eup %19838  ;;  %17737 = vmatpush3.msra.mxu1 %v4421_v38  ;;  %17738 = vmatprep.mubr.msk.f32.mxu1 %vm20382_vm0, %v20381_v50 }
 0x60f   : > { %v4418_v0 = vmul.f32 %v19839_v12, %v21808_v25  ;;  %v4909_v16 = vpop.xlane.xlu1 %4908  ;;  %17746 = vmatprep.subr.mxu1 %v20381_v50  ;;  %7298 = vmatprep.subr.bf16.mxu0 %v18842_v63  ;;  %v18911_v63 = vld [vmem:[%s20971_s13 + $0x16c] ss:$16 sps:$4 sm:$0xff]  }
 0x610   : > { %19844 = vrcp.f32 %v4909_v16  ;;  %7299 = vmatpush1.bf16.msra.mxu0 %v18840_v4  ;;  %v18908_v4 = vld [vmem:[%s20971_s13 + $0x164] ss:$16 sps:$4 sm:$0xff]  }
 0x611   : > { %17739 = vmatmul.mubr.msk.f32.vlgmr.msra.gmra.mrb[18].mxu1 %vm3916_vm2, %v4418_v0  ;;  %6080 = vrot.lane.b32.xlu1 %v21710_v10, %s20383_s23  ;;  %v18845_v0 = vld [vmem:[%s20971_s13 + $0xc] ss:$16 sps:$4 sm:$0xff]  }
 0x612   : > { %v19841_v30 = vpop.eup %19840  ;;  %17747 = vmatpush3.msra.mxu1 %v21774_v43  ;;  %17748 = vmatprep.mubr.msk.f32.mxu1 %vm20382_vm0, %v20381_v50 }
 0x613   : > { %v4583_v11 = vmul.f32 %v19841_v30, %v21813_v29  ;;  %v5072_v9 = vpop.xlane.xlu0 %5071  ;;  %17756 = vmatprep.subr.mxu1 %v20381_v50  ;;  %v18846_v30 = vld [vmem:[%s20971_s13 + $0x20] ss:$16 sps:$4 sm:$0xff]  }
 0x614   : > { %19846 = vrcp.f32 %v5072_v9  ;;  %v18849_v9 = vld [vmem:[%s20971_s13 + $0x28] ss:$16 sps:$4 sm:$0xff]  }
 0x615   : > { %17749 = vmatmul.mubr.msk.f32.vlgmr.msra.gmra.mrb[20].mxu1 %vm3916_vm2, %v4583_v11  ;;  %v18848_v11 = vld [vmem:[%s20971_s13 + $0x24] ss:$16 sps:$4 sm:$0xff]  }
 0x616   : > { %v19843_v25 = vpop.eup %19842  ;;  %17757 = vmatpush3.msra.mxu1 %v21864_v8  ;;  %17758 = vmatprep.mubr.msk.f32.mxu1 %vm20382_vm0, %v20381_v50 }
 0x617   : > { %v4746_v20 = vmul.f32 %v19843_v25, %v21818_v42  ;;  %17766 = vmatprep.subr.mxu1 %v20381_v50  ;;  %v5257_v43 = vpop.xlane.xlu0 %5256  ;;  %v18851_v25 = vld [vmem:[%s20971_s13 + $0x2c] ss:$16 sps:$4 sm:$0xff]   ;;  %7300 = vmatprep.subr.bf16.mxu0 %v18848_v11  ;;  %v18912_v11 = vld [vmem:[%s20971_s13 + $0x180] ss:$16 sps:$4 sm:$0xff]  }
 0x618   : > { %19848 = vrcp.f32 %v5257_v43  ;;  %7301 = vmatpush1.bf16.msra.mxu0 %v18846_v30  ;;  %v18852_v43 = vld [vmem:[%s20971_s13 + $0x40] ss:$16 sps:$4 sm:$0xff]   ;;  %v18917_v30 = vld [vmem:[%s20971_s13 + $0x18c] ss:$16 sps:$4 sm:$0xff]  }
 0x619   : > { %17759 = vmatmul.mubr.msk.f32.vlgmr.msra.gmra.mrb[22].mxu1 %vm3916_vm2, %v4746_v20  ;;  %v18854_v20 = vld [vmem:[%s20971_s13 + $0x44] ss:$16 sps:$4 sm:$0xff]  }
 0x61a   : > { %v19845_v24 = vpop.eup %19844  ;;  %17767 = vmatpush3.msra.mxu1 %v21846_v62  ;;  %6408 = vrot.lane.b32.xlu0 %v21713_v14, %s20383_s23 }
 0x61b   : > { %v4911_v29 = vmul.f32 %v19845_v24, %v21823_v41  ;;  %17768 = vmatprep.mubr.msk.f32.mxu1 %vm20382_vm0, %v20381_v50  ;;  %17776 = vmatprep.subr.mxu1 %v20381_v50  ;;  %v5420_v42 = vpop.xlane.xlu0 %5419  ;;  %v18857_v24 = vld [vmem:[%s20971_s13 + $0x4c] ss:$16 sps:$4 sm:$0xff]  }
 0x61c   : > { %19850 = vrcp.f32 %v5420_v42  ;;  %7302 = vmatprep.subr.bf16.mxu0 %v18854_v20  ;;  %v18860_v42 = vld [vmem:[%s20971_s13 + $0x64] ss:$16 sps:$4 sm:$0xff]   ;;  %v18923_v20 = vld [vmem:[%s20971_s13 + $0x1ac] ss:$16 sps:$4 sm:$0xff]  }
 0x61d   : > { %17769 = vmatmul.mubr.msk.f32.vlgmr.msra.gmra.mrb[24].mxu1 %vm3916_vm2, %v4911_v29  ;;  %v18855_v29 = vld [vmem:[%s20971_s13 + $0x48] ss:$16 sps:$4 sm:$0xff]   ;;  %7303 = vmatpush1.bf16.msra.mxu0 %v18852_v43  ;;  %v18918_v43 = vld [vmem:[%s20971_s13 + $0x1a0] ss:$16 sps:$4 sm:$0xff]  }
 0x61e   : > { %17778 = vmatprep.mubr.msk.f32.mxu1 %vm20382_vm0, %v20381_v50  ;;  %v19847_v8 = vpop.eup %19846  ;;  %7304 = vmatprep.subr.bf16.mxu0 %v18860_v42 }
 0x61f   : > { %v5074_v62 = vmul.f32 %v19847_v8, %v21827_v55  ;;  %v18858_v8 = vld [vmem:[%s20971_s13 + $0x60] ss:$16 sps:$4 sm:$0xff]  }
 0x621   : > { %7305 = vmatpush1.bf16.msra.mxu0 %v18858_v8  ;;  %v18924_v8 = vld [vmem:[%s20971_s13 + $0x1c0] ss:$16 sps:$4 sm:$0xff]  }
 0x622   : > { %v19849_v33 = vpop.eup %19848 }
 0x623   : > { %v5748_v7 = vpop.xlane.xlu0 %5747  ;;  %v5259_v41 = vmul.f32 %v19849_v33, %v21832_v56 }
 0x626   : > { %v19851_v21 = vpop.eup %19850 }
 0x627   : > { %v5077_v32 = vpop.permute.xlu0 %5076  ;;  %v5422_v26 = vmul.f32 %v19851_v21, %v21836_v59  ;;  %v18864_v21 = vld [vmem:[%s20971_s13 + $0x80] ss:$16 sps:$4 sm:$0xff]  }
 0x628   : > { %17777 = vmatpush3.msra.mxu1 %v5077_v32  ;;  %v18866_v32 = vld [vmem:[%s20971_s13 + $0x84] ss:$16 sps:$4 sm:$0xff]  }
 0x629   : > { %17779 = vmatmul.mubr.msk.f32.vlgmr.msra.gmra.mrb[26].mxu1 %vm3916_vm2, %v5074_v62  ;;  %17786 = vmatprep.subr.mxu1 %v20381_v50  ;;  %v18861_v62 = vld [vmem:[%s20971_s13 + $0x68] ss:$16 sps:$4 sm:$0xff]  }
 0x62a   : > { %17787 = vmatpush3.msra.mxu1 %v21619_v46  ;;  %17788 = vmatprep.mubr.msk.f32.mxu1 %vm20382_vm0, %v20381_v50 }
 0x62b   : > { %17796 = vmatprep.subr.mxu1 %v20381_v50  ;;  %7306 = vmatprep.subr.bf16.mxu0 %v18866_v32  ;;  %v18927_v32 = vld [vmem:[%s20971_s13 + $0x1c8] ss:$16 sps:$4 sm:$0xff]  }
 0x62c   : > { %7307 = vmatpush1.bf16.msra.mxu0 %v18864_v21  ;;  %v18935_v21 = vld [vmem:[%s20971_s13 + $0x1ec] ss:$16 sps:$4 sm:$0xff]  }
 0x62d   : > { %17789 = vmatmul.mubr.msk.f32.vlgmr.msra.gmra.mrb[28].mxu1 %vm3916_vm2, %v5259_v41  ;;  %v18869_v41 = vld [vmem:[%s20971_s13 + $0x8c] ss:$16 sps:$4 sm:$0xff]  }
 0x62e   : > { %17798 = vmatprep.mubr.msk.f32.mxu1 %vm20382_vm0, %v20381_v50 }
 0x64c   : > { %v5585_v55 = vpop.xlane.xlu1 %5584 }
 0x64d   : > { %19852 = vrcp.f32 %v5585_v55 }
 0x64e   : > { %19854 = vrcp.f32 %v5748_v7  ;;  %v18863_v7 = vld [vmem:[%s20971_s13 + $0x6c] ss:$16 sps:$4 sm:$0xff]  }
 0x650   : > { %v5425_v46 = vpop.permute.xlu1 %5424 }
 0x651   : > { %17797 = vmatpush3.msra.mxu1 %v5425_v46  ;;  %v18872_v46 = vld [vmem:[%s20971_s13 + $0xa4] ss:$16 sps:$4 sm:$0xff]  }
 0x652   : > { %17799 = vmatmul.mubr.msk.f32.vlgmr.msra.gmra.mrb[30].mxu1 %vm3916_vm2, %v5422_v26  ;;  %17806 = vmatprep.subr.mxu1 %v20381_v50  ;;  %v18867_v26 = vld [vmem:[%s20971_s13 + $0x88] ss:$16 sps:$4 sm:$0xff]  }
 0x653   : > { %17807 = vmatpush3.msra.mxu1 %v21623_v48  ;;  %17808 = vmatprep.mubr.msk.f32.mxu1 %vm20382_vm0, %v20381_v50 }
 0x654   : > { %17816 = vmatprep.subr.mxu1 %v20381_v50  ;;  %v5753_v19 = vpop.permute.xlu1 %5752  ;;  %7308 = vmatprep.subr.bf16.mxu0 %v18872_v46  ;;  %v18933_v46 = vld [vmem:[%s20971_s13 + $0x1e8] ss:$16 sps:$4 sm:$0xff]  }
 0x657   : > { %v19853_v56 = vpop.eup %19852 }
 0x658   : > { %v5587_v27 = vmul.f32 %v19853_v56, %v21851_v18  ;;  %v19855_v28 = vpop.eup %19854 }
 0x659   : > { %v5750_v59 = vmul.f32 %v19855_v28, %v21840_v61 }
 0x65a   : > { %17809 = vmatmul.mubr.msk.f32.vlgmr.msra.gmra.mrb[32].mxu1 %vm3916_vm2, %v5587_v27  ;;  %v18875_v27 = vld [vmem:[%s20971_s13 + $0xac] ss:$16 sps:$4 sm:$0xff]  }
 0x65b   : > { %17817 = vmatpush3.msra.mxu1 %v5753_v19  ;;  %17818 = vmatprep.mubr.msk.f32.mxu1 %vm20382_vm0, %v20381_v50  ;;  %v18870_v19 = vld [vmem:[%s20971_s13 + $0xa0] ss:$16 sps:$4 sm:$0xff]  }
 0x65c   : > { %17826 = vmatprep.subr.mxu1 %v20381_v50  ;;  %7309 = vmatpush1.bf16.msra.mxu0 %v18870_v19  ;;  %v18941_v19 = vld [vmem:[%s20971_s13 + $0x20c] ss:$16 sps:$4 sm:$0xff]  }
 0x65e   : > { %17819 = vmatmul.mubr.msk.f32.vlgmr.msra.gmra.mrb[34].mxu1 %vm3916_vm2, %v5750_v59  ;;  %v18873_v59 = vld [vmem:[%s20971_s13 + $0xa8] ss:$16 sps:$4 sm:$0xff]  }
 0x65f   : > { %17827 = vmatpush3.msra.mxu1 %v21710_v10  ;;  %17828 = vmatprep.mubr.msk.f32.mxu1 %vm20382_vm0, %v20381_v50 }
 0x660   : > { %17836 = vmatprep.subr.mxu1 %v20381_v50 }
 0x685   : > { %v5913_v48 = vpop.xlane.xlu1 %5912 }
 0x686   : > { %19856 = vrcp.f32 %v5913_v48  ;;  %v18878_v48 = vld [vmem:[%s20971_s13 + $0xc4] ss:$16 sps:$4 sm:$0xff]  }
 0x687   : > { %7310 = vmatprep.subr.bf16.mxu0 %v18878_v48 }
 0x689   : > { %v6076_v18 = vpop.xlane.xlu0 %6075 }
 0x68a   : > { %19858 = vrcp.f32 %v6076_v18  ;;  %v18881_v18 = vld [vmem:[%s20971_s13 + $0xcc] ss:$16 sps:$4 sm:$0xff]  }
 0x68d   : > { %v6241_v31 = vpop.xlane.xlu1 %6240 }
 0x68e   : > { %19860 = vrcp.f32 %v6241_v31  ;;  %v18876_v31 = vld [vmem:[%s20971_s13 + $0xc0] ss:$16 sps:$4 sm:$0xff]  }
 0x68f   : > { %7311 = vmatpush1.bf16.msra.mxu0 %v18876_v31 }
 0x690   : > { %v19857_v17 = vpop.eup %19856 }
 0x691   : > { %v5915_v61 = vmul.f32 %v19857_v17, %v21870_v39  ;;  %v6404_v45 = vpop.xlane.xlu0 %6403  ;;  %v6081_v23 = vpop.permute.xlu1 %6080  ;;  %v18879_v17 = vld [vmem:[%s20971_s13 + $0xc8] ss:$16 sps:$4 sm:$0xff]  }
 0x692   : > { %19862 = vrcp.f32 %v6404_v45  ;;  %v18887_v45 = vld [vmem:[%s20971_s13 + $0xec] ss:$16 sps:$4 sm:$0xff]  }
 0x693   : > { %17829 = vmatmul.mubr.msk.f32.vlgmr.msra.gmra.mrb[36].mxu1 %vm3916_vm2, %v5915_v61  ;;  %v18884_v61 = vld [vmem:[%s20971_s13 + $0xe4] ss:$16 sps:$4 sm:$0xff]  }
 0x694   : > { %v19859_v10 = vpop.eup %19858  ;;  %v21954_v34 = vpop.f32.mrb[12].mxu1  ;;  %17837 = vmatpush3.msra.mxu1 %v6081_v23  ;;  %17838 = vmatprep.mubr.msk.f32.mxu1 %vm20382_vm0, %v20381_v50  ;;  %v18882_v23 = vld [vmem:[%s20971_s13 + $0xe0] ss:$16 sps:$4 sm:$0xff]  }
 0x695   : > { %v6078_v38 = vmul.f32 %v19859_v10, %v21874_v22  ;;  %v17710_v3 = vpop.f32.mrb[13].mxu1  ;;  %17846 = vmatprep.subr.mxu1 %v20381_v50  ;;  %v6409_v36 = vpop.permute.xlu0 %6408  ;;  %7312 = vmatprep.subr.bf16.mxu0 %v18884_v61  ;;  %v18885_v10 = vld [vmem:[%s20971_s13 + $0xe8] ss:$16 sps:$4 sm:$0xff]  }
 0x696   : > { %v18893_v3 = vld [vmem:[%s20971_s13 + $0x10c] ss:$16 sps:$4 sm:$0xff]   ;;  %7313 = vmatpush1.bf16.msra.mxu0 %v18882_v23 }
 0x697   : > { %17839 = vmatmul.mubr.msk.f32.vlgmr.msra.gmra.mrb[38].mxu1 %vm3916_vm2, %v6078_v38  ;;  %v18890_v38 = vld [vmem:[%s20971_s13 + $0x104] ss:$16 sps:$4 sm:$0xff]  }
 0x698   : > { %v19861_v39 = vpop.eup %19860  ;;  %17847 = vmatpush3.msra.mxu1 %v21713_v14  ;;  %17848 = vmatprep.mubr.msk.f32.mxu1 %vm20382_vm0, %v20381_v50 }
 0x699   : > { %v6243_v47 = vmul.f32 %v19861_v39, %v21878_v6  ;;  %17856 = vmatprep.subr.mxu1 %v20381_v50  ;;  %v18888_v39 = vld [vmem:[%s20971_s13 + $0x100] ss:$16 sps:$4 sm:$0xff]   ;;  %7314 = vmatprep.subr.bf16.mxu0 %v18890_v38 }
 0x69a   : > { %7315 = vmatpush1.bf16.msra.mxu0 %v18888_v39 }
 0x69b   : > { %17849 = vmatmul.mubr.msk.f32.vlgmr.msra.gmra.mrb[40].mxu1 %vm3916_vm2, %v6243_v47  ;;  %v18891_v47 = vld [vmem:[%s20971_s13 + $0x108] ss:$16 sps:$4 sm:$0xff]  }
 0x69c   : > { %v19863_v22 = vpop.eup %19862  ;;  %17857 = vmatpush3.msra.mxu1 %v6409_v36  ;;  %17858 = vmatprep.mubr.msk.f32.mxu1 %vm20382_vm0, %v20381_v50  ;;  %v18896_v36 = vld [vmem:[%s20971_s13 + $0x124] ss:$16 sps:$4 sm:$0xff]  }
 0x69d   : > { %v6406_v14 = vmul.f32 %v19863_v22, %v21882_v49  ;;  %7384 = vmatprep.subr.bf16.mxu1 %v18845_v0  ;;  %v18899_v22 = vld [vmem:[%s20971_s13 + $0x12c] ss:$16 sps:$4 sm:$0xff]   ;;  %7316 = vmatprep.subr.bf16.mxu0 %v18896_v36  ;;  %v18909_v0 = vld [vmem:[%s20971_s13 + $0x168] ss:$16 sps:$4 sm:$0xff]  }
 0x69f   : > { %17859 = vmatmul.mubr.msk.f32.vlgmr.msra.gmra.mrb[42].mxu1 %vm3916_vm2, %v6406_v14  ;;  %v18894_v14 = vld [vmem:[%s20971_s13 + $0x120] ss:$16 sps:$4 sm:$0xff]  }
 0x6a0   : > { %7385 = vmatpush1.bf16.msra.mxu1 %v18843_v1  ;;  %7317 = vmatpush1.bf16.msra.mxu0 %v18894_v14  ;;  %v18906_v1 = vld [vmem:[%s20971_s13 + $0x160] ss:$16 sps:$4 sm:$0xff]  }
 0x6a1   : > { %7386 = vmatprep.subr.bf16.mxu1 %v18851_v25  ;;  %v18920_v25 = vld [vmem:[%s20971_s13 + $0x1a4] ss:$16 sps:$4 sm:$0xff]  }
 0x6a4   : > { %7387 = vmatpush1.bf16.msra.mxu1 %v18849_v9  ;;  %v18915_v9 = vld [vmem:[%s20971_s13 + $0x188] ss:$16 sps:$4 sm:$0xff]  }
 0x6a5   : > { %7388 = vmatprep.subr.bf16.mxu1 %v18857_v24  ;;  %v18921_v24 = vld [vmem:[%s20971_s13 + $0x1a8] ss:$16 sps:$4 sm:$0xff]  }
 0x6a8   : > { %7389 = vmatpush1.bf16.msra.mxu1 %v18855_v29 }
 0x6a9   : > { %7390 = vmatprep.subr.bf16.mxu1 %v18863_v7 }
 0x6ac   : > { %7391 = vmatpush1.bf16.msra.mxu1 %v18861_v62  ;;  %v18926_v62 = vld [vmem:[%s20971_s13 + $0x1c4] ss:$16 sps:$4 sm:$0xff]  }
 0x6ad   : > { %7392 = vmatprep.subr.bf16.mxu1 %v18869_v41  ;;  %v18929_v41 = vld [vmem:[%s20971_s13 + $0x1cc] ss:$16 sps:$4 sm:$0xff]  }
 0x6b0   : > { %7393 = vmatpush1.bf16.msra.mxu1 %v18867_v26  ;;  %v18930_v26 = vld [vmem:[%s20971_s13 + $0x1e0] ss:$16 sps:$4 sm:$0xff]  }
 0x6b1   : > { %7394 = vmatprep.subr.bf16.mxu1 %v18875_v27 }
 0x6b4   : > { %7395 = vmatpush1.bf16.msra.mxu1 %v18873_v59 }
 0x6b5   : > { %7396 = vmatprep.subr.bf16.mxu1 %v18881_v18 }
 0x6b8   : > { %7397 = vmatpush1.bf16.msra.mxu1 %v18879_v17 }
 0x6b9   : > { %7398 = vmatprep.subr.bf16.mxu1 %v18887_v45 }
 0x6bc   : > { %7399 = vmatpush1.bf16.msra.mxu1 %v18885_v10 }
 0x6bd   : > { %7400 = vmatprep.subr.bf16.mxu1 %v18893_v3 }
 0x6c0   : > { %7401 = vmatpush1.bf16.msra.mxu1 %v18891_v47 }
 0x6c1   : > { %7402 = vmatprep.subr.bf16.mxu1 %v18899_v22 }
 0x6dc   : > { %v21971_v44 = vpop.f32.mrb[14].mxu1 }
 0x6dd   : > { %v17720_v6 = vpop.f32.mrb[15].mxu1 }
 0x6de   : > { %v18897_v6 = vld [vmem:[%s20971_s13 + $0x128] ss:$16 sps:$4 sm:$0xff]  }
 0x6df   : > { %7403 = vmatpush1.bf16.msra.mxu1 %v18897_v6 }
 0x6e0   : > { %v21973_v15 = vpop.f32.mrb[16].mxu1 }
 0x6e1   : > { %v17730_v52 = vpop.f32.mrb[17].mxu1 }
 0x6e2   : > { %v18902_v52 = vld [vmem:[%s20971_s13 + $0x144] ss:$16 sps:$4 sm:$0xff]  }
 0x6e3   : > { %7318 = vmatprep.subr.bf16.mxu0 %v18902_v52 }
 0x6e4   : > { %v21975_v53 = vpop.f32.mrb[18].mxu1 }
 0x6e5   : > { %v17740_v60 = vpop.f32.mrb[19].mxu1 }
 0x6e6   : > { %v18905_v60 = vld [vmem:[%s20971_s13 + $0x14c] ss:$16 sps:$4 sm:$0xff]  }
 0x6e7   : > { %7404 = vmatprep.subr.bf16.mxu1 %v18905_v60 }
 0x6e8   : > { %v21977_v57 = vpop.f32.mrb[20].mxu1 }
 0x6e9   : > { %v17750_v50 = vpop.f32.mrb[21].mxu1 }
 0x6ea   : > { %v18900_v50 = vld [vmem:[%s20971_s13 + $0x140] ss:$16 sps:$4 sm:$0xff]  }
 0x6eb   : > { %7319 = vmatpush1.bf16.msra.mxu0 %v18900_v50 }
 0x6ec   : > { %v21979_v49 = vpop.f32.mrb[22].mxu1  ;;  %7320 = vmatprep.subr.bf16.mxu0 %v18908_v4  ;;  %v18936_v4 = vld [vmem:[%s20971_s13 + $0x200] ss:$16 sps:$4 sm:$0xff]  }
 0x6ed   : > { %v17760_v13 = vpop.f32.mrb[23].mxu1 }
 0x6ee   : > { %v18903_v13 = vld [vmem:[%s20971_s13 + $0x148] ss:$16 sps:$4 sm:$0xff]  }
 0x6ef   : > { %7405 = vmatpush1.bf16.msra.mxu1 %v18903_v13  ;;  %7321 = vmatpush1.bf16.msra.mxu0 %v18906_v1  ;;  %v18944_v1 = vld [vmem:[%s20971_s13 + $0x224] ss:$16 sps:$4 sm:$0xff]  }
 0x6f0   : > { %v21984_v12 = vpop.f32.mrb[24].mxu1  ;;  %7406 = vmatprep.subr.bf16.mxu1 %v18911_v63 }
 0x6f1   : > { %v17770_v16 = vpop.f32.mrb[25].mxu1 }
 0x6f2   : > { %v18914_v16 = vld [vmem:[%s20971_s13 + $0x184] ss:$16 sps:$4 sm:$0xff]  }
 0x6f3   : > { %7407 = vmatpush1.bf16.msra.mxu1 %v18909_v0  ;;  %7322 = vmatprep.subr.bf16.mxu0 %v18914_v16  ;;  %v18947_v0 = vld [vmem:[%s20971_s13 + $0x22c] ss:$16 sps:$4 sm:$0xff]   ;;  %v18942_v16 = vld [vmem:[%s20971_s13 + $0x220] ss:$16 sps:$4 sm:$0xff]  }
 0x6f4   : > { %7408 = vmatprep.subr.bf16.mxu1 %v18917_v30  ;;  %7323 = vmatpush1.bf16.msra.mxu0 %v18912_v11  ;;  %v18953_v30 = vld [vmem:[%s20971_s13 + $0x24c] ss:$16 sps:$4 sm:$0xff]   ;;  %v18948_v11 = vld [vmem:[%s20971_s13 + $0x240] ss:$16 sps:$4 sm:$0xff]  }
 0x6f5   : > { %7324 = vmatprep.subr.bf16.mxu0 %v18920_v25  ;;  %v18956_v25 = vld [vmem:[%s20971_s13 + $0x264] ss:$16 sps:$4 sm:$0xff]  }
 0x6f7   : > { %7409 = vmatpush1.bf16.msra.mxu1 %v18915_v9  ;;  %v18951_v9 = vld [vmem:[%s20971_s13 + $0x248] ss:$16 sps:$4 sm:$0xff]  }
 0x6f8   : > { %7410 = vmatprep.subr.bf16.mxu1 %v18923_v20  ;;  %7325 = vmatpush1.bf16.msra.mxu0 %v18918_v43  ;;  %v18959_v20 = vld [vmem:[%s20971_s13 + $0x26c] ss:$16 sps:$4 sm:$0xff]   ;;  %v18954_v43 = vld [vmem:[%s20971_s13 + $0x260] ss:$16 sps:$4 sm:$0xff]  }
 0x6f9   : > { %7326 = vmatprep.subr.bf16.mxu0 %v18926_v62  ;;  %v18968_v62 = vld [vmem:[%s20971_s13 + $0x2a4] ss:$16 sps:$4 sm:$0xff]  }
 0x6fb   : > { %7411 = vmatpush1.bf16.msra.mxu1 %v18921_v24  ;;  %v18957_v24 = vld [vmem:[%s20971_s13 + $0x268] ss:$16 sps:$4 sm:$0xff]  }
 0x6fc   : > { %v22000_v33 = vpop.f32.mrb[26].mxu1  ;;  %7412 = vmatprep.subr.bf16.mxu1 %v18929_v41  ;;  %7327 = vmatpush1.bf16.msra.mxu0 %v18924_v8  ;;  %v18963_v8 = vld [vmem:[%s20971_s13 + $0x288] ss:$16 sps:$4 sm:$0xff]   ;;  %v18966_v41 = vld [vmem:[%s20971_s13 + $0x2a0] ss:$16 sps:$4 sm:$0xff]  }
 0x6fd   : > { %v17780_v55 = vpop.f32.mrb[27].mxu1 }
 0x6fe   : > { %v18932_v55 = vld [vmem:[%s20971_s13 + $0x1e4] ss:$16 sps:$4 sm:$0xff]  }
 0x6ff   : > { %7413 = vmatpush1.bf16.msra.mxu1 %v18927_v32  ;;  %7328 = vmatprep.subr.bf16.mxu0 %v18932_v55  ;;  %v18971_v32 = vld [vmem:[%s20971_s13 + $0x2ac] ss:$16 sps:$4 sm:$0xff]   ;;  %v18969_v55 = vld [vmem:[%s20971_s13 + $0x2a8] ss:$16 sps:$4 sm:$0xff]  }
 0x700   : > { %v22006_v56 = vpop.f32.mrb[28].mxu1  ;;  %7414 = vmatprep.subr.bf16.mxu1 %v18935_v21  ;;  %7329 = vmatpush1.bf16.msra.mxu0 %v18930_v26  ;;  %v18974_v21 = vld [vmem:[%s20971_s13 + $0x2c4] ss:$16 sps:$4 sm:$0xff]   ;;  %v18977_v26 = vld [vmem:[%s20971_s13 + $0x2cc] ss:$16 sps:$4 sm:$0xff]  }
 0x701   : > { %v17790_v28 = vpop.f32.mrb[29].mxu1 }
 0x702   : > { %v18938_v28 = vld [vmem:[%s20971_s13 + $0x204] ss:$16 sps:$4 sm:$0xff]  }
 0x703   : > { %7415 = vmatpush1.bf16.msra.mxu1 %v18933_v46  ;;  %7341 = vmatprep.subr.bf16.mxu0 %v18938_v28  ;;  %v18972_v46 = vld [vmem:[%s20971_s13 + $0x2c0] ss:$16 sps:$4 sm:$0xff]   ;;  %v18983_v28 = vld [vmem:[%s20971_s13 + $0x2ec] ss:$16 sps:$4 sm:$0xff]  }
 0x704   : > { %7427 = vmatprep.subr.bf16.mxu1 %v18941_v19  ;;  %v18978_v19 = vld [vmem:[%s20971_s13 + $0x2e0] ss:$16 sps:$4 sm:$0xff]  }
 0x725   : > { %v5496_v29 = vpop.f32.mrb[30].mxu1 }
 0x726   : > { %v18249_v42 = vpack.i.bf16 %v5496_v29, %v21971_v44  ;;  %v17800_v7 = vpop.f32.mrb[31].mxu1  ;;  %v18962_v29 = vld [vmem:[%s20971_s13 + $0x284] ss:$16 sps:$4 sm:$0xff]  }
 0x727   : > { %v18960_v7 = vld [vmem:[%s20971_s13 + $0x280] ss:$16 sps:$4 sm:$0xff]  }
 0x72d   : > { %v5657_v27 = vpop.f32.mrb[32].mxu1 }
 0x72e   : > { %v17810_v44 = vpop.f32.mrb[33].mxu1 }
 0x72f   : > { %v18980_v44 = vld [vmem:[%s20971_s13 + $0x2e4] ss:$16 sps:$4 sm:$0xff]  }
 0x731   : > { %v5824_v59 = vpop.f32.mrb[34].mxu1 }
 0x732   : > { %v18244_v48 = vpack.i.bf16 %v5824_v59, %v21975_v53  ;;  %v17820_v18 = vpop.f32.mrb[35].mxu1  ;;  %v18981_v59 = vld [vmem:[%s20971_s13 + $0x2e8] ss:$16 sps:$4 sm:$0xff]  }
 0x733   : > { %v18989_v18 = vld [vmem:[%s20971_s13 + $0x30c] ss:$16 sps:$4 sm:$0xff]  }
 0x734   : > { %18245 = vrot.lane.b32.xlu1 %v18244_v48, %s20383_s23  ;;  %v18986_v48 = vld [vmem:[%s20971_s13 + $0x304] ss:$16 sps:$4 sm:$0xff]  }
 0x738   : > { %18250 = vrot.lane.b32.xlu1 %v18249_v42, %s20383_s23  ;;  %v18965_v42 = vld [vmem:[%s20971_s13 + $0x28c] ss:$16 sps:$4 sm:$0xff]  }
 0x766   : > { %v22057_v31 = vpop.f32.mrb[36].mxu1 }
 0x767   : > { %v17830_v17 = vpop.f32.mrb[37].mxu1 }
 0x768   : > { %v18984_v17 = vld [vmem:[%s20971_s13 + $0x300] ss:$16 sps:$4 sm:$0xff]  }
 0x76a   : > { %v6152_v61 = vpop.f32.mrb[38].mxu1 }
 0x76b   : > { %v18259_v45 = vpack.i.bf16 %v6152_v61, %v21979_v49  ;;  %v17840_v23 = vpop.f32.mrb[39].mxu1  ;;  %v18987_v61 = vld [vmem:[%s20971_s13 + $0x308] ss:$16 sps:$4 sm:$0xff]  }
 0x76c   : > { %v18995_v23 = vld [vmem:[%s20971_s13 + $0x32c] ss:$16 sps:$4 sm:$0xff]  }
 0x76d   : > { %18260 = vrot.lane.b32.xlu1 %v18259_v45, %s20383_s23  ;;  %v18992_v45 = vld [vmem:[%s20971_s13 + $0x324] ss:$16 sps:$4 sm:$0xff]  }
 0x76e   : > { %v22061_v10 = vpop.f32.mrb[40].mxu1 }
 0x76f   : > { %v17850_v38 = vpop.f32.mrb[41].mxu1 }
 0x770   : > { %v18990_v38 = vld [vmem:[%s20971_s13 + $0x320] ss:$16 sps:$4 sm:$0xff]  }
 0x772   : > { %v6480_v3 = vpop.f32.mrb[42].mxu1 }
 0x773   : > { %v18254_v53 = vpack.i.bf16 %v6480_v3, %v22000_v33  ;;  %v17860_v39 = vpop.f32.mrb[43].mxu1  ;;  %v18993_v3 = vld [vmem:[%s20971_s13 + $0x328] ss:$16 sps:$4 sm:$0xff]  }
 0x774   : > { %v19001_v39 = vld [vmem:[%s20971_s13 + $0x34c] ss:$16 sps:$4 sm:$0xff]  }
 0x775   : > { %18255 = vrot.lane.b32.xlu0 %v18254_v53, %s20383_s23  ;;  %v18998_v53 = vld [vmem:[%s20971_s13 + $0x344] ss:$16 sps:$4 sm:$0xff]  }
 0x7a6   : > { %v18246_v47 = vpop.permute.xlu1 %18245 }
 0x7a7   : > { %v18248_v36 = vunpack.i.h.bf16 %v18246_v47  ;;  %v18247_v22 = vunpack.i.l.bf16 %v18246_v47  ;;  %v18996_v47 = vld [vmem:[%s20971_s13 + $0x340] ss:$16 sps:$4 sm:$0xff]  }
 0x7a9   : > { %v5169_v49 = vsel %vm3838_vm1, %v21973_v15, %v18247_v22  ;;  %v6501_v14 = vsel %vm3838_vm1, %v5657_v27, %v18248_v36  ;;  %v18939_v15 = vld [vmem:[%s20971_s13 + $0x208] ss:$16 sps:$4 sm:$0xff]   ;;  %v19004_v22 = vld [vmem:[%s20971_s13 + $0x364] ss:$16 sps:$4 sm:$0xff]  }
 0x7aa   : > { %v18251_v6 = vpop.permute.xlu1 %18250  ;;  %v6505_v52 = vpack.c.bf16 %v6501_v14, %v5169_v49  ;;  %v18975_v27 = vld [vmem:[%s20971_s13 + $0x2c8] ss:$16 sps:$4 sm:$0xff]   ;;  %v19007_v49 = vld [vmem:[%s20971_s13 + $0x36c] ss:$16 sps:$4 sm:$0xff]   ;;  %v19002_v14 = vld [vmem:[%s20971_s13 + $0x360] ss:$16 sps:$4 sm:$0xff]  }
 0x7ab   : > { %v18253_v60 = vunpack.i.h.bf16 %v18251_v6  ;;  %v18252_v33 = vunpack.i.l.bf16 %v18251_v6  ;;  %v18999_v36 = vld [vmem:[%s20971_s13 + $0x348] ss:$16 sps:$4 sm:$0xff]  }
 0x7ac   : > { %7330 = vmatprep.mubr.bf16.mxu0 %v6505_v52  ;;  %7416 = vmatprep.mubr.bf16.mxu1 %v6505_v52  ;;  %v19005_v6 = vld [vmem:[%s20971_s13 + $0x368] ss:$16 sps:$4 sm:$0xff]   ;;  %v19010_v52 = vld [vmem:[%s20971_s13 + $0x384] ss:$16 sps:$4 sm:$0xff]  }
 0x7ad   : > { %v6500_v50 = vsel %vm3838_vm1, %v22006_v56, %v18253_v60  ;;  %v5168_v13 = vsel %vm3838_vm1, %v21954_v34, %v18252_v33  ;;  %v18945_v56 = vld [vmem:[%s20971_s13 + $0x228] ss:$16 sps:$4 sm:$0xff]   ;;  %v18950_v34 = vld [vmem:[%s20971_s13 + $0x244] ss:$16 sps:$4 sm:$0xff]   ;;  %v19013_v60 = vld [vmem:[%s20971_s13 + $0x38c] ss:$16 sps:$4 sm:$0xff]  }
 0x7ae   : > { %v6504_v63 = vpack.c.bf16 %v6500_v50, %v5168_v13  ;;  %v19008_v33 = vld [vmem:[%s20971_s13 + $0x380] ss:$16 sps:$4 sm:$0xff]   ;;  %v19011_v50 = vld [vmem:[%s20971_s13 + $0x388] ss:$16 sps:$4 sm:$0xff]   ;;  %v19016_v13 = vld [vmem:[%s20971_s13 + $0x3a4] ss:$16 sps:$4 sm:$0xff]  }
 0x7b0   : > { %7331 = vmatmul.mubr.bf16.vlgmr.msra.gmra.mrb[44].mxu0 %v6504_v63  ;;  %7417 = vmatmul.mubr.bf16.vlgmr.msra.gmra.mrb[44].mxu1 %v6504_v63 }
 0x7b1   : > { %7342 = vmatpush1.bf16.msra.mxu0 %v18936_v4  ;;  %7428 = vmatpush1.bf16.msra.mxu1 %v18939_v15  ;;  %v19019_v4 = vld [vmem:[%s20971_s13 + $0x3ac] ss:$16 sps:$4 sm:$0xff]  }
 0x7b2   : > { %7343 = vmatprep.subr.bf16.mxu0 %v18944_v1  ;;  %7429 = vmatprep.subr.bf16.mxu1 %v18947_v0  ;;  %v19014_v0 = vld [vmem:[%s20971_s13 + $0x3a0] ss:$16 sps:$4 sm:$0xff]  }
 0x7b5   : > { %7344 = vmatpush1.bf16.msra.mxu0 %v18942_v16  ;;  %7430 = vmatpush1.bf16.msra.mxu1 %v18945_v56  ;;  %v19017_v16 = vld [vmem:[%s20971_s13 + $0x3a8] ss:$16 sps:$4 sm:$0xff]  }
 0x7b6   : > { %7345 = vmatprep.subr.bf16.mxu0 %v18950_v34  ;;  %7431 = vmatprep.subr.bf16.mxu1 %v18953_v30  ;;  %v19022_v30 = vld [vmem:[%s20971_s13 + $0x3c4] ss:$16 sps:$4 sm:$0xff]  }
 0x7b9   : > { %7346 = vmatpush1.bf16.msra.mxu0 %v18948_v11  ;;  %7432 = vmatpush1.bf16.msra.mxu1 %v18951_v9  ;;  %v19025_v11 = vld [vmem:[%s20971_s13 + $0x3cc] ss:$16 sps:$4 sm:$0xff]  }
 0x7ba   : > { %7347 = vmatprep.subr.bf16.mxu0 %v18956_v25  ;;  %7433 = vmatprep.subr.bf16.mxu1 %v18959_v20  ;;  %v19020_v25 = vld [vmem:[%s20971_s13 + $0x3c0] ss:$16 sps:$4 sm:$0xff]   ;;  %v19023_v20 = vld [vmem:[%s20971_s13 + $0x3c8] ss:$16 sps:$4 sm:$0xff]  }
 0x7bd   : > { %7348 = vmatpush1.bf16.msra.mxu0 %v18954_v43  ;;  %7434 = vmatpush1.bf16.msra.mxu1 %v18957_v24  ;;  %v19028_v43 = vld [vmem:[%s20971_s13 + $0x3e4] ss:$16 sps:$4 sm:$0xff]   ;;  %v19031_v24 = vld [vmem:[%s20971_s13 + $0x3ec] ss:$16 sps:$4 sm:$0xff]  }
 0x7be   : > { %7349 = vmatprep.subr.bf16.mxu0 %v18962_v29  ;;  %7435 = vmatprep.subr.bf16.mxu1 %v18965_v42 }
 0x7c1   : > { %7350 = vmatpush1.bf16.msra.mxu0 %v18960_v7  ;;  %7436 = vmatpush1.bf16.msra.mxu1 %v18963_v8  ;;  %v19029_v7 = vld [vmem:[%s20971_s13 + $0x3e8] ss:$16 sps:$4 sm:$0xff]  }
 0x7c2   : > { %7351 = vmatprep.subr.bf16.mxu0 %v18968_v62  ;;  %7437 = vmatprep.subr.bf16.mxu1 %v18971_v32 }
 0x7c5   : > { %7352 = vmatpush1.bf16.msra.mxu0 %v18966_v41  ;;  %7438 = vmatpush1.bf16.msra.mxu1 %v18969_v55  ;;  %v6636_v41 = vld [vmem:[%s749_s0] sm:$0xf] }
 0x7c6   : > { %7353 = vmatprep.subr.bf16.mxu0 %v18974_v21  ;;  %7439 = vmatprep.subr.bf16.mxu1 %v18977_v26  ;;  %v6641_v55 = vrot.slane %v6636_v41, %v21465_v40  ;;  %v6649_v21 = vrot.slane %v6636_v41, %v21481_v54  ;;  %v6645_v26 = vrot.slane %v6636_v41, %v21470_v58 }
 0x7c9   : > { %7354 = vmatpush1.bf16.msra.mxu0 %v18972_v46  ;;  %7440 = vmatpush1.bf16.msra.mxu1 %v18975_v27  ;;  %v6653_v27 = vrot.slane %v6636_v41, %v21504_v5  ;;  %v7627_v41 = vld [vmem:[%s20988_s22 + $0x100] sm:$0xff] }
 0x7ca   : > { %7355 = vmatprep.subr.bf16.mxu0 %v18980_v44  ;;  %7441 = vmatprep.subr.bf16.mxu1 %v18983_v28 }
 0x7cd   : > { %7356 = vmatpush1.bf16.msra.mxu0 %v18978_v19  ;;  %7442 = vmatpush1.bf16.msra.mxu1 %v18981_v59 }
 0x7ce   : > { %7357 = vmatprep.subr.bf16.mxu0 %v18986_v48  ;;  %7443 = vmatprep.subr.bf16.mxu1 %v18989_v18 }
 0x7d1   : > { %7358 = vmatpush1.bf16.msra.mxu0 %v18984_v17  ;;  %7444 = vmatpush1.bf16.msra.mxu1 %v18987_v61  ;;  %v19872_v17 = vld [vmem:[#allocation2] sm:$0xff] }
 0x7d2   : > { %7359 = vmatprep.subr.bf16.mxu0 %v18992_v45  ;;  %7445 = vmatprep.subr.bf16.mxu1 %v18995_v23 }
 0x7d5   : > { %7360 = vmatpush1.bf16.msra.mxu0 %v18990_v38  ;;  %7446 = vmatpush1.bf16.msra.mxu1 %v18993_v3  ;;  %v19873_v3 = vld [vmem:[#allocation2 + $0x8] sm:$0xff] }
 0x7d6   : > { %7361 = vmatprep.subr.bf16.mxu0 %v18998_v53  ;;  %7447 = vmatprep.subr.bf16.mxu1 %v19001_v39 }
 0x7d9   : > { %7362 = vmatpush1.bf16.msra.mxu0 %v18996_v47  ;;  %7448 = vmatpush1.bf16.msra.mxu1 %v18999_v36 }
 0x7da   : > { %7363 = vmatprep.subr.bf16.mxu0 %v19004_v22  ;;  %7449 = vmatprep.subr.bf16.mxu1 %v19007_v49  ;;  %v19874_v22 = vld [vmem:[#allocation2 + $0x20] sm:$0xff] }
 0x7dd   : > { %7364 = vmatpush1.bf16.msra.mxu0 %v19002_v14  ;;  %7450 = vmatpush1.bf16.msra.mxu1 %v19005_v6  ;;  %v19875_v14 = vld [vmem:[#allocation2 + $0x10] sm:$0xff] }
 0x7de   : > { %7365 = vmatprep.subr.bf16.mxu0 %v19010_v52  ;;  %7451 = vmatprep.subr.bf16.mxu1 %v19013_v60  ;;  %v19876_v60 = vld [vmem:[#allocation2 + $0x28] sm:$0xff] }
 0x7df   : > { %v18261_v15 = vpop.permute.xlu1 %18260 }
 0x7e0   : > { %v18263_v63 = vunpack.i.h.bf16 %v18261_v15  ;;  %v18262_v1 = vunpack.i.l.bf16 %v18261_v15  ;;  %v19878_v15 = vld [vmem:[#allocation2 + $0x30] sm:$0xff] }
 0x7e1   : > { %7366 = vmatpush1.bf16.msra.mxu0 %v19008_v33  ;;  %7452 = vmatpush1.bf16.msra.mxu1 %v19011_v50 }
 0x7e2   : > { %v6502_v56 = vsel %vm3838_vm1, %v22057_v31, %v18263_v63  ;;  %v5170_v34 = vsel %vm3838_vm1, %v21977_v57, %v18262_v1  ;;  %7367 = vmatprep.subr.bf16.mxu0 %v19016_v13  ;;  %7453 = vmatprep.subr.bf16.mxu1 %v19019_v4  ;;  %v19026_v57 = vld [vmem:[%s20971_s13 + $0x3e0] ss:$16 sps:$4 sm:$0xff]   ;;  %s23794_s13 = scalar_lea.vmem [#allocation21], %s20969_s4  ;;  %s23795_s4 = sld [smem:[#allocation35_spill]] }
 0x7e3   : > { %v6506_v9 = vpack.c.bf16 %v6502_v56, %v5170_v34  ;;  %v19877_v13 = vld [vmem:[#allocation2 + $0x18] sm:$0xff] }
 0x7e5   : > { %7368 = vmatpush1.bf16.msra.mxu0 %v19014_v0  ;;  %7454 = vmatpush1.bf16.msra.mxu1 %v19017_v16  ;;  %v19879_v16 = vld [vmem:[#allocation2 + $0x38] sm:$0xff] }
 0x7e6   : > { %7369 = vmatprep.subr.bf16.mxu0 %v19022_v30  ;;  %7455 = vmatprep.subr.bf16.mxu1 %v19025_v11 }
 0x7e7   : > { %v18256_v29 = vpop.permute.xlu0 %18255 }
 0x7e8   : > { %v18258_v31 = vunpack.i.h.bf16 %v18256_v29  ;;  %v18257_v42 = vunpack.i.l.bf16 %v18256_v29  ;;  %v7604_v29 = vld [vmem:[%s20988_s22 + $0x48] sm:$0xff]  ;;  %p17551_p0 = scmp.ne.s32.totalorder %s23795_s4, 5 }
 0x7e9   : > { %7370 = vmatpush1.bf16.msra.mxu0 %v19020_v25  ;;  %7456 = vmatpush1.bf16.msra.mxu1 %v19023_v20  ;;  %v7603_v25 = vld [vmem:[%s20988_s22 + $0x40] sm:$0xff]  ;;  %v7596_v20 = vld [vmem:[%s20988_s22 + $0x8] sm:$0xff]  ;;  %vm15612_vm3 = vcmask (!%p17551_p0), 80896  }
 0x7ea   : > { %7371 = vmatprep.subr.bf16.mxu0 %v19028_v43  ;;  %7457 = vmatprep.subr.bf16.mxu1 %v19031_v24  ;;  %v5171_v8 = vsel %vm3838_vm1, %v21984_v12, %v18257_v42  ;;  %v6503_v62 = vsel %vm3838_vm1, %v22061_v10, %v18258_v31  ;;  %v7611_v31 = vld [vmem:[%s20988_s22 + $0x80] sm:$0xff] }
 0x7eb   : > { %v6507_v32 = vpack.c.bf16 %v6503_v62, %v5171_v8  ;;  %v7619_v42 = vld [vmem:[%s20988_s22 + $0xc0] sm:$0xff]  ;;  %v7612_v62 = vld [vmem:[%s20988_s22 + $0x88] sm:$0xff] }
 0x7ec   : > { %v16544_v8 = vcombine.high %v7611_v31, %v7619_v42 }
 0x7ed   : > { %7372 = vmatpush1.bf16.msra.mxu0 %v19026_v57  ;;  %7458 = vmatpush1.bf16.msra.mxu1 %v19029_v7  ;;  %v16529_v57 = vcombine.low %v7596_v20, %v7604_v29  ;;  %v16530_v7 = vcombine.high %v7596_v20, %v7604_v29 }
 0x7ee   : > { %7373 = vmatprep.mubr.bf16.mxu0 %v6507_v32  ;;  %7459 = vmatprep.mubr.bf16.mxu1 %v6507_v32  ;;  %v7620_v32 = vld [vmem:[%s20988_s22 + $0xc8] sm:$0xff] }
 0x7ef   : > { %10837 = vmatprep.subr.bf16.mxu1 %v16530_v7  ;;  %v7716_v7 = vld [vmem:[%s20988_s22 + $0x3c8] sm:$0xff] }
 0x7f0   : > { %7374 = vmatmul.mubr.bf16.vlgmr.msra.gmra.mrb[44].mxu0 %v6506_v9  ;;  %7460 = vmatmul.mubr.bf16.vlgmr.msra.gmra.mrb[44].mxu1 %v6506_v9  ;;  %v7595_v9 = vld [vmem:[%s20988_s22] sm:$0xff] }
 0x7f1   : > { %v16527_v43 = vcombine.low %v7595_v9, %v7603_v25  ;;  %v16528_v24 = vcombine.high %v7595_v9, %v7603_v25  ;;  %10838 = vmatpush1.bf16.msra.mxu1 %v16529_v57  ;;  %v7692_v9 = vld [vmem:[%s20988_s22 + $0x308] sm:$0xff] }
 0x7f2   : > { %v7700_v25 = vld [vmem:[%s20988_s22 + $0x348] sm:$0xff] }
 0x7f3   : > { %10751 = vmatprep.subr.bf16.mxu0 %v16528_v24  ;;  %v16626_v29 = vcombine.high %v7692_v9, %v7700_v25  ;;  %v7708_v57 = vld [vmem:[%s20988_s22 + $0x388] sm:$0xff] }
 0x7f4   : > { %10752 = vmatpush1.bf16.msra.mxu0 %v16527_v43 }
 0x7f5   : > { %10753 = vmatprep.subr.bf16.mxu0 %v16544_v8 }
 0x8c3   : > { %v7375_v46 = vpop.f32.mrb[44].mxu0  ;;  %v7461_v12 = vpop.f32.mrb[44].mxu1 }
 0x8c4   : > { %v17949_v10 = vadd.f32 %v7375_v46, %v6641_v55  ;;  %v7377_v44 = vpop.f32.mrb[45].mxu0  ;;  %v7463_v28 = vpop.f32.mrb[45].mxu1  ;;  %v17953_v19 = vadd.f32 %v7461_v12, %v6649_v21  ;;  %v7636_v46 = vld [vmem:[%s20988_s22 + $0x148] sm:$0xff]  ;;  %v16543_v12 = vcombine.low %v7611_v31, %v7619_v42  ;;  %v7707_v31 = vld [vmem:[%s20988_s22 + $0x380] sm:$0xff] }
 0x8c5   : > { %v17950_v59 = vadd.f32 %v7377_v44, %v6645_v26  ;;  %v7379_v48 = vpop.f32.mrb[46].mxu0  ;;  %v7465_v18 = vpop.f32.mrb[46].mxu1  ;;  %v17954_v39 = vadd.f32 %v7463_v28, %v6653_v27  ;;  %v7643_v28 = vld [vmem:[%s20988_s22 + $0x180] sm:$0xff] }
 0x8c6   : > { %v22148_v61 = vadd.f32 %v19872_v17, %v17949_v10  ;;  %v17951_v45 = vadd.f32 %v7379_v48, %v6641_v55  ;;  %v7381_v23 = vpop.f32.mrb[47].mxu0  ;;  %v7467_v38 = vpop.f32.mrb[47].mxu1  ;;  %v17955_v47 = vadd.f32 %v7465_v18, %v6649_v21  ;;  %v22154_v6 = vadd.f32 %v19875_v14, %v17953_v19  ;;  %v7635_v21 = vld [vmem:[%s20988_s22 + $0x140] sm:$0xff]  ;;  %v7652_v48 = vld [vmem:[%s20988_s22 + $0x1c8] sm:$0xff]  ;;  %10754 = vmatpush1.bf16.msra.mxu0 %v16543_v12 }
 0x8c7   : > { %v22150_v53 = vadd.f32 %v19873_v3, %v17950_v59  ;;  %v17952_v36 = vadd.f32 %v7381_v23, %v6645_v26  ;;  %v17956_v50 = vadd.f32 %v7467_v38, %v6653_v27  ;;  %v22160_v4 = vadd.f32 %v19877_v13, %v17954_v39  ;;  %v7628_v26 = vld [vmem:[%s20988_s22 + $0x108] sm:$0xff]  ;;  %v7651_v19 = vld [vmem:[%s20988_s22 + $0x1c0] sm:$0xff] }
 0x8c8   : > { %v22152_v49 = vadd.f32 %v19874_v22, %v17951_v45  ;;  %v22162_v63 = vadd.f32 %v19878_v15, %v17955_v47  ;;  %v16546_v55 = vcombine.high %v7612_v62, %v7620_v32  ;;  %v16545_v27 = vcombine.low %v7612_v62, %v7620_v32  ;;  %v7644_v59 = vld [vmem:[%s20988_s22 + $0x188] sm:$0xff]  ;;  %v7659_v38 = vld [vmem:[%s20988_s22 + $0x200] sm:$0xff] }
 0x8c9   : > { %v7480_v52 = vadd.f32 %v22150_v53, %v22148_v61  ;;  %v22158_v33 = vadd.f32 %v19876_v60, %v17952_v36  ;;  %v22167_v56 = vadd.f32 %v19879_v16, %v17956_v50  ;;  %v16560_v10 = vcombine.high %v7627_v41, %v7635_v21  ;;  %v7667_v3 = vld [vmem:[%s20988_s22 + $0x240] sm:$0xff]  ;;  %v7660_v39 = vld [vmem:[%s20988_s22 + $0x208] sm:$0xff] }
 0x8ca   : > { %10839 = vmatprep.subr.bf16.mxu1 %v16546_v55  ;;  %v16562_v44 = vcombine.high %v7628_v26, %v7636_v46  ;;  %v16559_v18 = vcombine.low %v7627_v41, %v7635_v21  ;;  %v16561_v17 = vcombine.low %v7628_v26, %v7636_v46  ;;  %v16576_v45 = vcombine.high %v7643_v28, %v7651_v19  ;;  %v7668_v47 = vld [vmem:[%s20988_s22 + $0x248] sm:$0xff]  ;;  %v7675_v60 = vld [vmem:[%s20988_s22 + $0x280] sm:$0xff] }
 0x8cb   : > { %v7485_v1 = vadd.f32 %v22158_v33, %v22152_v49  ;;  %v7481_v0 = vadd.f32 %v7480_v52, %v22154_v6  ;;  %10840 = vmatpush1.bf16.msra.mxu1 %v16545_v27  ;;  %10755 = vmatprep.subr.bf16.mxu0 %v16560_v10  ;;  %v16578_v23 = vcombine.high %v7644_v59, %v7652_v48  ;;  %v7683_v50 = vld [vmem:[%s20988_s22 + $0x2c0] sm:$0xff]  ;;  %v7676_v13 = vld [vmem:[%s20988_s22 + $0x288] sm:$0xff] }
 0x8cc   : > { %10841 = vmatprep.subr.bf16.mxu1 %v16562_v44  ;;  %10756 = vmatpush1.bf16.msra.mxu0 %v16559_v18  ;;  %v16575_v36 = vcombine.low %v7643_v28, %v7651_v19  ;;  %v16577_v22 = vcombine.low %v7644_v59, %v7652_v48  ;;  %v16592_v14 = vcombine.high %v7659_v38, %v7667_v3  ;;  %v7684_v15 = vld [vmem:[%s20988_s22 + $0x2c8] sm:$0xff]  ;;  %v7715_v42 = vld [vmem:[%s20988_s22 + $0x3c0] sm:$0xff] }
 0x8cd   : > { %v7482_v34 = vadd.f32 %v7481_v0, %v22160_v4  ;;  %v7486_v30 = vadd.f32 %v7485_v1, %v22162_v63  ;;  %10757 = vmatprep.subr.bf16.mxu0 %v16576_v45  ;;  %v16594_v52 = vcombine.high %v7660_v39, %v7668_v47  ;;  %v16591_v1 = vcombine.low %v7659_v38, %v7667_v3  ;;  %v7723_v55 = vld [vmem:[%s20988_s22 + $0x400] sm:$0xff]  ;;  %v7724_v26 = vld [vmem:[%s20988_s22 + $0x408] sm:$0xff] }
 0x8ce   : > { %v16593_v0 = vcombine.low %v7660_v39, %v7668_v47  ;;  %v16608_v16 = vcombine.high %v7675_v60, %v7683_v50  ;;  %v16607_v20 = vcombine.low %v7675_v60, %v7683_v50  ;;  %v16609_v43 = vcombine.low %v7676_v13, %v7684_v15  ;;  %v7731_v21 = vld [vmem:[%s20988_s22 + $0x440] sm:$0xff]  ;;  %v7732_v46 = vld [vmem:[%s20988_s22 + $0x448] sm:$0xff] }
 0x8cf   : > { %7483 = vadd.xlane.f32.xlu0 %v7482_v34  ;;  %v7487_v11 = vadd.f32 %v7486_v30, %v22167_v56  ;;  %10842 = vmatpush1.bf16.msra.mxu1 %v16561_v17  ;;  %v16610_v34 = vcombine.high %v7676_v13, %v7684_v15  ;;  %v7691_v30 = vld [vmem:[%s20988_s22 + $0x300] sm:$0xff]  ;;  %v16625_v62 = vcombine.low %v7692_v9, %v7700_v25  ;;  %v7740_v59 = vld [vmem:[%s20988_s22 + $0x488] sm:$0xff] }
 0x8d0   : > { %10843 = vmatprep.subr.bf16.mxu1 %v16578_v23  ;;  %10758 = vmatpush1.bf16.msra.mxu0 %v16575_v36  ;;  %v16640_v32 = vcombine.high %v7707_v31, %v7715_v42  ;;  %v16642_v41 = vcombine.high %v7708_v57, %v7716_v7  ;;  %v16639_v12 = vcombine.low %v7707_v31, %v7715_v42  ;;  %v7739_v28 = vld [vmem:[%s20988_s22 + $0x480] sm:$0xff]  ;;  %v7748_v48 = vld [vmem:[%s20988_s22 + $0x4c8] sm:$0xff] }
 0x8d1   : > { %7488 = vadd.xlane.f32.xlu1 %v7487_v11  ;;  %10759 = vmatprep.subr.bf16.mxu0 %v16592_v14  ;;  %v7699_v11 = vld [vmem:[%s20988_s22 + $0x340] sm:$0xff]  ;;  %v16641_v27 = vcombine.low %v7708_v57, %v7716_v7  ;;  %v16656_v10 = vcombine.high %v7723_v55, %v7731_v21  ;;  %v16658_v44 = vcombine.high %v7724_v26, %v7732_v46  ;;  %v7764_v31 = vld [vmem:[%s20988_s22 + $0x548] sm:$0xff] }
 0x8d2   : > { %v16624_v24 = vcombine.high %v7691_v30, %v7699_v11  ;;  %v16623_v8 = vcombine.low %v7691_v30, %v7699_v11  ;;  %v7747_v19 = vld [vmem:[%s20988_s22 + $0x4c0] sm:$0xff]  ;;  %v16655_v18 = vcombine.low %v7723_v55, %v7731_v21  ;;  %v16657_v17 = vcombine.low %v7724_v26, %v7732_v46  ;;  %v7780_v55 = vld [vmem:[%s20988_s22 + $0x5c8] sm:$0xff] }
 0x8d3   : > { %10844 = vmatpush1.bf16.msra.mxu1 %v16577_v22  ;;  %v16672_v45 = vcombine.high %v7739_v28, %v7747_v19  ;;  %v16674_v23 = vcombine.high %v7740_v59, %v7748_v48  ;;  %v16671_v38 = vcombine.low %v7739_v28, %v7747_v19  ;;  %v16673_v3 = vcombine.low %v7740_v59, %v7748_v48  ;;  %v7796_v19 = vld [vmem:[%s20988_s22 + $0x648] sm:$0xff]  ;;  %v7803_v59 = vld [vmem:[%s20988_s22 + $0x680] sm:$0xff] }
 0x8d4   : > { %10845 = vmatprep.subr.bf16.mxu1 %v16594_v52  ;;  %10760 = vmatpush1.bf16.msra.mxu0 %v16591_v1  ;;  %v7811_v48 = vld [vmem:[%s20988_s22 + $0x6c0] sm:$0xff] }
 0x8d5   : > { %10761 = vmatprep.subr.bf16.mxu0 %v16608_v16 }
 0x8d7   : > { %10846 = vmatpush1.bf16.msra.mxu1 %v16593_v0 }
 0x8d8   : > { %10847 = vmatprep.subr.bf16.mxu1 %v16610_v34  ;;  %10762 = vmatpush1.bf16.msra.mxu0 %v16607_v20 }
 0x8d9   : > { %10763 = vmatprep.subr.bf16.mxu0 %v16624_v24  ;;  %v7763_v24 = vld [vmem:[%s20988_s22 + $0x540] sm:$0xff] }
 0x8db   : > { %10848 = vmatpush1.bf16.msra.mxu1 %v16609_v43  ;;  %v7755_v43 = vld [vmem:[%s20988_s22 + $0x500] sm:$0xff] }
 0x8dc   : > { %10849 = vmatprep.subr.bf16.mxu1 %v16626_v29  ;;  %10764 = vmatpush1.bf16.msra.mxu0 %v16623_v8  ;;  %v16688_v29 = vcombine.high %v7755_v43, %v7763_v24  ;;  %v16687_v42 = vcombine.low %v7755_v43, %v7763_v24  ;;  %v7771_v8 = vld [vmem:[%s20988_s22 + $0x580] sm:$0xff] }
 0x8dd   : > { %10765 = vmatprep.subr.bf16.mxu0 %v16640_v32  ;;  %v7772_v32 = vld [vmem:[%s20988_s22 + $0x588] sm:$0xff]  ;;  %v22277_v43 = vld [vmem:[%s20988_s22 + $0x800] sm:$0xff] }
 0x8de   : > { %v16705_v26 = vcombine.low %v7772_v32, %v7780_v55  ;;  %v16706_v46 = vcombine.high %v7772_v32, %v7780_v55  ;;  %v22280_v24 = vld [vmem:[%s20988_s22 + $0x840] sm:$0xff] }
 0x8df   : > { %10850 = vmatpush1.bf16.msra.mxu1 %v16625_v62  ;;  %v7779_v62 = vld [vmem:[%s20988_s22 + $0x5c0] sm:$0xff] }
 0x8e0   : > { %10851 = vmatprep.subr.bf16.mxu1 %v16642_v41  ;;  %10766 = vmatpush1.bf16.msra.mxu0 %v16639_v12  ;;  %v16704_v41 = vcombine.high %v7771_v8, %v7779_v62  ;;  %v16703_v21 = vcombine.low %v7771_v8, %v7779_v62  ;;  %v7787_v12 = vld [vmem:[%s20988_s22 + $0x600] sm:$0xff] }
 0x8e1   : > { %10767 = vmatprep.subr.bf16.mxu0 %v16656_v10  ;;  %v7788_v10 = vld [vmem:[%s20988_s22 + $0x608] sm:$0xff] }
 0x8e3   : > { %10852 = vmatpush1.bf16.msra.mxu1 %v16641_v27  ;;  %v7795_v27 = vld [vmem:[%s20988_s22 + $0x640] sm:$0xff] }
 0x8e4   : > { %10853 = vmatprep.subr.bf16.mxu1 %v16658_v44  ;;  %10768 = vmatpush1.bf16.msra.mxu0 %v16655_v18  ;;  %v16719_v44 = vcombine.low %v7787_v12, %v7795_v27  ;;  %v16720_v28 = vcombine.high %v7787_v12, %v7795_v27  ;;  %v16721_v18 = vcombine.low %v7788_v10, %v7796_v19 }
 0x8e5   : > { %10769 = vmatprep.subr.bf16.mxu0 %v16672_v45  ;;  %v16736_v45 = vcombine.high %v7803_v59, %v7811_v48 }
 0x8e7   : > { %10854 = vmatpush1.bf16.msra.mxu1 %v16657_v17  ;;  %v16722_v17 = vcombine.high %v7788_v10, %v7796_v19 }
 0x8e8   : > { %10855 = vmatprep.subr.bf16.mxu1 %v16674_v23  ;;  %10770 = vmatpush1.bf16.msra.mxu0 %v16671_v38  ;;  %v7804_v23 = vld [vmem:[%s20988_s22 + $0x688] sm:$0xff] }
 0x8e9   : > { %10771 = vmatprep.subr.bf16.mxu0 %v16688_v29  ;;  %v7812_v38 = vld [vmem:[%s20988_s22 + $0x6c8] sm:$0xff]  ;;  %v16784_v29 = vcombine.high %v22277_v43, %v22280_v24 }
 0x8eb   : > { %10856 = vmatpush1.bf16.msra.mxu1 %v16673_v3  ;;  %v16738_v3 = vcombine.high %v7804_v23, %v7812_v38 }
 0x8ec   : > { %10772 = vmatpush1.bf16.msra.mxu0 %v16687_v42  ;;  %v16783_v42 = vcombine.low %v22277_v43, %v22280_v24  ;;  %v7907_v43 = vld [vmem:[%s20988_s22 + $0x9c0] sm:$0xff]  ;;  %v7900_v24 = vld [vmem:[%s20988_s22 + $0x988] sm:$0xff] }
 0x8ed   : > { %10773 = vmatprep.subr.bf16.mxu0 %v16704_v41 }
 0x8f0   : > { %10774 = vmatpush1.bf16.msra.mxu0 %v16703_v21 }
 0x8f1   : > { %10775 = vmatprep.subr.bf16.mxu0 %v16720_v28 }
 0x8f4   : > { %10776 = vmatpush1.bf16.msra.mxu0 %v16719_v44 }
 0x8f5   : > { %10777 = vmatprep.subr.bf16.mxu0 %v16736_v45 }
 0x95c   : > { %v7484_v39 = vpop.xlane.xlu0 %7483 }
 0x95d   : > { %v7491_v47 = vmul.f32 0.001953125, %v7484_v39  ;;  %v7819_v39 = vld [vmem:[%s20988_s22 + $0x700] sm:$0xff] }
 0x95e   : > { %v7489_v36 = vpop.xlane.xlu1 %7488 }
 0x95f   : > { %v22213_v22 = vsub.f32 %v22148_v61, %v7491_v47  ;;  %v22216_v14 = vsub.f32 %v22150_v53, %v7491_v47  ;;  %v7492_v52 = vmul.f32 0.001953125, %v7489_v36  ;;  %v22219_v60 = vsub.f32 %v22154_v6, %v7491_v47  ;;  %v7820_v36 = vld [vmem:[%s20988_s22 + $0x708] sm:$0xff] }
 0x960   : > { %v22222_v50 = vsub.f32 %v22160_v4, %v7491_v47  ;;  %v7827_v47 = vld [vmem:[%s20988_s22 + $0x740] sm:$0xff] }
 0x961   : > { %v22225_v13 = vsub.f32 %v22152_v49, %v7492_v52  ;;  %v22228_v15 = vsub.f32 %v22158_v33, %v7492_v52  ;;  %v7501_v61 = vmul.f32 %v22213_v22, %v22213_v22  ;;  %v7502_v53 = vmul.f32 %v22216_v14, %v22216_v14 }
 0x962   : > { %v22235_v1 = vsub.f32 %v22162_v63, %v7492_v52  ;;  %v7503_v6 = vmul.f32 %v22219_v60, %v22219_v60  ;;  %v7504_v0 = vmul.f32 %v22222_v50, %v22222_v50  ;;  %v22246_v63 = vsub.f32 %v22167_v56, %v7492_v52  ;;  %v7756_v56 = vld [vmem:[%s20988_s22 + $0x508] sm:$0xff] }
 0x963   : > { %v7509_v4 = vadd.f32 %v7502_v53, %v7501_v61  ;;  %v7505_v49 = vmul.f32 %v22225_v13, %v22225_v13  ;;  %v7506_v33 = vmul.f32 %v22228_v15, %v22228_v15  ;;  %v16689_v57 = vcombine.low %v7756_v56, %v7764_v31  ;;  %v7828_v52 = vld [vmem:[%s20988_s22 + $0x748] sm:$0xff] }
 0x964   : > { %v7507_v34 = vmul.f32 %v22235_v1, %v22235_v1  ;;  %v7508_v25 = vmul.f32 %v22246_v63, %v22246_v63  ;;  %v16690_v7 = vcombine.high %v7756_v56, %v7764_v31  ;;  %v16735_v61 = vcombine.low %v7803_v59, %v7811_v48  ;;  %v22283_v56 = vld [vmem:[%s20988_s22 + $0x808] sm:$0xff] }
 0x965   : > { %v7510_v16 = vadd.f32 %v7509_v4, %v7503_v6  ;;  %v7514_v30 = vadd.f32 %v7506_v33, %v7505_v49  ;;  %v16737_v53 = vcombine.low %v7804_v23, %v7812_v38  ;;  %v16752_v6 = vcombine.high %v7819_v39, %v7827_v47  ;;  %v7835_v49 = vld [vmem:[%s20988_s22 + $0x780] sm:$0xff]  ;;  %v22288_v31 = vld [vmem:[%s20988_s22 + $0x848] sm:$0xff] }
 0x966   : > { %10857 = vmatprep.subr.bf16.mxu1 %v16690_v7  ;;  %v16754_v4 = vcombine.high %v7820_v36, %v7828_v52  ;;  %v7843_v33 = vld [vmem:[%s20988_s22 + $0x7c0] sm:$0xff]  ;;  %10778 = vmatpush1.bf16.msra.mxu0 %v16735_v61  ;;  %v16786_v7 = vcombine.high %v22283_v56, %v22288_v31 }
 0x967   : > { %v7511_v11 = vadd.f32 %v7510_v16, %v7504_v0  ;;  %v7515_v9 = vadd.f32 %v7514_v30, %v7507_v34  ;;  %10858 = vmatpush1.bf16.msra.mxu1 %v16689_v57  ;;  %v7836_v0 = vld [vmem:[%s20988_s22 + $0x788] sm:$0xff]  ;;  %v16751_v34 = vcombine.low %v7819_v39, %v7827_v47  ;;  %10779 = vmatprep.subr.bf16.mxu0 %v16752_v6 }
 0x968   : > { %10859 = vmatprep.subr.bf16.mxu1 %v16706_v46  ;;  %v7844_v16 = vld [vmem:[%s20988_s22 + $0x7c8] sm:$0xff]  ;;  %v16753_v30 = vcombine.low %v7820_v36, %v7828_v52  ;;  %v16785_v57 = vcombine.low %v22283_v56, %v22288_v31  ;;  %v7479_v46 = vld [vmem:[%s767_s24] sm:$0xf]  ;;  %s23796_s24 = sld [smem:[#allocation43_spill]] (!%p17551_p0) }
 0x969   : > { %7512 = vadd.xlane.f32.xlu0 %v7511_v11  ;;  %v7516_v20 = vadd.f32 %v7515_v9, %v7508_v25  ;;  %v16768_v11 = vcombine.high %v7835_v49, %v7843_v33  ;;  %v16770_v9 = vcombine.high %v7836_v0, %v7844_v16  ;;  %v16767_v25 = vcombine.low %v7835_v49, %v7843_v33 }
 0x96a   : > { %10780 = vmatpush1.bf16.msra.mxu0 %v16751_v34  ;;  %v7574_v48 = vrot.slane %v7479_v46, %v21481_v54  ;;  %v7570_v45 = vrot.slane %v7479_v46, %v21470_v58  ;;  %v7566_v23 = vrot.slane %v7479_v46, %v21465_v40  ;;  %v7868_v34 = vld [vmem:[%s20988_s22 + $0x888] sm:$0xff] }
 0x96b   : > { %10860 = vmatpush1.bf16.msra.mxu1 %v16705_v26  ;;  %10781 = vmatprep.subr.bf16.mxu0 %v16768_v11  ;;  %v7478_v26 = vld [vmem:[%s758_s28] sm:$0xf] }
 0x96c   : > { %10861 = vmatprep.subr.bf16.mxu1 %v16722_v17  ;;  %v7545_v12 = vrot.slane %v7478_v26, %v21481_v54  ;;  %v7541_v10 = vrot.slane %v7478_v26, %v21470_v58  ;;  %v7537_v19 = vrot.slane %v7478_v26, %v21465_v40 }
 0x96d   : > { %7517 = vadd.xlane.f32.xlu0 %v7516_v20  ;;  %v16769_v20 = vcombine.low %v7836_v0, %v7844_v16  ;;  %v7875_v16 = vld [vmem:[%s20988_s22 + $0x8c0] sm:$0xff] }
 0x96e   : > { %10782 = vmatpush1.bf16.msra.mxu0 %v16767_v25 }
 0x96f   : > { %10862 = vmatpush1.bf16.msra.mxu1 %v16721_v18  ;;  %10794 = vmatprep.subr.bf16.mxu0 %v16784_v29  ;;  %v7883_v29 = vld [vmem:[%s20988_s22 + $0x900] sm:$0xff] }
 0x970   : > { %10863 = vmatprep.subr.bf16.mxu1 %v16738_v3  ;;  %v7549_v3 = vrot.slane %v7478_v26, %v21504_v5 }
 0x973   : > { %10864 = vmatpush1.bf16.msra.mxu1 %v16737_v53 }
 0x974   : > { %10865 = vmatprep.subr.bf16.mxu1 %v16754_v4 }
 0x977   : > { %10866 = vmatpush1.bf16.msra.mxu1 %v16753_v30  ;;  %v7876_v30 = vld [vmem:[%s20988_s22 + $0x8c8] sm:$0xff] }
 0x978   : > { %10867 = vmatprep.subr.bf16.mxu1 %v16770_v9  ;;  %v16801_v26 = vcombine.low %v7868_v34, %v7876_v30 }
 0x97b   : > { %10868 = vmatpush1.bf16.msra.mxu1 %v16769_v20 }
 0x97c   : > { %10880 = vmatprep.subr.bf16.mxu1 %v16786_v7 }
 0x9f6   : > { %v7513_v8 = vpop.xlane.xlu0 %7512 }
 0x9f7   : > { %v7519_v62 = vmul.f32 0.001953125, %v7513_v8  ;;  %v16802_v8 = vcombine.high %v7868_v34, %v7876_v30  ;;  %v7971_v34 = vld [vmem:[%s20988_s22 + $0xbc0] sm:$0xff]  ;;  %v7964_v30 = vld [vmem:[%s20988_s22 + $0xb88] sm:$0xff] }
 0x9f9   : > { %v7521_v32 = vadd.f32 1e-05, %v7519_v62  ;;  %v7891_v62 = vld [vmem:[%s20988_s22 + $0x940] sm:$0xff] }
 0x9fa   : > { %v7518_v41 = vpop.xlane.xlu0 %7517  ;;  %v16815_v56 = vcombine.low %v7883_v29, %v7891_v62 }
 0x9fb   : > { %19864 = vrsqrt.f32 %v7521_v32  ;;  %v7520_v55 = vmul.f32 0.001953125, %v7518_v41  ;;  %v7884_v32 = vld [vmem:[%s20988_s22 + $0x908] sm:$0xff] }
 0x9fc   : > { %v7892_v41 = vld [vmem:[%s20988_s22 + $0x948] sm:$0xff] }
 0x9fd   : > { %v7522_v21 = vadd.f32 1e-05, %v7520_v55  ;;  %v16817_v31 = vcombine.low %v7884_v32, %v7892_v41 }
 0x9ff   : > { %19866 = vrsqrt.f32 %v7522_v21 }
 0xa05   : > { %v19865_v27 = vpop.eup %19864 }
 0xa06   : > { %v7526_v44 = vmul.f32 %v19865_v27, %v22216_v14  ;;  %v7525_v28 = vmul.f32 %v19865_v27, %v22213_v22  ;;  %v7527_v59 = vmul.f32 %v19865_v27, %v22219_v60  ;;  %v7528_v38 = vmul.f32 %v19865_v27, %v22222_v50  ;;  %v7899_v27 = vld [vmem:[%s20988_s22 + $0x980] sm:$0xff] }
 0xa08   : > { %v7556_v18 = vmul.f32 %v7545_v12, %v7527_v59  ;;  %v7555_v39 = vmul.f32 %v7541_v10, %v7526_v44  ;;  %v7554_v47 = vmul.f32 %v7537_v19, %v7525_v28  ;;  %v7557_v53 = vmul.f32 %v7549_v3, %v7528_v38  ;;  %v7915_v44 = vld [vmem:[%s20988_s22 + $0xa00] sm:$0xff]  ;;  %v7924_v59 = vld [vmem:[%s20988_s22 + $0xa48] sm:$0xff] }
 0xa09   : > { %v19867_v17 = vpop.eup %19866  ;;  %v7923_v28 = vld [vmem:[%s20988_s22 + $0xa40] sm:$0xff] }
 0xa0a   : > { %v7530_v14 = vmul.f32 %v19867_v17, %v22228_v15  ;;  %v7529_v22 = vmul.f32 %v19867_v17, %v22225_v13  ;;  %v7532_v60 = vmul.f32 %v19867_v17, %v22246_v63  ;;  %v7531_v36 = vmul.f32 %v19867_v17, %v22235_v1  ;;  %v7867_v1 = vld [vmem:[%s20988_s22 + $0x880] sm:$0xff] }
 0xa0b   : > { %v22315_v52 = vadd.f32 %v7574_v48, %v7556_v18  ;;  %v7578_v15 = vrot.slane %v7479_v46, %v21504_v5  ;;  %v22318_v49 = vadd.f32 %v7570_v45, %v7555_v39  ;;  %v22322_v33 = vadd.f32 %v7566_v23, %v7554_v47  ;;  %v7939_v38 = vld [vmem:[%s20988_s22 + $0xac0] sm:$0xff] }
 0xa0c   : > { %v7559_v61 = vmul.f32 %v7541_v10, %v7530_v14  ;;  %v7558_v50 = vmul.f32 %v7537_v19, %v7529_v22  ;;  %v7561_v6 = vmul.f32 %v7549_v3, %v7532_v60  ;;  %v7560_v4 = vmul.f32 %v7545_v12, %v7531_v36  ;;  %v7916_v19 = vld [vmem:[%s20988_s22 + $0xa08] sm:$0xff]  ;;  %v7947_v36 = vld [vmem:[%s20988_s22 + $0xb00] sm:$0xff] }
 0xa0d   : > { %v22342_v20 = vadd.f32 %v7578_v15, %v7557_v53  ;;  %v16800_v7 = vcombine.high %v7867_v1, %v7875_v16  ;;  %v16799_v21 = vcombine.low %v7867_v1, %v7875_v16  ;;  %v16816_v46 = vcombine.high %v7883_v29, %v7891_v62  ;;  %v7932_v3 = vld [vmem:[%s20988_s22 + $0xa88] sm:$0xff]  ;;  %v7963_v16 = vld [vmem:[%s20988_s22 + $0xb80] sm:$0xff] }
 0xa0e   : > { %v22320_v13 = vadd.f32 %v7570_v45, %v7559_v61  ;;  %v22324_v63 = vadd.f32 %v7566_v23, %v7558_v50  ;;  %v22327_v0 = vadd.f32 %v7578_v15, %v7561_v6  ;;  %v22332_v11 = vadd.f32 %v7574_v48, %v7560_v4  ;;  %v7931_v23 = vld [vmem:[%s20988_s22 + $0xa80] sm:$0xff]  ;;  %v7940_v14 = vld [vmem:[%s20988_s22 + $0xac8] sm:$0xff] }
 0xa0f   : > { %v16818_v12 = vcombine.high %v7884_v32, %v7892_v41  ;;  %v16831_v48 = vcombine.low %v7899_v27, %v7907_v43  ;;  %v16848_v17 = vcombine.high %v7915_v44, %v7923_v28  ;;  %v16850_v45 = vcombine.high %v7916_v19, %v7924_v59  ;;  %v7955_v61 = vld [vmem:[%s20988_s22 + $0xb40] sm:$0xff]  ;;  %v7948_v50 = vld [vmem:[%s20988_s22 + $0xb08] sm:$0xff] }
 0xa10   : > { %v22336_v9 = vpack.c.bf16 %v22320_v13, %v22318_v49  ;;  %v22340_v25 = vpack.c.bf16 %v22324_v63, %v22322_v33  ;;  %v22354_v55 = vpack.c.bf16 %v22327_v0, %v22342_v20  ;;  %v16847_v39 = vcombine.low %v7915_v44, %v7923_v28  ;;  %v7956_v53 = vld [vmem:[%s20988_s22 + $0xb48] sm:$0xff]  ;;  %v7979_v41 = vld [vmem:[%s20988_s22 + $0xc00] sm:$0xff] }
 0xa11   : > { %v16849_v22 = vcombine.low %v7916_v19, %v7924_v59  ;;  %v16864_v47 = vcombine.high %v7931_v23, %v7939_v38  ;;  %v16866_v60 = vcombine.high %v7932_v3, %v7940_v14  ;;  %v16863_v6 = vcombine.low %v7931_v23, %v7939_v38  ;;  %v7972_v29 = vld [vmem:[%s20988_s22 + $0xbc8] sm:$0xff]  ;;  %v8011_v59 = vld [vmem:[%s20988_s22 + $0xd00] sm:$0xff] }
 0xa12   : > { %10783 = vmatprep.mubr.bf16.mxu0 %v22336_v9  ;;  %10869 = vmatprep.mubr.bf16.mxu1 %v22336_v9  ;;  %v16865_v15 = vcombine.low %v7932_v3, %v7940_v14  ;;  %v16880_v4 = vcombine.high %v7947_v36, %v7955_v61  ;;  %v16882_v1 = vcombine.high %v7948_v50, %v7956_v53  ;;  %v8027_v14 = vld [vmem:[%s20988_s22 + $0xd80] sm:$0xff] }
 0xa13   : > { %10784 = vmatmul.mubr.bf16.vlgmr.msra.gmra.mrb[48].mxu0 %v22340_v25  ;;  %10870 = vmatmul.mubr.bf16.vlgmr.msra.gmra.mrb[48].mxu1 %v22340_v25  ;;  %v16896_v62 = vcombine.high %v7963_v16, %v7971_v34  ;;  %v16898_v32 = vcombine.high %v7964_v30, %v7972_v29 }
 0xa14   : > { %10795 = vmatpush1.bf16.msra.mxu0 %v16783_v42  ;;  %10881 = vmatpush1.bf16.msra.mxu1 %v16785_v57  ;;  %v7908_v42 = vld [vmem:[%s20988_s22 + $0x9c8] sm:$0xff]  ;;  %v16832_v57 = vcombine.high %v7899_v27, %v7907_v43  ;;  %v16897_v27 = vcombine.low %v7964_v30, %v7972_v29  ;;  %v8059_v29 = vld [vmem:[%s20988_s22 + $0xe80] sm:$0xff] }
 0xa15   : > { %10826 = vmatprep.mubr.bf16.mxu0 %v22354_v55  ;;  %10912 = vmatprep.mubr.bf16.mxu1 %v22354_v55  ;;  %v16834_v10 = vcombine.high %v7900_v24, %v7908_v42  ;;  %v16833_v18 = vcombine.low %v7900_v24, %v7908_v42  ;;  %v7995_v42 = vld [vmem:[%s20988_s22 + $0xc80] sm:$0xff] }
 0xa16   : > { %10796 = vmatprep.subr.bf16.mxu0 %v16800_v7  ;;  %10882 = vmatprep.subr.bf16.mxu1 %v16802_v8  ;;  %v16879_v7 = vcombine.low %v7947_v36, %v7955_v61  ;;  %v16881_v8 = vcombine.low %v7948_v50, %v7956_v53  ;;  %v8043_v53 = vld [vmem:[%s20988_s22 + $0xe00] sm:$0xff] }
 0xa18   : > { %10797 = vmatpush1.bf16.msra.mxu0 %v16799_v21  ;;  %10883 = vmatpush1.bf16.msra.mxu1 %v16801_v26  ;;  %v7987_v21 = vld [vmem:[%s20988_s22 + $0xc40] sm:$0xff]  ;;  %v7980_v26 = vld [vmem:[%s20988_s22 + $0xc08] sm:$0xff] }
 0xa19   : > { %10798 = vmatprep.subr.bf16.mxu0 %v16816_v46  ;;  %10884 = vmatprep.subr.bf16.mxu1 %v16818_v12  ;;  %v7988_v46 = vld [vmem:[%s20988_s22 + $0xc48] sm:$0xff]  ;;  %v16895_v12 = vcombine.low %v7963_v16, %v7971_v34  ;;  %v16912_v43 = vcombine.high %v7979_v41, %v7987_v21 }
 0xa1a   : > { %v16914_v24 = vcombine.high %v7980_v26, %v7988_v46  ;;  %v16913_v44 = vcombine.low %v7980_v26, %v7988_v46  ;;  %v8075_v46 = vld [vmem:[%s20988_s22 + $0xf00] sm:$0xff] }
 0xa1c   : > { %10799 = vmatpush1.bf16.msra.mxu0 %v16815_v56  ;;  %10885 = vmatpush1.bf16.msra.mxu1 %v16817_v31  ;;  %v8003_v56 = vld [vmem:[%s20988_s22 + $0xcc0] sm:$0xff]  ;;  %v7996_v31 = vld [vmem:[%s20988_s22 + $0xc88] sm:$0xff] }
 0xa1d   : > { %10800 = vmatprep.subr.bf16.mxu0 %v16832_v57  ;;  %10886 = vmatprep.subr.bf16.mxu1 %v16834_v10  ;;  %v8004_v57 = vld [vmem:[%s20988_s22 + $0xcc8] sm:$0xff]  ;;  %v16911_v10 = vcombine.low %v7979_v41, %v7987_v21  ;;  %v16928_v28 = vcombine.high %v7995_v42, %v8003_v56 }
 0xa1e   : > { %v16930_v19 = vcombine.high %v7996_v31, %v8004_v57  ;;  %v16929_v23 = vcombine.low %v7996_v31, %v8004_v57  ;;  %v8091_v57 = vld [vmem:[%s20988_s22 + $0xf80] sm:$0xff] }
 0xa20   : > { %10801 = vmatpush1.bf16.msra.mxu0 %v16831_v48  ;;  %10887 = vmatpush1.bf16.msra.mxu1 %v16833_v18  ;;  %v8019_v48 = vld [vmem:[%s20988_s22 + $0xd40] sm:$0xff]  ;;  %v8012_v18 = vld [vmem:[%s20988_s22 + $0xd08] sm:$0xff] }
 0xa21   : > { %10802 = vmatprep.subr.bf16.mxu0 %v16848_v17  ;;  %10888 = vmatprep.subr.bf16.mxu1 %v16850_v45  ;;  %v8020_v17 = vld [vmem:[%s20988_s22 + $0xd48] sm:$0xff]  ;;  %v16927_v45 = vcombine.low %v7995_v42, %v8003_v56  ;;  %v16944_v38 = vcombine.high %v8011_v59, %v8019_v48 }
 0xa22   : > { %v16946_v3 = vcombine.high %v8012_v18, %v8020_v17  ;;  %v16945_v36 = vcombine.low %v8012_v18, %v8020_v17  ;;  %v7597_v17 = vld [vmem:[%s20988_s22 + $0x10] sm:$0xff] }
 0xa24   : > { %10803 = vmatpush1.bf16.msra.mxu0 %v16847_v39  ;;  %10889 = vmatpush1.bf16.msra.mxu1 %v16849_v22  ;;  %v8035_v39 = vld [vmem:[%s20988_s22 + $0xdc0] sm:$0xff]  ;;  %v8028_v22 = vld [vmem:[%s20988_s22 + $0xd88] sm:$0xff] }
 0xa25   : > { %10804 = vmatprep.subr.bf16.mxu0 %v16864_v47  ;;  %10890 = vmatprep.subr.bf16.mxu1 %v16866_v60  ;;  %v8036_v47 = vld [vmem:[%s20988_s22 + $0xdc8] sm:$0xff]  ;;  %v16943_v60 = vcombine.low %v8011_v59, %v8019_v48  ;;  %v16960_v61 = vcombine.high %v8027_v14, %v8035_v39 }
 0xa26   : > { %v16962_v50 = vcombine.high %v8028_v22, %v8036_v47  ;;  %v16961_v16 = vcombine.low %v8028_v22, %v8036_v47  ;;  %v7613_v47 = vld [vmem:[%s20988_s22 + $0x90] sm:$0xff] }
 0xa28   : > { %10805 = vmatpush1.bf16.msra.mxu0 %v16863_v6  ;;  %10891 = vmatpush1.bf16.msra.mxu1 %v16865_v15  ;;  %v8051_v6 = vld [vmem:[%s20988_s22 + $0xe40] sm:$0xff]  ;;  %v8044_v15 = vld [vmem:[%s20988_s22 + $0xe08] sm:$0xff] }
 0xa29   : > { %10806 = vmatprep.subr.bf16.mxu0 %v16880_v4  ;;  %10892 = vmatprep.subr.bf16.mxu1 %v16882_v1  ;;  %v8052_v4 = vld [vmem:[%s20988_s22 + $0xe48] sm:$0xff]  ;;  %v16959_v1 = vcombine.low %v8027_v14, %v8035_v39  ;;  %v16976_v34 = vcombine.high %v8043_v53, %v8051_v6 }
 0xa2a   : > { %v16978_v30 = vcombine.high %v8044_v15, %v8052_v4  ;;  %v16977_v41 = vcombine.low %v8044_v15, %v8052_v4 }
 0xa2c   : > { %10807 = vmatpush1.bf16.msra.mxu0 %v16879_v7  ;;  %10893 = vmatpush1.bf16.msra.mxu1 %v16881_v8  ;;  %v8067_v7 = vld [vmem:[%s20988_s22 + $0xec0] sm:$0xff]  ;;  %v8060_v8 = vld [vmem:[%s20988_s22 + $0xe88] sm:$0xff] }
 0xa2d   : > { %10808 = vmatprep.subr.bf16.mxu0 %v16896_v62  ;;  %10894 = vmatprep.subr.bf16.mxu1 %v16898_v32  ;;  %v8068_v62 = vld [vmem:[%s20988_s22 + $0xec8] sm:$0xff]  ;;  %v16975_v32 = vcombine.low %v8043_v53, %v8051_v6  ;;  %v16992_v21 = vcombine.high %v8059_v29, %v8067_v7  ;;  %v22426_v53 = vpack.c.bf16 %v22332_v11, %v22315_v52 }
 0xa2e   : > { %v16994_v26 = vcombine.high %v8060_v8, %v8068_v62  ;;  %v16993_v42 = vcombine.low %v8060_v8, %v8068_v62 }
 0xa30   : > { %10809 = vmatpush1.bf16.msra.mxu0 %v16895_v12  ;;  %10895 = vmatpush1.bf16.msra.mxu1 %v16897_v27  ;;  %v8083_v12 = vld [vmem:[%s20988_s22 + $0xf40] sm:$0xff]  ;;  %v8076_v27 = vld [vmem:[%s20988_s22 + $0xf08] sm:$0xff] }
 0xa31   : > { %10810 = vmatprep.subr.bf16.mxu0 %v16912_v43  ;;  %10896 = vmatprep.subr.bf16.mxu1 %v16914_v24  ;;  %v8084_v43 = vld [vmem:[%s20988_s22 + $0xf48] sm:$0xff]  ;;  %v16991_v24 = vcombine.low %v8059_v29, %v8067_v7  ;;  %v17008_v56 = vcombine.high %v8075_v46, %v8083_v12 }
 0xa32   : > { %v17010_v31 = vcombine.high %v8076_v27, %v8084_v43  ;;  %v17009_v59 = vcombine.low %v8076_v27, %v8084_v43 }
 0xa34   : > { %10811 = vmatpush1.bf16.msra.mxu0 %v16911_v10  ;;  %10897 = vmatpush1.bf16.msra.mxu1 %v16913_v44  ;;  %v8099_v10 = vld [vmem:[%s20988_s22 + $0xfc0] sm:$0xff]  ;;  %v8092_v44 = vld [vmem:[%s20988_s22 + $0xf88] sm:$0xff] }
 0xa35   : > { %10812 = vmatprep.subr.bf16.mxu0 %v16928_v28  ;;  %10898 = vmatprep.subr.bf16.mxu1 %v16930_v19  ;;  %v8100_v28 = vld [vmem:[%s20988_s22 + $0xfc8] sm:$0xff]  ;;  %v17007_v19 = vcombine.low %v8075_v46, %v8083_v12  ;;  %v17024_v48 = vcombine.high %v8091_v57, %v8099_v10 }
 0xa36   : > { %v17026_v18 = vcombine.high %v8092_v44, %v8100_v28  ;;  %v17025_v14 = vcombine.low %v8092_v44, %v8100_v28 }
 0xa38   : > { %10813 = vmatpush1.bf16.msra.mxu0 %v16927_v45  ;;  %10899 = vmatpush1.bf16.msra.mxu1 %v16929_v23  ;;  %v7605_v45 = vld [vmem:[%s20988_s22 + $0x50] sm:$0xff]  ;;  %v7598_v23 = vld [vmem:[%s20988_s22 + $0x18] sm:$0xff] }
 0xa39   : > { %10814 = vmatprep.subr.bf16.mxu0 %v16944_v38  ;;  %10900 = vmatprep.subr.bf16.mxu1 %v16946_v3  ;;  %v7606_v38 = vld [vmem:[%s20988_s22 + $0x58] sm:$0xff]  ;;  %v17023_v3 = vcombine.low %v8091_v57, %v8099_v10  ;;  %v16532_v39 = vcombine.high %v7597_v17, %v7605_v45 }
 0xa3a   : > { %v16534_v22 = vcombine.high %v7598_v23, %v7606_v38  ;;  %v16533_v6 = vcombine.low %v7598_v23, %v7606_v38 }
 0xa3c   : > { %10815 = vmatpush1.bf16.msra.mxu0 %v16943_v60  ;;  %10901 = vmatpush1.bf16.msra.mxu1 %v16945_v36  ;;  %v7621_v60 = vld [vmem:[%s20988_s22 + $0xd0] sm:$0xff]  ;;  %v7614_v36 = vld [vmem:[%s20988_s22 + $0x98] sm:$0xff] }
 0xa3d   : > { %10816 = vmatprep.subr.bf16.mxu0 %v16960_v61  ;;  %10902 = vmatprep.subr.bf16.mxu1 %v16962_v50  ;;  %v7622_v61 = vld [vmem:[%s20988_s22 + $0xd8] sm:$0xff]  ;;  %v16531_v50 = vcombine.low %v7597_v17, %v7605_v45  ;;  %v16548_v15 = vcombine.high %v7613_v47, %v7621_v60  ;;  %v16547_v29 = vcombine.low %v7613_v47, %v7621_v60 }
 0xa3e   : > { %v16550_v4 = vcombine.high %v7614_v36, %v7622_v61  ;;  %v16549_v7 = vcombine.low %v7614_v36, %v7622_v61 }
 0xa40   : > { %10817 = vmatpush1.bf16.msra.mxu0 %v16959_v1  ;;  %10903 = vmatpush1.bf16.msra.mxu1 %v16961_v16  ;;  %v7629_v1 = vld [vmem:[%s20988_s22 + $0x110] sm:$0xff] }
 0xa41   : > { %10818 = vmatprep.subr.bf16.mxu0 %v16976_v34  ;;  %10904 = vmatprep.subr.bf16.mxu1 %v16978_v30  ;;  %v7637_v16 = vld [vmem:[%s20988_s22 + $0x150] sm:$0xff]  ;;  %v7630_v34 = vld [vmem:[%s20988_s22 + $0x118] sm:$0xff] }
 0xa42   : > { %v7638_v30 = vld [vmem:[%s20988_s22 + $0x158] sm:$0xff]  ;;  %v16564_v8 = vcombine.high %v7629_v1, %v7637_v16  ;;  %v16563_v46 = vcombine.low %v7629_v1, %v7637_v16 }
 0xa43   : > { %v16566_v62 = vcombine.high %v7630_v34, %v7638_v30  ;;  %v16565_v12 = vcombine.low %v7630_v34, %v7638_v30 }
 0xa44   : > { %10819 = vmatpush1.bf16.msra.mxu0 %v16975_v32  ;;  %10905 = vmatpush1.bf16.msra.mxu1 %v16977_v41  ;;  %v7645_v32 = vld [vmem:[%s20988_s22 + $0x190] sm:$0xff] }
 0xa45   : > { %10820 = vmatprep.subr.bf16.mxu0 %v16992_v21  ;;  %10906 = vmatprep.subr.bf16.mxu1 %v16994_v26  ;;  %v7653_v41 = vld [vmem:[%s20988_s22 + $0x1d0] sm:$0xff]  ;;  %v7646_v21 = vld [vmem:[%s20988_s22 + $0x198] sm:$0xff] }
 0xa46   : > { %v7654_v26 = vld [vmem:[%s20988_s22 + $0x1d8] sm:$0xff]  ;;  %v16580_v27 = vcombine.high %v7645_v32, %v7653_v41  ;;  %v16579_v57 = vcombine.low %v7645_v32, %v7653_v41 }
 0xa47   : > { %v16582_v43 = vcombine.high %v7646_v21, %v7654_v26  ;;  %v16581_v10 = vcombine.low %v7646_v21, %v7654_v26 }
 0xa48   : > { %10821 = vmatpush1.bf16.msra.mxu0 %v16991_v24  ;;  %10907 = vmatpush1.bf16.msra.mxu1 %v16993_v42  ;;  %v7661_v24 = vld [vmem:[%s20988_s22 + $0x210] sm:$0xff] }
 0xa49   : > { %10822 = vmatprep.subr.bf16.mxu0 %v17008_v56  ;;  %10908 = vmatprep.subr.bf16.mxu1 %v17010_v31  ;;  %v7669_v42 = vld [vmem:[%s20988_s22 + $0x250] sm:$0xff]  ;;  %v7662_v56 = vld [vmem:[%s20988_s22 + $0x218] sm:$0xff] }
 0xa4a   : > { %v7670_v31 = vld [vmem:[%s20988_s22 + $0x258] sm:$0xff]  ;;  %v16596_v44 = vcombine.high %v7661_v24, %v7669_v42  ;;  %v16595_v17 = vcombine.low %v7661_v24, %v7669_v42 }
 0xa4b   : > { %v16598_v28 = vcombine.high %v7662_v56, %v7670_v31  ;;  %v16597_v45 = vcombine.low %v7662_v56, %v7670_v31 }
 0xa4c   : > { %10823 = vmatpush1.bf16.msra.mxu0 %v17007_v19  ;;  %10909 = vmatpush1.bf16.msra.mxu1 %v17009_v59  ;;  %v7677_v19 = vld [vmem:[%s20988_s22 + $0x290] sm:$0xff] }
 0xa4d   : > { %10824 = vmatprep.subr.bf16.mxu0 %v17024_v48  ;;  %10910 = vmatprep.subr.bf16.mxu1 %v17026_v18  ;;  %v7685_v59 = vld [vmem:[%s20988_s22 + $0x2d0] sm:$0xff]  ;;  %v7678_v48 = vld [vmem:[%s20988_s22 + $0x298] sm:$0xff] }
 0xa4e   : > { %v7686_v18 = vld [vmem:[%s20988_s22 + $0x2d8] sm:$0xff]  ;;  %v16612_v23 = vcombine.high %v7677_v19, %v7685_v59  ;;  %v16611_v47 = vcombine.low %v7677_v19, %v7685_v59 }
 0xa4f   : > { %v16614_v38 = vcombine.high %v7678_v48, %v7686_v18  ;;  %v16613_v60 = vcombine.low %v7678_v48, %v7686_v18 }
 0xa50   : > { %10825 = vmatpush1.bf16.msra.mxu0 %v17023_v3  ;;  %10911 = vmatpush1.bf16.msra.mxu1 %v17025_v14  ;;  %v7693_v3 = vld [vmem:[%s20988_s22 + $0x310] sm:$0xff] }
 0xa51   : > { %10923 = vmatprep.subr.bf16.mxu0 %v16532_v39  ;;  %11009 = vmatprep.subr.bf16.mxu1 %v16534_v22  ;;  %v7701_v14 = vld [vmem:[%s20988_s22 + $0x350] sm:$0xff]  ;;  %v7694_v39 = vld [vmem:[%s20988_s22 + $0x318] sm:$0xff] }
 0xa52   : > { %v7702_v22 = vld [vmem:[%s20988_s22 + $0x358] sm:$0xff]  ;;  %v16628_v36 = vcombine.high %v7693_v3, %v7701_v14  ;;  %v16627_v1 = vcombine.low %v7693_v3, %v7701_v14 }
 0xa53   : > { %10827 = vmatmul.mubr.bf16.vlgmr.msra.gmra.mrb[48].mxu0 %v22426_v53  ;;  %10913 = vmatmul.mubr.bf16.vlgmr.msra.gmra.mrb[48].mxu1 %v22426_v53  ;;  %v16630_v61 = vcombine.high %v7694_v39, %v7702_v22  ;;  %v16629_v16 = vcombine.low %v7694_v39, %v7702_v22 }
 0xa54   : > { %10924 = vmatpush1.bf16.msra.mxu0 %v16531_v50  ;;  %10955 = vmatprep.mubr.bf16.mxu0 %v22336_v9  ;;  %v7709_v50 = vld [vmem:[%s20988_s22 + $0x390] sm:$0xff] }
 0xa55   : > { %11010 = vmatpush1.bf16.msra.mxu1 %v16533_v6  ;;  %11041 = vmatprep.mubr.bf16.mxu1 %v22336_v9  ;;  %v7717_v6 = vld [vmem:[%s20988_s22 + $0x3d0] sm:$0xff] }
 0xa56   : > { %10925 = vmatprep.subr.bf16.mxu0 %v16548_v15  ;;  %11011 = vmatprep.subr.bf16.mxu1 %v16550_v4  ;;  %v7710_v15 = vld [vmem:[%s20988_s22 + $0x398] sm:$0xff]  ;;  %v16644_v34 = vcombine.high %v7709_v50, %v7717_v6  ;;  %v16643_v32 = vcombine.low %v7709_v50, %v7717_v6 }
 0xa57   : > { %v7718_v4 = vld [vmem:[%s20988_s22 + $0x3d8] sm:$0xff] }
 0xa58   : > { %10926 = vmatpush1.bf16.msra.mxu0 %v16547_v29  ;;  %v16646_v30 = vcombine.high %v7710_v15, %v7718_v4  ;;  %v7725_v29 = vld [vmem:[%s20988_s22 + $0x410] sm:$0xff]  ;;  %v16645_v41 = vcombine.low %v7710_v15, %v7718_v4 }
 0xa59   : > { %11012 = vmatpush1.bf16.msra.mxu1 %v16549_v7  ;;  %10927 = vmatprep.subr.bf16.mxu0 %v16564_v8  ;;  %v7733_v7 = vld [vmem:[%s20988_s22 + $0x450] sm:$0xff]  ;;  %v7726_v8 = vld [vmem:[%s20988_s22 + $0x418] sm:$0xff] }
 0xa5a   : > { %11013 = vmatprep.subr.bf16.mxu1 %v16566_v62  ;;  %v7734_v62 = vld [vmem:[%s20988_s22 + $0x458] sm:$0xff]  ;;  %v16660_v21 = vcombine.high %v7725_v29, %v7733_v7  ;;  %v16659_v24 = vcombine.low %v7725_v29, %v7733_v7 }
 0xa5b   : > { %v16662_v26 = vcombine.high %v7726_v8, %v7734_v62  ;;  %v16661_v42 = vcombine.low %v7726_v8, %v7734_v62 }
 0xa5c   : > { %10928 = vmatpush1.bf16.msra.mxu0 %v16563_v46  ;;  %v7741_v46 = vld [vmem:[%s20988_s22 + $0x490] sm:$0xff] }
 0xa5d   : > { %11014 = vmatpush1.bf16.msra.mxu1 %v16565_v12  ;;  %10929 = vmatprep.subr.bf16.mxu0 %v16580_v27  ;;  %v7749_v12 = vld [vmem:[%s20988_s22 + $0x4d0] sm:$0xff]  ;;  %v7742_v27 = vld [vmem:[%s20988_s22 + $0x498] sm:$0xff] }
 0xa5e   : > { %11015 = vmatprep.subr.bf16.mxu1 %v16582_v43  ;;  %v7750_v43 = vld [vmem:[%s20988_s22 + $0x4d8] sm:$0xff]  ;;  %v16676_v56 = vcombine.high %v7741_v46, %v7749_v12  ;;  %v16675_v19 = vcombine.low %v7741_v46, %v7749_v12 }
 0xa5f   : > { %v16678_v31 = vcombine.high %v7742_v27, %v7750_v43  ;;  %v16677_v59 = vcombine.low %v7742_v27, %v7750_v43 }
 0xa60   : > { %10930 = vmatpush1.bf16.msra.mxu0 %v16579_v57  ;;  %v7757_v57 = vld [vmem:[%s20988_s22 + $0x510] sm:$0xff] }
 0xa61   : > { %11016 = vmatpush1.bf16.msra.mxu1 %v16581_v10  ;;  %10931 = vmatprep.subr.bf16.mxu0 %v16596_v44  ;;  %v7765_v10 = vld [vmem:[%s20988_s22 + $0x550] sm:$0xff]  ;;  %v7758_v44 = vld [vmem:[%s20988_s22 + $0x518] sm:$0xff] }
 0xa62   : > { %11017 = vmatprep.subr.bf16.mxu1 %v16598_v28  ;;  %v7766_v28 = vld [vmem:[%s20988_s22 + $0x558] sm:$0xff]  ;;  %v16692_v48 = vcombine.high %v7757_v57, %v7765_v10  ;;  %v16691_v3 = vcombine.low %v7757_v57, %v7765_v10 }
 0xa63   : > { %v16694_v18 = vcombine.high %v7758_v44, %v7766_v28  ;;  %v16693_v14 = vcombine.low %v7758_v44, %v7766_v28 }
 0xa64   : > { %10932 = vmatpush1.bf16.msra.mxu0 %v16595_v17  ;;  %v7773_v17 = vld [vmem:[%s20988_s22 + $0x590] sm:$0xff] }
 0xa65   : > { %11018 = vmatpush1.bf16.msra.mxu1 %v16597_v45  ;;  %10933 = vmatprep.subr.bf16.mxu0 %v16612_v23  ;;  %v7781_v45 = vld [vmem:[%s20988_s22 + $0x5d0] sm:$0xff]  ;;  %v7774_v23 = vld [vmem:[%s20988_s22 + $0x598] sm:$0xff] }
 0xa66   : > { %11019 = vmatprep.subr.bf16.mxu1 %v16614_v38  ;;  %v7782_v38 = vld [vmem:[%s20988_s22 + $0x5d8] sm:$0xff]  ;;  %v16708_v39 = vcombine.high %v7773_v17, %v7781_v45  ;;  %v16707_v50 = vcombine.low %v7773_v17, %v7781_v45 }
 0xa67   : > { %v16710_v22 = vcombine.high %v7774_v23, %v7782_v38  ;;  %v16709_v6 = vcombine.low %v7774_v23, %v7782_v38 }
 0xa68   : > { %10934 = vmatpush1.bf16.msra.mxu0 %v16611_v47  ;;  %v7789_v47 = vld [vmem:[%s20988_s22 + $0x610] sm:$0xff] }
 0xa69   : > { %11020 = vmatpush1.bf16.msra.mxu1 %v16613_v60  ;;  %10935 = vmatprep.subr.bf16.mxu0 %v16628_v36  ;;  %v7797_v60 = vld [vmem:[%s20988_s22 + $0x650] sm:$0xff]  ;;  %v7790_v36 = vld [vmem:[%s20988_s22 + $0x618] sm:$0xff] }
 0xa6a   : > { %11021 = vmatprep.subr.bf16.mxu1 %v16630_v61  ;;  %v7798_v61 = vld [vmem:[%s20988_s22 + $0x658] sm:$0xff]  ;;  %v16724_v15 = vcombine.high %v7789_v47, %v7797_v60  ;;  %v16723_v29 = vcombine.low %v7789_v47, %v7797_v60 }
 0xa6b   : > { %v16726_v4 = vcombine.high %v7790_v36, %v7798_v61  ;;  %v16725_v7 = vcombine.low %v7790_v36, %v7798_v61  ;;  %v7878_v47 = vld [vmem:[%s20988_s22 + $0x8d8] sm:$0xff]  ;;  %v7885_v61 = vld [vmem:[%s20988_s22 + $0x910] sm:$0xff] }
 0xa6c   : > { %10936 = vmatpush1.bf16.msra.mxu0 %v16627_v1  ;;  %v7805_v1 = vld [vmem:[%s20988_s22 + $0x690] sm:$0xff] }
 0xa6d   : > { %11022 = vmatpush1.bf16.msra.mxu1 %v16629_v16  ;;  %10937 = vmatprep.subr.bf16.mxu0 %v16644_v34  ;;  %v7813_v16 = vld [vmem:[%s20988_s22 + $0x6d0] sm:$0xff]  ;;  %v7806_v34 = vld [vmem:[%s20988_s22 + $0x698] sm:$0xff] }
 0xa6e   : > { %11023 = vmatprep.subr.bf16.mxu1 %v16646_v30  ;;  %v7814_v30 = vld [vmem:[%s20988_s22 + $0x6d8] sm:$0xff]  ;;  %v16740_v8 = vcombine.high %v7805_v1, %v7813_v16  ;;  %v16739_v46 = vcombine.low %v7805_v1, %v7813_v16 }
 0xa6f   : > { %v16742_v62 = vcombine.high %v7806_v34, %v7814_v30  ;;  %v16741_v12 = vcombine.low %v7806_v34, %v7814_v30 }
 0xa70   : > { %10938 = vmatpush1.bf16.msra.mxu0 %v16643_v32  ;;  %v7821_v32 = vld [vmem:[%s20988_s22 + $0x710] sm:$0xff] }
 0xa71   : > { %11024 = vmatpush1.bf16.msra.mxu1 %v16645_v41  ;;  %10939 = vmatprep.subr.bf16.mxu0 %v16660_v21  ;;  %v7829_v41 = vld [vmem:[%s20988_s22 + $0x750] sm:$0xff]  ;;  %v7822_v21 = vld [vmem:[%s20988_s22 + $0x718] sm:$0xff] }
 0xa72   : > { %11025 = vmatprep.subr.bf16.mxu1 %v16662_v26  ;;  %v7830_v26 = vld [vmem:[%s20988_s22 + $0x758] sm:$0xff]  ;;  %v16756_v27 = vcombine.high %v7821_v32, %v7829_v41  ;;  %v16755_v57 = vcombine.low %v7821_v32, %v7829_v41 }
 0xa73   : > { %v16758_v43 = vcombine.high %v7822_v21, %v7830_v26  ;;  %v16757_v10 = vcombine.low %v7822_v21, %v7830_v26 }
 0xa74   : > { %10940 = vmatpush1.bf16.msra.mxu0 %v16659_v24  ;;  %v7837_v24 = vld [vmem:[%s20988_s22 + $0x790] sm:$0xff] }
 0xa75   : > { %11026 = vmatpush1.bf16.msra.mxu1 %v16661_v42  ;;  %10941 = vmatprep.subr.bf16.mxu0 %v16676_v56  ;;  %v7845_v42 = vld [vmem:[%s20988_s22 + $0x7d0] sm:$0xff]  ;;  %v7838_v56 = vld [vmem:[%s20988_s22 + $0x798] sm:$0xff] }
 0xa76   : > { %11027 = vmatprep.subr.bf16.mxu1 %v16678_v31  ;;  %v7846_v31 = vld [vmem:[%s20988_s22 + $0x7d8] sm:$0xff]  ;;  %v16772_v44 = vcombine.high %v7837_v24, %v7845_v42  ;;  %v16771_v17 = vcombine.low %v7837_v24, %v7845_v42 }
 0xa77   : > { %v16774_v28 = vcombine.high %v7838_v56, %v7846_v31  ;;  %v16773_v45 = vcombine.low %v7838_v56, %v7846_v31 }
 0xa78   : > { %10942 = vmatpush1.bf16.msra.mxu0 %v16675_v19  ;;  %v7853_v19 = vld [vmem:[%s20988_s22 + $0x810] sm:$0xff] }
 0xa79   : > { %11028 = vmatpush1.bf16.msra.mxu1 %v16677_v59  ;;  %10943 = vmatprep.subr.bf16.mxu0 %v16692_v48  ;;  %v7861_v59 = vld [vmem:[%s20988_s22 + $0x850] sm:$0xff]  ;;  %v7854_v48 = vld [vmem:[%s20988_s22 + $0x818] sm:$0xff] }
 0xa7a   : > { %11029 = vmatprep.subr.bf16.mxu1 %v16694_v18  ;;  %v7862_v18 = vld [vmem:[%s20988_s22 + $0x858] sm:$0xff]  ;;  %v16788_v23 = vcombine.high %v7853_v19, %v7861_v59 }
 0xa7b   : > { %v16790_v38 = vcombine.high %v7854_v48, %v7862_v18  ;;  %v16789_v60 = vcombine.low %v7854_v48, %v7862_v18 }
 0xa7c   : > { %10944 = vmatpush1.bf16.msra.mxu0 %v16691_v3  ;;  %v7869_v3 = vld [vmem:[%s20988_s22 + $0x890] sm:$0xff] }
 0xa7d   : > { %11030 = vmatpush1.bf16.msra.mxu1 %v16693_v14  ;;  %10945 = vmatprep.subr.bf16.mxu0 %v16708_v39  ;;  %v7877_v14 = vld [vmem:[%s20988_s22 + $0x8d0] sm:$0xff]  ;;  %v16787_v39 = vcombine.low %v7853_v19, %v7861_v59 }
 0xa7e   : > { %11031 = vmatprep.subr.bf16.mxu1 %v16710_v22  ;;  %v7870_v22 = vld [vmem:[%s20988_s22 + $0x898] sm:$0xff]  ;;  %v16804_v36 = vcombine.high %v7869_v3, %v7877_v14  ;;  %v16803_v1 = vcombine.low %v7869_v3, %v7877_v14 }
 0xa7f   : > { %v16805_v16 = vcombine.low %v7870_v22, %v7878_v47 }
 0xa80   : > { %10946 = vmatpush1.bf16.msra.mxu0 %v16707_v50  ;;  %v7893_v50 = vld [vmem:[%s20988_s22 + $0x950] sm:$0xff] }
 0xa81   : > { %11032 = vmatpush1.bf16.msra.mxu1 %v16709_v6  ;;  %10947 = vmatprep.subr.bf16.mxu0 %v16724_v15  ;;  %v16806_v6 = vcombine.high %v7870_v22, %v7878_v47  ;;  %v7886_v15 = vld [vmem:[%s20988_s22 + $0x918] sm:$0xff]  ;;  %v16820_v34 = vcombine.high %v7885_v61, %v7893_v50  ;;  %v16819_v32 = vcombine.low %v7885_v61, %v7893_v50  ;;  %v7965_v47 = vld [vmem:[%s20988_s22 + $0xb90] sm:$0xff] }
 0xa82   : > { %11033 = vmatprep.subr.bf16.mxu1 %v16726_v4  ;;  %v7894_v4 = vld [vmem:[%s20988_s22 + $0x958] sm:$0xff] }
 0xa83   : > { %v16822_v30 = vcombine.high %v7886_v15, %v7894_v4  ;;  %v16821_v41 = vcombine.low %v7886_v15, %v7894_v4  ;;  %v7974_v61 = vld [vmem:[%s20988_s22 + $0xbd8] sm:$0xff] }
 0xa84   : > { %10948 = vmatpush1.bf16.msra.mxu0 %v16723_v29  ;;  %v7901_v29 = vld [vmem:[%s20988_s22 + $0x990] sm:$0xff] }
 0xa85   : > { %11034 = vmatpush1.bf16.msra.mxu1 %v16725_v7  ;;  %10949 = vmatprep.subr.bf16.mxu0 %v16740_v8  ;;  %v7909_v7 = vld [vmem:[%s20988_s22 + $0x9d0] sm:$0xff]  ;;  %v7902_v8 = vld [vmem:[%s20988_s22 + $0x998] sm:$0xff] }
 0xa86   : > { %11035 = vmatprep.subr.bf16.mxu1 %v16742_v62  ;;  %v7910_v62 = vld [vmem:[%s20988_s22 + $0x9d8] sm:$0xff]  ;;  %v16836_v21 = vcombine.high %v7901_v29, %v7909_v7  ;;  %v16835_v24 = vcombine.low %v7901_v29, %v7909_v7 }
 0xa87   : > { %v16838_v26 = vcombine.high %v7902_v8, %v7910_v62  ;;  %v16837_v42 = vcombine.low %v7902_v8, %v7910_v62 }
 0xa88   : > { %10950 = vmatpush1.bf16.msra.mxu0 %v16739_v46  ;;  %v7917_v46 = vld [vmem:[%s20988_s22 + $0xa10] sm:$0xff] }
 0xa89   : > { %11036 = vmatpush1.bf16.msra.mxu1 %v16741_v12  ;;  %10951 = vmatprep.subr.bf16.mxu0 %v16756_v27  ;;  %v7925_v12 = vld [vmem:[%s20988_s22 + $0xa50] sm:$0xff]  ;;  %v7918_v27 = vld [vmem:[%s20988_s22 + $0xa18] sm:$0xff] }
 0xa8a   : > { %11037 = vmatprep.subr.bf16.mxu1 %v16758_v43  ;;  %v7926_v43 = vld [vmem:[%s20988_s22 + $0xa58] sm:$0xff]  ;;  %v16852_v56 = vcombine.high %v7917_v46, %v7925_v12  ;;  %v16851_v19 = vcombine.low %v7917_v46, %v7925_v12 }
 0xa8b   : > { %v16854_v31 = vcombine.high %v7918_v27, %v7926_v43  ;;  %v16853_v59 = vcombine.low %v7918_v27, %v7926_v43 }
 0xa8c   : > { %10952 = vmatpush1.bf16.msra.mxu0 %v16755_v57  ;;  %v7933_v57 = vld [vmem:[%s20988_s22 + $0xa90] sm:$0xff] }
 0xa8d   : > { %11038 = vmatpush1.bf16.msra.mxu1 %v16757_v10  ;;  %10953 = vmatprep.subr.bf16.mxu0 %v16772_v44  ;;  %v7941_v10 = vld [vmem:[%s20988_s22 + $0xad0] sm:$0xff]  ;;  %v7934_v44 = vld [vmem:[%s20988_s22 + $0xa98] sm:$0xff] }
 0xa8e   : > { %11039 = vmatprep.subr.bf16.mxu1 %v16774_v28  ;;  %v7942_v28 = vld [vmem:[%s20988_s22 + $0xad8] sm:$0xff]  ;;  %v16868_v48 = vcombine.high %v7933_v57, %v7941_v10  ;;  %v16867_v3 = vcombine.low %v7933_v57, %v7941_v10 }
 0xa8f   : > { %v16870_v18 = vcombine.high %v7934_v44, %v7942_v28  ;;  %v16869_v14 = vcombine.low %v7934_v44, %v7942_v28 }
 0xa90   : > { %10954 = vmatpush1.bf16.msra.mxu0 %v16771_v17  ;;  %v7949_v17 = vld [vmem:[%s20988_s22 + $0xb10] sm:$0xff] }
 0xa91   : > { %11040 = vmatpush1.bf16.msra.mxu1 %v16773_v45  ;;  %10966 = vmatprep.subr.bf16.mxu0 %v16788_v23  ;;  %v7957_v45 = vld [vmem:[%s20988_s22 + $0xb50] sm:$0xff]  ;;  %v7950_v23 = vld [vmem:[%s20988_s22 + $0xb18] sm:$0xff] }
 0xa92   : > { %11052 = vmatprep.subr.bf16.mxu1 %v16790_v38  ;;  %v7958_v38 = vld [vmem:[%s20988_s22 + $0xb58] sm:$0xff]  ;;  %v16883_v50 = vcombine.low %v7949_v17, %v7957_v45 }
 0xa93   : > { %10956 = vmatmul.mubr.bf16.vlgmr.msra.gmra.mrb[52].mxu0 %v22340_v25  ;;  %v16886_v22 = vcombine.high %v7950_v23, %v7958_v38 }
 0xa94   : > { %11042 = vmatmul.mubr.bf16.vlgmr.msra.gmra.mrb[52].mxu1 %v22340_v25  ;;  %10967 = vmatpush1.bf16.msra.mxu0 %v16787_v39  ;;  %v16884_v39 = vcombine.high %v7949_v17, %v7957_v45 }
 0xa95   : > { %10998 = vmatprep.mubr.bf16.mxu0 %v22354_v55  ;;  %11053 = vmatpush1.bf16.msra.mxu1 %v16789_v60  ;;  %v7973_v60 = vld [vmem:[%s20988_s22 + $0xbd0] sm:$0xff] }
 0xa96   : > { %11084 = vmatprep.mubr.bf16.mxu1 %v22354_v55  ;;  %10968 = vmatprep.subr.bf16.mxu0 %v16804_v36  ;;  %v7966_v36 = vld [vmem:[%s20988_s22 + $0xb98] sm:$0xff]  ;;  %v16900_v15 = vcombine.high %v7965_v47, %v7973_v60  ;;  %v16899_v29 = vcombine.low %v7965_v47, %v7973_v60 }
 0xa97   : > { %11054 = vmatprep.subr.bf16.mxu1 %v16806_v6  ;;  %v16885_v6 = vcombine.low %v7950_v23, %v7958_v38  ;;  %v16902_v4 = vcombine.high %v7966_v36, %v7974_v61  ;;  %v16901_v7 = vcombine.low %v7966_v36, %v7974_v61 }
 0xa98   : > { %10969 = vmatpush1.bf16.msra.mxu0 %v16803_v1  ;;  %v7981_v1 = vld [vmem:[%s20988_s22 + $0xc10] sm:$0xff] }
 0xa99   : > { %11055 = vmatpush1.bf16.msra.mxu1 %v16805_v16  ;;  %10970 = vmatprep.subr.bf16.mxu0 %v16820_v34  ;;  %v7989_v16 = vld [vmem:[%s20988_s22 + $0xc50] sm:$0xff]  ;;  %v7982_v34 = vld [vmem:[%s20988_s22 + $0xc18] sm:$0xff] }
 0xa9a   : > { %11056 = vmatprep.subr.bf16.mxu1 %v16822_v30  ;;  %v7990_v30 = vld [vmem:[%s20988_s22 + $0xc58] sm:$0xff]  ;;  %v16916_v8 = vcombine.high %v7981_v1, %v7989_v16  ;;  %v16915_v46 = vcombine.low %v7981_v1, %v7989_v16 }
 0xa9b   : > { %v16918_v62 = vcombine.high %v7982_v34, %v7990_v30  ;;  %v16917_v12 = vcombine.low %v7982_v34, %v7990_v30 }
 0xa9c   : > { %10971 = vmatpush1.bf16.msra.mxu0 %v16819_v32  ;;  %v7997_v32 = vld [vmem:[%s20988_s22 + $0xc90] sm:$0xff] }
 0xa9d   : > { %11057 = vmatpush1.bf16.msra.mxu1 %v16821_v41  ;;  %10972 = vmatprep.subr.bf16.mxu0 %v16836_v21  ;;  %v8005_v41 = vld [vmem:[%s20988_s22 + $0xcd0] sm:$0xff]  ;;  %v7998_v21 = vld [vmem:[%s20988_s22 + $0xc98] sm:$0xff] }
 0xa9e   : > { %11058 = vmatprep.subr.bf16.mxu1 %v16838_v26  ;;  %v8006_v26 = vld [vmem:[%s20988_s22 + $0xcd8] sm:$0xff]  ;;  %v16932_v27 = vcombine.high %v7997_v32, %v8005_v41  ;;  %v16931_v57 = vcombine.low %v7997_v32, %v8005_v41 }
 0xa9f   : > { %v16934_v43 = vcombine.high %v7998_v21, %v8006_v26  ;;  %v16933_v10 = vcombine.low %v7998_v21, %v8006_v26 }
 0xaa0   : > { %10973 = vmatpush1.bf16.msra.mxu0 %v16835_v24  ;;  %v8013_v24 = vld [vmem:[%s20988_s22 + $0xd10] sm:$0xff] }
 0xaa1   : > { %11059 = vmatpush1.bf16.msra.mxu1 %v16837_v42  ;;  %10974 = vmatprep.subr.bf16.mxu0 %v16852_v56  ;;  %v8021_v42 = vld [vmem:[%s20988_s22 + $0xd50] sm:$0xff]  ;;  %v8014_v56 = vld [vmem:[%s20988_s22 + $0xd18] sm:$0xff] }
 0xaa2   : > { %11060 = vmatprep.subr.bf16.mxu1 %v16854_v31  ;;  %v8022_v31 = vld [vmem:[%s20988_s22 + $0xd58] sm:$0xff]  ;;  %v16948_v44 = vcombine.high %v8013_v24, %v8021_v42  ;;  %v16947_v17 = vcombine.low %v8013_v24, %v8021_v42 }
 0xaa3   : > { %v16950_v28 = vcombine.high %v8014_v56, %v8022_v31  ;;  %v16949_v45 = vcombine.low %v8014_v56, %v8022_v31 }
 0xaa4   : > { %10975 = vmatpush1.bf16.msra.mxu0 %v16851_v19  ;;  %v8029_v19 = vld [vmem:[%s20988_s22 + $0xd90] sm:$0xff] }
 0xaa5   : > { %11061 = vmatpush1.bf16.msra.mxu1 %v16853_v59  ;;  %10976 = vmatprep.subr.bf16.mxu0 %v16868_v48  ;;  %v8037_v59 = vld [vmem:[%s20988_s22 + $0xdd0] sm:$0xff]  ;;  %v8030_v48 = vld [vmem:[%s20988_s22 + $0xd98] sm:$0xff] }
 0xaa6   : > { %11062 = vmatprep.subr.bf16.mxu1 %v16870_v18  ;;  %v8038_v18 = vld [vmem:[%s20988_s22 + $0xdd8] sm:$0xff]  ;;  %v16964_v23 = vcombine.high %v8029_v19, %v8037_v59  ;;  %v16963_v47 = vcombine.low %v8029_v19, %v8037_v59 }
 0xaa7   : > { %v16966_v38 = vcombine.high %v8030_v48, %v8038_v18  ;;  %v16965_v60 = vcombine.low %v8030_v48, %v8038_v18 }
 0xaa8   : > { %10977 = vmatpush1.bf16.msra.mxu0 %v16867_v3  ;;  %v8045_v3 = vld [vmem:[%s20988_s22 + $0xe10] sm:$0xff] }
 0xaa9   : > { %11063 = vmatpush1.bf16.msra.mxu1 %v16869_v14  ;;  %10978 = vmatprep.subr.bf16.mxu0 %v16884_v39  ;;  %v8053_v14 = vld [vmem:[%s20988_s22 + $0xe50] sm:$0xff]  ;;  %v8046_v39 = vld [vmem:[%s20988_s22 + $0xe18] sm:$0xff] }
 0xaaa   : > { %11064 = vmatprep.subr.bf16.mxu1 %v16886_v22  ;;  %v8054_v22 = vld [vmem:[%s20988_s22 + $0xe58] sm:$0xff]  ;;  %v16980_v36 = vcombine.high %v8045_v3, %v8053_v14  ;;  %v16979_v1 = vcombine.low %v8045_v3, %v8053_v14  ;;  %v7624_v3 = vld [vmem:[%s20988_s22 + $0xe8] sm:$0xff] }
 0xaab   : > { %v16982_v61 = vcombine.high %v8046_v39, %v8054_v22  ;;  %v16981_v16 = vcombine.low %v8046_v39, %v8054_v22  ;;  %v7631_v22 = vld [vmem:[%s20988_s22 + $0x120] sm:$0xff] }
 0xaac   : > { %10979 = vmatpush1.bf16.msra.mxu0 %v16883_v50  ;;  %v8061_v50 = vld [vmem:[%s20988_s22 + $0xe90] sm:$0xff] }
 0xaad   : > { %11065 = vmatpush1.bf16.msra.mxu1 %v16885_v6  ;;  %10980 = vmatprep.subr.bf16.mxu0 %v16900_v15  ;;  %v8069_v6 = vld [vmem:[%s20988_s22 + $0xed0] sm:$0xff]  ;;  %v8062_v15 = vld [vmem:[%s20988_s22 + $0xe98] sm:$0xff] }
 0xaae   : > { %11066 = vmatprep.subr.bf16.mxu1 %v16902_v4  ;;  %v8070_v4 = vld [vmem:[%s20988_s22 + $0xed8] sm:$0xff]  ;;  %v16996_v34 = vcombine.high %v8061_v50, %v8069_v6  ;;  %v16995_v32 = vcombine.low %v8061_v50, %v8069_v6 }
 0xaaf   : > { %v16998_v30 = vcombine.high %v8062_v15, %v8070_v4  ;;  %v16997_v41 = vcombine.low %v8062_v15, %v8070_v4 }
 0xab0   : > { %10981 = vmatpush1.bf16.msra.mxu0 %v16899_v29  ;;  %v8077_v29 = vld [vmem:[%s20988_s22 + $0xf10] sm:$0xff] }
 0xab1   : > { %11067 = vmatpush1.bf16.msra.mxu1 %v16901_v7  ;;  %10982 = vmatprep.subr.bf16.mxu0 %v16916_v8  ;;  %v8085_v7 = vld [vmem:[%s20988_s22 + $0xf50] sm:$0xff]  ;;  %v8078_v8 = vld [vmem:[%s20988_s22 + $0xf18] sm:$0xff] }
 0xab2   : > { %11068 = vmatprep.subr.bf16.mxu1 %v16918_v62  ;;  %v8086_v62 = vld [vmem:[%s20988_s22 + $0xf58] sm:$0xff]  ;;  %v17012_v21 = vcombine.high %v8077_v29, %v8085_v7  ;;  %v17011_v24 = vcombine.low %v8077_v29, %v8085_v7 }
 0xab3   : > { %v17014_v26 = vcombine.high %v8078_v8, %v8086_v62  ;;  %v17013_v42 = vcombine.low %v8078_v8, %v8086_v62 }
 0xab4   : > { %10983 = vmatpush1.bf16.msra.mxu0 %v16915_v46  ;;  %v8093_v46 = vld [vmem:[%s20988_s22 + $0xf90] sm:$0xff] }
 0xab5   : > { %11069 = vmatpush1.bf16.msra.mxu1 %v16917_v12  ;;  %10984 = vmatprep.subr.bf16.mxu0 %v16932_v27  ;;  %v8101_v12 = vld [vmem:[%s20988_s22 + $0xfd0] sm:$0xff]  ;;  %v8094_v27 = vld [vmem:[%s20988_s22 + $0xf98] sm:$0xff] }
 0xab6   : > { %11070 = vmatprep.subr.bf16.mxu1 %v16934_v43  ;;  %v8102_v43 = vld [vmem:[%s20988_s22 + $0xfd8] sm:$0xff]  ;;  %v17028_v56 = vcombine.high %v8093_v46, %v8101_v12  ;;  %v17027_v19 = vcombine.low %v8093_v46, %v8101_v12 }
 0xab7   : > { %v17030_v31 = vcombine.high %v8094_v27, %v8102_v43  ;;  %v17029_v59 = vcombine.low %v8094_v27, %v8102_v43 }
 0xab8   : > { %10985 = vmatpush1.bf16.msra.mxu0 %v16931_v57  ;;  %v7599_v57 = vld [vmem:[%s20988_s22 + $0x20] sm:$0xff] }
 0xab9   : > { %11071 = vmatpush1.bf16.msra.mxu1 %v16933_v10  ;;  %10986 = vmatprep.subr.bf16.mxu0 %v16948_v44  ;;  %v7607_v10 = vld [vmem:[%s20988_s22 + $0x60] sm:$0xff]  ;;  %v7600_v44 = vld [vmem:[%s20988_s22 + $0x28] sm:$0xff] }
 0xaba   : > { %11072 = vmatprep.subr.bf16.mxu1 %v16950_v28  ;;  %v7608_v28 = vld [vmem:[%s20988_s22 + $0x68] sm:$0xff]  ;;  %v16536_v48 = vcombine.high %v7599_v57, %v7607_v10 }
 0xabb   : > { %v16538_v18 = vcombine.high %v7600_v44, %v7608_v28  ;;  %v16537_v14 = vcombine.low %v7600_v44, %v7608_v28 }
 0xabc   : > { %10987 = vmatpush1.bf16.msra.mxu0 %v16947_v17  ;;  %v7615_v17 = vld [vmem:[%s20988_s22 + $0xa0] sm:$0xff] }
 0xabd   : > { %11073 = vmatpush1.bf16.msra.mxu1 %v16949_v45  ;;  %10988 = vmatprep.subr.bf16.mxu0 %v16964_v23  ;;  %v7623_v45 = vld [vmem:[%s20988_s22 + $0xe0] sm:$0xff]  ;;  %v16535_v23 = vcombine.low %v7599_v57, %v7607_v10 }
 0xabe   : > { %11074 = vmatprep.subr.bf16.mxu1 %v16966_v38  ;;  %v7616_v38 = vld [vmem:[%s20988_s22 + $0xa8] sm:$0xff]  ;;  %v16552_v39 = vcombine.high %v7615_v17, %v7623_v45  ;;  %v16551_v50 = vcombine.low %v7615_v17, %v7623_v45 }
 0xabf   : > { %v16553_v6 = vcombine.low %v7616_v38, %v7624_v3 }
 0xac0   : > { %10989 = vmatpush1.bf16.msra.mxu0 %v16963_v47  ;;  %v7639_v47 = vld [vmem:[%s20988_s22 + $0x160] sm:$0xff] }
 0xac1   : > { %11075 = vmatpush1.bf16.msra.mxu1 %v16965_v60  ;;  %10990 = vmatprep.subr.bf16.mxu0 %v16980_v36  ;;  %v16554_v60 = vcombine.high %v7616_v38, %v7624_v3  ;;  %v7632_v36 = vld [vmem:[%s20988_s22 + $0x128] sm:$0xff]  ;;  %v16568_v15 = vcombine.high %v7631_v22, %v7639_v47  ;;  %v16567_v29 = vcombine.low %v7631_v22, %v7639_v47  ;;  %v7711_v3 = vld [vmem:[%s20988_s22 + $0x3a0] sm:$0xff] }
 0xac2   : > { %11076 = vmatprep.subr.bf16.mxu1 %v16982_v61  ;;  %v7640_v61 = vld [vmem:[%s20988_s22 + $0x168] sm:$0xff] }
 0xac3   : > { %v16570_v4 = vcombine.high %v7632_v36, %v7640_v61  ;;  %v16569_v7 = vcombine.low %v7632_v36, %v7640_v61  ;;  %v7720_v22 = vld [vmem:[%s20988_s22 + $0x3e8] sm:$0xff] }
 0xac4   : > { %10991 = vmatpush1.bf16.msra.mxu0 %v16979_v1  ;;  %v7647_v1 = vld [vmem:[%s20988_s22 + $0x1a0] sm:$0xff] }
 0xac5   : > { %11077 = vmatpush1.bf16.msra.mxu1 %v16981_v16  ;;  %10992 = vmatprep.subr.bf16.mxu0 %v16996_v34  ;;  %v7655_v16 = vld [vmem:[%s20988_s22 + $0x1e0] sm:$0xff]  ;;  %v7648_v34 = vld [vmem:[%s20988_s22 + $0x1a8] sm:$0xff] }
 0xac6   : > { %11078 = vmatprep.subr.bf16.mxu1 %v16998_v30  ;;  %v7656_v30 = vld [vmem:[%s20988_s22 + $0x1e8] sm:$0xff]  ;;  %v16584_v8 = vcombine.high %v7647_v1, %v7655_v16  ;;  %v16583_v46 = vcombine.low %v7647_v1, %v7655_v16 }
 0xac7   : > { %v16586_v62 = vcombine.high %v7648_v34, %v7656_v30  ;;  %v16585_v12 = vcombine.low %v7648_v34, %v7656_v30 }
 0xac8   : > { %10993 = vmatpush1.bf16.msra.mxu0 %v16995_v32  ;;  %v7663_v32 = vld [vmem:[%s20988_s22 + $0x220] sm:$0xff] }
 0xac9   : > { %11079 = vmatpush1.bf16.msra.mxu1 %v16997_v41  ;;  %10994 = vmatprep.subr.bf16.mxu0 %v17012_v21  ;;  %v7671_v41 = vld [vmem:[%s20988_s22 + $0x260] sm:$0xff]  ;;  %v7664_v21 = vld [vmem:[%s20988_s22 + $0x228] sm:$0xff] }
 0xaca   : > { %11080 = vmatprep.subr.bf16.mxu1 %v17014_v26  ;;  %v7672_v26 = vld [vmem:[%s20988_s22 + $0x268] sm:$0xff]  ;;  %v16600_v27 = vcombine.high %v7663_v32, %v7671_v41  ;;  %v16599_v57 = vcombine.low %v7663_v32, %v7671_v41 }
 0xacb   : > { %v16602_v43 = vcombine.high %v7664_v21, %v7672_v26  ;;  %v16601_v10 = vcombine.low %v7664_v21, %v7672_v26 }
 0xacc   : > { %10995 = vmatpush1.bf16.msra.mxu0 %v17011_v24  ;;  %v7679_v24 = vld [vmem:[%s20988_s22 + $0x2a0] sm:$0xff] }
 0xacd   : > { %11081 = vmatpush1.bf16.msra.mxu1 %v17013_v42  ;;  %10996 = vmatprep.subr.bf16.mxu0 %v17028_v56  ;;  %v7687_v42 = vld [vmem:[%s20988_s22 + $0x2e0] sm:$0xff]  ;;  %v7680_v56 = vld [vmem:[%s20988_s22 + $0x2a8] sm:$0xff] }
 0xace   : > { %11082 = vmatprep.subr.bf16.mxu1 %v17030_v31  ;;  %v7688_v31 = vld [vmem:[%s20988_s22 + $0x2e8] sm:$0xff]  ;;  %v16616_v44 = vcombine.high %v7679_v24, %v7687_v42  ;;  %v16615_v17 = vcombine.low %v7679_v24, %v7687_v42 }
 0xacf   : > { %v16618_v28 = vcombine.high %v7680_v56, %v7688_v31  ;;  %v16617_v45 = vcombine.low %v7680_v56, %v7688_v31 }
 0xad0   : > { %10997 = vmatpush1.bf16.msra.mxu0 %v17027_v19  ;;  %v7695_v19 = vld [vmem:[%s20988_s22 + $0x320] sm:$0xff] }
 0xad1   : > { %11083 = vmatpush1.bf16.msra.mxu1 %v17029_v59  ;;  %11095 = vmatprep.subr.bf16.mxu0 %v16536_v48  ;;  %v7703_v59 = vld [vmem:[%s20988_s22 + $0x360] sm:$0xff]  ;;  %v7696_v48 = vld [vmem:[%s20988_s22 + $0x328] sm:$0xff] }
 0xad2   : > { %11181 = vmatprep.subr.bf16.mxu1 %v16538_v18  ;;  %v7704_v18 = vld [vmem:[%s20988_s22 + $0x368] sm:$0xff]  ;;  %v16631_v47 = vcombine.low %v7695_v19, %v7703_v59 }
 0xad3   : > { %10999 = vmatmul.mubr.bf16.vlgmr.msra.gmra.mrb[52].mxu0 %v22426_v53  ;;  %v16634_v38 = vcombine.high %v7696_v48, %v7704_v18 }
 0xad4   : > { %11085 = vmatmul.mubr.bf16.vlgmr.msra.gmra.mrb[52].mxu1 %v22426_v53  ;;  %11096 = vmatpush1.bf16.msra.mxu0 %v16535_v23  ;;  %v16632_v23 = vcombine.high %v7695_v19, %v7703_v59 }
 0xad5   : > { %11127 = vmatprep.mubr.bf16.mxu0 %v22336_v9  ;;  %11182 = vmatpush1.bf16.msra.mxu1 %v16537_v14  ;;  %v7719_v14 = vld [vmem:[%s20988_s22 + $0x3e0] sm:$0xff] }
 0xad6   : > { %11213 = vmatprep.mubr.bf16.mxu1 %v22336_v9  ;;  %11097 = vmatprep.subr.bf16.mxu0 %v16552_v39  ;;  %v7712_v39 = vld [vmem:[%s20988_s22 + $0x3a8] sm:$0xff]  ;;  %v16648_v36 = vcombine.high %v7711_v3, %v7719_v14  ;;  %v16647_v1 = vcombine.low %v7711_v3, %v7719_v14 }
 0xad7   : > { %11183 = vmatprep.subr.bf16.mxu1 %v16554_v60  ;;  %v16633_v60 = vcombine.low %v7696_v48, %v7704_v18  ;;  %v16650_v61 = vcombine.high %v7712_v39, %v7720_v22  ;;  %v16649_v16 = vcombine.low %v7712_v39, %v7720_v22 }
 0xad8   : > { %11098 = vmatpush1.bf16.msra.mxu0 %v16551_v50  ;;  %v7727_v50 = vld [vmem:[%s20988_s22 + $0x420] sm:$0xff] }
 0xad9   : > { %11184 = vmatpush1.bf16.msra.mxu1 %v16553_v6  ;;  %11099 = vmatprep.subr.bf16.mxu0 %v16568_v15  ;;  %v7735_v6 = vld [vmem:[%s20988_s22 + $0x460] sm:$0xff]  ;;  %v7728_v15 = vld [vmem:[%s20988_s22 + $0x428] sm:$0xff] }
 0xada   : > { %11185 = vmatprep.subr.bf16.mxu1 %v16570_v4  ;;  %v7736_v4 = vld [vmem:[%s20988_s22 + $0x468] sm:$0xff]  ;;  %v16664_v34 = vcombine.high %v7727_v50, %v7735_v6  ;;  %v16663_v32 = vcombine.low %v7727_v50, %v7735_v6 }
 0xadb   : > { %v16666_v30 = vcombine.high %v7728_v15, %v7736_v4  ;;  %v16665_v41 = vcombine.low %v7728_v15, %v7736_v4 }
 0xadc   : > { %11100 = vmatpush1.bf16.msra.mxu0 %v16567_v29  ;;  %v7743_v29 = vld [vmem:[%s20988_s22 + $0x4a0] sm:$0xff] }
 0xadd   : > { %11186 = vmatpush1.bf16.msra.mxu1 %v16569_v7  ;;  %11101 = vmatprep.subr.bf16.mxu0 %v16584_v8  ;;  %v7751_v7 = vld [vmem:[%s20988_s22 + $0x4e0] sm:$0xff]  ;;  %v7744_v8 = vld [vmem:[%s20988_s22 + $0x4a8] sm:$0xff] }
 0xade   : > { %11187 = vmatprep.subr.bf16.mxu1 %v16586_v62  ;;  %v7752_v62 = vld [vmem:[%s20988_s22 + $0x4e8] sm:$0xff]  ;;  %v16680_v21 = vcombine.high %v7743_v29, %v7751_v7  ;;  %v16679_v24 = vcombine.low %v7743_v29, %v7751_v7 }
 0xadf   : > { %v16682_v26 = vcombine.high %v7744_v8, %v7752_v62  ;;  %v16681_v42 = vcombine.low %v7744_v8, %v7752_v62 }
 0xae0   : > { %11102 = vmatpush1.bf16.msra.mxu0 %v16583_v46  ;;  %v7759_v46 = vld [vmem:[%s20988_s22 + $0x520] sm:$0xff] }
 0xae1   : > { %11188 = vmatpush1.bf16.msra.mxu1 %v16585_v12  ;;  %11103 = vmatprep.subr.bf16.mxu0 %v16600_v27  ;;  %v7767_v12 = vld [vmem:[%s20988_s22 + $0x560] sm:$0xff]  ;;  %v7760_v27 = vld [vmem:[%s20988_s22 + $0x528] sm:$0xff] }
 0xae2   : > { %11189 = vmatprep.subr.bf16.mxu1 %v16602_v43  ;;  %v7768_v43 = vld [vmem:[%s20988_s22 + $0x568] sm:$0xff]  ;;  %v16696_v56 = vcombine.high %v7759_v46, %v7767_v12  ;;  %v16695_v19 = vcombine.low %v7759_v46, %v7767_v12 }
 0xae3   : > { %v16698_v31 = vcombine.high %v7760_v27, %v7768_v43  ;;  %v16697_v59 = vcombine.low %v7760_v27, %v7768_v43 }
 0xae4   : > { %11104 = vmatpush1.bf16.msra.mxu0 %v16599_v57  ;;  %v7775_v57 = vld [vmem:[%s20988_s22 + $0x5a0] sm:$0xff] }
 0xae5   : > { %11190 = vmatpush1.bf16.msra.mxu1 %v16601_v10  ;;  %11105 = vmatprep.subr.bf16.mxu0 %v16616_v44  ;;  %v7783_v10 = vld [vmem:[%s20988_s22 + $0x5e0] sm:$0xff]  ;;  %v7776_v44 = vld [vmem:[%s20988_s22 + $0x5a8] sm:$0xff] }
 0xae6   : > { %11191 = vmatprep.subr.bf16.mxu1 %v16618_v28  ;;  %v7784_v28 = vld [vmem:[%s20988_s22 + $0x5e8] sm:$0xff]  ;;  %v16712_v48 = vcombine.high %v7775_v57, %v7783_v10  ;;  %v16711_v3 = vcombine.low %v7775_v57, %v7783_v10 }
 0xae7   : > { %v16714_v18 = vcombine.high %v7776_v44, %v7784_v28  ;;  %v16713_v14 = vcombine.low %v7776_v44, %v7784_v28 }
 0xae8   : > { %11106 = vmatpush1.bf16.msra.mxu0 %v16615_v17  ;;  %v7791_v17 = vld [vmem:[%s20988_s22 + $0x620] sm:$0xff] }
 0xae9   : > { %11192 = vmatpush1.bf16.msra.mxu1 %v16617_v45  ;;  %11107 = vmatprep.subr.bf16.mxu0 %v16632_v23  ;;  %v7799_v45 = vld [vmem:[%s20988_s22 + $0x660] sm:$0xff]  ;;  %v7792_v23 = vld [vmem:[%s20988_s22 + $0x628] sm:$0xff] }
 0xaea   : > { %11193 = vmatprep.subr.bf16.mxu1 %v16634_v38  ;;  %v7800_v38 = vld [vmem:[%s20988_s22 + $0x668] sm:$0xff]  ;;  %v16728_v39 = vcombine.high %v7791_v17, %v7799_v45  ;;  %v16727_v50 = vcombine.low %v7791_v17, %v7799_v45 }
 0xaeb   : > { %v16730_v22 = vcombine.high %v7792_v23, %v7800_v38  ;;  %v16729_v6 = vcombine.low %v7792_v23, %v7800_v38  ;;  %v7880_v17 = vld [vmem:[%s20988_s22 + $0x8e8] sm:$0xff]  ;;  %v7887_v38 = vld [vmem:[%s20988_s22 + $0x920] sm:$0xff] }
 0xaec   : > { %11108 = vmatpush1.bf16.msra.mxu0 %v16631_v47  ;;  %v7807_v47 = vld [vmem:[%s20988_s22 + $0x6a0] sm:$0xff] }
 0xaed   : > { %11194 = vmatpush1.bf16.msra.mxu1 %v16633_v60  ;;  %11109 = vmatprep.subr.bf16.mxu0 %v16648_v36  ;;  %v7815_v60 = vld [vmem:[%s20988_s22 + $0x6e0] sm:$0xff]  ;;  %v7808_v36 = vld [vmem:[%s20988_s22 + $0x6a8] sm:$0xff] }
 0xaee   : > { %11195 = vmatprep.subr.bf16.mxu1 %v16650_v61  ;;  %v7816_v61 = vld [vmem:[%s20988_s22 + $0x6e8] sm:$0xff]  ;;  %v16744_v15 = vcombine.high %v7807_v47, %v7815_v60  ;;  %v16743_v29 = vcombine.low %v7807_v47, %v7815_v60 }
 0xaef   : > { %v16746_v4 = vcombine.high %v7808_v36, %v7816_v61  ;;  %v16745_v7 = vcombine.low %v7808_v36, %v7816_v61 }
 0xaf0   : > { %11110 = vmatpush1.bf16.msra.mxu0 %v16647_v1  ;;  %v7823_v1 = vld [vmem:[%s20988_s22 + $0x720] sm:$0xff] }
 0xaf1   : > { %11196 = vmatpush1.bf16.msra.mxu1 %v16649_v16  ;;  %11111 = vmatprep.subr.bf16.mxu0 %v16664_v34  ;;  %v7831_v16 = vld [vmem:[%s20988_s22 + $0x760] sm:$0xff]  ;;  %v7824_v34 = vld [vmem:[%s20988_s22 + $0x728] sm:$0xff] }
 0xaf2   : > { %11197 = vmatprep.subr.bf16.mxu1 %v16666_v30  ;;  %v7832_v30 = vld [vmem:[%s20988_s22 + $0x768] sm:$0xff]  ;;  %v16760_v8 = vcombine.high %v7823_v1, %v7831_v16  ;;  %v16759_v46 = vcombine.low %v7823_v1, %v7831_v16 }
 0xaf3   : > { %v16762_v62 = vcombine.high %v7824_v34, %v7832_v30  ;;  %v16761_v12 = vcombine.low %v7824_v34, %v7832_v30 }
 0xaf4   : > { %11112 = vmatpush1.bf16.msra.mxu0 %v16663_v32  ;;  %v7839_v32 = vld [vmem:[%s20988_s22 + $0x7a0] sm:$0xff] }
 0xaf5   : > { %11198 = vmatpush1.bf16.msra.mxu1 %v16665_v41  ;;  %11113 = vmatprep.subr.bf16.mxu0 %v16680_v21  ;;  %v7847_v41 = vld [vmem:[%s20988_s22 + $0x7e0] sm:$0xff]  ;;  %v7840_v21 = vld [vmem:[%s20988_s22 + $0x7a8] sm:$0xff] }
 0xaf6   : > { %11199 = vmatprep.subr.bf16.mxu1 %v16682_v26  ;;  %v7848_v26 = vld [vmem:[%s20988_s22 + $0x7e8] sm:$0xff]  ;;  %v16776_v27 = vcombine.high %v7839_v32, %v7847_v41  ;;  %v16775_v57 = vcombine.low %v7839_v32, %v7847_v41 }
 0xaf7   : > { %v16778_v43 = vcombine.high %v7840_v21, %v7848_v26  ;;  %v16777_v10 = vcombine.low %v7840_v21, %v7848_v26 }
 0xaf8   : > { %11114 = vmatpush1.bf16.msra.mxu0 %v16679_v24  ;;  %v7855_v24 = vld [vmem:[%s20988_s22 + $0x820] sm:$0xff] }
 0xaf9   : > { %11200 = vmatpush1.bf16.msra.mxu1 %v16681_v42  ;;  %11115 = vmatprep.subr.bf16.mxu0 %v16696_v56  ;;  %v7863_v42 = vld [vmem:[%s20988_s22 + $0x860] sm:$0xff]  ;;  %v7856_v56 = vld [vmem:[%s20988_s22 + $0x828] sm:$0xff] }
 0xafa   : > { %11201 = vmatprep.subr.bf16.mxu1 %v16698_v31  ;;  %v7864_v31 = vld [vmem:[%s20988_s22 + $0x868] sm:$0xff]  ;;  %v16792_v44 = vcombine.high %v7855_v24, %v7863_v42 }
 0xafb   : > { %v16794_v28 = vcombine.high %v7856_v56, %v7864_v31  ;;  %v16793_v45 = vcombine.low %v7856_v56, %v7864_v31 }
 0xafc   : > { %11116 = vmatpush1.bf16.msra.mxu0 %v16695_v19  ;;  %v7871_v19 = vld [vmem:[%s20988_s22 + $0x8a0] sm:$0xff] }
 0xafd   : > { %11202 = vmatpush1.bf16.msra.mxu1 %v16697_v59  ;;  %11117 = vmatprep.subr.bf16.mxu0 %v16712_v48  ;;  %v7879_v59 = vld [vmem:[%s20988_s22 + $0x8e0] sm:$0xff]  ;;  %v16791_v48 = vcombine.low %v7855_v24, %v7863_v42 }
 0xafe   : > { %11203 = vmatprep.subr.bf16.mxu1 %v16714_v18  ;;  %v7872_v18 = vld [vmem:[%s20988_s22 + $0x8a8] sm:$0xff]  ;;  %v16808_v23 = vcombine.high %v7871_v19, %v7879_v59  ;;  %v16807_v47 = vcombine.low %v7871_v19, %v7879_v59  ;;  %v22653_v42 = vld [vmem:[%s20991_s21] sm:$0xff] }
 0xaff   : > { %v16809_v60 = vcombine.low %v7872_v18, %v7880_v17  ;;  %v8122_v19 = vrot.slane %v22653_v42, %v21481_v54  ;;  %v7952_v59 = vld [vmem:[%s20988_s22 + $0xb28] sm:$0xff] }
 0xb00   : > { %11118 = vmatpush1.bf16.msra.mxu0 %v16711_v3  ;;  %v7895_v3 = vld [vmem:[%s20988_s22 + $0x960] sm:$0xff] }
 0xb01   : > { %11204 = vmatpush1.bf16.msra.mxu1 %v16713_v14  ;;  %11119 = vmatprep.subr.bf16.mxu0 %v16728_v39  ;;  %v16810_v14 = vcombine.high %v7872_v18, %v7880_v17  ;;  %v7888_v39 = vld [vmem:[%s20988_s22 + $0x928] sm:$0xff]  ;;  %v16824_v36 = vcombine.high %v7887_v38, %v7895_v3  ;;  %v16823_v1 = vcombine.low %v7887_v38, %v7895_v3  ;;  %v7967_v3 = vld [vmem:[%s20988_s22 + $0xba0] sm:$0xff] }
 0xb02   : > { %11205 = vmatprep.subr.bf16.mxu1 %v16730_v22  ;;  %v7896_v22 = vld [vmem:[%s20988_s22 + $0x968] sm:$0xff]  ;;  %v8118_v18 = vrot.slane %v22653_v42, %v21470_v58  ;;  %v8126_v17 = vrot.slane %v22653_v42, %v21504_v5 }
 0xb03   : > { %v16826_v61 = vcombine.high %v7888_v39, %v7896_v22  ;;  %v16825_v16 = vcombine.low %v7888_v39, %v7896_v22 }
 0xb04   : > { %11120 = vmatpush1.bf16.msra.mxu0 %v16727_v50  ;;  %v7903_v50 = vld [vmem:[%s20988_s22 + $0x9a0] sm:$0xff] }
 0xb05   : > { %11206 = vmatpush1.bf16.msra.mxu1 %v16729_v6  ;;  %11121 = vmatprep.subr.bf16.mxu0 %v16744_v15  ;;  %v7911_v6 = vld [vmem:[%s20988_s22 + $0x9e0] sm:$0xff]  ;;  %v7904_v15 = vld [vmem:[%s20988_s22 + $0x9a8] sm:$0xff] }
 0xb06   : > { %11207 = vmatprep.subr.bf16.mxu1 %v16746_v4  ;;  %v7912_v4 = vld [vmem:[%s20988_s22 + $0x9e8] sm:$0xff]  ;;  %v16840_v34 = vcombine.high %v7903_v50, %v7911_v6  ;;  %v16839_v32 = vcombine.low %v7903_v50, %v7911_v6 }
 0xb07   : > { %v16842_v30 = vcombine.high %v7904_v15, %v7912_v4  ;;  %v16841_v41 = vcombine.low %v7904_v15, %v7912_v4  ;;  %v7968_v15 = vld [vmem:[%s20988_s22 + $0xba8] sm:$0xff] }
 0xb08   : > { %11122 = vmatpush1.bf16.msra.mxu0 %v16743_v29  ;;  %v7919_v29 = vld [vmem:[%s20988_s22 + $0xa20] sm:$0xff]  ;;  %v7976_v4 = vld [vmem:[%s20988_s22 + $0xbe8] sm:$0xff] }
 0xb09   : > { %11208 = vmatpush1.bf16.msra.mxu1 %v16745_v7  ;;  %11123 = vmatprep.subr.bf16.mxu0 %v16760_v8  ;;  %v7927_v7 = vld [vmem:[%s20988_s22 + $0xa60] sm:$0xff]  ;;  %v7920_v8 = vld [vmem:[%s20988_s22 + $0xa28] sm:$0xff] }
 0xb0a   : > { %11209 = vmatprep.subr.bf16.mxu1 %v16762_v62  ;;  %v7928_v62 = vld [vmem:[%s20988_s22 + $0xa68] sm:$0xff]  ;;  %v16856_v21 = vcombine.high %v7919_v29, %v7927_v7  ;;  %v16855_v24 = vcombine.low %v7919_v29, %v7927_v7 }
 0xb0b   : > { %v16858_v26 = vcombine.high %v7920_v8, %v7928_v62  ;;  %v16857_v56 = vcombine.low %v7920_v8, %v7928_v62 }
 0xb0c   : > { %11124 = vmatpush1.bf16.msra.mxu0 %v16759_v46  ;;  %v7935_v46 = vld [vmem:[%s20988_s22 + $0xaa0] sm:$0xff] }
 0xb0d   : > { %11210 = vmatpush1.bf16.msra.mxu1 %v16761_v12  ;;  %11125 = vmatprep.subr.bf16.mxu0 %v16776_v27  ;;  %v7943_v12 = vld [vmem:[%s20988_s22 + $0xae0] sm:$0xff]  ;;  %v7936_v27 = vld [vmem:[%s20988_s22 + $0xaa8] sm:$0xff] }
 0xb0e   : > { %11211 = vmatprep.subr.bf16.mxu1 %v16778_v43  ;;  %v7944_v43 = vld [vmem:[%s20988_s22 + $0xae8] sm:$0xff]  ;;  %v16872_v31 = vcombine.high %v7935_v46, %v7943_v12 }
 0xb10   : > { %11126 = vmatpush1.bf16.msra.mxu0 %v16775_v57  ;;  %v16874_v57 = vcombine.high %v7936_v27, %v7944_v43 }
 0xb11   : > { %11212 = vmatpush1.bf16.msra.mxu1 %v16777_v10  ;;  %11138 = vmatprep.subr.bf16.mxu0 %v16792_v44  ;;  %v7951_v10 = vld [vmem:[%s20988_s22 + $0xb20] sm:$0xff] }
 0xb12   : > { %11224 = vmatprep.subr.bf16.mxu1 %v16794_v28  ;;  %v7959_v44 = vld [vmem:[%s20988_s22 + $0xb60] sm:$0xff]  ;;  %v8114_v28 = vrot.slane %v22653_v42, %v21465_v40 }
 0xb13   : > { %11128 = vmatmul.mubr.bf16.vlgmr.msra.gmra.mrb[56].mxu0 %v22340_v25  ;;  %v16888_v38 = vcombine.high %v7951_v10, %v7959_v44  ;;  %v16887_v6 = vcombine.low %v7951_v10, %v7959_v44  ;;  %v7984_v44 = vld [vmem:[%s20988_s22 + $0xc28] sm:$0xff] }
 0xb14   : > { %11214 = vmatmul.mubr.bf16.vlgmr.msra.gmra.mrb[56].mxu1 %v22340_v25  ;;  %11139 = vmatpush1.bf16.msra.mxu0 %v16791_v48  ;;  %v7960_v48 = vld [vmem:[%s20988_s22 + $0xb68] sm:$0xff] }
 0xb15   : > { %11170 = vmatprep.mubr.bf16.mxu0 %v22354_v55  ;;  %11225 = vmatpush1.bf16.msra.mxu1 %v16793_v45  ;;  %v16871_v45 = vcombine.low %v7935_v46, %v7943_v12  ;;  %v16889_v29 = vcombine.low %v7952_v59, %v7960_v48  ;;  %v16905_v12 = vcombine.low %v7968_v15, %v7976_v4 }
 0xb16   : > { %11256 = vmatprep.mubr.bf16.mxu1 %v22354_v55  ;;  %11140 = vmatprep.subr.bf16.mxu0 %v16808_v23  ;;  %v16873_v23 = vcombine.low %v7936_v27, %v7944_v43  ;;  %v16906_v27 = vcombine.high %v7968_v15, %v7976_v4  ;;  %v7983_v43 = vld [vmem:[%s20988_s22 + $0xc20] sm:$0xff] }
 0xb17   : > { %11226 = vmatprep.subr.bf16.mxu1 %v16810_v14  ;;  %v7975_v14 = vld [vmem:[%s20988_s22 + $0xbe0] sm:$0xff] }
 0xb18   : > { %11141 = vmatpush1.bf16.msra.mxu0 %v16807_v47  ;;  %v16890_v47 = vcombine.high %v7952_v59, %v7960_v48  ;;  %v16903_v7 = vcombine.low %v7967_v3, %v7975_v14  ;;  %v8015_v15 = vld [vmem:[%s20988_s22 + $0xd20] sm:$0xff] }
 0xb19   : > { %11227 = vmatpush1.bf16.msra.mxu1 %v16809_v60  ;;  %11142 = vmatprep.subr.bf16.mxu0 %v16824_v36  ;;  %v8023_v4 = vld [vmem:[%s20988_s22 + $0xd60] sm:$0xff] }
 0xb1a   : > { %11228 = vmatprep.subr.bf16.mxu1 %v16826_v61 }
 0xb1c   : > { %11143 = vmatpush1.bf16.msra.mxu0 %v16823_v1 }
 0xb1d   : > { %11229 = vmatpush1.bf16.msra.mxu1 %v16825_v16  ;;  %11144 = vmatprep.subr.bf16.mxu0 %v16840_v34 }
 0xb1e   : > { %11230 = vmatprep.subr.bf16.mxu1 %v16842_v30 }
 0xb20   : > { %11145 = vmatpush1.bf16.msra.mxu0 %v16839_v32 }
 0xb21   : > { %11231 = vmatpush1.bf16.msra.mxu1 %v16841_v41  ;;  %11146 = vmatprep.subr.bf16.mxu0 %v16856_v21  ;;  %v16904_v21 = vcombine.high %v7967_v3, %v7975_v14 }
 0xb22   : > { %11232 = vmatprep.subr.bf16.mxu1 %v16858_v26 }
 0xb24   : > { %11147 = vmatpush1.bf16.msra.mxu0 %v16855_v24  ;;  %v7991_v24 = vld [vmem:[%s20988_s22 + $0xc60] sm:$0xff] }
 0xb25   : > { %11233 = vmatpush1.bf16.msra.mxu1 %v16857_v56  ;;  %11148 = vmatprep.subr.bf16.mxu0 %v16872_v31 }
 0xb26   : > { %v10828_v39 = vpop.f32.mrb[48].mxu0  ;;  %v10914_v22 = vpop.f32.mrb[48].mxu1  ;;  %11234 = vmatprep.subr.bf16.mxu1 %v16874_v57 }
 0xb27   : > { %v17957_v60 = vadd.f32 %v10828_v39, %v8114_v28  ;;  %v17961_v36 = vadd.f32 %v10914_v22, %v8122_v19  ;;  %v10830_v61 = vpop.f32.mrb[49].mxu0  ;;  %v10916_v50 = vpop.f32.mrb[49].mxu1  ;;  %v7999_v39 = vld [vmem:[%s20988_s22 + $0xca0] sm:$0xff] }
 0xb28   : > { %v17958_v1 = vadd.f32 %v10830_v61, %v8118_v18  ;;  %v17962_v16 = vadd.f32 %v10916_v50, %v8126_v17  ;;  %v10832_v34 = vpop.f32.mrb[50].mxu0  ;;  %v10918_v30 = vpop.f32.mrb[50].mxu1  ;;  %11149 = vmatpush1.bf16.msra.mxu0 %v16871_v45  ;;  %v8007_v22 = vld [vmem:[%s20988_s22 + $0xce0] sm:$0xff] }
 0xb29   : > { %v17959_v8 = vadd.f32 %v10832_v34, %v8114_v28  ;;  %v17963_v62 = vadd.f32 %v10918_v30, %v8122_v19  ;;  %11235 = vmatpush1.bf16.msra.mxu1 %v16873_v23  ;;  %v10834_v32 = vpop.f32.mrb[51].mxu0  ;;  %v10920_v41 = vpop.f32.mrb[51].mxu1  ;;  %11150 = vmatprep.subr.bf16.mxu0 %v16888_v38  ;;  %v11439_v56 = vmax.f32 %v17957_v60, 0.0  ;;  %v11441_v31 = vmax.f32 %v17961_v36, 0.0  ;;  %v7992_v28 = vld [vmem:[%s20988_s22 + $0xc68] sm:$0xff] }
 0xb2a   : > { %v17960_v26 = vadd.f32 %v10834_v32, %v8118_v18  ;;  %v17964_v46 = vadd.f32 %v10920_v41, %v8126_v17  ;;  %11236 = vmatprep.subr.bf16.mxu1 %v16890_v47  ;;  %v11440_v19 = vmax.f32 %v17958_v1, 0.0  ;;  %v11442_v59 = vmax.f32 %v17962_v16, 0.0  ;;  %v8000_v47 = vld [vmem:[%s20988_s22 + $0xca8] sm:$0xff] }
 0xb2b   : > { %v11455_v57 = vmax.f32 %v17959_v8, 0.0  ;;  %v11457_v10 = vmax.f32 %v17963_v62, 0.0  ;;  %v16920_v23 = vcombine.high %v7983_v43, %v7991_v24  ;;  %v16922_v14 = vcombine.high %v7984_v44, %v7992_v28  ;;  %v8008_v60 = vld [vmem:[%s20988_s22 + $0xce8] sm:$0xff]  ;;  %v8031_v8 = vld [vmem:[%s20988_s22 + $0xda0] sm:$0xff] }
 0xb2c   : > { %v11456_v48 = vmax.f32 %v17960_v26, 0.0  ;;  %v11458_v18 = vmax.f32 %v17964_v46, 0.0  ;;  %11151 = vmatpush1.bf16.msra.mxu0 %v16887_v6  ;;  %v16919_v36 = vcombine.low %v7983_v43, %v7991_v24  ;;  %v16921_v61 = vcombine.low %v7984_v44, %v7992_v28  ;;  %v8016_v1 = vld [vmem:[%s20988_s22 + $0xd28] sm:$0xff]  ;;  %v8039_v62 = vld [vmem:[%s20988_s22 + $0xde0] sm:$0xff] }
 0xb2d   : > { %v22675_v17 = vpack.c.bf16 %v11455_v57, %v11439_v56  ;;  %v22677_v45 = vpack.c.bf16 %v11457_v10, %v11441_v31  ;;  %11237 = vmatpush1.bf16.msra.mxu1 %v16889_v29  ;;  %11152 = vmatprep.subr.bf16.mxu0 %v16904_v21  ;;  %v16936_v50 = vcombine.high %v7999_v39, %v8007_v22  ;;  %v8024_v16 = vld [vmem:[%s20988_s22 + $0xd68] sm:$0xff]  ;;  %v8055_v43 = vld [vmem:[%s20988_s22 + $0xe60] sm:$0xff] }
 0xb2e   : > { %v22679_v38 = vpack.c.bf16 %v11456_v48, %v11440_v19  ;;  %v22681_v3 = vpack.c.bf16 %v11458_v18, %v11442_v59  ;;  %11238 = vmatprep.subr.bf16.mxu1 %v16906_v27  ;;  %v16938_v6 = vcombine.high %v8000_v47, %v8008_v60  ;;  %v16935_v34 = vcombine.low %v7999_v39, %v8007_v22  ;;  %v8032_v32 = vld [vmem:[%s20988_s22 + $0xda8] sm:$0xff]  ;;  %v8047_v27 = vld [vmem:[%s20988_s22 + $0xe20] sm:$0xff] }
 0xb2f   : > { %v16937_v30 = vcombine.low %v8000_v47, %v8008_v60  ;;  %v16952_v29 = vcombine.high %v8015_v15, %v8023_v4  ;;  %v8040_v41 = vld [vmem:[%s20988_s22 + $0xde8] sm:$0xff]  ;;  %v16951_v21 = vcombine.low %v8015_v15, %v8023_v4  ;;  %v16953_v26 = vcombine.low %v8016_v1, %v8024_v16  ;;  %v8063_v28 = vld [vmem:[%s20988_s22 + $0xea0] sm:$0xff] }
 0xb30   : > { %11153 = vmatpush1.bf16.msra.mxu0 %v16903_v7  ;;  %v16954_v7 = vcombine.high %v8016_v1, %v8024_v16  ;;  %v16968_v46 = vcombine.high %v8031_v8, %v8039_v62  ;;  %v8048_v24 = vld [vmem:[%s20988_s22 + $0xe28] sm:$0xff]  ;;  %v16967_v31 = vcombine.low %v8031_v8, %v8039_v62  ;;  %v16969_v57 = vcombine.low %v8032_v32, %v8040_v41  ;;  %v8071_v19 = vld [vmem:[%s20988_s22 + $0xee0] sm:$0xff]  ;;  %v7601_v62 = vld [vmem:[%s20988_s22 + $0x30] sm:$0xff] }
 0xb31   : > { %11239 = vmatpush1.bf16.msra.mxu1 %v16905_v12  ;;  %11154 = vmatprep.subr.bf16.mxu0 %v16920_v23  ;;  %v16970_v12 = vcombine.high %v8032_v32, %v8040_v41  ;;  %v8056_v56 = vld [vmem:[%s20988_s22 + $0xe68] sm:$0xff]  ;;  %v16984_v10 = vcombine.high %v8047_v27, %v8055_v43  ;;  %v16983_v18 = vcombine.low %v8047_v27, %v8055_v43  ;;  %v8079_v22 = vld [vmem:[%s20988_s22 + $0xf20] sm:$0xff]  ;;  %v7609_v32 = vld [vmem:[%s20988_s22 + $0x70] sm:$0xff] }
 0xb32   : > { %11240 = vmatprep.subr.bf16.mxu1 %v16922_v14  ;;  %v16986_v44 = vcombine.high %v8048_v24, %v8056_v56  ;;  %v8064_v59 = vld [vmem:[%s20988_s22 + $0xea8] sm:$0xff]  ;;  %v16985_v23 = vcombine.low %v8048_v24, %v8056_v56  ;;  %v17000_v14 = vcombine.high %v8063_v28, %v8071_v19  ;;  %v8087_v47 = vld [vmem:[%s20988_s22 + $0xf60] sm:$0xff]  ;;  %v7602_v41 = vld [vmem:[%s20988_s22 + $0x38] sm:$0xff]  ;;  %v16539_v56 = vcombine.low %v7601_v62, %v7609_v32 }
 0xb33   : > { %v8072_v48 = vld [vmem:[%s20988_s22 + $0xee8] sm:$0xff]  ;;  %v8095_v4 = vld [vmem:[%s20988_s22 + $0xfa0] sm:$0xff]  ;;  %v7617_v43 = vld [vmem:[%s20988_s22 + $0xb0] sm:$0xff] }
 0xb34   : > { %11155 = vmatpush1.bf16.msra.mxu0 %v16919_v36  ;;  %v17002_v39 = vcombine.high %v8064_v59, %v8072_v48  ;;  %v8080_v60 = vld [vmem:[%s20988_s22 + $0xf28] sm:$0xff]  ;;  %v8103_v1 = vld [vmem:[%s20988_s22 + $0xfe0] sm:$0xff]  ;;  %v7625_v24 = vld [vmem:[%s20988_s22 + $0xf0] sm:$0xff] }
 0xb35   : > { %11241 = vmatpush1.bf16.msra.mxu1 %v16921_v61  ;;  %11156 = vmatprep.subr.bf16.mxu0 %v16936_v50  ;;  %v8088_v36 = vld [vmem:[%s20988_s22 + $0xf68] sm:$0xff]  ;;  %v16999_v61 = vcombine.low %v8063_v28, %v8071_v19  ;;  %v17001_v50 = vcombine.low %v8064_v59, %v8072_v48  ;;  %v7633_v28 = vld [vmem:[%s20988_s22 + $0x130] sm:$0xff]  ;;  %v7634_v48 = vld [vmem:[%s20988_s22 + $0x138] sm:$0xff] }
 0xb36   : > { %11242 = vmatprep.subr.bf16.mxu1 %v16938_v6  ;;  %v17016_v6 = vcombine.high %v8079_v22, %v8087_v47  ;;  %v17018_v15 = vcombine.high %v8080_v60, %v8088_v36  ;;  %v8096_v16 = vld [vmem:[%s20988_s22 + $0xfa8] sm:$0xff]  ;;  %v7641_v19 = vld [vmem:[%s20988_s22 + $0x170] sm:$0xff] }
 0xb38   : > { %11157 = vmatpush1.bf16.msra.mxu0 %v16935_v34  ;;  %v8104_v34 = vld [vmem:[%s20988_s22 + $0xfe8] sm:$0xff] }
 0xb39   : > { %11243 = vmatpush1.bf16.msra.mxu1 %v16937_v30  ;;  %11158 = vmatprep.subr.bf16.mxu0 %v16952_v29  ;;  %v17015_v30 = vcombine.low %v8079_v22, %v8087_v47  ;;  %v17017_v29 = vcombine.low %v8080_v60, %v8088_v36  ;;  %v17034_v8 = vcombine.high %v8096_v16, %v8104_v34  ;;  %v7649_v47 = vld [vmem:[%s20988_s22 + $0x1b0] sm:$0xff]  ;;  %v7650_v36 = vld [vmem:[%s20988_s22 + $0x1b8] sm:$0xff] }
 0xb3a   : > { %11244 = vmatprep.subr.bf16.mxu1 %v16954_v7  ;;  %v17032_v7 = vcombine.high %v8095_v4, %v8103_v1  ;;  %v7657_v60 = vld [vmem:[%s20988_s22 + $0x1f0] sm:$0xff] }
 0xb3c   : > { %11159 = vmatpush1.bf16.msra.mxu0 %v16951_v21  ;;  %v7610_v21 = vld [vmem:[%s20988_s22 + $0x78] sm:$0xff] }
 0xb3d   : > { %11245 = vmatpush1.bf16.msra.mxu1 %v16953_v26  ;;  %11160 = vmatprep.subr.bf16.mxu0 %v16968_v46  ;;  %v17031_v26 = vcombine.low %v8095_v4, %v8103_v1  ;;  %v17033_v46 = vcombine.low %v8096_v16, %v8104_v34  ;;  %v16542_v27 = vcombine.high %v7602_v41, %v7610_v21  ;;  %v7665_v4 = vld [vmem:[%s20988_s22 + $0x230] sm:$0xff]  ;;  %v7666_v16 = vld [vmem:[%s20988_s22 + $0x238] sm:$0xff] }
 0xb3e   : > { %11246 = vmatprep.subr.bf16.mxu1 %v16970_v12  ;;  %v16540_v12 = vcombine.high %v7601_v62, %v7609_v32  ;;  %v7673_v1 = vld [vmem:[%s20988_s22 + $0x270] sm:$0xff]  ;;  %v7674_v34 = vld [vmem:[%s20988_s22 + $0x278] sm:$0xff] }
 0xb3f   : > { %v7681_v62 = vld [vmem:[%s20988_s22 + $0x2b0] sm:$0xff] }
 0xb40   : > { %11161 = vmatpush1.bf16.msra.mxu0 %v16967_v31  ;;  %v7618_v31 = vld [vmem:[%s20988_s22 + $0xb8] sm:$0xff]  ;;  %v7689_v32 = vld [vmem:[%s20988_s22 + $0x2f0] sm:$0xff] }
 0xb41   : > { %11247 = vmatpush1.bf16.msra.mxu1 %v16969_v57  ;;  %11162 = vmatprep.subr.bf16.mxu0 %v16984_v10  ;;  %v7626_v57 = vld [vmem:[%s20988_s22 + $0xf8] sm:$0xff]  ;;  %v16541_v10 = vcombine.low %v7602_v41, %v7610_v21 }
 0xb42   : > { %11248 = vmatprep.subr.bf16.mxu1 %v16986_v44  ;;  %v16556_v44 = vcombine.high %v7617_v43, %v7625_v24  ;;  %v16558_v59 = vcombine.high %v7618_v31, %v7626_v57  ;;  %v7682_v41 = vld [vmem:[%s20988_s22 + $0x2b8] sm:$0xff] }
 0xb43   : > { %v7690_v21 = vld [vmem:[%s20988_s22 + $0x2f8] sm:$0xff] }
 0xb44   : > { %11163 = vmatpush1.bf16.msra.mxu0 %v16983_v18  ;;  %v7642_v18 = vld [vmem:[%s20988_s22 + $0x178] sm:$0xff] }
 0xb45   : > { %11249 = vmatpush1.bf16.msra.mxu1 %v16985_v23  ;;  %11164 = vmatprep.subr.bf16.mxu0 %v17000_v14  ;;  %v16555_v23 = vcombine.low %v7617_v43, %v7625_v24  ;;  %v16557_v14 = vcombine.low %v7618_v31, %v7626_v57  ;;  %v16574_v22 = vcombine.high %v7634_v48, %v7642_v18  ;;  %v7697_v43 = vld [vmem:[%s20988_s22 + $0x330] sm:$0xff]  ;;  %v7706_v31 = vld [vmem:[%s20988_s22 + $0x378] sm:$0xff] }
 0xb46   : > { %11250 = vmatprep.subr.bf16.mxu1 %v17002_v39  ;;  %v16572_v39 = vcombine.high %v7633_v28, %v7641_v19  ;;  %v7705_v24 = vld [vmem:[%s20988_s22 + $0x370] sm:$0xff]  ;;  %v16619_v57 = vcombine.low %v7681_v62, %v7689_v32 }
 0xb48   : > { %11165 = vmatpush1.bf16.msra.mxu0 %v16999_v61  ;;  %v7658_v61 = vld [vmem:[%s20988_s22 + $0x1f8] sm:$0xff] }
 0xb49   : > { %11251 = vmatpush1.bf16.msra.mxu1 %v17001_v50  ;;  %11166 = vmatprep.subr.bf16.mxu0 %v17016_v6  ;;  %v16571_v50 = vcombine.low %v7633_v28, %v7641_v19  ;;  %v16573_v6 = vcombine.low %v7634_v48, %v7642_v18  ;;  %v7713_v19 = vld [vmem:[%s20988_s22 + $0x3b0] sm:$0xff]  ;;  %v7714_v48 = vld [vmem:[%s20988_s22 + $0x3b8] sm:$0xff] }
 0xb4a   : > { %11252 = vmatprep.subr.bf16.mxu1 %v17018_v15  ;;  %v16588_v15 = vcombine.high %v7649_v47, %v7657_v60  ;;  %v7722_v18 = vld [vmem:[%s20988_s22 + $0x3f8] sm:$0xff] }
 0xb4c   : > { %11167 = vmatpush1.bf16.msra.mxu0 %v17015_v30  ;;  %v16587_v30 = vcombine.low %v7649_v47, %v7657_v60  ;;  %v7729_v47 = vld [vmem:[%s20988_s22 + $0x430] sm:$0xff] }
 0xb4d   : > { %11253 = vmatpush1.bf16.msra.mxu1 %v17017_v29  ;;  %11168 = vmatprep.subr.bf16.mxu0 %v17032_v7  ;;  %v16589_v29 = vcombine.low %v7650_v36, %v7658_v61  ;;  %v16604_v7 = vcombine.high %v7665_v4, %v7673_v1  ;;  %v7737_v60 = vld [vmem:[%s20988_s22 + $0x470] sm:$0xff] }
 0xb4e   : > { %11254 = vmatprep.subr.bf16.mxu1 %v17034_v8  ;;  %v16606_v8 = vcombine.high %v7666_v16, %v7674_v34 }
 0xb50   : > { %11169 = vmatpush1.bf16.msra.mxu0 %v17031_v26  ;;  %v16603_v26 = vcombine.low %v7665_v4, %v7673_v1  ;;  %v7745_v4 = vld [vmem:[%s20988_s22 + $0x4b0] sm:$0xff] }
 0xb51   : > { %11255 = vmatpush1.bf16.msra.mxu1 %v17033_v46  ;;  %11267 = vmatprep.subr.bf16.mxu0 %v16540_v12  ;;  %v16605_v46 = vcombine.low %v7666_v16, %v7674_v34  ;;  %v16620_v12 = vcombine.high %v7681_v62, %v7689_v32  ;;  %v7753_v1 = vld [vmem:[%s20988_s22 + $0x4f0] sm:$0xff]  ;;  %v7746_v16 = vld [vmem:[%s20988_s22 + $0x4b8] sm:$0xff] }
 0xb52   : > { %11353 = vmatprep.subr.bf16.mxu1 %v16542_v27  ;;  %v16622_v27 = vcombine.high %v7682_v41, %v7690_v21  ;;  %v7754_v34 = vld [vmem:[%s20988_s22 + $0x4f8] sm:$0xff]  ;;  %v7761_v62 = vld [vmem:[%s20988_s22 + $0x530] sm:$0xff] }
 0xb53   : > { %11171 = vmatmul.mubr.bf16.vlgmr.msra.gmra.mrb[56].mxu0 %v22426_v53  ;;  %v7769_v32 = vld [vmem:[%s20988_s22 + $0x570] sm:$0xff] }
 0xb54   : > { %11257 = vmatmul.mubr.bf16.vlgmr.msra.gmra.mrb[56].mxu1 %v22426_v53  ;;  %11268 = vmatpush1.bf16.msra.mxu0 %v16539_v56  ;;  %v7698_v56 = vld [vmem:[%s20988_s22 + $0x338] sm:$0xff] }
 0xb55   : > { %11299 = vmatprep.mubr.bf16.mxu0 %v22336_v9  ;;  %11354 = vmatpush1.bf16.msra.mxu1 %v16541_v10  ;;  %v16621_v10 = vcombine.low %v7682_v41, %v7690_v21  ;;  %v16638_v28 = vcombine.high %v7698_v56, %v7706_v31  ;;  %v7762_v41 = vld [vmem:[%s20988_s22 + $0x538] sm:$0xff] }
 0xb56   : > { %11385 = vmatprep.mubr.bf16.mxu1 %v22336_v9  ;;  %11269 = vmatprep.subr.bf16.mxu0 %v16556_v44  ;;  %v16590_v9 = vcombine.high %v7650_v36, %v7658_v61  ;;  %v16636_v44 = vcombine.high %v7697_v43, %v7705_v24  ;;  %v7730_v36 = vld [vmem:[%s20988_s22 + $0x438] sm:$0xff] }
 0xb57   : > { %11355 = vmatprep.subr.bf16.mxu1 %v16558_v59  ;;  %v7721_v59 = vld [vmem:[%s20988_s22 + $0x3f0] sm:$0xff]  ;;  %v7738_v61 = vld [vmem:[%s20988_s22 + $0x478] sm:$0xff] }
 0xb58   : > { %11270 = vmatpush1.bf16.msra.mxu0 %v16555_v23  ;;  %v16635_v23 = vcombine.low %v7697_v43, %v7705_v24  ;;  %v7770_v21 = vld [vmem:[%s20988_s22 + $0x578] sm:$0xff]  ;;  %v7777_v43 = vld [vmem:[%s20988_s22 + $0x5b0] sm:$0xff] }
 0xb59   : > { %11356 = vmatpush1.bf16.msra.mxu1 %v16557_v14  ;;  %11271 = vmatprep.subr.bf16.mxu0 %v16572_v39  ;;  %v16637_v14 = vcombine.low %v7698_v56, %v7706_v31  ;;  %v16652_v39 = vcombine.high %v7713_v19, %v7721_v59  ;;  %v7785_v24 = vld [vmem:[%s20988_s22 + $0x5f0] sm:$0xff]  ;;  %v7778_v56 = vld [vmem:[%s20988_s22 + $0x5b8] sm:$0xff] }
 0xb5a   : > { %11357 = vmatprep.subr.bf16.mxu1 %v16574_v22  ;;  %v16654_v22 = vcombine.high %v7714_v48, %v7722_v18  ;;  %v7786_v31 = vld [vmem:[%s20988_s22 + $0x5f8] sm:$0xff] }
 0xb5c   : > { %11272 = vmatpush1.bf16.msra.mxu0 %v16571_v50  ;;  %v16651_v50 = vcombine.low %v7713_v19, %v7721_v59  ;;  %v7793_v19 = vld [vmem:[%s20988_s22 + $0x630] sm:$0xff] }
 0xb5d   : > { %11358 = vmatpush1.bf16.msra.mxu1 %v16573_v6  ;;  %11273 = vmatprep.subr.bf16.mxu0 %v16588_v15  ;;  %v16653_v6 = vcombine.low %v7714_v48, %v7722_v18  ;;  %v16668_v15 = vcombine.high %v7729_v47, %v7737_v60  ;;  %v7801_v59 = vld [vmem:[%s20988_s22 + $0x670] sm:$0xff]  ;;  %v7794_v48 = vld [vmem:[%s20988_s22 + $0x638] sm:$0xff] }
 0xb5e   : > { %11359 = vmatprep.subr.bf16.mxu1 %v16590_v9  ;;  %v16670_v9 = vcombine.high %v7730_v36, %v7738_v61  ;;  %v7802_v18 = vld [vmem:[%s20988_s22 + $0x678] sm:$0xff] }
 0xb60   : > { %11274 = vmatpush1.bf16.msra.mxu0 %v16587_v30  ;;  %v16667_v30 = vcombine.low %v7729_v47, %v7737_v60  ;;  %v7809_v47 = vld [vmem:[%s20988_s22 + $0x6b0] sm:$0xff] }
 0xb61   : > { %11360 = vmatpush1.bf16.msra.mxu1 %v16589_v29  ;;  %11275 = vmatprep.subr.bf16.mxu0 %v16604_v7  ;;  %v16669_v29 = vcombine.low %v7730_v36, %v7738_v61  ;;  %v16684_v7 = vcombine.high %v7745_v4, %v7753_v1  ;;  %v7817_v60 = vld [vmem:[%s20988_s22 + $0x6f0] sm:$0xff]  ;;  %v7810_v36 = vld [vmem:[%s20988_s22 + $0x6b8] sm:$0xff] }
 0xb62   : > { %11361 = vmatprep.subr.bf16.mxu1 %v16606_v8  ;;  %v16686_v8 = vcombine.high %v7746_v16, %v7754_v34  ;;  %v7818_v61 = vld [vmem:[%s20988_s22 + $0x6f8] sm:$0xff] }
 0xb64   : > { %11276 = vmatpush1.bf16.msra.mxu0 %v16603_v26  ;;  %v16683_v26 = vcombine.low %v7745_v4, %v7753_v1  ;;  %v7825_v4 = vld [vmem:[%s20988_s22 + $0x730] sm:$0xff] }
 0xb65   : > { %11362 = vmatpush1.bf16.msra.mxu1 %v16605_v46  ;;  %11277 = vmatprep.subr.bf16.mxu0 %v16620_v12  ;;  %v16685_v46 = vcombine.low %v7746_v16, %v7754_v34  ;;  %v16700_v12 = vcombine.high %v7761_v62, %v7769_v32  ;;  %v7833_v1 = vld [vmem:[%s20988_s22 + $0x770] sm:$0xff]  ;;  %v7826_v16 = vld [vmem:[%s20988_s22 + $0x738] sm:$0xff] }
 0xb66   : > { %11363 = vmatprep.subr.bf16.mxu1 %v16622_v27  ;;  %v16702_v27 = vcombine.high %v7762_v41, %v7770_v21  ;;  %v7834_v34 = vld [vmem:[%s20988_s22 + $0x778] sm:$0xff] }
 0xb68   : > { %11278 = vmatpush1.bf16.msra.mxu0 %v16619_v57  ;;  %v16699_v57 = vcombine.low %v7761_v62, %v7769_v32  ;;  %v7841_v62 = vld [vmem:[%s20988_s22 + $0x7b0] sm:$0xff] }
 0xb69   : > { %11364 = vmatpush1.bf16.msra.mxu1 %v16621_v10  ;;  %11279 = vmatprep.subr.bf16.mxu0 %v16636_v44  ;;  %v16701_v10 = vcombine.low %v7762_v41, %v7770_v21  ;;  %v16716_v44 = vcombine.high %v7777_v43, %v7785_v24  ;;  %v7849_v32 = vld [vmem:[%s20988_s22 + $0x7f0] sm:$0xff]  ;;  %v7842_v41 = vld [vmem:[%s20988_s22 + $0x7b8] sm:$0xff] }
 0xb6a   : > { %11365 = vmatprep.subr.bf16.mxu1 %v16638_v28  ;;  %v16718_v28 = vcombine.high %v7778_v56, %v7786_v31  ;;  %v7850_v21 = vld [vmem:[%s20988_s22 + $0x7f8] sm:$0xff] }
 0xb6c   : > { %11280 = vmatpush1.bf16.msra.mxu0 %v16635_v23  ;;  %v16715_v23 = vcombine.low %v7777_v43, %v7785_v24  ;;  %v7857_v43 = vld [vmem:[%s20988_s22 + $0x830] sm:$0xff] }
 0xb6d   : > { %11366 = vmatpush1.bf16.msra.mxu1 %v16637_v14  ;;  %11281 = vmatprep.subr.bf16.mxu0 %v16652_v39  ;;  %v16717_v14 = vcombine.low %v7778_v56, %v7786_v31  ;;  %v16732_v39 = vcombine.high %v7793_v19, %v7801_v59  ;;  %v7865_v24 = vld [vmem:[%s20988_s22 + $0x870] sm:$0xff]  ;;  %v7858_v56 = vld [vmem:[%s20988_s22 + $0x838] sm:$0xff] }
 0xb6e   : > { %11367 = vmatprep.subr.bf16.mxu1 %v16654_v22  ;;  %v16734_v22 = vcombine.high %v7794_v48, %v7802_v18  ;;  %v7866_v31 = vld [vmem:[%s20988_s22 + $0x878] sm:$0xff] }
 0xb70   : > { %11282 = vmatpush1.bf16.msra.mxu0 %v16651_v50  ;;  %v16731_v50 = vcombine.low %v7793_v19, %v7801_v59  ;;  %v7873_v19 = vld [vmem:[%s20988_s22 + $0x8b0] sm:$0xff] }
 0xb71   : > { %11368 = vmatpush1.bf16.msra.mxu1 %v16653_v6  ;;  %11283 = vmatprep.subr.bf16.mxu0 %v16668_v15  ;;  %v16733_v6 = vcombine.low %v7794_v48, %v7802_v18  ;;  %v16748_v15 = vcombine.high %v7809_v47, %v7817_v60  ;;  %v7881_v59 = vld [vmem:[%s20988_s22 + $0x8f0] sm:$0xff]  ;;  %v16795_v48 = vcombine.low %v7857_v43, %v7865_v24  ;;  %v7874_v18 = vld [vmem:[%s20988_s22 + $0x8b8] sm:$0xff] }
 0xb72   : > { %11369 = vmatprep.subr.bf16.mxu1 %v16670_v9  ;;  %v16750_v9 = vcombine.high %v7810_v36, %v7818_v61 }
 0xb74   : > { %11284 = vmatpush1.bf16.msra.mxu0 %v16667_v30  ;;  %v16747_v30 = vcombine.low %v7809_v47, %v7817_v60  ;;  %v7897_v47 = vld [vmem:[%s20988_s22 + $0x970] sm:$0xff] }
 0xb75   : > { %11370 = vmatpush1.bf16.msra.mxu1 %v16669_v29  ;;  %11285 = vmatprep.subr.bf16.mxu0 %v16684_v7  ;;  %v16749_v29 = vcombine.low %v7810_v36, %v7818_v61  ;;  %v16764_v7 = vcombine.high %v7825_v4, %v7833_v1  ;;  %v7890_v36 = vld [vmem:[%s20988_s22 + $0x938] sm:$0xff] }
 0xb76   : > { %11371 = vmatprep.subr.bf16.mxu1 %v16686_v8  ;;  %v16766_v8 = vcombine.high %v7826_v16, %v7834_v34  ;;  %v7898_v61 = vld [vmem:[%s20988_s22 + $0x978] sm:$0xff] }
 0xb78   : > { %11286 = vmatpush1.bf16.msra.mxu0 %v16683_v26  ;;  %v16763_v26 = vcombine.low %v7825_v4, %v7833_v1  ;;  %v7905_v4 = vld [vmem:[%s20988_s22 + $0x9b0] sm:$0xff] }
 0xb79   : > { %11372 = vmatpush1.bf16.msra.mxu1 %v16685_v46  ;;  %11287 = vmatprep.subr.bf16.mxu0 %v16700_v12  ;;  %v16765_v46 = vcombine.low %v7826_v16, %v7834_v34  ;;  %v16780_v12 = vcombine.high %v7841_v62, %v7849_v32  ;;  %v7913_v1 = vld [vmem:[%s20988_s22 + $0x9f0] sm:$0xff]  ;;  %v7906_v16 = vld [vmem:[%s20988_s22 + $0x9b8] sm:$0xff] }
 0xb7a   : > { %11373 = vmatprep.subr.bf16.mxu1 %v16702_v27  ;;  %v16782_v27 = vcombine.high %v7842_v41, %v7850_v21 }
 0xb7c   : > { %11288 = vmatpush1.bf16.msra.mxu0 %v16699_v57  ;;  %v16779_v57 = vcombine.low %v7841_v62, %v7849_v32  ;;  %v7922_v62 = vld [vmem:[%s20988_s22 + $0xa38] sm:$0xff] }
 0xb7d   : > { %11374 = vmatpush1.bf16.msra.mxu1 %v16701_v10  ;;  %11289 = vmatprep.subr.bf16.mxu0 %v16716_v44  ;;  %v16781_v10 = vcombine.low %v7842_v41, %v7850_v21  ;;  %v16796_v44 = vcombine.high %v7857_v43, %v7865_v24  ;;  %v7930_v32 = vld [vmem:[%s20988_s22 + $0xa78] sm:$0xff]  ;;  %v16843_v41 = vcombine.low %v7905_v4, %v7913_v1 }
 0xb7e   : > { %11375 = vmatprep.subr.bf16.mxu1 %v16718_v28  ;;  %v16798_v28 = vcombine.high %v7858_v56, %v7866_v31  ;;  %v7938_v43 = vld [vmem:[%s20988_s22 + $0xab8] sm:$0xff] }
 0xb7f   : > { %v7946_v24 = vld [vmem:[%s20988_s22 + $0xaf8] sm:$0xff] }
 0xb80   : > { %11290 = vmatpush1.bf16.msra.mxu0 %v16715_v23  ;;  %v7882_v23 = vld [vmem:[%s20988_s22 + $0x8f8] sm:$0xff] }
 0xb81   : > { %11376 = vmatpush1.bf16.msra.mxu1 %v16717_v14  ;;  %11291 = vmatprep.subr.bf16.mxu0 %v16732_v39  ;;  %v16797_v14 = vcombine.low %v7858_v56, %v7866_v31  ;;  %v16812_v39 = vcombine.high %v7873_v19, %v7881_v59  ;;  %v16814_v60 = vcombine.high %v7874_v18, %v7882_v23 }
 0xb82   : > { %11377 = vmatprep.subr.bf16.mxu1 %v16734_v22  ;;  %v7889_v22 = vld [vmem:[%s20988_s22 + $0x930] sm:$0xff]  ;;  %v16861_v31 = vcombine.low %v7922_v62, %v7930_v32 }
 0xb83   : > { %v16827_v34 = vcombine.low %v7889_v22, %v7897_v47 }
 0xb84   : > { %11292 = vmatpush1.bf16.msra.mxu0 %v16731_v50  ;;  %v16811_v50 = vcombine.low %v7873_v19, %v7881_v59  ;;  %v8130_v19 = vrot.slane %v22653_v42, %v21458_v35  ;;  %v7954_v59 = vld [vmem:[%s20988_s22 + $0xb38] sm:$0xff] }
 0xb85   : > { %11378 = vmatpush1.bf16.msra.mxu1 %v16733_v6  ;;  %11293 = vmatprep.subr.bf16.mxu0 %v16748_v15  ;;  %v16813_v6 = vcombine.low %v7874_v18, %v7882_v23  ;;  %v16828_v15 = vcombine.high %v7889_v22, %v7897_v47  ;;  %v8138_v18 = vrot.slane %v22653_v42, %v21479_v51 }
 0xb86   : > { %11379 = vmatprep.subr.bf16.mxu1 %v16750_v9  ;;  %v16830_v9 = vcombine.high %v7890_v36, %v7898_v61  ;;  %v8134_v23 = vrot.slane %v22653_v42, %v21461_v37  ;;  %v16877_v22 = vcombine.low %v7938_v43, %v7946_v24 }
 0xb88   : > { %11294 = vmatpush1.bf16.msra.mxu0 %v16747_v30  ;;  %v16829_v30 = vcombine.low %v7890_v36, %v7898_v61  ;;  %v7969_v61 = vld [vmem:[%s20988_s22 + $0xbb0] sm:$0xff] }
 0xb89   : > { %11380 = vmatpush1.bf16.msra.mxu1 %v16749_v29  ;;  %11295 = vmatprep.subr.bf16.mxu0 %v16764_v7  ;;  %v16844_v29 = vcombine.high %v7905_v4, %v7913_v1  ;;  %v7921_v7 = vld [vmem:[%s20988_s22 + $0xa30] sm:$0xff]  ;;  %v7970_v4 = vld [vmem:[%s20988_s22 + $0xbb8] sm:$0xff] }
 0xb8a   : > { %11381 = vmatprep.subr.bf16.mxu1 %v16766_v8  ;;  %v7929_v8 = vld [vmem:[%s20988_s22 + $0xa70] sm:$0xff]  ;;  %v7978_v1 = vld [vmem:[%s20988_s22 + $0xbf8] sm:$0xff] }
 0xb8b   : > { %v16859_v56 = vcombine.low %v7921_v7, %v7929_v8 }
 0xb8c   : > { %11296 = vmatpush1.bf16.msra.mxu0 %v16763_v26  ;;  %v16860_v26 = vcombine.high %v7921_v7, %v7929_v8 }
 0xb8d   : > { %11382 = vmatpush1.bf16.msra.mxu1 %v16765_v46  ;;  %11297 = vmatprep.subr.bf16.mxu0 %v16780_v12  ;;  %v16862_v46 = vcombine.high %v7922_v62, %v7930_v32  ;;  %v7937_v12 = vld [vmem:[%s20988_s22 + $0xab0] sm:$0xff] }
 0xb8e   : > { %11383 = vmatprep.subr.bf16.mxu1 %v16782_v27  ;;  %v7945_v27 = vld [vmem:[%s20988_s22 + $0xaf0] sm:$0xff] }
 0xb90   : > { %11298 = vmatpush1.bf16.msra.mxu0 %v16779_v57  ;;  %v16876_v57 = vcombine.high %v7937_v12, %v7945_v27 }
 0xb91   : > { %11384 = vmatpush1.bf16.msra.mxu1 %v16781_v10  ;;  %11310 = vmatprep.subr.bf16.mxu0 %v16796_v44  ;;  %v16878_v10 = vcombine.high %v7938_v43, %v7946_v24  ;;  %v7953_v44 = vld [vmem:[%s20988_s22 + $0xb30] sm:$0xff] }
 0xb92   : > { %11396 = vmatprep.subr.bf16.mxu1 %v16798_v28  ;;  %v7961_v28 = vld [vmem:[%s20988_s22 + $0xb70] sm:$0xff] }
 0xb93   : > { %11300 = vmatmul.mubr.bf16.vlgmr.msra.gmra.mrb[60].mxu0 %v22340_v25  ;;  %v16892_v47 = vcombine.high %v7953_v44, %v7961_v28  ;;  %v7993_v43 = vld [vmem:[%s20988_s22 + $0xc70] sm:$0xff] }
 0xb94   : > { %11386 = vmatmul.mubr.bf16.vlgmr.msra.gmra.mrb[60].mxu1 %v22340_v25  ;;  %11311 = vmatpush1.bf16.msra.mxu0 %v16795_v48  ;;  %v7914_v25 = vld [vmem:[%s20988_s22 + $0x9f8] sm:$0xff] }
 0xb95   : > { %11342 = vmatprep.mubr.bf16.mxu0 %v22354_v55  ;;  %11397 = vmatpush1.bf16.msra.mxu1 %v16797_v14  ;;  %v16845_v21 = vcombine.low %v7906_v16, %v7914_v25  ;;  %v7962_v48 = vld [vmem:[%s20988_s22 + $0xb78] sm:$0xff]  ;;  %v16875_v14 = vcombine.low %v7937_v12, %v7945_v27  ;;  %v16910_v12 = vcombine.high %v7970_v4, %v7978_v1  ;;  %v7985_v27 = vld [vmem:[%s20988_s22 + $0xc30] sm:$0xff] }
 0xb96   : > { %11428 = vmatprep.mubr.bf16.mxu1 %v22354_v55  ;;  %11312 = vmatprep.subr.bf16.mxu0 %v16812_v39  ;;  %v16846_v55 = vcombine.high %v7906_v16, %v7914_v25  ;;  %v8142_v39 = vrot.slane %v22653_v42, %v21498_v2  ;;  %v16894_v36 = vcombine.high %v7954_v59, %v7962_v48 }
 0xb97   : > { %11398 = vmatprep.subr.bf16.mxu1 %v16814_v60  ;;  %v16891_v42 = vcombine.low %v7953_v44, %v7961_v28  ;;  %v7994_v44 = vld [vmem:[%s20988_s22 + $0xc78] sm:$0xff] }
 0xb98   : > { %11313 = vmatpush1.bf16.msra.mxu0 %v16811_v50  ;;  %v7977_v50 = vld [vmem:[%s20988_s22 + $0xbf0] sm:$0xff] }
 0xb99   : > { %11399 = vmatpush1.bf16.msra.mxu1 %v16813_v6  ;;  %11314 = vmatprep.subr.bf16.mxu0 %v16828_v15  ;;  %v16908_v32 = vcombine.high %v7969_v61, %v7977_v50 }
 0xb9a   : > { %11400 = vmatprep.subr.bf16.mxu1 %v16830_v9 }
 0xb9c   : > { %11315 = vmatpush1.bf16.msra.mxu0 %v16827_v34 }
 0xb9d   : > { %11401 = vmatpush1.bf16.msra.mxu1 %v16829_v30  ;;  %11316 = vmatprep.subr.bf16.mxu0 %v16844_v29  ;;  %v16893_v29 = vcombine.low %v7954_v59, %v7962_v48 }
 0xb9e   : > { %11402 = vmatprep.subr.bf16.mxu1 %v16846_v55 }
 0xba0   : > { %11317 = vmatpush1.bf16.msra.mxu0 %v16843_v41 }
 0xba1   : > { %11403 = vmatpush1.bf16.msra.mxu1 %v16845_v21  ;;  %11318 = vmatprep.subr.bf16.mxu0 %v16860_v26 }
 0xba2   : > { %11404 = vmatprep.subr.bf16.mxu1 %v16862_v46  ;;  %v16907_v46 = vcombine.low %v7969_v61, %v7977_v50  ;;  %v8009_v61 = vld [vmem:[%s20988_s22 + $0xcf0] sm:$0xff] }
 0xba4   : > { %11319 = vmatpush1.bf16.msra.mxu0 %v16859_v56 }
 0xba5   : > { %11405 = vmatpush1.bf16.msra.mxu1 %v16861_v31  ;;  %11320 = vmatprep.subr.bf16.mxu0 %v16876_v57  ;;  %v16909_v57 = vcombine.low %v7970_v4, %v7978_v1 }
 0xba6   : > { %v11000_v60 = vpop.f32.mrb[52].mxu0  ;;  %11406 = vmatprep.subr.bf16.mxu1 %v16878_v10  ;;  %v7986_v10 = vld [vmem:[%s20988_s22 + $0xc38] sm:$0xff] }
 0xba7   : > { %v17965_v6 = vadd.f32 %v11000_v60, %v8130_v19  ;;  %v11086_v15 = vpop.f32.mrb[52].mxu1  ;;  %v11002_v9 = vpop.f32.mrb[53].mxu0  ;;  %v16926_v60 = vcombine.high %v7986_v10, %v7994_v44  ;;  %v16925_v4 = vcombine.low %v7986_v10, %v7994_v44 }
 0xba8   : > { %v17969_v16 = vadd.f32 %v11086_v15, %v8138_v18  ;;  %v17966_v25 = vadd.f32 %v11002_v9, %v8134_v23  ;;  %v11088_v34 = vpop.f32.mrb[53].mxu1  ;;  %v11004_v30 = vpop.f32.mrb[54].mxu0  ;;  %11321 = vmatpush1.bf16.msra.mxu0 %v16875_v14  ;;  %v8010_v15 = vld [vmem:[%s20988_s22 + $0xcf8] sm:$0xff]  ;;  %v16923_v9 = vcombine.low %v7985_v27, %v7993_v43 }
 0xba9   : > { %v17970_v55 = vadd.f32 %v11088_v34, %v8142_v39  ;;  %v17967_v7 = vadd.f32 %v11004_v30, %v8130_v19  ;;  %v11090_v8 = vpop.f32.mrb[54].mxu1  ;;  %11407 = vmatpush1.bf16.msra.mxu1 %v16877_v22  ;;  %v11006_v62 = vpop.f32.mrb[55].mxu0  ;;  %11322 = vmatprep.subr.bf16.mxu0 %v16892_v47  ;;  %v11443_v24 = vmax.f32 %v17965_v6, 0.0  ;;  %v16924_v22 = vcombine.high %v7985_v27, %v7993_v43  ;;  %v8002_v6 = vld [vmem:[%s20988_s22 + $0xcb8] sm:$0xff]  ;;  %v8025_v34 = vld [vmem:[%s20988_s22 + $0xd70] sm:$0xff] }
 0xbaa   : > { %v17971_v41 = vadd.f32 %v11090_v8, %v8138_v18  ;;  %v17968_v21 = vadd.f32 %v11006_v62, %v8134_v23  ;;  %v11092_v26 = vpop.f32.mrb[55].mxu1  ;;  %11408 = vmatprep.subr.bf16.mxu1 %v16894_v36  ;;  %v11445_v28 = vmax.f32 %v17969_v16, 0.0  ;;  %v11444_v19 = vmax.f32 %v17966_v25, 0.0  ;;  %v8001_v36 = vld [vmem:[%s20988_s22 + $0xcb0] sm:$0xff]  ;;  %v8018_v30 = vld [vmem:[%s20988_s22 + $0xd38] sm:$0xff] }
 0xbab   : > { %v11459_v56 = vmax.f32 %v17967_v7, 0.0  ;;  %v17972_v31 = vadd.f32 %v11092_v26, %v8142_v39  ;;  %v11446_v18 = vmax.f32 %v17970_v55, 0.0  ;;  %v16940_v1 = vcombine.high %v8001_v36, %v8009_v61  ;;  %v8017_v25 = vld [vmem:[%s20988_s22 + $0xd30] sm:$0xff] }
 0xbac   : > { %v11461_v59 = vmax.f32 %v17971_v41, 0.0  ;;  %v11460_v48 = vmax.f32 %v17968_v21, 0.0  ;;  %11323 = vmatpush1.bf16.msra.mxu0 %v16891_v42  ;;  %v16942_v16 = vcombine.high %v8002_v6, %v8010_v15  ;;  %v8026_v42 = vld [vmem:[%s20988_s22 + $0xd78] sm:$0xff]  ;;  %v16941_v55 = vcombine.low %v8002_v6, %v8010_v15  ;;  %v8033_v62 = vld [vmem:[%s20988_s22 + $0xdb0] sm:$0xff] }
 0xbad   : > { %v22827_v23 = vpack.c.bf16 %v11459_v56, %v11443_v24  ;;  %v11462_v14 = vmax.f32 %v17972_v31, 0.0  ;;  %11409 = vmatpush1.bf16.msra.mxu1 %v16893_v29  ;;  %11324 = vmatprep.subr.bf16.mxu0 %v16908_v32  ;;  %v16939_v29 = vcombine.low %v8001_v36, %v8009_v61  ;;  %v16956_v7 = vcombine.high %v8017_v25, %v8025_v34  ;;  %v8041_v32 = vld [vmem:[%s20988_s22 + $0xdf0] sm:$0xff]  ;;  %v8034_v41 = vld [vmem:[%s20988_s22 + $0xdb8] sm:$0xff] }
 0xbae   : > { %v22829_v39 = vpack.c.bf16 %v11461_v59, %v11445_v28  ;;  %v22831_v47 = vpack.c.bf16 %v11460_v48, %v11444_v19  ;;  %11410 = vmatprep.subr.bf16.mxu1 %v16910_v12  ;;  %v16958_v8 = vcombine.high %v8018_v30, %v8026_v42  ;;  %v8042_v21 = vld [vmem:[%s20988_s22 + $0xdf8] sm:$0xff]  ;;  %v16955_v26 = vcombine.low %v8017_v25, %v8025_v34  ;;  %v8049_v43 = vld [vmem:[%s20988_s22 + $0xe30] sm:$0xff] }
 0xbaf   : > { %v22835_v50 = vpack.c.bf16 %v11462_v14, %v11446_v18  ;;  %v16972_v12 = vcombine.high %v8033_v62, %v8041_v32  ;;  %v16974_v27 = vcombine.high %v8034_v41, %v8042_v21  ;;  %v8057_v24 = vld [vmem:[%s20988_s22 + $0xe70] sm:$0xff]  ;;  %v8050_v56 = vld [vmem:[%s20988_s22 + $0xe38] sm:$0xff]  ;;  %v16973_v10 = vcombine.low %v8034_v41, %v8042_v21 }
 0xbb0   : > { %11325 = vmatpush1.bf16.msra.mxu0 %v16907_v46  ;;  %v16957_v46 = vcombine.low %v8018_v30, %v8026_v42  ;;  %v8058_v31 = vld [vmem:[%s20988_s22 + $0xe78] sm:$0xff]  ;;  %v16988_v44 = vcombine.high %v8049_v43, %v8057_v24  ;;  %v8065_v19 = vld [vmem:[%s20988_s22 + $0xeb0] sm:$0xff]  ;;  %v16987_v14 = vcombine.low %v8049_v43, %v8057_v24 }
 0xbb1   : > { %11411 = vmatpush1.bf16.msra.mxu1 %v16909_v57  ;;  %11326 = vmatprep.subr.bf16.mxu0 %v16924_v22  ;;  %v16971_v57 = vcombine.low %v8033_v62, %v8041_v32  ;;  %v16990_v28 = vcombine.high %v8050_v56, %v8058_v31  ;;  %v8073_v59 = vld [vmem:[%s20988_s22 + $0xef0] sm:$0xff]  ;;  %v8066_v48 = vld [vmem:[%s20988_s22 + $0xeb8] sm:$0xff]  ;;  %v16989_v22 = vcombine.low %v8050_v56, %v8058_v31 }
 0xbb2   : > { %11412 = vmatprep.subr.bf16.mxu1 %v16926_v60  ;;  %v8074_v18 = vld [vmem:[%s20988_s22 + $0xef8] sm:$0xff]  ;;  %v17004_v60 = vcombine.high %v8065_v19, %v8073_v59  ;;  %v8081_v61 = vld [vmem:[%s20988_s22 + $0xf30] sm:$0xff] }
 0xbb3   : > { %v17006_v36 = vcombine.high %v8066_v48, %v8074_v18  ;;  %v8089_v6 = vld [vmem:[%s20988_s22 + $0xf70] sm:$0xff]  ;;  %v8082_v15 = vld [vmem:[%s20988_s22 + $0xf38] sm:$0xff] }
 0xbb4   : > { %11327 = vmatpush1.bf16.msra.mxu0 %v16923_v9  ;;  %v8090_v9 = vld [vmem:[%s20988_s22 + $0xf78] sm:$0xff]  ;;  %v8097_v34 = vld [vmem:[%s20988_s22 + $0xfb0] sm:$0xff] }
 0xbb5   : > { %11413 = vmatpush1.bf16.msra.mxu1 %v16925_v4  ;;  %11328 = vmatprep.subr.bf16.mxu0 %v16940_v1  ;;  %v17003_v4 = vcombine.low %v8065_v19, %v8073_v59  ;;  %v17005_v1 = vcombine.low %v8066_v48, %v8074_v18  ;;  %v17022_v25 = vcombine.high %v8082_v15, %v8090_v9  ;;  %v8105_v30 = vld [vmem:[%s20988_s22 + $0xff0] sm:$0xff]  ;;  %v8098_v42 = vld [vmem:[%s20988_s22 + $0xfb8] sm:$0xff] }
 0xbb6   : > { %11414 = vmatprep.subr.bf16.mxu1 %v16942_v16  ;;  %v17020_v16 = vcombine.high %v8081_v61, %v8089_v6  ;;  %v17035_v32 = vcombine.low %v8097_v34, %v8105_v30  ;;  %v19034_v21 = vld [vmem:[%s20997_s2 + $0x4] ss:$16 sps:$4 sm:$0xff]   ;;  %v19043_v43 = vld [vmem:[%s20997_s2 + $0x2c] ss:$16 sps:$4 sm:$0xff]   ;;  %v19038_v24 = vld [vmem:[%s20997_s2 + $0x20] ss:$16 sps:$4 sm:$0xff]  }
 0xbb7   : > { %v19041_v56 = vld [vmem:[%s20997_s2 + $0x28] ss:$16 sps:$4 sm:$0xff]   ;;  %v19046_v31 = vld [vmem:[%s20997_s2 + $0x44] ss:$16 sps:$4 sm:$0xff]   ;;  %v19061_v48 = vld [vmem:[%s20997_s2 + $0x8c] ss:$16 sps:$4 sm:$0xff]  }
 0xbb8   : > { %11329 = vmatpush1.bf16.msra.mxu0 %v16939_v29  ;;  %v8106_v29 = vld [vmem:[%s20988_s22 + $0xff8] sm:$0xff]  ;;  %v19058_v59 = vld [vmem:[%s20997_s2 + $0x84] ss:$16 sps:$4 sm:$0xff]   ;;  %v19056_v18 = vld [vmem:[%s20997_s2 + $0x80] ss:$16 sps:$4 sm:$0xff]  }
 0xbb9   : > { %11415 = vmatpush1.bf16.msra.mxu1 %v16941_v55  ;;  %11330 = vmatprep.subr.bf16.mxu0 %v16956_v7  ;;  %v17019_v55 = vcombine.low %v8081_v61, %v8089_v6  ;;  %v17021_v7 = vcombine.low %v8082_v15, %v8090_v9  ;;  %v17038_v62 = vcombine.high %v8098_v42, %v8106_v29  ;;  %v19053_v19 = vld [vmem:[%s20997_s2 + $0x68] ss:$16 sps:$4 sm:$0xff]   ;;  %v19070_v6 = vld [vmem:[%s20997_s2 + $0xc4] ss:$16 sps:$4 sm:$0xff]   ;;  %v19073_v15 = vld [vmem:[%s20997_s2 + $0xcc] ss:$16 sps:$4 sm:$0xff]  }
 0xbba   : > { %11416 = vmatprep.subr.bf16.mxu1 %v16958_v8  ;;  %v17036_v8 = vcombine.high %v8097_v34, %v8105_v30  ;;  %v17037_v41 = vcombine.low %v8098_v42, %v8106_v29  ;;  %v19065_v61 = vld [vmem:[%s20997_s2 + $0xa8] ss:$16 sps:$4 sm:$0xff]   ;;  %v19068_v9 = vld [vmem:[%s20997_s2 + $0xc0] ss:$16 sps:$4 sm:$0xff]   ;;  %v19082_v30 = vld [vmem:[%s20997_s2 + $0x104] ss:$16 sps:$4 sm:$0xff]  }
 0xbbb   : > { %v19077_v34 = vld [vmem:[%s20997_s2 + $0xe8] ss:$16 sps:$4 sm:$0xff]   ;;  %v19085_v42 = vld [vmem:[%s20997_s2 + $0x10c] ss:$16 sps:$4 sm:$0xff]   ;;  %v19080_v29 = vld [vmem:[%s20997_s2 + $0x100] ss:$16 sps:$4 sm:$0xff]  }
 0xbbc   : > { %11331 = vmatpush1.bf16.msra.mxu0 %v16955_v26  ;;  %v19037_v26 = vld [vmem:[%s20997_s2 + $0xc] ss:$16 sps:$4 sm:$0xff]  }
 0xbbd   : > { %11417 = vmatpush1.bf16.msra.mxu1 %v16957_v46  ;;  %11332 = vmatprep.subr.bf16.mxu0 %v16972_v12  ;;  %v19032_v46 = vld [vmem:[%s20997_s2] ss:$16 sps:$4 sm:$0xff]   ;;  %v19035_v12 = vld [vmem:[%s20997_s2 + $0x8] ss:$16 sps:$4 sm:$0xff]  }
 0xbbe   : > { %11418 = vmatprep.subr.bf16.mxu1 %v16974_v27  ;;  %v19040_v27 = vld [vmem:[%s20997_s2 + $0x24] ss:$16 sps:$4 sm:$0xff]  }
 0xbc0   : > { %11333 = vmatpush1.bf16.msra.mxu0 %v16971_v57  ;;  %v19049_v57 = vld [vmem:[%s20997_s2 + $0x4c] ss:$16 sps:$4 sm:$0xff]  }
 0xbc1   : > { %11419 = vmatpush1.bf16.msra.mxu1 %v16973_v10  ;;  %11334 = vmatprep.subr.bf16.mxu0 %v16988_v44  ;;  %v19047_v10 = vld [vmem:[%s20997_s2 + $0x48] ss:$16 sps:$4 sm:$0xff]   ;;  %v19052_v44 = vld [vmem:[%s20997_s2 + $0x64] ss:$16 sps:$4 sm:$0xff]  }
 0xbc2   : > { %11420 = vmatprep.subr.bf16.mxu1 %v16990_v28  ;;  %v19055_v28 = vld [vmem:[%s20997_s2 + $0x6c] ss:$16 sps:$4 sm:$0xff]  }
 0xbc4   : > { %11335 = vmatpush1.bf16.msra.mxu0 %v16987_v14  ;;  %v19059_v14 = vld [vmem:[%s20997_s2 + $0x88] ss:$16 sps:$4 sm:$0xff]  }
 0xbc5   : > { %11421 = vmatpush1.bf16.msra.mxu1 %v16989_v22  ;;  %11336 = vmatprep.subr.bf16.mxu0 %v17004_v60  ;;  %v19064_v22 = vld [vmem:[%s20997_s2 + $0xa4] ss:$16 sps:$4 sm:$0xff]   ;;  %v19067_v60 = vld [vmem:[%s20997_s2 + $0xac] ss:$16 sps:$4 sm:$0xff]  }
 0xbc6   : > { %11422 = vmatprep.subr.bf16.mxu1 %v17006_v36  ;;  %v19062_v36 = vld [vmem:[%s20997_s2 + $0xa0] ss:$16 sps:$4 sm:$0xff]  }
 0xbc8   : > { %11337 = vmatpush1.bf16.msra.mxu0 %v17003_v4  ;;  %v19071_v4 = vld [vmem:[%s20997_s2 + $0xc8] ss:$16 sps:$4 sm:$0xff]  }
 0xbc9   : > { %11423 = vmatpush1.bf16.msra.mxu1 %v17005_v1  ;;  %11338 = vmatprep.subr.bf16.mxu0 %v17020_v16  ;;  %v19076_v1 = vld [vmem:[%s20997_s2 + $0xe4] ss:$16 sps:$4 sm:$0xff]   ;;  %v19079_v16 = vld [vmem:[%s20997_s2 + $0xec] ss:$16 sps:$4 sm:$0xff]  }
 0xbca   : > { %11424 = vmatprep.subr.bf16.mxu1 %v17022_v25  ;;  %v19074_v25 = vld [vmem:[%s20997_s2 + $0xe0] ss:$16 sps:$4 sm:$0xff]  }
 0xbcc   : > { %11339 = vmatpush1.bf16.msra.mxu0 %v17019_v55  ;;  %v19083_v55 = vld [vmem:[%s20997_s2 + $0x108] ss:$16 sps:$4 sm:$0xff]  }
 0xbcd   : > { %11425 = vmatpush1.bf16.msra.mxu1 %v17021_v7  ;;  %11340 = vmatprep.subr.bf16.mxu0 %v17036_v8  ;;  %v19088_v7 = vld [vmem:[%s20997_s2 + $0x124] ss:$16 sps:$4 sm:$0xff]   ;;  %v19091_v8 = vld [vmem:[%s20997_s2 + $0x12c] ss:$16 sps:$4 sm:$0xff]  }
 0xbce   : > { %11426 = vmatprep.subr.bf16.mxu1 %v17038_v62  ;;  %v19086_v62 = vld [vmem:[%s20997_s2 + $0x120] ss:$16 sps:$4 sm:$0xff]  }
 0xbd0   : > { %11341 = vmatpush1.bf16.msra.mxu0 %v17035_v32  ;;  %v19089_v32 = vld [vmem:[%s20997_s2 + $0x128] ss:$16 sps:$4 sm:$0xff]  }
 0xbd1   : > { %11427 = vmatpush1.bf16.msra.mxu1 %v17037_v41  ;;  %14581 = vmatprep.subr.bf16.mxu0 %v19034_v21  ;;  %v19094_v41 = vld [vmem:[%s20997_s2 + $0x144] ss:$16 sps:$4 sm:$0xff]   ;;  %v19097_v21 = vld [vmem:[%s20997_s2 + $0x14c] ss:$16 sps:$4 sm:$0xff]  }
 0xbd2   : > { %14925 = vmatprep.subr.bf16.mxu1 %v19037_v26  ;;  %v19092_v26 = vld [vmem:[%s20997_s2 + $0x140] ss:$16 sps:$4 sm:$0xff]  }
 0xbd3   : > { %11343 = vmatmul.mubr.bf16.vlgmr.msra.gmra.mrb[60].mxu0 %v22426_v53 }
 0xbd4   : > { %11429 = vmatmul.mubr.bf16.vlgmr.msra.gmra.mrb[60].mxu1 %v22426_v53  ;;  %14582 = vmatpush1.bf16.msra.mxu0 %v19032_v46  ;;  %v19044_v53 = vld [vmem:[%s20997_s2 + $0x40] ss:$16 sps:$4 sm:$0xff]   ;;  %v19095_v46 = vld [vmem:[%s20997_s2 + $0x148] ss:$16 sps:$4 sm:$0xff]  }
 0xbd5   : > { %14613 = vmatprep.mubr.bf16.mxu0 %v22679_v38  ;;  %14926 = vmatpush1.bf16.msra.mxu1 %v19035_v12  ;;  %v19100_v12 = vld [vmem:[%s20997_s2 + $0x164] ss:$16 sps:$4 sm:$0xff]  }
 0xbd6   : > { %14957 = vmatprep.mubr.bf16.mxu1 %v22679_v38  ;;  %14583 = vmatprep.subr.bf16.mxu0 %v19040_v27  ;;  %v19050_v38 = vld [vmem:[%s20997_s2 + $0x60] ss:$16 sps:$4 sm:$0xff]   ;;  %v19103_v27 = vld [vmem:[%s20997_s2 + $0x16c] ss:$16 sps:$4 sm:$0xff]  }
 0xbd7   : > { %14927 = vmatprep.subr.bf16.mxu1 %v19043_v43  ;;  %v19098_v43 = vld [vmem:[%s20997_s2 + $0x160] ss:$16 sps:$4 sm:$0xff]  }
 0xbd8   : > { %14584 = vmatpush1.bf16.msra.mxu0 %v19038_v24  ;;  %v19101_v24 = vld [vmem:[%s20997_s2 + $0x168] ss:$16 sps:$4 sm:$0xff]  }
 0xbd9   : > { %14928 = vmatpush1.bf16.msra.mxu1 %v19041_v56  ;;  %14585 = vmatprep.subr.bf16.mxu0 %v19046_v31  ;;  %v19106_v56 = vld [vmem:[%s20997_s2 + $0x184] ss:$16 sps:$4 sm:$0xff]   ;;  %v19109_v31 = vld [vmem:[%s20997_s2 + $0x18c] ss:$16 sps:$4 sm:$0xff]  }
 0xbda   : > { %14929 = vmatprep.subr.bf16.mxu1 %v19049_v57  ;;  %v19104_v57 = vld [vmem:[%s20997_s2 + $0x180] ss:$16 sps:$4 sm:$0xff]  }
 0xbdc   : > { %14586 = vmatpush1.bf16.msra.mxu0 %v19044_v53  ;;  %v19107_v53 = vld [vmem:[%s20997_s2 + $0x188] ss:$16 sps:$4 sm:$0xff]  }
 0xbdd   : > { %14930 = vmatpush1.bf16.msra.mxu1 %v19047_v10  ;;  %14587 = vmatprep.subr.bf16.mxu0 %v19052_v44  ;;  %v19112_v10 = vld [vmem:[%s20997_s2 + $0x1a4] ss:$16 sps:$4 sm:$0xff]   ;;  %v19115_v44 = vld [vmem:[%s20997_s2 + $0x1ac] ss:$16 sps:$4 sm:$0xff]  }
 0xbde   : > { %14931 = vmatprep.subr.bf16.mxu1 %v19055_v28  ;;  %v19110_v28 = vld [vmem:[%s20997_s2 + $0x1a0] ss:$16 sps:$4 sm:$0xff]  }
 0xbe0   : > { %14588 = vmatpush1.bf16.msra.mxu0 %v19050_v38  ;;  %v19113_v38 = vld [vmem:[%s20997_s2 + $0x1a8] ss:$16 sps:$4 sm:$0xff]  }
 0xbe1   : > { %14932 = vmatpush1.bf16.msra.mxu1 %v19053_v19  ;;  %14589 = vmatprep.subr.bf16.mxu0 %v19058_v59  ;;  %v19118_v19 = vld [vmem:[%s20997_s2 + $0x1c4] ss:$16 sps:$4 sm:$0xff]   ;;  %v19121_v59 = vld [vmem:[%s20997_s2 + $0x1cc] ss:$16 sps:$4 sm:$0xff]  }
 0xbe2   : > { %14933 = vmatprep.subr.bf16.mxu1 %v19061_v48  ;;  %v19116_v48 = vld [vmem:[%s20997_s2 + $0x1c0] ss:$16 sps:$4 sm:$0xff]  }
 0xbe4   : > { %14590 = vmatpush1.bf16.msra.mxu0 %v19056_v18  ;;  %v19119_v18 = vld [vmem:[%s20997_s2 + $0x1c8] ss:$16 sps:$4 sm:$0xff]  }
 0xbe5   : > { %14934 = vmatpush1.bf16.msra.mxu1 %v19059_v14  ;;  %14591 = vmatprep.subr.bf16.mxu0 %v19064_v22  ;;  %v19124_v14 = vld [vmem:[%s20997_s2 + $0x1e4] ss:$16 sps:$4 sm:$0xff]   ;;  %v19127_v22 = vld [vmem:[%s20997_s2 + $0x1ec] ss:$16 sps:$4 sm:$0xff]  }
 0xbe6   : > { %14935 = vmatprep.subr.bf16.mxu1 %v19067_v60  ;;  %v19122_v60 = vld [vmem:[%s20997_s2 + $0x1e0] ss:$16 sps:$4 sm:$0xff]  }
 0xbe8   : > { %14592 = vmatpush1.bf16.msra.mxu0 %v19062_v36  ;;  %v19125_v36 = vld [vmem:[%s20997_s2 + $0x1e8] ss:$16 sps:$4 sm:$0xff]  }
 0xbe9   : > { %14936 = vmatpush1.bf16.msra.mxu1 %v19065_v61  ;;  %14593 = vmatprep.subr.bf16.mxu0 %v19070_v6  ;;  %v19130_v61 = vld [vmem:[%s20997_s2 + $0x204] ss:$16 sps:$4 sm:$0xff]   ;;  %v19133_v6 = vld [vmem:[%s20997_s2 + $0x20c] ss:$16 sps:$4 sm:$0xff]  }
 0xbea   : > { %14937 = vmatprep.subr.bf16.mxu1 %v19073_v15  ;;  %v19128_v15 = vld [vmem:[%s20997_s2 + $0x200] ss:$16 sps:$4 sm:$0xff]  }
 0xbec   : > { %14594 = vmatpush1.bf16.msra.mxu0 %v19068_v9  ;;  %v19131_v9 = vld [vmem:[%s20997_s2 + $0x208] ss:$16 sps:$4 sm:$0xff]  }
 0xbed   : > { %14938 = vmatpush1.bf16.msra.mxu1 %v19071_v4  ;;  %14595 = vmatprep.subr.bf16.mxu0 %v19076_v1  ;;  %v19136_v4 = vld [vmem:[%s20997_s2 + $0x224] ss:$16 sps:$4 sm:$0xff]   ;;  %v19139_v1 = vld [vmem:[%s20997_s2 + $0x22c] ss:$16 sps:$4 sm:$0xff]  }
 0xbee   : > { %14939 = vmatprep.subr.bf16.mxu1 %v19079_v16  ;;  %v19134_v16 = vld [vmem:[%s20997_s2 + $0x220] ss:$16 sps:$4 sm:$0xff]  }
 0xbf0   : > { %14596 = vmatpush1.bf16.msra.mxu0 %v19074_v25  ;;  %v19137_v25 = vld [vmem:[%s20997_s2 + $0x228] ss:$16 sps:$4 sm:$0xff]  }
 0xbf1   : > { %14940 = vmatpush1.bf16.msra.mxu1 %v19077_v34  ;;  %14597 = vmatprep.subr.bf16.mxu0 %v19082_v30  ;;  %v19142_v34 = vld [vmem:[%s20997_s2 + $0x244] ss:$16 sps:$4 sm:$0xff]   ;;  %v19145_v30 = vld [vmem:[%s20997_s2 + $0x24c] ss:$16 sps:$4 sm:$0xff]  }
 0xbf2   : > { %14941 = vmatprep.subr.bf16.mxu1 %v19085_v42  ;;  %v19143_v42 = vld [vmem:[%s20997_s2 + $0x248] ss:$16 sps:$4 sm:$0xff]  }
 0xbf4   : > { %14598 = vmatpush1.bf16.msra.mxu0 %v19080_v29  ;;  %v19148_v29 = vld [vmem:[%s20997_s2 + $0x264] ss:$16 sps:$4 sm:$0xff]  }
 0xbf5   : > { %14942 = vmatpush1.bf16.msra.mxu1 %v19083_v55  ;;  %14599 = vmatprep.subr.bf16.mxu0 %v19088_v7  ;;  %v19151_v55 = vld [vmem:[%s20997_s2 + $0x26c] ss:$16 sps:$4 sm:$0xff]   ;;  %v19149_v7 = vld [vmem:[%s20997_s2 + $0x268] ss:$16 sps:$4 sm:$0xff]  }
 0xbf6   : > { %14943 = vmatprep.subr.bf16.mxu1 %v19091_v8  ;;  %v19154_v8 = vld [vmem:[%s20997_s2 + $0x284] ss:$16 sps:$4 sm:$0xff]  }
 0xbf8   : > { %14600 = vmatpush1.bf16.msra.mxu0 %v19086_v62  ;;  %v19157_v62 = vld [vmem:[%s20997_s2 + $0x28c] ss:$16 sps:$4 sm:$0xff]  }
 0xbf9   : > { %14944 = vmatpush1.bf16.msra.mxu1 %v19089_v32  ;;  %14601 = vmatprep.subr.bf16.mxu0 %v19094_v41  ;;  %v19152_v32 = vld [vmem:[%s20997_s2 + $0x280] ss:$16 sps:$4 sm:$0xff]   ;;  %v22955_v41 = vld [vmem:[%s20991_s21 + $0x8] sm:$0xff] }
 0xbfa   : > { %14945 = vmatprep.subr.bf16.mxu1 %v19097_v21  ;;  %v19155_v21 = vld [vmem:[%s20997_s2 + $0x288] ss:$16 sps:$4 sm:$0xff]  }
 0xbfc   : > { %14602 = vmatpush1.bf16.msra.mxu0 %v19092_v26  ;;  %v19160_v26 = vld [vmem:[%s20997_s2 + $0x2a4] ss:$16 sps:$4 sm:$0xff]  }
 0xbfd   : > { %14946 = vmatpush1.bf16.msra.mxu1 %v19095_v46  ;;  %14603 = vmatprep.subr.bf16.mxu0 %v19100_v12  ;;  %v19163_v46 = vld [vmem:[%s20997_s2 + $0x2ac] ss:$16 sps:$4 sm:$0xff]   ;;  %v8146_v12 = vrot.slane %v22955_v41, %v21465_v40 }
 0xbfe   : > { %14947 = vmatprep.subr.bf16.mxu1 %v19103_v27  ;;  %v8154_v27 = vrot.slane %v22955_v41, %v21481_v54 }
 0xc00   : > { %14604 = vmatpush1.bf16.msra.mxu0 %v19098_v43  ;;  %v8150_v43 = vrot.slane %v22955_v41, %v21470_v58 }
 0xc01   : > { %14948 = vmatpush1.bf16.msra.mxu1 %v19101_v24  ;;  %14605 = vmatprep.subr.bf16.mxu0 %v19106_v56  ;;  %v19158_v24 = vld [vmem:[%s20997_s2 + $0x2a0] ss:$16 sps:$4 sm:$0xff]   ;;  %v8158_v56 = vrot.slane %v22955_v41, %v21504_v5 }
 0xc02   : > { %14949 = vmatprep.subr.bf16.mxu1 %v19109_v31  ;;  %v19161_v31 = vld [vmem:[%s20997_s2 + $0x2a8] ss:$16 sps:$4 sm:$0xff]  }
 0xc04   : > { %14606 = vmatpush1.bf16.msra.mxu0 %v19104_v57  ;;  %v19166_v57 = vld [vmem:[%s20997_s2 + $0x2c4] ss:$16 sps:$4 sm:$0xff]  }
 0xc05   : > { %14950 = vmatpush1.bf16.msra.mxu1 %v19107_v53  ;;  %14607 = vmatprep.subr.bf16.mxu0 %v19112_v10  ;;  %v19169_v10 = vld [vmem:[%s20997_s2 + $0x2cc] ss:$16 sps:$4 sm:$0xff]  }
 0xc06   : > { %14951 = vmatprep.subr.bf16.mxu1 %v19115_v44 }
 0xc08   : > { %14608 = vmatpush1.bf16.msra.mxu0 %v19110_v28 }
 0xc09   : > { %14952 = vmatpush1.bf16.msra.mxu1 %v19113_v38  ;;  %14609 = vmatprep.subr.bf16.mxu0 %v19118_v19 }
 0xc0a   : > { %14953 = vmatprep.subr.bf16.mxu1 %v19121_v59 }
 0xc0c   : > { %14610 = vmatpush1.bf16.msra.mxu0 %v19116_v48 }
 0xc0d   : > { %14954 = vmatpush1.bf16.msra.mxu1 %v19119_v18  ;;  %14611 = vmatprep.subr.bf16.mxu0 %v19124_v14  ;;  %v19164_v14 = vld [vmem:[%s20997_s2 + $0x2c0] ss:$16 sps:$4 sm:$0xff]  }
 0xc0e   : > { %14955 = vmatprep.subr.bf16.mxu1 %v19127_v22 }
 0xc10   : > { %14612 = vmatpush1.bf16.msra.mxu0 %v19122_v60 }
 0xc11   : > { %14956 = vmatpush1.bf16.msra.mxu1 %v19125_v36  ;;  %14624 = vmatprep.subr.bf16.mxu0 %v19130_v61 }
 0xc12   : > { %14968 = vmatprep.subr.bf16.mxu1 %v19133_v6  ;;  %v19167_v6 = vld [vmem:[%s20997_s2 + $0x2c8] ss:$16 sps:$4 sm:$0xff]  }
 0xc13   : > { %14614 = vmatmul.mubr.bf16.vlgmr.msra.gmra.mrb[64].mxu0 %v22675_v17 }
 0xc14   : > { %14958 = vmatmul.mubr.bf16.vlgmr.msra.gmra.mrb[64].mxu1 %v22675_v17  ;;  %14625 = vmatpush1.bf16.msra.mxu0 %v19128_v15  ;;  %v19140_v17 = vld [vmem:[%s20997_s2 + $0x240] ss:$16 sps:$4 sm:$0xff]   ;;  %v19172_v15 = vld [vmem:[%s20997_s2 + $0x2e4] ss:$16 sps:$4 sm:$0xff]  }
 0xc15   : > { %14656 = vmatprep.mubr.bf16.mxu0 %v22681_v3  ;;  %14969 = vmatpush1.bf16.msra.mxu1 %v19131_v9 }
 0xc16   : > { %15000 = vmatprep.mubr.bf16.mxu1 %v22681_v3  ;;  %14626 = vmatprep.subr.bf16.mxu0 %v19136_v4  ;;  %v19146_v3 = vld [vmem:[%s20997_s2 + $0x260] ss:$16 sps:$4 sm:$0xff]  }
 0xc17   : > { %14970 = vmatprep.subr.bf16.mxu1 %v19139_v1 }
 0xc18   : > { %14627 = vmatpush1.bf16.msra.mxu0 %v19134_v16  ;;  %v19175_v16 = vld [vmem:[%s20997_s2 + $0x2ec] ss:$16 sps:$4 sm:$0xff]  }
 0xc19   : > { %14971 = vmatpush1.bf16.msra.mxu1 %v19137_v25  ;;  %14628 = vmatprep.subr.bf16.mxu0 %v19142_v34 }
 0xc1a   : > { %14972 = vmatprep.subr.bf16.mxu1 %v19145_v30 }
 0xc1c   : > { %14629 = vmatpush1.bf16.msra.mxu0 %v19140_v17 }
 0xc1d   : > { %14973 = vmatpush1.bf16.msra.mxu1 %v19143_v42  ;;  %14630 = vmatprep.subr.bf16.mxu0 %v19148_v29 }
 0xc1e   : > { %14974 = vmatprep.subr.bf16.mxu1 %v19151_v55 }
 0xc20   : > { %14631 = vmatpush1.bf16.msra.mxu0 %v19146_v3  ;;  %v19170_v3 = vld [vmem:[%s20997_s2 + $0x2e0] ss:$16 sps:$4 sm:$0xff]  }
 0xc21   : > { %14975 = vmatpush1.bf16.msra.mxu1 %v19149_v7  ;;  %14632 = vmatprep.subr.bf16.mxu0 %v19154_v8 }
 0xc22   : > { %14976 = vmatprep.subr.bf16.mxu1 %v19157_v62 }
 0xc24   : > { %14633 = vmatpush1.bf16.msra.mxu0 %v19152_v32  ;;  %v19173_v32 = vld [vmem:[%s20997_s2 + $0x2e8] ss:$16 sps:$4 sm:$0xff]  }
 0xc25   : > { %14977 = vmatpush1.bf16.msra.mxu1 %v19155_v21  ;;  %14634 = vmatprep.subr.bf16.mxu0 %v19160_v26  ;;  %v19178_v21 = vld [vmem:[%s20997_s2 + $0x304] ss:$16 sps:$4 sm:$0xff]  }
 0xc26   : > { %v11172_v53 = vpop.f32.mrb[56].mxu0  ;;  %14978 = vmatprep.subr.bf16.mxu1 %v19163_v46 }
 0xc27   : > { %v17973_v44 = vadd.f32 %v11172_v53, %v8146_v12  ;;  %v11258_v28 = vpop.f32.mrb[56].mxu1  ;;  %v11174_v38 = vpop.f32.mrb[57].mxu0  ;;  %v19185_v53 = vld [vmem:[%s20997_s2 + $0x328] ss:$16 sps:$4 sm:$0xff]  }
 0xc28   : > { %v17977_v19 = vadd.f32 %v11258_v28, %v8154_v27  ;;  %v17974_v59 = vadd.f32 %v11174_v38, %v8150_v43  ;;  %v11260_v48 = vpop.f32.mrb[57].mxu1  ;;  %v11176_v18 = vpop.f32.mrb[58].mxu0  ;;  %14635 = vmatpush1.bf16.msra.mxu0 %v19158_v24  ;;  %v19179_v24 = vld [vmem:[%s20997_s2 + $0x308] ss:$16 sps:$4 sm:$0xff]   ;;  %v19188_v28 = vld [vmem:[%s20997_s2 + $0x340] ss:$16 sps:$4 sm:$0xff]  }
 0xc29   : > { %v17978_v22 = vadd.f32 %v11260_v48, %v8158_v56  ;;  %v17975_v60 = vadd.f32 %v11176_v18, %v8146_v12  ;;  %v11262_v36 = vpop.f32.mrb[58].mxu1  ;;  %14979 = vmatpush1.bf16.msra.mxu1 %v19161_v31  ;;  %v11178_v61 = vpop.f32.mrb[59].mxu0  ;;  %14636 = vmatprep.subr.bf16.mxu0 %v19166_v57  ;;  %v11447_v25 = vmax.f32 %v17973_v44, 0.0  ;;  %v19181_v12 = vld [vmem:[%s20997_s2 + $0x30c] ss:$16 sps:$4 sm:$0xff]  }
 0xc2a   : > { %v17979_v9 = vadd.f32 %v11262_v36, %v8154_v27  ;;  %v17976_v4 = vadd.f32 %v11178_v61, %v8150_v43  ;;  %v11264_v1 = vpop.f32.mrb[59].mxu1  ;;  %14980 = vmatprep.subr.bf16.mxu1 %v19169_v10  ;;  %v11449_v17 = vmax.f32 %v17977_v19, 0.0  ;;  %v11448_v42 = vmax.f32 %v17974_v59, 0.0  ;;  %v19176_v43 = vld [vmem:[%s20997_s2 + $0x300] ss:$16 sps:$4 sm:$0xff]  }
 0xc2b   : > { %v11463_v34 = vmax.f32 %v17975_v60, 0.0  ;;  %v17980_v30 = vadd.f32 %v11264_v1, %v8158_v56  ;;  %v11450_v7 = vmax.f32 %v17978_v22, 0.0  ;;  %v19184_v56 = vld [vmem:[%s20997_s2 + $0x324] ss:$16 sps:$4 sm:$0xff]   ;;  %v19187_v31 = vld [vmem:[%s20997_s2 + $0x32c] ss:$16 sps:$4 sm:$0xff]  }
 0xc2c   : > { %v11465_v29 = vmax.f32 %v17979_v9, 0.0  ;;  %v11464_v55 = vmax.f32 %v17976_v4, 0.0  ;;  %14637 = vmatpush1.bf16.msra.mxu0 %v19164_v14  ;;  %v19182_v57 = vld [vmem:[%s20997_s2 + $0x320] ss:$16 sps:$4 sm:$0xff]   ;;  %v19190_v10 = vld [vmem:[%s20997_s2 + $0x344] ss:$16 sps:$4 sm:$0xff]  }
 0xc2d   : > { %v22977_v8 = vpack.c.bf16 %v11463_v34, %v11447_v25  ;;  %v11466_v62 = vmax.f32 %v17980_v30, 0.0  ;;  %14981 = vmatpush1.bf16.msra.mxu1 %v19167_v6  ;;  %14638 = vmatprep.subr.bf16.mxu0 %v19172_v15  ;;  %v19193_v44 = vld [vmem:[%s20997_s2 + $0x34c] ss:$16 sps:$4 sm:$0xff]   ;;  %v19191_v38 = vld [vmem:[%s20997_s2 + $0x348] ss:$16 sps:$4 sm:$0xff]  }
 0xc2e   : > { %v22981_v26 = vpack.c.bf16 %v11465_v29, %v11449_v17  ;;  %v22983_v46 = vpack.c.bf16 %v11464_v55, %v11448_v42  ;;  %14982 = vmatprep.subr.bf16.mxu1 %v19175_v16  ;;  %v19196_v19 = vld [vmem:[%s20997_s2 + $0x364] ss:$16 sps:$4 sm:$0xff]   ;;  %v19199_v59 = vld [vmem:[%s20997_s2 + $0x36c] ss:$16 sps:$4 sm:$0xff]   ;;  %v19194_v48 = vld [vmem:[%s20997_s2 + $0x360] ss:$16 sps:$4 sm:$0xff]  }
 0xc2f   : > { %v22986_v27 = vpack.c.bf16 %v11466_v62, %v11450_v7  ;;  %v19197_v18 = vld [vmem:[%s20997_s2 + $0x368] ss:$16 sps:$4 sm:$0xff]   ;;  %v19202_v14 = vld [vmem:[%s20997_s2 + $0x384] ss:$16 sps:$4 sm:$0xff]   ;;  %v19205_v22 = vld [vmem:[%s20997_s2 + $0x38c] ss:$16 sps:$4 sm:$0xff]  }
 0xc30   : > { %14639 = vmatpush1.bf16.msra.mxu0 %v19170_v3  ;;  %v19200_v60 = vld [vmem:[%s20997_s2 + $0x380] ss:$16 sps:$4 sm:$0xff]   ;;  %v19203_v36 = vld [vmem:[%s20997_s2 + $0x388] ss:$16 sps:$4 sm:$0xff]   ;;  %v19208_v61 = vld [vmem:[%s20997_s2 + $0x3a4] ss:$16 sps:$4 sm:$0xff]  }
 0xc31   : > { %14983 = vmatpush1.bf16.msra.mxu1 %v19173_v32  ;;  %14640 = vmatprep.subr.bf16.mxu0 %v19178_v21  ;;  %v19211_v6 = vld [vmem:[%s20997_s2 + $0x3ac] ss:$16 sps:$4 sm:$0xff]   ;;  %v19206_v15 = vld [vmem:[%s20997_s2 + $0x3a0] ss:$16 sps:$4 sm:$0xff]   ;;  %v19209_v9 = vld [vmem:[%s20997_s2 + $0x3a8] ss:$16 sps:$4 sm:$0xff]  }
 0xc32   : > { %14984 = vmatprep.subr.bf16.mxu1 %v19181_v12  ;;  %v19214_v4 = vld [vmem:[%s20997_s2 + $0x3c4] ss:$16 sps:$4 sm:$0xff]   ;;  %v19217_v1 = vld [vmem:[%s20997_s2 + $0x3cc] ss:$16 sps:$4 sm:$0xff]   ;;  %v19212_v16 = vld [vmem:[%s20997_s2 + $0x3c0] ss:$16 sps:$4 sm:$0xff]  }
 0xc33   : > { %v19215_v25 = vld [vmem:[%s20997_s2 + $0x3c8] ss:$16 sps:$4 sm:$0xff]   ;;  %v19220_v34 = vld [vmem:[%s20997_s2 + $0x3e4] ss:$16 sps:$4 sm:$0xff]   ;;  %v19223_v30 = vld [vmem:[%s20997_s2 + $0x3ec] ss:$16 sps:$4 sm:$0xff]  }
 0xc34   : > { %14641 = vmatpush1.bf16.msra.mxu0 %v19176_v43  ;;  %v19218_v17 = vld [vmem:[%s20997_s2 + $0x3e0] ss:$16 sps:$4 sm:$0xff]   ;;  %v19221_v42 = vld [vmem:[%s20997_s2 + $0x3e8] ss:$16 sps:$4 sm:$0xff]   ;;  %v19226_v29 = vld [vmem:[%s20997_s2 + $0x404] ss:$16 sps:$4 sm:$0xff]  }
 0xc35   : > { %14985 = vmatpush1.bf16.msra.mxu1 %v19179_v24  ;;  %14642 = vmatprep.subr.bf16.mxu0 %v19184_v56  ;;  %v19229_v55 = vld [vmem:[%s20997_s2 + $0x40c] ss:$16 sps:$4 sm:$0xff]   ;;  %v19224_v3 = vld [vmem:[%s20997_s2 + $0x400] ss:$16 sps:$4 sm:$0xff]   ;;  %v19227_v7 = vld [vmem:[%s20997_s2 + $0x408] ss:$16 sps:$4 sm:$0xff]  }
 0xc36   : > { %14986 = vmatprep.subr.bf16.mxu1 %v19187_v31  ;;  %v19232_v62 = vld [vmem:[%s20997_s2 + $0x424] ss:$16 sps:$4 sm:$0xff]   ;;  %v19235_v32 = vld [vmem:[%s20997_s2 + $0x42c] ss:$16 sps:$4 sm:$0xff]   ;;  %v19230_v21 = vld [vmem:[%s20997_s2 + $0x420] ss:$16 sps:$4 sm:$0xff]  }
 0xc37   : > { %v19233_v12 = vld [vmem:[%s20997_s2 + $0x428] ss:$16 sps:$4 sm:$0xff]   ;;  %v19238_v43 = vld [vmem:[%s20997_s2 + $0x444] ss:$16 sps:$4 sm:$0xff]   ;;  %v19241_v24 = vld [vmem:[%s20997_s2 + $0x44c] ss:$16 sps:$4 sm:$0xff]  }
 0xc38   : > { %14643 = vmatpush1.bf16.msra.mxu0 %v19182_v57  ;;  %v19239_v56 = vld [vmem:[%s20997_s2 + $0x448] ss:$16 sps:$4 sm:$0xff]   ;;  %v19244_v31 = vld [vmem:[%s20997_s2 + $0x464] ss:$16 sps:$4 sm:$0xff]   ;;  %v19247_v57 = vld [vmem:[%s20997_s2 + $0x46c] ss:$16 sps:$4 sm:$0xff]  }
 0xc39   : > { %14987 = vmatpush1.bf16.msra.mxu1 %v19185_v53  ;;  %14644 = vmatprep.subr.bf16.mxu0 %v19190_v10  ;;  %v19245_v53 = vld [vmem:[%s20997_s2 + $0x468] ss:$16 sps:$4 sm:$0xff]   ;;  %v19250_v10 = vld [vmem:[%s20997_s2 + $0x484] ss:$16 sps:$4 sm:$0xff]  }
 0xc3a   : > { %14988 = vmatprep.subr.bf16.mxu1 %v19193_v44  ;;  %v19253_v44 = vld [vmem:[%s20997_s2 + $0x48c] ss:$16 sps:$4 sm:$0xff]  }
 0xc3c   : > { %14645 = vmatpush1.bf16.msra.mxu0 %v19188_v28  ;;  %v19248_v28 = vld [vmem:[%s20997_s2 + $0x480] ss:$16 sps:$4 sm:$0xff]  }
 0xc3d   : > { %14989 = vmatpush1.bf16.msra.mxu1 %v19191_v38  ;;  %14646 = vmatprep.subr.bf16.mxu0 %v19196_v19  ;;  %v19251_v38 = vld [vmem:[%s20997_s2 + $0x488] ss:$16 sps:$4 sm:$0xff]   ;;  %v19256_v19 = vld [vmem:[%s20997_s2 + $0x4a4] ss:$16 sps:$4 sm:$0xff]  }
 0xc3e   : > { %14990 = vmatprep.subr.bf16.mxu1 %v19199_v59  ;;  %v19259_v59 = vld [vmem:[%s20997_s2 + $0x4ac] ss:$16 sps:$4 sm:$0xff]  }
 0xc40   : > { %14647 = vmatpush1.bf16.msra.mxu0 %v19194_v48  ;;  %v19254_v48 = vld [vmem:[%s20997_s2 + $0x4a0] ss:$16 sps:$4 sm:$0xff]  }
 0xc41   : > { %14991 = vmatpush1.bf16.msra.mxu1 %v19197_v18  ;;  %14648 = vmatprep.subr.bf16.mxu0 %v19202_v14  ;;  %v19257_v18 = vld [vmem:[%s20997_s2 + $0x4a8] ss:$16 sps:$4 sm:$0xff]   ;;  %v19262_v14 = vld [vmem:[%s20997_s2 + $0x4c4] ss:$16 sps:$4 sm:$0xff]  }
 0xc42   : > { %14992 = vmatprep.subr.bf16.mxu1 %v19205_v22  ;;  %v19265_v22 = vld [vmem:[%s20997_s2 + $0x4cc] ss:$16 sps:$4 sm:$0xff]  }
 0xc44   : > { %14649 = vmatpush1.bf16.msra.mxu0 %v19200_v60  ;;  %v19260_v60 = vld [vmem:[%s20997_s2 + $0x4c0] ss:$16 sps:$4 sm:$0xff]  }
 0xc45   : > { %14993 = vmatpush1.bf16.msra.mxu1 %v19203_v36  ;;  %14650 = vmatprep.subr.bf16.mxu0 %v19208_v61  ;;  %v19263_v36 = vld [vmem:[%s20997_s2 + $0x4c8] ss:$16 sps:$4 sm:$0xff]   ;;  %v19268_v61 = vld [vmem:[%s20997_s2 + $0x4e4] ss:$16 sps:$4 sm:$0xff]  }
 0xc46   : > { %14994 = vmatprep.subr.bf16.mxu1 %v19211_v6  ;;  %v19271_v6 = vld [vmem:[%s20997_s2 + $0x4ec] ss:$16 sps:$4 sm:$0xff]  }
 0xc48   : > { %14651 = vmatpush1.bf16.msra.mxu0 %v19206_v15  ;;  %v19266_v15 = vld [vmem:[%s20997_s2 + $0x4e0] ss:$16 sps:$4 sm:$0xff]  }
 0xc49   : > { %14995 = vmatpush1.bf16.msra.mxu1 %v19209_v9  ;;  %14652 = vmatprep.subr.bf16.mxu0 %v19214_v4  ;;  %v19269_v9 = vld [vmem:[%s20997_s2 + $0x4e8] ss:$16 sps:$4 sm:$0xff]   ;;  %v19274_v4 = vld [vmem:[%s20997_s2 + $0x504] ss:$16 sps:$4 sm:$0xff]  }
 0xc4a   : > { %14996 = vmatprep.subr.bf16.mxu1 %v19217_v1  ;;  %v19277_v1 = vld [vmem:[%s20997_s2 + $0x50c] ss:$16 sps:$4 sm:$0xff]  }
 0xc4c   : > { %14653 = vmatpush1.bf16.msra.mxu0 %v19212_v16  ;;  %v19272_v16 = vld [vmem:[%s20997_s2 + $0x500] ss:$16 sps:$4 sm:$0xff]  }
 0xc4d   : > { %14997 = vmatpush1.bf16.msra.mxu1 %v19215_v25  ;;  %14654 = vmatprep.subr.bf16.mxu0 %v19220_v34  ;;  %v19275_v25 = vld [vmem:[%s20997_s2 + $0x508] ss:$16 sps:$4 sm:$0xff]   ;;  %v19280_v34 = vld [vmem:[%s20997_s2 + $0x524] ss:$16 sps:$4 sm:$0xff]  }
 0xc4e   : > { %14998 = vmatprep.subr.bf16.mxu1 %v19223_v30  ;;  %v19283_v30 = vld [vmem:[%s20997_s2 + $0x52c] ss:$16 sps:$4 sm:$0xff]  }
 0xc50   : > { %14655 = vmatpush1.bf16.msra.mxu0 %v19218_v17  ;;  %v19278_v17 = vld [vmem:[%s20997_s2 + $0x520] ss:$16 sps:$4 sm:$0xff]  }
 0xc51   : > { %14999 = vmatpush1.bf16.msra.mxu1 %v19221_v42  ;;  %14667 = vmatprep.subr.bf16.mxu0 %v19226_v29  ;;  %v19281_v42 = vld [vmem:[%s20997_s2 + $0x528] ss:$16 sps:$4 sm:$0xff]   ;;  %v19286_v29 = vld [vmem:[%s20997_s2 + $0x544] ss:$16 sps:$4 sm:$0xff]  }
 0xc52   : > { %15011 = vmatprep.subr.bf16.mxu1 %v19229_v55  ;;  %v19289_v55 = vld [vmem:[%s20997_s2 + $0x54c] ss:$16 sps:$4 sm:$0xff]  }
 0xc53   : > { %14657 = vmatmul.mubr.bf16.vlgmr.msra.gmra.mrb[64].mxu0 %v22677_v45 }
 0xc54   : > { %15001 = vmatmul.mubr.bf16.vlgmr.msra.gmra.mrb[64].mxu1 %v22677_v45  ;;  %14668 = vmatpush1.bf16.msra.mxu0 %v19224_v3  ;;  %v19236_v45 = vld [vmem:[%s20997_s2 + $0x440] ss:$16 sps:$4 sm:$0xff]  }
 0xc55   : > { %14699 = vmatprep.mubr.bf16.mxu0 %v22831_v47  ;;  %15012 = vmatpush1.bf16.msra.mxu1 %v19227_v7  ;;  %v19284_v3 = vld [vmem:[%s20997_s2 + $0x540] ss:$16 sps:$4 sm:$0xff]   ;;  %v19287_v7 = vld [vmem:[%s20997_s2 + $0x548] ss:$16 sps:$4 sm:$0xff]  }
 0xc56   : > { %15043 = vmatprep.mubr.bf16.mxu1 %v22831_v47  ;;  %14669 = vmatprep.subr.bf16.mxu0 %v19232_v62  ;;  %v19242_v47 = vld [vmem:[%s20997_s2 + $0x460] ss:$16 sps:$4 sm:$0xff]   ;;  %v19292_v62 = vld [vmem:[%s20997_s2 + $0x564] ss:$16 sps:$4 sm:$0xff]  }
 0xc57   : > { %15013 = vmatprep.subr.bf16.mxu1 %v19235_v32  ;;  %v19295_v32 = vld [vmem:[%s20997_s2 + $0x56c] ss:$16 sps:$4 sm:$0xff]  }
 0xc58   : > { %14670 = vmatpush1.bf16.msra.mxu0 %v19230_v21  ;;  %v19290_v21 = vld [vmem:[%s20997_s2 + $0x560] ss:$16 sps:$4 sm:$0xff]  }
 0xc59   : > { %15014 = vmatpush1.bf16.msra.mxu1 %v19233_v12  ;;  %14671 = vmatprep.subr.bf16.mxu0 %v19238_v43  ;;  %v19293_v12 = vld [vmem:[%s20997_s2 + $0x568] ss:$16 sps:$4 sm:$0xff]   ;;  %v19298_v43 = vld [vmem:[%s20997_s2 + $0x584] ss:$16 sps:$4 sm:$0xff]  }
 0xc5a   : > { %15015 = vmatprep.subr.bf16.mxu1 %v19241_v24  ;;  %v19301_v24 = vld [vmem:[%s20997_s2 + $0x58c] ss:$16 sps:$4 sm:$0xff]  }
 0xc5c   : > { %14672 = vmatpush1.bf16.msra.mxu0 %v19236_v45  ;;  %v19296_v45 = vld [vmem:[%s20997_s2 + $0x580] ss:$16 sps:$4 sm:$0xff]  }
 0xc5d   : > { %15016 = vmatpush1.bf16.msra.mxu1 %v19239_v56  ;;  %14673 = vmatprep.subr.bf16.mxu0 %v19244_v31  ;;  %v19299_v56 = vld [vmem:[%s20997_s2 + $0x588] ss:$16 sps:$4 sm:$0xff]   ;;  %v19304_v31 = vld [vmem:[%s20997_s2 + $0x5a4] ss:$16 sps:$4 sm:$0xff]  }
 0xc5e   : > { %15017 = vmatprep.subr.bf16.mxu1 %v19247_v57  ;;  %v19307_v57 = vld [vmem:[%s20997_s2 + $0x5ac] ss:$16 sps:$4 sm:$0xff]  }
 0xc60   : > { %14674 = vmatpush1.bf16.msra.mxu0 %v19242_v47  ;;  %v19302_v47 = vld [vmem:[%s20997_s2 + $0x5a0] ss:$16 sps:$4 sm:$0xff]  }
 0xc61   : > { %15018 = vmatpush1.bf16.msra.mxu1 %v19245_v53  ;;  %14675 = vmatprep.subr.bf16.mxu0 %v19250_v10  ;;  %v19305_v53 = vld [vmem:[%s20997_s2 + $0x5a8] ss:$16 sps:$4 sm:$0xff]   ;;  %v19310_v10 = vld [vmem:[%s20997_s2 + $0x5c4] ss:$16 sps:$4 sm:$0xff]  }
 0xc62   : > { %15019 = vmatprep.subr.bf16.mxu1 %v19253_v44  ;;  %v19313_v44 = vld [vmem:[%s20997_s2 + $0x5cc] ss:$16 sps:$4 sm:$0xff]  }
 0xc64   : > { %14676 = vmatpush1.bf16.msra.mxu0 %v19248_v28  ;;  %v19308_v28 = vld [vmem:[%s20997_s2 + $0x5c0] ss:$16 sps:$4 sm:$0xff]  }
 0xc65   : > { %15020 = vmatpush1.bf16.msra.mxu1 %v19251_v38  ;;  %14677 = vmatprep.subr.bf16.mxu0 %v19256_v19  ;;  %v19311_v38 = vld [vmem:[%s20997_s2 + $0x5c8] ss:$16 sps:$4 sm:$0xff]   ;;  %v19316_v19 = vld [vmem:[%s20997_s2 + $0x5e4] ss:$16 sps:$4 sm:$0xff]  }
 0xc66   : > { %15021 = vmatprep.subr.bf16.mxu1 %v19259_v59  ;;  %v19319_v59 = vld [vmem:[%s20997_s2 + $0x5ec] ss:$16 sps:$4 sm:$0xff]  }
 0xc68   : > { %14678 = vmatpush1.bf16.msra.mxu0 %v19254_v48  ;;  %v19314_v48 = vld [vmem:[%s20997_s2 + $0x5e0] ss:$16 sps:$4 sm:$0xff]  }
 0xc69   : > { %15022 = vmatpush1.bf16.msra.mxu1 %v19257_v18  ;;  %14679 = vmatprep.subr.bf16.mxu0 %v19262_v14  ;;  %v19317_v18 = vld [vmem:[%s20997_s2 + $0x5e8] ss:$16 sps:$4 sm:$0xff]   ;;  %v19322_v14 = vld [vmem:[%s20997_s2 + $0x604] ss:$16 sps:$4 sm:$0xff]  }
 0xc6a   : > { %15023 = vmatprep.subr.bf16.mxu1 %v19265_v22  ;;  %v19325_v22 = vld [vmem:[%s20997_s2 + $0x60c] ss:$16 sps:$4 sm:$0xff]  }
 0xc6c   : > { %14680 = vmatpush1.bf16.msra.mxu0 %v19260_v60  ;;  %v19320_v60 = vld [vmem:[%s20997_s2 + $0x600] ss:$16 sps:$4 sm:$0xff]  }
 0xc6d   : > { %15024 = vmatpush1.bf16.msra.mxu1 %v19263_v36  ;;  %14681 = vmatprep.subr.bf16.mxu0 %v19268_v61  ;;  %v19323_v36 = vld [vmem:[%s20997_s2 + $0x608] ss:$16 sps:$4 sm:$0xff]   ;;  %v19328_v61 = vld [vmem:[%s20997_s2 + $0x624] ss:$16 sps:$4 sm:$0xff]  }
 0xc6e   : > { %15025 = vmatprep.subr.bf16.mxu1 %v19271_v6  ;;  %v19331_v6 = vld [vmem:[%s20997_s2 + $0x62c] ss:$16 sps:$4 sm:$0xff]  }
 0xc70   : > { %14682 = vmatpush1.bf16.msra.mxu0 %v19266_v15  ;;  %v19326_v15 = vld [vmem:[%s20997_s2 + $0x620] ss:$16 sps:$4 sm:$0xff]  }
 0xc71   : > { %15026 = vmatpush1.bf16.msra.mxu1 %v19269_v9  ;;  %14683 = vmatprep.subr.bf16.mxu0 %v19274_v4  ;;  %v19329_v9 = vld [vmem:[%s20997_s2 + $0x628] ss:$16 sps:$4 sm:$0xff]   ;;  %v19334_v4 = vld [vmem:[%s20997_s2 + $0x644] ss:$16 sps:$4 sm:$0xff]  }
 0xc72   : > { %15027 = vmatprep.subr.bf16.mxu1 %v19277_v1  ;;  %v19337_v1 = vld [vmem:[%s20997_s2 + $0x64c] ss:$16 sps:$4 sm:$0xff]  }
 0xc74   : > { %14684 = vmatpush1.bf16.msra.mxu0 %v19272_v16  ;;  %v19335_v16 = vld [vmem:[%s20997_s2 + $0x648] ss:$16 sps:$4 sm:$0xff]  }
 0xc75   : > { %15028 = vmatpush1.bf16.msra.mxu1 %v19275_v25  ;;  %14685 = vmatprep.subr.bf16.mxu0 %v19280_v34  ;;  %v19340_v25 = vld [vmem:[%s20997_s2 + $0x664] ss:$16 sps:$4 sm:$0xff]   ;;  %v19343_v34 = vld [vmem:[%s20997_s2 + $0x66c] ss:$16 sps:$4 sm:$0xff]  }
 0xc76   : > { %15029 = vmatprep.subr.bf16.mxu1 %v19283_v30  ;;  %v19341_v30 = vld [vmem:[%s20997_s2 + $0x668] ss:$16 sps:$4 sm:$0xff]  }
 0xc78   : > { %14686 = vmatpush1.bf16.msra.mxu0 %v19278_v17  ;;  %v19346_v17 = vld [vmem:[%s20997_s2 + $0x684] ss:$16 sps:$4 sm:$0xff]  }
 0xc79   : > { %15030 = vmatpush1.bf16.msra.mxu1 %v19281_v42  ;;  %14687 = vmatprep.subr.bf16.mxu0 %v19286_v29  ;;  %v19349_v42 = vld [vmem:[%s20997_s2 + $0x68c] ss:$16 sps:$4 sm:$0xff]   ;;  %v19344_v29 = vld [vmem:[%s20997_s2 + $0x680] ss:$16 sps:$4 sm:$0xff]  }
 0xc7a   : > { %15031 = vmatprep.subr.bf16.mxu1 %v19289_v55  ;;  %v19347_v55 = vld [vmem:[%s20997_s2 + $0x688] ss:$16 sps:$4 sm:$0xff]  }
 0xc7c   : > { %14688 = vmatpush1.bf16.msra.mxu0 %v19284_v3  ;;  %v19352_v3 = vld [vmem:[%s20997_s2 + $0x6a4] ss:$16 sps:$4 sm:$0xff]  }
 0xc7d   : > { %15032 = vmatpush1.bf16.msra.mxu1 %v19287_v7  ;;  %14689 = vmatprep.subr.bf16.mxu0 %v19292_v62  ;;  %v19355_v7 = vld [vmem:[%s20997_s2 + $0x6ac] ss:$16 sps:$4 sm:$0xff]   ;;  %v8162_v62 = vrot.slane %v22955_v41, %v21458_v35 }
 0xc7e   : > { %15033 = vmatprep.subr.bf16.mxu1 %v19295_v32  ;;  %v8170_v32 = vrot.slane %v22955_v41, %v21479_v51 }
 0xc80   : > { %14690 = vmatpush1.bf16.msra.mxu0 %v19290_v21  ;;  %v8166_v21 = vrot.slane %v22955_v41, %v21461_v37 }
 0xc81   : > { %15034 = vmatpush1.bf16.msra.mxu1 %v19293_v12  ;;  %14691 = vmatprep.subr.bf16.mxu0 %v19298_v43  ;;  %v19350_v12 = vld [vmem:[%s20997_s2 + $0x6a0] ss:$16 sps:$4 sm:$0xff]   ;;  %v8174_v43 = vrot.slane %v22955_v41, %v21498_v2 }
 0xc82   : > { %15035 = vmatprep.subr.bf16.mxu1 %v19301_v24  ;;  %v19353_v24 = vld [vmem:[%s20997_s2 + $0x6a8] ss:$16 sps:$4 sm:$0xff]  }
 0xc84   : > { %14692 = vmatpush1.bf16.msra.mxu0 %v19296_v45  ;;  %v19358_v45 = vld [vmem:[%s20997_s2 + $0x6c4] ss:$16 sps:$4 sm:$0xff]  }
 0xc85   : > { %15036 = vmatpush1.bf16.msra.mxu1 %v19299_v56  ;;  %14693 = vmatprep.subr.bf16.mxu0 %v19304_v31  ;;  %v19361_v31 = vld [vmem:[%s20997_s2 + $0x6cc] ss:$16 sps:$4 sm:$0xff]  }
 0xc86   : > { %15037 = vmatprep.subr.bf16.mxu1 %v19307_v57 }
 0xc88   : > { %14694 = vmatpush1.bf16.msra.mxu0 %v19302_v47 }
 0xc89   : > { %15038 = vmatpush1.bf16.msra.mxu1 %v19305_v53  ;;  %14695 = vmatprep.subr.bf16.mxu0 %v19310_v10 }
 0xc8a   : > { %15039 = vmatprep.subr.bf16.mxu1 %v19313_v44  ;;  %v19356_v44 = vld [vmem:[%s20997_s2 + $0x6c0] ss:$16 sps:$4 sm:$0xff]  }
 0xc8c   : > { %14696 = vmatpush1.bf16.msra.mxu0 %v19308_v28 }
 0xc8d   : > { %15040 = vmatpush1.bf16.msra.mxu1 %v19311_v38  ;;  %14697 = vmatprep.subr.bf16.mxu0 %v19316_v19  ;;  %v19359_v19 = vld [vmem:[%s20997_s2 + $0x6c8] ss:$16 sps:$4 sm:$0xff]  }
 0xc8e   : > { %15041 = vmatprep.subr.bf16.mxu1 %v19319_v59  ;;  %v19364_v59 = vld [vmem:[%s20997_s2 + $0x6e4] ss:$16 sps:$4 sm:$0xff]  }
 0xc90   : > { %14698 = vmatpush1.bf16.msra.mxu0 %v19314_v48 }
 0xc91   : > { %15042 = vmatpush1.bf16.msra.mxu1 %v19317_v18  ;;  %14710 = vmatprep.subr.bf16.mxu0 %v19322_v14 }
 0xc92   : > { %15054 = vmatprep.subr.bf16.mxu1 %v19325_v22  ;;  %v19367_v22 = vld [vmem:[%s20997_s2 + $0x6ec] ss:$16 sps:$4 sm:$0xff]  }
 0xc93   : > { %14700 = vmatmul.mubr.bf16.vlgmr.msra.gmra.mrb[64].mxu0 %v22827_v23 }
 0xc94   : > { %15044 = vmatmul.mubr.bf16.vlgmr.msra.gmra.mrb[64].mxu1 %v22827_v23  ;;  %14711 = vmatpush1.bf16.msra.mxu0 %v19320_v60  ;;  %v19332_v23 = vld [vmem:[%s20997_s2 + $0x640] ss:$16 sps:$4 sm:$0xff]  }
 0xc95   : > { %14742 = vmatprep.mubr.bf16.mxu0 %v22835_v50  ;;  %15055 = vmatpush1.bf16.msra.mxu1 %v19323_v36 }
 0xc96   : > { %15086 = vmatprep.mubr.bf16.mxu1 %v22835_v50  ;;  %14712 = vmatprep.subr.bf16.mxu0 %v19328_v61  ;;  %v19338_v50 = vld [vmem:[%s20997_s2 + $0x660] ss:$16 sps:$4 sm:$0xff]  }
 0xc97   : > { %15056 = vmatprep.subr.bf16.mxu1 %v19331_v6 }
 0xc98   : > { %14713 = vmatpush1.bf16.msra.mxu0 %v19326_v15 }
 0xc99   : > { %15057 = vmatpush1.bf16.msra.mxu1 %v19329_v9  ;;  %14714 = vmatprep.subr.bf16.mxu0 %v19334_v4 }
 0xc9a   : > { %15058 = vmatprep.subr.bf16.mxu1 %v19337_v1  ;;  %v19362_v1 = vld [vmem:[%s20997_s2 + $0x6e0] ss:$16 sps:$4 sm:$0xff]  }
 0xc9c   : > { %14715 = vmatpush1.bf16.msra.mxu0 %v19332_v23 }
 0xc9d   : > { %15059 = vmatpush1.bf16.msra.mxu1 %v19335_v16  ;;  %14716 = vmatprep.subr.bf16.mxu0 %v19340_v25 }
 0xc9e   : > { %15060 = vmatprep.subr.bf16.mxu1 %v19343_v34  ;;  %v19365_v34 = vld [vmem:[%s20997_s2 + $0x6e8] ss:$16 sps:$4 sm:$0xff]  }
 0xca0   : > { %14717 = vmatpush1.bf16.msra.mxu0 %v19338_v50  ;;  %v19370_v50 = vld [vmem:[%s20997_s2 + $0x704] ss:$16 sps:$4 sm:$0xff]  }
 0xca1   : > { %15061 = vmatpush1.bf16.msra.mxu1 %v19341_v30  ;;  %14718 = vmatprep.subr.bf16.mxu0 %v19346_v17 }
 0xca2   : > { %15062 = vmatprep.subr.bf16.mxu1 %v19349_v42  ;;  %v19373_v42 = vld [vmem:[%s20997_s2 + $0x70c] ss:$16 sps:$4 sm:$0xff]  }
 0xca4   : > { %14719 = vmatpush1.bf16.msra.mxu0 %v19344_v29 }
 0xca5   : > { %15063 = vmatpush1.bf16.msra.mxu1 %v19347_v55  ;;  %14720 = vmatprep.subr.bf16.mxu0 %v19352_v3  ;;  %v19368_v55 = vld [vmem:[%s20997_s2 + $0x700] ss:$16 sps:$4 sm:$0xff]   ;;  %v19371_v3 = vld [vmem:[%s20997_s2 + $0x708] ss:$16 sps:$4 sm:$0xff]  }
 0xca6   : > { %v11344_v56 = vpop.f32.mrb[60].mxu0  ;;  %15064 = vmatprep.subr.bf16.mxu1 %v19355_v7  ;;  %v19376_v7 = vld [vmem:[%s20997_s2 + $0x724] ss:$16 sps:$4 sm:$0xff]  }
 0xca7   : > { %v17981_v35 = vadd.f32 %v11344_v56, %v8162_v62  ;;  %v11430_v57 = vpop.f32.mrb[60].mxu1  ;;  %v11346_v51 = vpop.f32.mrb[61].mxu0  ;;  %v19388_v56 = vld [vmem:[%s20997_s2 + $0x764] ss:$16 sps:$4 sm:$0xff]  }
 0xca8   : > { %v17985_v47 = vadd.f32 %v11430_v57, %v8170_v32  ;;  %v17982_v53 = vadd.f32 %v11346_v51, %v8166_v21  ;;  %v11432_v37 = vpop.f32.mrb[61].mxu1  ;;  %v11348_v10 = vpop.f32.mrb[62].mxu0  ;;  %14721 = vmatpush1.bf16.msra.mxu0 %v19350_v12  ;;  %v19382_v12 = vld [vmem:[%s20997_s2 + $0x744] ss:$16 sps:$4 sm:$0xff]   ;;  %v19389_v57 = vld [vmem:[%s20997_s2 + $0x768] ss:$16 sps:$4 sm:$0xff]  }
 0xca9   : > { %v17986_v28 = vadd.f32 %v11432_v37, %v8174_v43  ;;  %v17983_v2 = vadd.f32 %v11348_v10, %v8162_v62  ;;  %v11434_v41 = vpop.f32.mrb[62].mxu1  ;;  %15065 = vmatpush1.bf16.msra.mxu1 %v19353_v24  ;;  %v11350_v38 = vpop.f32.mrb[63].mxu0  ;;  %14722 = vmatprep.subr.bf16.mxu0 %v19358_v45  ;;  %v11451_v60 = vmax.f32 %v17981_v35, 0.0  ;;  %v19379_v62 = vld [vmem:[%s20997_s2 + $0x72c] ss:$16 sps:$4 sm:$0xff]  }
 0xcaa   : > { %v17987_v48 = vadd.f32 %v11434_v41, %v8170_v32  ;;  %v17984_v18 = vadd.f32 %v11350_v38, %v8166_v21  ;;  %v11436_v14 = vpop.f32.mrb[63].mxu1  ;;  %15066 = vmatprep.subr.bf16.mxu1 %v19361_v31  ;;  %v11453_v6 = vmax.f32 %v17985_v47, 0.0  ;;  %v11452_v15 = vmax.f32 %v17982_v53, 0.0  ;;  %v19374_v32 = vld [vmem:[%s20997_s2 + $0x720] ss:$16 sps:$4 sm:$0xff]  }
 0xcab   : > { %v11467_v36 = vmax.f32 %v17983_v2, 0.0  ;;  %v17988_v61 = vadd.f32 %v11436_v14, %v8174_v43  ;;  %v11454_v23 = vmax.f32 %v17986_v28, 0.0  ;;  %v19377_v21 = vld [vmem:[%s20997_s2 + $0x728] ss:$16 sps:$4 sm:$0xff]   ;;  %v19385_v43 = vld [vmem:[%s20997_s2 + $0x74c] ss:$16 sps:$4 sm:$0xff]  }
 0xcac   : > { %v11469_v9 = vmax.f32 %v17987_v48, 0.0  ;;  %v11468_v4 = vmax.f32 %v17984_v18, 0.0  ;;  %14723 = vmatpush1.bf16.msra.mxu0 %v19356_v44  ;;  %v19380_v24 = vld [vmem:[%s20997_s2 + $0x740] ss:$16 sps:$4 sm:$0xff]   ;;  %v19383_v45 = vld [vmem:[%s20997_s2 + $0x748] ss:$16 sps:$4 sm:$0xff]  }
 0xcad   : > { %v23129_v16 = vpack.c.bf16 %v11467_v36, %v11451_v60  ;;  %v11470_v25 = vmax.f32 %v17988_v61, 0.0  ;;  %15067 = vmatpush1.bf16.msra.mxu1 %v19359_v19  ;;  %14724 = vmatprep.subr.bf16.mxu0 %v19364_v59  ;;  %v19391_v31 = vld [vmem:[%s20997_s2 + $0x76c] ss:$16 sps:$4 sm:$0xff]   ;;  %v19386_v35 = vld [vmem:[%s20997_s2 + $0x760] ss:$16 sps:$4 sm:$0xff]  }
 0xcae   : > { %v23133_v30 = vpack.c.bf16 %v11469_v9, %v11453_v6  ;;  %v23135_v17 = vpack.c.bf16 %v11468_v4, %v11452_v15  ;;  %15068 = vmatprep.subr.bf16.mxu1 %v19367_v22  ;;  %v19394_v51 = vld [vmem:[%s20997_s2 + $0x784] ss:$16 sps:$4 sm:$0xff]   ;;  %v19397_v47 = vld [vmem:[%s20997_s2 + $0x78c] ss:$16 sps:$4 sm:$0xff]   ;;  %v19392_v53 = vld [vmem:[%s20997_s2 + $0x780] ss:$16 sps:$4 sm:$0xff]  }
 0xcaf   : > { %v23138_v29 = vpack.c.bf16 %v11470_v25, %v11454_v23  ;;  %v19395_v37 = vld [vmem:[%s20997_s2 + $0x788] ss:$16 sps:$4 sm:$0xff]   ;;  %v19400_v10 = vld [vmem:[%s20997_s2 + $0x7a4] ss:$16 sps:$4 sm:$0xff]   ;;  %v19403_v44 = vld [vmem:[%s20997_s2 + $0x7ac] ss:$16 sps:$4 sm:$0xff]  }
 0xcb0   : > { %14725 = vmatpush1.bf16.msra.mxu0 %v19362_v1  ;;  %v19398_v28 = vld [vmem:[%s20997_s2 + $0x7a0] ss:$16 sps:$4 sm:$0xff]   ;;  %v19401_v2 = vld [vmem:[%s20997_s2 + $0x7a8] ss:$16 sps:$4 sm:$0xff]   ;;  %v19406_v41 = vld [vmem:[%s20997_s2 + $0x7c4] ss:$16 sps:$4 sm:$0xff]  }
 0xcb1   : > { %15069 = vmatpush1.bf16.msra.mxu1 %v19365_v34  ;;  %14726 = vmatprep.subr.bf16.mxu0 %v19370_v50  ;;  %v19409_v38 = vld [vmem:[%s20997_s2 + $0x7cc] ss:$16 sps:$4 sm:$0xff]   ;;  %v19404_v19 = vld [vmem:[%s20997_s2 + $0x7c0] ss:$16 sps:$4 sm:$0xff]   ;;  %v19407_v59 = vld [vmem:[%s20997_s2 + $0x7c8] ss:$16 sps:$4 sm:$0xff]  }
 0xcb2   : > { %15070 = vmatprep.subr.bf16.mxu1 %v19373_v42  ;;  %v19412_v48 = vld [vmem:[%s20997_s2 + $0x7e4] ss:$16 sps:$4 sm:$0xff]   ;;  %v19415_v18 = vld [vmem:[%s20997_s2 + $0x7ec] ss:$16 sps:$4 sm:$0xff]   ;;  %v19410_v14 = vld [vmem:[%s20997_s2 + $0x7e0] ss:$16 sps:$4 sm:$0xff]  }
 0xcb3   : > { %v19413_v22 = vld [vmem:[%s20997_s2 + $0x7e8] ss:$16 sps:$4 sm:$0xff]   ;;  %v19418_v60 = vld [vmem:[%s20997_s2 + $0x804] ss:$16 sps:$4 sm:$0xff]   ;;  %v19421_v36 = vld [vmem:[%s20997_s2 + $0x80c] ss:$16 sps:$4 sm:$0xff]  }
 0xcb4   : > { %14727 = vmatpush1.bf16.msra.mxu0 %v19368_v55  ;;  %v19416_v61 = vld [vmem:[%s20997_s2 + $0x800] ss:$16 sps:$4 sm:$0xff]   ;;  %v19419_v6 = vld [vmem:[%s20997_s2 + $0x808] ss:$16 sps:$4 sm:$0xff]   ;;  %v19424_v15 = vld [vmem:[%s20997_s2 + $0x824] ss:$16 sps:$4 sm:$0xff]  }
 0xcb5   : > { %15071 = vmatpush1.bf16.msra.mxu1 %v19371_v3  ;;  %14728 = vmatprep.subr.bf16.mxu0 %v19376_v7  ;;  %v19427_v9 = vld [vmem:[%s20997_s2 + $0x82c] ss:$16 sps:$4 sm:$0xff]   ;;  %v19422_v4 = vld [vmem:[%s20997_s2 + $0x820] ss:$16 sps:$4 sm:$0xff]   ;;  %v19425_v1 = vld [vmem:[%s20997_s2 + $0x828] ss:$16 sps:$4 sm:$0xff]  }
 0xcb6   : > { %15072 = vmatprep.subr.bf16.mxu1 %v19379_v62  ;;  %v19430_v23 = vld [vmem:[%s20997_s2 + $0x844] ss:$16 sps:$4 sm:$0xff]   ;;  %v19433_v25 = vld [vmem:[%s20997_s2 + $0x84c] ss:$16 sps:$4 sm:$0xff]   ;;  %v19431_v34 = vld [vmem:[%s20997_s2 + $0x848] ss:$16 sps:$4 sm:$0xff]  }
 0xcb7   : > { %v19436_v50 = vld [vmem:[%s20997_s2 + $0x864] ss:$16 sps:$4 sm:$0xff]   ;;  %v19439_v42 = vld [vmem:[%s20997_s2 + $0x86c] ss:$16 sps:$4 sm:$0xff]   ;;  %v19437_v55 = vld [vmem:[%s20997_s2 + $0x868] ss:$16 sps:$4 sm:$0xff]  }
 0xcb8   : > { %14729 = vmatpush1.bf16.msra.mxu0 %v19374_v32  ;;  %v19442_v3 = vld [vmem:[%s20997_s2 + $0x884] ss:$16 sps:$4 sm:$0xff]   ;;  %v19445_v7 = vld [vmem:[%s20997_s2 + $0x88c] ss:$16 sps:$4 sm:$0xff]   ;;  %v19440_v62 = vld [vmem:[%s20997_s2 + $0x880] ss:$16 sps:$4 sm:$0xff]  }
 0xcb9   : > { %15073 = vmatpush1.bf16.msra.mxu1 %v19377_v21  ;;  %14730 = vmatprep.subr.bf16.mxu0 %v19382_v12  ;;  %v19443_v32 = vld [vmem:[%s20997_s2 + $0x888] ss:$16 sps:$4 sm:$0xff]   ;;  %v19448_v21 = vld [vmem:[%s20997_s2 + $0x8a4] ss:$16 sps:$4 sm:$0xff]   ;;  %v19451_v12 = vld [vmem:[%s20997_s2 + $0x8ac] ss:$16 sps:$4 sm:$0xff]  }
 0xcba   : > { %15074 = vmatprep.subr.bf16.mxu1 %v19385_v43  ;;  %v19446_v43 = vld [vmem:[%s20997_s2 + $0x8a0] ss:$16 sps:$4 sm:$0xff]  }
 0xcbc   : > { %14731 = vmatpush1.bf16.msra.mxu0 %v19380_v24  ;;  %v19449_v24 = vld [vmem:[%s20997_s2 + $0x8a8] ss:$16 sps:$4 sm:$0xff]  }
 0xcbd   : > { %15075 = vmatpush1.bf16.msra.mxu1 %v19383_v45  ;;  %14732 = vmatprep.subr.bf16.mxu0 %v19388_v56  ;;  %v19454_v45 = vld [vmem:[%s20997_s2 + $0x8c4] ss:$16 sps:$4 sm:$0xff]   ;;  %v19457_v56 = vld [vmem:[%s20997_s2 + $0x8cc] ss:$16 sps:$4 sm:$0xff]  }
 0xcbe   : > { %15076 = vmatprep.subr.bf16.mxu1 %v19391_v31  ;;  %v19452_v31 = vld [vmem:[%s20997_s2 + $0x8c0] ss:$16 sps:$4 sm:$0xff]  }
 0xcc0   : > { %14733 = vmatpush1.bf16.msra.mxu0 %v19386_v35  ;;  %v19455_v35 = vld [vmem:[%s20997_s2 + $0x8c8] ss:$16 sps:$4 sm:$0xff]  }
 0xcc1   : > { %15077 = vmatpush1.bf16.msra.mxu1 %v19389_v57  ;;  %14734 = vmatprep.subr.bf16.mxu0 %v19394_v51  ;;  %v19460_v57 = vld [vmem:[%s20997_s2 + $0x8e4] ss:$16 sps:$4 sm:$0xff]   ;;  %v19463_v51 = vld [vmem:[%s20997_s2 + $0x8ec] ss:$16 sps:$4 sm:$0xff]  }
 0xcc2   : > { %15078 = vmatprep.subr.bf16.mxu1 %v19397_v47  ;;  %v19458_v47 = vld [vmem:[%s20997_s2 + $0x8e0] ss:$16 sps:$4 sm:$0xff]  }
 0xcc4   : > { %14735 = vmatpush1.bf16.msra.mxu0 %v19392_v53  ;;  %v19461_v53 = vld [vmem:[%s20997_s2 + $0x8e8] ss:$16 sps:$4 sm:$0xff]  }
 0xcc5   : > { %15079 = vmatpush1.bf16.msra.mxu1 %v19395_v37  ;;  %14736 = vmatprep.subr.bf16.mxu0 %v19400_v10  ;;  %v19466_v37 = vld [vmem:[%s20997_s2 + $0x904] ss:$16 sps:$4 sm:$0xff]   ;;  %v19469_v10 = vld [vmem:[%s20997_s2 + $0x90c] ss:$16 sps:$4 sm:$0xff]  }
 0xcc6   : > { %15080 = vmatprep.subr.bf16.mxu1 %v19403_v44  ;;  %v19464_v44 = vld [vmem:[%s20997_s2 + $0x900] ss:$16 sps:$4 sm:$0xff]  }
 0xcc8   : > { %14737 = vmatpush1.bf16.msra.mxu0 %v19398_v28  ;;  %v19467_v28 = vld [vmem:[%s20997_s2 + $0x908] ss:$16 sps:$4 sm:$0xff]  }
 0xcc9   : > { %15081 = vmatpush1.bf16.msra.mxu1 %v19401_v2  ;;  %14738 = vmatprep.subr.bf16.mxu0 %v19406_v41  ;;  %v19472_v2 = vld [vmem:[%s20997_s2 + $0x924] ss:$16 sps:$4 sm:$0xff]   ;;  %v19475_v41 = vld [vmem:[%s20997_s2 + $0x92c] ss:$16 sps:$4 sm:$0xff]  }
 0xcca   : > { %15082 = vmatprep.subr.bf16.mxu1 %v19409_v38  ;;  %v19470_v38 = vld [vmem:[%s20997_s2 + $0x920] ss:$16 sps:$4 sm:$0xff]  }
 0xccc   : > { %14739 = vmatpush1.bf16.msra.mxu0 %v19404_v19  ;;  %v19473_v19 = vld [vmem:[%s20997_s2 + $0x928] ss:$16 sps:$4 sm:$0xff]  }
 0xccd   : > { %15083 = vmatpush1.bf16.msra.mxu1 %v19407_v59  ;;  %14740 = vmatprep.subr.bf16.mxu0 %v19412_v48  ;;  %v19478_v59 = vld [vmem:[%s20997_s2 + $0x944] ss:$16 sps:$4 sm:$0xff]   ;;  %v19481_v48 = vld [vmem:[%s20997_s2 + $0x94c] ss:$16 sps:$4 sm:$0xff]  }
 0xcce   : > { %15084 = vmatprep.subr.bf16.mxu1 %v19415_v18  ;;  %v19476_v18 = vld [vmem:[%s20997_s2 + $0x940] ss:$16 sps:$4 sm:$0xff]  }
 0xcd0   : > { %14741 = vmatpush1.bf16.msra.mxu0 %v19410_v14  ;;  %v19479_v14 = vld [vmem:[%s20997_s2 + $0x948] ss:$16 sps:$4 sm:$0xff]  }
 0xcd1   : > { %15085 = vmatpush1.bf16.msra.mxu1 %v19413_v22  ;;  %14753 = vmatprep.subr.bf16.mxu0 %v19418_v60  ;;  %v19484_v22 = vld [vmem:[%s20997_s2 + $0x964] ss:$16 sps:$4 sm:$0xff]   ;;  %v19487_v60 = vld [vmem:[%s20997_s2 + $0x96c] ss:$16 sps:$4 sm:$0xff]  }
 0xcd2   : > { %15097 = vmatprep.subr.bf16.mxu1 %v19421_v36  ;;  %v19482_v36 = vld [vmem:[%s20997_s2 + $0x960] ss:$16 sps:$4 sm:$0xff]  }
 0xcd3   : > { %14743 = vmatmul.mubr.bf16.vlgmr.msra.gmra.mrb[64].mxu0 %v22829_v39 }
 0xcd4   : > { %15087 = vmatmul.mubr.bf16.vlgmr.msra.gmra.mrb[64].mxu1 %v22829_v39  ;;  %14754 = vmatpush1.bf16.msra.mxu0 %v19416_v61  ;;  %v19428_v39 = vld [vmem:[%s20997_s2 + $0x840] ss:$16 sps:$4 sm:$0xff]   ;;  %v19485_v61 = vld [vmem:[%s20997_s2 + $0x968] ss:$16 sps:$4 sm:$0xff]  }
 0xcd5   : > { %14785 = vmatprep.mubr.bf16.mxu0 %v22983_v46  ;;  %15098 = vmatpush1.bf16.msra.mxu1 %v19419_v6  ;;  %v19490_v6 = vld [vmem:[%s20997_s2 + $0x984] ss:$16 sps:$4 sm:$0xff]  }
 0xcd6   : > { %15129 = vmatprep.mubr.bf16.mxu1 %v22983_v46  ;;  %14755 = vmatprep.subr.bf16.mxu0 %v19424_v15  ;;  %v19434_v46 = vld [vmem:[%s20997_s2 + $0x860] ss:$16 sps:$4 sm:$0xff]   ;;  %v19493_v15 = vld [vmem:[%s20997_s2 + $0x98c] ss:$16 sps:$4 sm:$0xff]  }
 0xcd7   : > { %15099 = vmatprep.subr.bf16.mxu1 %v19427_v9  ;;  %v19488_v9 = vld [vmem:[%s20997_s2 + $0x980] ss:$16 sps:$4 sm:$0xff]  }
 0xcd8   : > { %14756 = vmatpush1.bf16.msra.mxu0 %v19422_v4  ;;  %v19491_v4 = vld [vmem:[%s20997_s2 + $0x988] ss:$16 sps:$4 sm:$0xff]  }
 0xcd9   : > { %15100 = vmatpush1.bf16.msra.mxu1 %v19425_v1  ;;  %14757 = vmatprep.subr.bf16.mxu0 %v19430_v23  ;;  %v19496_v1 = vld [vmem:[%s20997_s2 + $0x9a4] ss:$16 sps:$4 sm:$0xff]   ;;  %v19499_v23 = vld [vmem:[%s20997_s2 + $0x9ac] ss:$16 sps:$4 sm:$0xff]  }
 0xcda   : > { %15101 = vmatprep.subr.bf16.mxu1 %v19433_v25  ;;  %v19494_v25 = vld [vmem:[%s20997_s2 + $0x9a0] ss:$16 sps:$4 sm:$0xff]  }
 0xcdc   : > { %14758 = vmatpush1.bf16.msra.mxu0 %v19428_v39  ;;  %v19497_v39 = vld [vmem:[%s20997_s2 + $0x9a8] ss:$16 sps:$4 sm:$0xff]  }
 0xcdd   : > { %15102 = vmatpush1.bf16.msra.mxu1 %v19431_v34  ;;  %14759 = vmatprep.subr.bf16.mxu0 %v19436_v50  ;;  %v19502_v34 = vld [vmem:[%s20997_s2 + $0x9c4] ss:$16 sps:$4 sm:$0xff]   ;;  %v19505_v50 = vld [vmem:[%s20997_s2 + $0x9cc] ss:$16 sps:$4 sm:$0xff]  }
 0xcde   : > { %15103 = vmatprep.subr.bf16.mxu1 %v19439_v42  ;;  %v19500_v42 = vld [vmem:[%s20997_s2 + $0x9c0] ss:$16 sps:$4 sm:$0xff]  }
 0xce0   : > { %14760 = vmatpush1.bf16.msra.mxu0 %v19434_v46  ;;  %v19503_v46 = vld [vmem:[%s20997_s2 + $0x9c8] ss:$16 sps:$4 sm:$0xff]  }
 0xce1   : > { %15104 = vmatpush1.bf16.msra.mxu1 %v19437_v55  ;;  %14761 = vmatprep.subr.bf16.mxu0 %v19442_v3  ;;  %v19508_v55 = vld [vmem:[%s20997_s2 + $0x9e4] ss:$16 sps:$4 sm:$0xff]   ;;  %v19511_v3 = vld [vmem:[%s20997_s2 + $0x9ec] ss:$16 sps:$4 sm:$0xff]  }
 0xce2   : > { %15105 = vmatprep.subr.bf16.mxu1 %v19445_v7  ;;  %v19506_v7 = vld [vmem:[%s20997_s2 + $0x9e0] ss:$16 sps:$4 sm:$0xff]  }
 0xce4   : > { %14762 = vmatpush1.bf16.msra.mxu0 %v19440_v62  ;;  %v19509_v62 = vld [vmem:[%s20997_s2 + $0x9e8] ss:$16 sps:$4 sm:$0xff]  }
 0xce5   : > { %15106 = vmatpush1.bf16.msra.mxu1 %v19443_v32  ;;  %14763 = vmatprep.subr.bf16.mxu0 %v19448_v21  ;;  %v19514_v32 = vld [vmem:[%s20997_s2 + $0xa04] ss:$16 sps:$4 sm:$0xff]   ;;  %v19517_v21 = vld [vmem:[%s20997_s2 + $0xa0c] ss:$16 sps:$4 sm:$0xff]  }
 0xce6   : > { %15107 = vmatprep.subr.bf16.mxu1 %v19451_v12  ;;  %v19512_v12 = vld [vmem:[%s20997_s2 + $0xa00] ss:$16 sps:$4 sm:$0xff]  }
 0xce8   : > { %14764 = vmatpush1.bf16.msra.mxu0 %v19446_v43  ;;  %v19515_v43 = vld [vmem:[%s20997_s2 + $0xa08] ss:$16 sps:$4 sm:$0xff]  }
 0xce9   : > { %15108 = vmatpush1.bf16.msra.mxu1 %v19449_v24  ;;  %14765 = vmatprep.subr.bf16.mxu0 %v19454_v45  ;;  %v19520_v24 = vld [vmem:[%s20997_s2 + $0xa24] ss:$16 sps:$4 sm:$0xff]   ;;  %v19523_v45 = vld [vmem:[%s20997_s2 + $0xa2c] ss:$16 sps:$4 sm:$0xff]  }
 0xcea   : > { %15109 = vmatprep.subr.bf16.mxu1 %v19457_v56  ;;  %v19518_v56 = vld [vmem:[%s20997_s2 + $0xa20] ss:$16 sps:$4 sm:$0xff]  }
 0xcec   : > { %14766 = vmatpush1.bf16.msra.mxu0 %v19452_v31  ;;  %v19521_v31 = vld [vmem:[%s20997_s2 + $0xa28] ss:$16 sps:$4 sm:$0xff]  }
 0xced   : > { %15110 = vmatpush1.bf16.msra.mxu1 %v19455_v35  ;;  %14767 = vmatprep.subr.bf16.mxu0 %v19460_v57  ;;  %v19526_v35 = vld [vmem:[%s20997_s2 + $0xa44] ss:$16 sps:$4 sm:$0xff]   ;;  %v19529_v57 = vld [vmem:[%s20997_s2 + $0xa4c] ss:$16 sps:$4 sm:$0xff]  }
 0xcee   : > { %15111 = vmatprep.subr.bf16.mxu1 %v19463_v51  ;;  %v19527_v51 = vld [vmem:[%s20997_s2 + $0xa48] ss:$16 sps:$4 sm:$0xff]  }
 0xcf0   : > { %14768 = vmatpush1.bf16.msra.mxu0 %v19458_v47  ;;  %v19532_v47 = vld [vmem:[%s20997_s2 + $0xa64] ss:$16 sps:$4 sm:$0xff]  }
 0xcf1   : > { %15112 = vmatpush1.bf16.msra.mxu1 %v19461_v53  ;;  %14769 = vmatprep.subr.bf16.mxu0 %v19466_v37  ;;  %v19535_v53 = vld [vmem:[%s20997_s2 + $0xa6c] ss:$16 sps:$4 sm:$0xff]   ;;  %v19533_v37 = vld [vmem:[%s20997_s2 + $0xa68] ss:$16 sps:$4 sm:$0xff]  }
 0xcf2   : > { %15113 = vmatprep.subr.bf16.mxu1 %v19469_v10  ;;  %v19538_v10 = vld [vmem:[%s20997_s2 + $0xa84] ss:$16 sps:$4 sm:$0xff]  }
 0xcf4   : > { %14770 = vmatpush1.bf16.msra.mxu0 %v19464_v44  ;;  %v19541_v44 = vld [vmem:[%s20997_s2 + $0xa8c] ss:$16 sps:$4 sm:$0xff]  }
 0xcf5   : > { %15114 = vmatpush1.bf16.msra.mxu1 %v19467_v28  ;;  %14771 = vmatprep.subr.bf16.mxu0 %v19472_v2  ;;  %v19536_v28 = vld [vmem:[%s20997_s2 + $0xa80] ss:$16 sps:$4 sm:$0xff]   ;;  %v19539_v2 = vld [vmem:[%s20997_s2 + $0xa88] ss:$16 sps:$4 sm:$0xff]  }
 0xcf6   : > { %15115 = vmatprep.subr.bf16.mxu1 %v19475_v41  ;;  %v19544_v41 = vld [vmem:[%s20997_s2 + $0xaa4] ss:$16 sps:$4 sm:$0xff]  }
 0xcf8   : > { %14772 = vmatpush1.bf16.msra.mxu0 %v19470_v38  ;;  %v19547_v38 = vld [vmem:[%s20997_s2 + $0xaac] ss:$16 sps:$4 sm:$0xff]  }
 0xcf9   : > { %15116 = vmatpush1.bf16.msra.mxu1 %v19473_v19  ;;  %14773 = vmatprep.subr.bf16.mxu0 %v19478_v59  ;;  %v19542_v19 = vld [vmem:[%s20997_s2 + $0xaa0] ss:$16 sps:$4 sm:$0xff]   ;;  %v19545_v59 = vld [vmem:[%s20997_s2 + $0xaa8] ss:$16 sps:$4 sm:$0xff]  }
 0xcfa   : > { %15117 = vmatprep.subr.bf16.mxu1 %v19481_v48  ;;  %v19550_v48 = vld [vmem:[%s20997_s2 + $0xac4] ss:$16 sps:$4 sm:$0xff]  }
 0xcfc   : > { %14774 = vmatpush1.bf16.msra.mxu0 %v19476_v18  ;;  %v19553_v18 = vld [vmem:[%s20997_s2 + $0xacc] ss:$16 sps:$4 sm:$0xff]  }
 0xcfd   : > { %15118 = vmatpush1.bf16.msra.mxu1 %v19479_v14  ;;  %14775 = vmatprep.subr.bf16.mxu0 %v19484_v22  ;;  %v19548_v14 = vld [vmem:[%s20997_s2 + $0xac0] ss:$16 sps:$4 sm:$0xff]   ;;  %v19551_v22 = vld [vmem:[%s20997_s2 + $0xac8] ss:$16 sps:$4 sm:$0xff]  }
 0xcfe   : > { %15119 = vmatprep.subr.bf16.mxu1 %v19487_v60  ;;  %v19556_v60 = vld [vmem:[%s20997_s2 + $0xae4] ss:$16 sps:$4 sm:$0xff]  }
 0xd00   : > { %14776 = vmatpush1.bf16.msra.mxu0 %v19482_v36  ;;  %v19559_v36 = vld [vmem:[%s20997_s2 + $0xaec] ss:$16 sps:$4 sm:$0xff]  }
 0xd01   : > { %15120 = vmatpush1.bf16.msra.mxu1 %v19485_v61  ;;  %14777 = vmatprep.subr.bf16.mxu0 %v19490_v6  ;;  %v19554_v61 = vld [vmem:[%s20997_s2 + $0xae0] ss:$16 sps:$4 sm:$0xff]   ;;  %v19557_v6 = vld [vmem:[%s20997_s2 + $0xae8] ss:$16 sps:$4 sm:$0xff]  }
 0xd02   : > { %15121 = vmatprep.subr.bf16.mxu1 %v19493_v15  ;;  %v19562_v15 = vld [vmem:[%s20997_s2 + $0xb04] ss:$16 sps:$4 sm:$0xff]  }
 0xd04   : > { %14778 = vmatpush1.bf16.msra.mxu0 %v19488_v9  ;;  %v19565_v9 = vld [vmem:[%s20997_s2 + $0xb0c] ss:$16 sps:$4 sm:$0xff]  }
 0xd05   : > { %15122 = vmatpush1.bf16.msra.mxu1 %v19491_v4  ;;  %14779 = vmatprep.subr.bf16.mxu0 %v19496_v1  ;;  %v19560_v4 = vld [vmem:[%s20997_s2 + $0xb00] ss:$16 sps:$4 sm:$0xff]   ;;  %v19563_v1 = vld [vmem:[%s20997_s2 + $0xb08] ss:$16 sps:$4 sm:$0xff]  }
 0xd06   : > { %15123 = vmatprep.subr.bf16.mxu1 %v19499_v23  ;;  %v19568_v23 = vld [vmem:[%s20997_s2 + $0xb24] ss:$16 sps:$4 sm:$0xff]  }
 0xd08   : > { %14780 = vmatpush1.bf16.msra.mxu0 %v19494_v25  ;;  %v19571_v25 = vld [vmem:[%s20997_s2 + $0xb2c] ss:$16 sps:$4 sm:$0xff]  }
 0xd09   : > { %15124 = vmatpush1.bf16.msra.mxu1 %v19497_v39  ;;  %14781 = vmatprep.subr.bf16.mxu0 %v19502_v34  ;;  %v19566_v39 = vld [vmem:[%s20997_s2 + $0xb20] ss:$16 sps:$4 sm:$0xff]   ;;  %v19569_v34 = vld [vmem:[%s20997_s2 + $0xb28] ss:$16 sps:$4 sm:$0xff]  }
 0xd0a   : > { %15125 = vmatprep.subr.bf16.mxu1 %v19505_v50  ;;  %v19574_v50 = vld [vmem:[%s20997_s2 + $0xb44] ss:$16 sps:$4 sm:$0xff]  }
 0xd0c   : > { %14782 = vmatpush1.bf16.msra.mxu0 %v19500_v42  ;;  %v19577_v42 = vld [vmem:[%s20997_s2 + $0xb4c] ss:$16 sps:$4 sm:$0xff]  }
 0xd0d   : > { %15126 = vmatpush1.bf16.msra.mxu1 %v19503_v46  ;;  %14783 = vmatprep.subr.bf16.mxu0 %v19508_v55  ;;  %v19572_v46 = vld [vmem:[%s20997_s2 + $0xb40] ss:$16 sps:$4 sm:$0xff]   ;;  %v19575_v55 = vld [vmem:[%s20997_s2 + $0xb48] ss:$16 sps:$4 sm:$0xff]  }
 0xd0e   : > { %15127 = vmatprep.subr.bf16.mxu1 %v19511_v3  ;;  %v19580_v3 = vld [vmem:[%s20997_s2 + $0xb64] ss:$16 sps:$4 sm:$0xff]  }
 0xd10   : > { %14784 = vmatpush1.bf16.msra.mxu0 %v19506_v7  ;;  %v19583_v7 = vld [vmem:[%s20997_s2 + $0xb6c] ss:$16 sps:$4 sm:$0xff]  }
 0xd11   : > { %15128 = vmatpush1.bf16.msra.mxu1 %v19509_v62  ;;  %14796 = vmatprep.subr.bf16.mxu0 %v19514_v32  ;;  %v19578_v62 = vld [vmem:[%s20997_s2 + $0xb60] ss:$16 sps:$4 sm:$0xff]   ;;  %v19581_v32 = vld [vmem:[%s20997_s2 + $0xb68] ss:$16 sps:$4 sm:$0xff]  }
 0xd12   : > { %15140 = vmatprep.subr.bf16.mxu1 %v19517_v21  ;;  %v19586_v21 = vld [vmem:[%s20997_s2 + $0xb84] ss:$16 sps:$4 sm:$0xff]  }
 0xd13   : > { %14786 = vmatmul.mubr.bf16.vlgmr.msra.gmra.mrb[64].mxu0 %v22977_v8 }
 0xd14   : > { %15130 = vmatmul.mubr.bf16.vlgmr.msra.gmra.mrb[64].mxu1 %v22977_v8  ;;  %14797 = vmatpush1.bf16.msra.mxu0 %v19512_v12  ;;  %v19524_v8 = vld [vmem:[%s20997_s2 + $0xa40] ss:$16 sps:$4 sm:$0xff]   ;;  %v19589_v12 = vld [vmem:[%s20997_s2 + $0xb8c] ss:$16 sps:$4 sm:$0xff]  }
 0xd15   : > { %14828 = vmatprep.mubr.bf16.mxu0 %v22986_v27  ;;  %15141 = vmatpush1.bf16.msra.mxu1 %v19515_v43  ;;  %v19584_v43 = vld [vmem:[%s20997_s2 + $0xb80] ss:$16 sps:$4 sm:$0xff]  }
 0xd16   : > { %15172 = vmatprep.mubr.bf16.mxu1 %v22986_v27  ;;  %14798 = vmatprep.subr.bf16.mxu0 %v19520_v24  ;;  %v19530_v27 = vld [vmem:[%s20997_s2 + $0xa60] ss:$16 sps:$4 sm:$0xff]   ;;  %v19587_v24 = vld [vmem:[%s20997_s2 + $0xb88] ss:$16 sps:$4 sm:$0xff]  }
 0xd17   : > { %15142 = vmatprep.subr.bf16.mxu1 %v19523_v45  ;;  %v19592_v45 = vld [vmem:[%s20997_s2 + $0xba4] ss:$16 sps:$4 sm:$0xff]  }
 0xd18   : > { %14799 = vmatpush1.bf16.msra.mxu0 %v19518_v56  ;;  %v19595_v56 = vld [vmem:[%s20997_s2 + $0xbac] ss:$16 sps:$4 sm:$0xff]  }
 0xd19   : > { %15143 = vmatpush1.bf16.msra.mxu1 %v19521_v31  ;;  %14800 = vmatprep.subr.bf16.mxu0 %v19526_v35  ;;  %v19590_v31 = vld [vmem:[%s20997_s2 + $0xba0] ss:$16 sps:$4 sm:$0xff]   ;;  %v19593_v35 = vld [vmem:[%s20997_s2 + $0xba8] ss:$16 sps:$4 sm:$0xff]  }
 0xd1a   : > { %15144 = vmatprep.subr.bf16.mxu1 %v19529_v57  ;;  %v19598_v57 = vld [vmem:[%s20997_s2 + $0xbc4] ss:$16 sps:$4 sm:$0xff]  }
 0xd1c   : > { %14801 = vmatpush1.bf16.msra.mxu0 %v19524_v8  ;;  %v19601_v8 = vld [vmem:[%s20997_s2 + $0xbcc] ss:$16 sps:$4 sm:$0xff]  }
 0xd1d   : > { %15145 = vmatpush1.bf16.msra.mxu1 %v19527_v51  ;;  %14802 = vmatprep.subr.bf16.mxu0 %v19532_v47  ;;  %v19596_v51 = vld [vmem:[%s20997_s2 + $0xbc0] ss:$16 sps:$4 sm:$0xff]   ;;  %v19599_v47 = vld [vmem:[%s20997_s2 + $0xbc8] ss:$16 sps:$4 sm:$0xff]  }
 0xd1e   : > { %15146 = vmatprep.subr.bf16.mxu1 %v19535_v53  ;;  %v19604_v53 = vld [vmem:[%s20997_s2 + $0xbe4] ss:$16 sps:$4 sm:$0xff]  }
 0xd20   : > { %14803 = vmatpush1.bf16.msra.mxu0 %v19530_v27  ;;  %v19607_v27 = vld [vmem:[%s20997_s2 + $0xbec] ss:$16 sps:$4 sm:$0xff]  }
 0xd21   : > { %15147 = vmatpush1.bf16.msra.mxu1 %v19533_v37  ;;  %14804 = vmatprep.subr.bf16.mxu0 %v19538_v10  ;;  %v19602_v37 = vld [vmem:[%s20997_s2 + $0xbe0] ss:$16 sps:$4 sm:$0xff]   ;;  %v19605_v10 = vld [vmem:[%s20997_s2 + $0xbe8] ss:$16 sps:$4 sm:$0xff]  }
 0xd22   : > { %15148 = vmatprep.subr.bf16.mxu1 %v19541_v44  ;;  %v19610_v44 = vld [vmem:[%s20997_s2 + $0xc04] ss:$16 sps:$4 sm:$0xff]  }
 0xd24   : > { %14805 = vmatpush1.bf16.msra.mxu0 %v19536_v28  ;;  %v19613_v28 = vld [vmem:[%s20997_s2 + $0xc0c] ss:$16 sps:$4 sm:$0xff]  }
 0xd25   : > { %15149 = vmatpush1.bf16.msra.mxu1 %v19539_v2  ;;  %14806 = vmatprep.subr.bf16.mxu0 %v19544_v41  ;;  %v19608_v2 = vld [vmem:[%s20997_s2 + $0xc00] ss:$16 sps:$4 sm:$0xff]   ;;  %v19611_v41 = vld [vmem:[%s20997_s2 + $0xc08] ss:$16 sps:$4 sm:$0xff]  }
 0xd26   : > { %15150 = vmatprep.subr.bf16.mxu1 %v19547_v38  ;;  %v19616_v38 = vld [vmem:[%s20997_s2 + $0xc24] ss:$16 sps:$4 sm:$0xff]  }
 0xd28   : > { %14807 = vmatpush1.bf16.msra.mxu0 %v19542_v19  ;;  %v19619_v19 = vld [vmem:[%s20997_s2 + $0xc2c] ss:$16 sps:$4 sm:$0xff]  }
 0xd29   : > { %15151 = vmatpush1.bf16.msra.mxu1 %v19545_v59  ;;  %14808 = vmatprep.subr.bf16.mxu0 %v19550_v48  ;;  %v19614_v59 = vld [vmem:[%s20997_s2 + $0xc20] ss:$16 sps:$4 sm:$0xff]   ;;  %v19617_v48 = vld [vmem:[%s20997_s2 + $0xc28] ss:$16 sps:$4 sm:$0xff]  }
 0xd2a   : > { %15152 = vmatprep.subr.bf16.mxu1 %v19553_v18  ;;  %v19622_v18 = vld [vmem:[%s20997_s2 + $0xc44] ss:$16 sps:$4 sm:$0xff]  }
 0xd2c   : > { %14809 = vmatpush1.bf16.msra.mxu0 %v19548_v14  ;;  %v19625_v14 = vld [vmem:[%s20997_s2 + $0xc4c] ss:$16 sps:$4 sm:$0xff]  }
 0xd2d   : > { %15153 = vmatpush1.bf16.msra.mxu1 %v19551_v22  ;;  %14810 = vmatprep.subr.bf16.mxu0 %v19556_v60  ;;  %v19623_v22 = vld [vmem:[%s20997_s2 + $0xc48] ss:$16 sps:$4 sm:$0xff]   ;;  %v19628_v60 = vld [vmem:[%s20997_s2 + $0xc64] ss:$16 sps:$4 sm:$0xff]  }
 0xd2e   : > { %15154 = vmatprep.subr.bf16.mxu1 %v19559_v36  ;;  %v19631_v36 = vld [vmem:[%s20997_s2 + $0xc6c] ss:$16 sps:$4 sm:$0xff]  }
 0xd30   : > { %14811 = vmatpush1.bf16.msra.mxu0 %v19554_v61  ;;  %v19629_v61 = vld [vmem:[%s20997_s2 + $0xc68] ss:$16 sps:$4 sm:$0xff]  }
 0xd31   : > { %15155 = vmatpush1.bf16.msra.mxu1 %v19557_v6  ;;  %14812 = vmatprep.subr.bf16.mxu0 %v19562_v15  ;;  %v19634_v6 = vld [vmem:[%s20997_s2 + $0xc84] ss:$16 sps:$4 sm:$0xff]   ;;  %v19637_v15 = vld [vmem:[%s20997_s2 + $0xc8c] ss:$16 sps:$4 sm:$0xff]  }
 0xd32   : > { %15156 = vmatprep.subr.bf16.mxu1 %v19565_v9  ;;  %v19632_v9 = vld [vmem:[%s20997_s2 + $0xc80] ss:$16 sps:$4 sm:$0xff]  }
 0xd34   : > { %14813 = vmatpush1.bf16.msra.mxu0 %v19560_v4  ;;  %v19635_v4 = vld [vmem:[%s20997_s2 + $0xc88] ss:$16 sps:$4 sm:$0xff]  }
 0xd35   : > { %15157 = vmatpush1.bf16.msra.mxu1 %v19563_v1  ;;  %14814 = vmatprep.subr.bf16.mxu0 %v19568_v23  ;;  %v19640_v1 = vld [vmem:[%s20997_s2 + $0xca4] ss:$16 sps:$4 sm:$0xff]   ;;  %v19643_v23 = vld [vmem:[%s20997_s2 + $0xcac] ss:$16 sps:$4 sm:$0xff]  }
 0xd36   : > { %15158 = vmatprep.subr.bf16.mxu1 %v19571_v25  ;;  %v19638_v25 = vld [vmem:[%s20997_s2 + $0xca0] ss:$16 sps:$4 sm:$0xff]  }
 0xd38   : > { %14815 = vmatpush1.bf16.msra.mxu0 %v19566_v39  ;;  %v19641_v39 = vld [vmem:[%s20997_s2 + $0xca8] ss:$16 sps:$4 sm:$0xff]  }
 0xd39   : > { %15159 = vmatpush1.bf16.msra.mxu1 %v19569_v34  ;;  %14816 = vmatprep.subr.bf16.mxu0 %v19574_v50  ;;  %v19646_v34 = vld [vmem:[%s20997_s2 + $0xcc4] ss:$16 sps:$4 sm:$0xff]   ;;  %v19649_v50 = vld [vmem:[%s20997_s2 + $0xccc] ss:$16 sps:$4 sm:$0xff]  }
 0xd3a   : > { %15160 = vmatprep.subr.bf16.mxu1 %v19577_v42  ;;  %v19644_v42 = vld [vmem:[%s20997_s2 + $0xcc0] ss:$16 sps:$4 sm:$0xff]  }
 0xd3c   : > { %14817 = vmatpush1.bf16.msra.mxu0 %v19572_v46  ;;  %v19647_v46 = vld [vmem:[%s20997_s2 + $0xcc8] ss:$16 sps:$4 sm:$0xff]  }
 0xd3d   : > { %15161 = vmatpush1.bf16.msra.mxu1 %v19575_v55  ;;  %14818 = vmatprep.subr.bf16.mxu0 %v19580_v3  ;;  %v19652_v55 = vld [vmem:[%s20997_s2 + $0xce4] ss:$16 sps:$4 sm:$0xff]   ;;  %v19655_v3 = vld [vmem:[%s20997_s2 + $0xcec] ss:$16 sps:$4 sm:$0xff]  }
 0xd3e   : > { %15162 = vmatprep.subr.bf16.mxu1 %v19583_v7  ;;  %v19650_v7 = vld [vmem:[%s20997_s2 + $0xce0] ss:$16 sps:$4 sm:$0xff]  }
 0xd40   : > { %14819 = vmatpush1.bf16.msra.mxu0 %v19578_v62  ;;  %v19653_v62 = vld [vmem:[%s20997_s2 + $0xce8] ss:$16 sps:$4 sm:$0xff]  }
 0xd41   : > { %15163 = vmatpush1.bf16.msra.mxu1 %v19581_v32  ;;  %14820 = vmatprep.subr.bf16.mxu0 %v19586_v21  ;;  %v19658_v32 = vld [vmem:[%s20997_s2 + $0xd04] ss:$16 sps:$4 sm:$0xff]   ;;  %v19661_v21 = vld [vmem:[%s20997_s2 + $0xd0c] ss:$16 sps:$4 sm:$0xff]  }
 0xd42   : > { %15164 = vmatprep.subr.bf16.mxu1 %v19589_v12  ;;  %v19656_v12 = vld [vmem:[%s20997_s2 + $0xd00] ss:$16 sps:$4 sm:$0xff]  }
 0xd44   : > { %14821 = vmatpush1.bf16.msra.mxu0 %v19584_v43  ;;  %v19659_v43 = vld [vmem:[%s20997_s2 + $0xd08] ss:$16 sps:$4 sm:$0xff]  }
 0xd45   : > { %15165 = vmatpush1.bf16.msra.mxu1 %v19587_v24  ;;  %14822 = vmatprep.subr.bf16.mxu0 %v19592_v45  ;;  %v19664_v24 = vld [vmem:[%s20997_s2 + $0xd24] ss:$16 sps:$4 sm:$0xff]   ;;  %v19667_v45 = vld [vmem:[%s20997_s2 + $0xd2c] ss:$16 sps:$4 sm:$0xff]  }
 0xd46   : > { %15166 = vmatprep.subr.bf16.mxu1 %v19595_v56  ;;  %v19662_v56 = vld [vmem:[%s20997_s2 + $0xd20] ss:$16 sps:$4 sm:$0xff]  }
 0xd48   : > { %14823 = vmatpush1.bf16.msra.mxu0 %v19590_v31  ;;  %v19665_v31 = vld [vmem:[%s20997_s2 + $0xd28] ss:$16 sps:$4 sm:$0xff]  }
 0xd49   : > { %15167 = vmatpush1.bf16.msra.mxu1 %v19593_v35  ;;  %14824 = vmatprep.subr.bf16.mxu0 %v19598_v57  ;;  %v19670_v35 = vld [vmem:[%s20997_s2 + $0xd44] ss:$16 sps:$4 sm:$0xff]   ;;  %v19673_v57 = vld [vmem:[%s20997_s2 + $0xd4c] ss:$16 sps:$4 sm:$0xff]  }
 0xd4a   : > { %15168 = vmatprep.subr.bf16.mxu1 %v19601_v8  ;;  %v19668_v8 = vld [vmem:[%s20997_s2 + $0xd40] ss:$16 sps:$4 sm:$0xff]  }
 0xd4c   : > { %14825 = vmatpush1.bf16.msra.mxu0 %v19596_v51  ;;  %v19671_v51 = vld [vmem:[%s20997_s2 + $0xd48] ss:$16 sps:$4 sm:$0xff]  }
 0xd4d   : > { %15169 = vmatpush1.bf16.msra.mxu1 %v19599_v47  ;;  %14826 = vmatprep.subr.bf16.mxu0 %v19604_v53  ;;  %v19676_v47 = vld [vmem:[%s20997_s2 + $0xd64] ss:$16 sps:$4 sm:$0xff]   ;;  %v19679_v53 = vld [vmem:[%s20997_s2 + $0xd6c] ss:$16 sps:$4 sm:$0xff]  }
 0xd4e   : > { %15170 = vmatprep.subr.bf16.mxu1 %v19607_v27  ;;  %v19674_v27 = vld [vmem:[%s20997_s2 + $0xd60] ss:$16 sps:$4 sm:$0xff]  }
 0xd50   : > { %14827 = vmatpush1.bf16.msra.mxu0 %v19602_v37  ;;  %v19677_v37 = vld [vmem:[%s20997_s2 + $0xd68] ss:$16 sps:$4 sm:$0xff]  }
 0xd51   : > { %15171 = vmatpush1.bf16.msra.mxu1 %v19605_v10  ;;  %14839 = vmatprep.subr.bf16.mxu0 %v19610_v44  ;;  %v19682_v10 = vld [vmem:[%s20997_s2 + $0xd84] ss:$16 sps:$4 sm:$0xff]   ;;  %v19685_v44 = vld [vmem:[%s20997_s2 + $0xd8c] ss:$16 sps:$4 sm:$0xff]  }
 0xd52   : > { %15183 = vmatprep.subr.bf16.mxu1 %v19613_v28  ;;  %v19680_v28 = vld [vmem:[%s20997_s2 + $0xd80] ss:$16 sps:$4 sm:$0xff]  }
 0xd53   : > { %14829 = vmatmul.mubr.bf16.vlgmr.msra.gmra.mrb[64].mxu0 %v22981_v26 }
 0xd54   : > { %15173 = vmatmul.mubr.bf16.vlgmr.msra.gmra.mrb[64].mxu1 %v22981_v26  ;;  %14840 = vmatpush1.bf16.msra.mxu0 %v19608_v2  ;;  %v19620_v26 = vld [vmem:[%s20997_s2 + $0xc40] ss:$16 sps:$4 sm:$0xff]   ;;  %v19683_v2 = vld [vmem:[%s20997_s2 + $0xd88] ss:$16 sps:$4 sm:$0xff]  }
 0xd55   : > { %14871 = vmatprep.mubr.bf16.mxu0 %v23135_v17  ;;  %15184 = vmatpush1.bf16.msra.mxu1 %v19611_v41  ;;  %v19688_v41 = vld [vmem:[%s20997_s2 + $0xda4] ss:$16 sps:$4 sm:$0xff]  }
 0xd56   : > { %15215 = vmatprep.mubr.bf16.mxu1 %v23135_v17  ;;  %14841 = vmatprep.subr.bf16.mxu0 %v19616_v38  ;;  %v19626_v17 = vld [vmem:[%s20997_s2 + $0xc60] ss:$16 sps:$4 sm:$0xff]   ;;  %v19691_v38 = vld [vmem:[%s20997_s2 + $0xdac] ss:$16 sps:$4 sm:$0xff]  }
 0xd57   : > { %15185 = vmatprep.subr.bf16.mxu1 %v19619_v19  ;;  %v19686_v19 = vld [vmem:[%s20997_s2 + $0xda0] ss:$16 sps:$4 sm:$0xff]  }
 0xd58   : > { %14842 = vmatpush1.bf16.msra.mxu0 %v19614_v59  ;;  %v19689_v59 = vld [vmem:[%s20997_s2 + $0xda8] ss:$16 sps:$4 sm:$0xff]  }
 0xd59   : > { %15186 = vmatpush1.bf16.msra.mxu1 %v19617_v48  ;;  %14843 = vmatprep.subr.bf16.mxu0 %v19622_v18  ;;  %v19694_v48 = vld [vmem:[%s20997_s2 + $0xdc4] ss:$16 sps:$4 sm:$0xff]   ;;  %v19697_v18 = vld [vmem:[%s20997_s2 + $0xdcc] ss:$16 sps:$4 sm:$0xff]  }
 0xd5a   : > { %15187 = vmatprep.subr.bf16.mxu1 %v19625_v14  ;;  %v19692_v14 = vld [vmem:[%s20997_s2 + $0xdc0] ss:$16 sps:$4 sm:$0xff]  }
 0xd5c   : > { %14844 = vmatpush1.bf16.msra.mxu0 %v19620_v26  ;;  %v19695_v26 = vld [vmem:[%s20997_s2 + $0xdc8] ss:$16 sps:$4 sm:$0xff]  }
 0xd5d   : > { %15188 = vmatpush1.bf16.msra.mxu1 %v19623_v22  ;;  %14845 = vmatprep.subr.bf16.mxu0 %v19628_v60  ;;  %v19700_v22 = vld [vmem:[%s20997_s2 + $0xde4] ss:$16 sps:$4 sm:$0xff]   ;;  %v19703_v60 = vld [vmem:[%s20997_s2 + $0xdec] ss:$16 sps:$4 sm:$0xff]  }
 0xd5e   : > { %15189 = vmatprep.subr.bf16.mxu1 %v19631_v36  ;;  %v19698_v36 = vld [vmem:[%s20997_s2 + $0xde0] ss:$16 sps:$4 sm:$0xff]  }
 0xd60   : > { %14846 = vmatpush1.bf16.msra.mxu0 %v19626_v17  ;;  %v19701_v17 = vld [vmem:[%s20997_s2 + $0xde8] ss:$16 sps:$4 sm:$0xff]  }
 0xd61   : > { %15190 = vmatpush1.bf16.msra.mxu1 %v19629_v61  ;;  %14847 = vmatprep.subr.bf16.mxu0 %v19634_v6  ;;  %v19706_v61 = vld [vmem:[%s20997_s2 + $0xe04] ss:$16 sps:$4 sm:$0xff]   ;;  %v19709_v6 = vld [vmem:[%s20997_s2 + $0xe0c] ss:$16 sps:$4 sm:$0xff]  }
 0xd62   : > { %15191 = vmatprep.subr.bf16.mxu1 %v19637_v15  ;;  %v19704_v15 = vld [vmem:[%s20997_s2 + $0xe00] ss:$16 sps:$4 sm:$0xff]  }
 0xd64   : > { %14848 = vmatpush1.bf16.msra.mxu0 %v19632_v9  ;;  %v19707_v9 = vld [vmem:[%s20997_s2 + $0xe08] ss:$16 sps:$4 sm:$0xff]  }
 0xd65   : > { %15192 = vmatpush1.bf16.msra.mxu1 %v19635_v4  ;;  %14849 = vmatprep.subr.bf16.mxu0 %v19640_v1  ;;  %v19712_v4 = vld [vmem:[%s20997_s2 + $0xe24] ss:$16 sps:$4 sm:$0xff]   ;;  %v19715_v1 = vld [vmem:[%s20997_s2 + $0xe2c] ss:$16 sps:$4 sm:$0xff]  }
 0xd66   : > { %15193 = vmatprep.subr.bf16.mxu1 %v19643_v23  ;;  %v19710_v23 = vld [vmem:[%s20997_s2 + $0xe20] ss:$16 sps:$4 sm:$0xff]  }
 0xd68   : > { %14850 = vmatpush1.bf16.msra.mxu0 %v19638_v25  ;;  %v19713_v25 = vld [vmem:[%s20997_s2 + $0xe28] ss:$16 sps:$4 sm:$0xff]  }
 0xd69   : > { %15194 = vmatpush1.bf16.msra.mxu1 %v19641_v39  ;;  %14851 = vmatprep.subr.bf16.mxu0 %v19646_v34  ;;  %v19718_v39 = vld [vmem:[%s20997_s2 + $0xe44] ss:$16 sps:$4 sm:$0xff]   ;;  %v19721_v34 = vld [vmem:[%s20997_s2 + $0xe4c] ss:$16 sps:$4 sm:$0xff]  }
 0xd6a   : > { %15195 = vmatprep.subr.bf16.mxu1 %v19649_v50  ;;  %v19719_v50 = vld [vmem:[%s20997_s2 + $0xe48] ss:$16 sps:$4 sm:$0xff]  }
 0xd6c   : > { %14852 = vmatpush1.bf16.msra.mxu0 %v19644_v42  ;;  %v19724_v42 = vld [vmem:[%s20997_s2 + $0xe64] ss:$16 sps:$4 sm:$0xff]  }
 0xd6d   : > { %15196 = vmatpush1.bf16.msra.mxu1 %v19647_v46  ;;  %14853 = vmatprep.subr.bf16.mxu0 %v19652_v55  ;;  %v19727_v46 = vld [vmem:[%s20997_s2 + $0xe6c] ss:$16 sps:$4 sm:$0xff]   ;;  %v19725_v55 = vld [vmem:[%s20997_s2 + $0xe68] ss:$16 sps:$4 sm:$0xff]  }
 0xd6e   : > { %15197 = vmatprep.subr.bf16.mxu1 %v19655_v3  ;;  %v19730_v3 = vld [vmem:[%s20997_s2 + $0xe84] ss:$16 sps:$4 sm:$0xff]  }
 0xd70   : > { %14854 = vmatpush1.bf16.msra.mxu0 %v19650_v7  ;;  %v19733_v7 = vld [vmem:[%s20997_s2 + $0xe8c] ss:$16 sps:$4 sm:$0xff]  }
 0xd71   : > { %15198 = vmatpush1.bf16.msra.mxu1 %v19653_v62  ;;  %14855 = vmatprep.subr.bf16.mxu0 %v19658_v32  ;;  %v19728_v62 = vld [vmem:[%s20997_s2 + $0xe80] ss:$16 sps:$4 sm:$0xff]   ;;  %v19731_v32 = vld [vmem:[%s20997_s2 + $0xe88] ss:$16 sps:$4 sm:$0xff]  }
 0xd72   : > { %15199 = vmatprep.subr.bf16.mxu1 %v19661_v21  ;;  %v19736_v21 = vld [vmem:[%s20997_s2 + $0xea4] ss:$16 sps:$4 sm:$0xff]  }
 0xd74   : > { %14856 = vmatpush1.bf16.msra.mxu0 %v19656_v12  ;;  %v19739_v12 = vld [vmem:[%s20997_s2 + $0xeac] ss:$16 sps:$4 sm:$0xff]  }
 0xd75   : > { %15200 = vmatpush1.bf16.msra.mxu1 %v19659_v43  ;;  %14857 = vmatprep.subr.bf16.mxu0 %v19664_v24  ;;  %v19734_v43 = vld [vmem:[%s20997_s2 + $0xea0] ss:$16 sps:$4 sm:$0xff]   ;;  %v19737_v24 = vld [vmem:[%s20997_s2 + $0xea8] ss:$16 sps:$4 sm:$0xff]  }
 0xd76   : > { %15201 = vmatprep.subr.bf16.mxu1 %v19667_v45  ;;  %v19742_v45 = vld [vmem:[%s20997_s2 + $0xec4] ss:$16 sps:$4 sm:$0xff]  }
 0xd78   : > { %14858 = vmatpush1.bf16.msra.mxu0 %v19662_v56  ;;  %v19745_v56 = vld [vmem:[%s20997_s2 + $0xecc] ss:$16 sps:$4 sm:$0xff]  }
 0xd79   : > { %15202 = vmatpush1.bf16.msra.mxu1 %v19665_v31  ;;  %14859 = vmatprep.subr.bf16.mxu0 %v19670_v35  ;;  %v19740_v31 = vld [vmem:[%s20997_s2 + $0xec0] ss:$16 sps:$4 sm:$0xff]   ;;  %v19743_v35 = vld [vmem:[%s20997_s2 + $0xec8] ss:$16 sps:$4 sm:$0xff]  }
 0xd7a   : > { %15203 = vmatprep.subr.bf16.mxu1 %v19673_v57  ;;  %v19748_v57 = vld [vmem:[%s20997_s2 + $0xee4] ss:$16 sps:$4 sm:$0xff]  }
 0xd7c   : > { %14860 = vmatpush1.bf16.msra.mxu0 %v19668_v8  ;;  %v19751_v8 = vld [vmem:[%s20997_s2 + $0xeec] ss:$16 sps:$4 sm:$0xff]  }
 0xd7d   : > { %15204 = vmatpush1.bf16.msra.mxu1 %v19671_v51  ;;  %14861 = vmatprep.subr.bf16.mxu0 %v19676_v47  ;;  %v19746_v51 = vld [vmem:[%s20997_s2 + $0xee0] ss:$16 sps:$4 sm:$0xff]   ;;  %v19749_v47 = vld [vmem:[%s20997_s2 + $0xee8] ss:$16 sps:$4 sm:$0xff]  }
 0xd7e   : > { %15205 = vmatprep.subr.bf16.mxu1 %v19679_v53  ;;  %v19754_v53 = vld [vmem:[%s20997_s2 + $0xf04] ss:$16 sps:$4 sm:$0xff]  }
 0xd80   : > { %14862 = vmatpush1.bf16.msra.mxu0 %v19674_v27  ;;  %v19757_v27 = vld [vmem:[%s20997_s2 + $0xf0c] ss:$16 sps:$4 sm:$0xff]  }
 0xd81   : > { %15206 = vmatpush1.bf16.msra.mxu1 %v19677_v37  ;;  %14863 = vmatprep.subr.bf16.mxu0 %v19682_v10  ;;  %v19752_v37 = vld [vmem:[%s20997_s2 + $0xf00] ss:$16 sps:$4 sm:$0xff]   ;;  %v19755_v10 = vld [vmem:[%s20997_s2 + $0xf08] ss:$16 sps:$4 sm:$0xff]  }
 0xd82   : > { %15207 = vmatprep.subr.bf16.mxu1 %v19685_v44  ;;  %v19760_v44 = vld [vmem:[%s20997_s2 + $0xf24] ss:$16 sps:$4 sm:$0xff]  }
 0xd84   : > { %14864 = vmatpush1.bf16.msra.mxu0 %v19680_v28  ;;  %v19763_v28 = vld [vmem:[%s20997_s2 + $0xf2c] ss:$16 sps:$4 sm:$0xff]  }
 0xd85   : > { %15208 = vmatpush1.bf16.msra.mxu1 %v19683_v2  ;;  %14865 = vmatprep.subr.bf16.mxu0 %v19688_v41  ;;  %v19758_v2 = vld [vmem:[%s20997_s2 + $0xf20] ss:$16 sps:$4 sm:$0xff]   ;;  %v19761_v41 = vld [vmem:[%s20997_s2 + $0xf28] ss:$16 sps:$4 sm:$0xff]  }
 0xd86   : > { %15209 = vmatprep.subr.bf16.mxu1 %v19691_v38  ;;  %v19766_v38 = vld [vmem:[%s20997_s2 + $0xf44] ss:$16 sps:$4 sm:$0xff]  }
 0xd88   : > { %14866 = vmatpush1.bf16.msra.mxu0 %v19686_v19  ;;  %v19769_v19 = vld [vmem:[%s20997_s2 + $0xf4c] ss:$16 sps:$4 sm:$0xff]  }
 0xd89   : > { %15210 = vmatpush1.bf16.msra.mxu1 %v19689_v59  ;;  %14867 = vmatprep.subr.bf16.mxu0 %v19694_v48  ;;  %v19764_v59 = vld [vmem:[%s20997_s2 + $0xf40] ss:$16 sps:$4 sm:$0xff]   ;;  %v19767_v48 = vld [vmem:[%s20997_s2 + $0xf48] ss:$16 sps:$4 sm:$0xff]  }
 0xd8a   : > { %15211 = vmatprep.subr.bf16.mxu1 %v19697_v18  ;;  %v19772_v18 = vld [vmem:[%s20997_s2 + $0xf64] ss:$16 sps:$4 sm:$0xff]  }
 0xd8c   : > { %14868 = vmatpush1.bf16.msra.mxu0 %v19692_v14  ;;  %v19775_v14 = vld [vmem:[%s20997_s2 + $0xf6c] ss:$16 sps:$4 sm:$0xff]  }
 0xd8d   : > { %15212 = vmatpush1.bf16.msra.mxu1 %v19695_v26  ;;  %14869 = vmatprep.subr.bf16.mxu0 %v19700_v22  ;;  %v19770_v26 = vld [vmem:[%s20997_s2 + $0xf60] ss:$16 sps:$4 sm:$0xff]   ;;  %v19773_v22 = vld [vmem:[%s20997_s2 + $0xf68] ss:$16 sps:$4 sm:$0xff]  }
 0xd8e   : > { %15213 = vmatprep.subr.bf16.mxu1 %v19703_v60  ;;  %v19778_v60 = vld [vmem:[%s20997_s2 + $0xf84] ss:$16 sps:$4 sm:$0xff]  }
 0xd90   : > { %14870 = vmatpush1.bf16.msra.mxu0 %v19698_v36  ;;  %v19781_v36 = vld [vmem:[%s20997_s2 + $0xf8c] ss:$16 sps:$4 sm:$0xff]  }
 0xd91   : > { %15214 = vmatpush1.bf16.msra.mxu1 %v19701_v17  ;;  %14882 = vmatprep.subr.bf16.mxu0 %v19706_v61  ;;  %v19776_v17 = vld [vmem:[%s20997_s2 + $0xf80] ss:$16 sps:$4 sm:$0xff]   ;;  %v19779_v61 = vld [vmem:[%s20997_s2 + $0xf88] ss:$16 sps:$4 sm:$0xff]  }
 0xd92   : > { %15226 = vmatprep.subr.bf16.mxu1 %v19709_v6  ;;  %v19784_v6 = vld [vmem:[%s20997_s2 + $0xfa4] ss:$16 sps:$4 sm:$0xff]  }
 0xd93   : > { %14872 = vmatmul.mubr.bf16.vlgmr.msra.gmra.mrb[64].mxu0 %v23129_v16 }
 0xd94   : > { %15216 = vmatmul.mubr.bf16.vlgmr.msra.gmra.mrb[64].mxu1 %v23129_v16  ;;  %14883 = vmatpush1.bf16.msra.mxu0 %v19704_v15  ;;  %v19716_v16 = vld [vmem:[%s20997_s2 + $0xe40] ss:$16 sps:$4 sm:$0xff]   ;;  %v19787_v15 = vld [vmem:[%s20997_s2 + $0xfac] ss:$16 sps:$4 sm:$0xff]  }
 0xd95   : > { %14914 = vmatprep.mubr.bf16.mxu0 %v23138_v29  ;;  %15227 = vmatpush1.bf16.msra.mxu1 %v19707_v9  ;;  %v19782_v9 = vld [vmem:[%s20997_s2 + $0xfa0] ss:$16 sps:$4 sm:$0xff]  }
 0xd96   : > { %15258 = vmatprep.mubr.bf16.mxu1 %v23138_v29  ;;  %14884 = vmatprep.subr.bf16.mxu0 %v19712_v4  ;;  %v19722_v29 = vld [vmem:[%s20997_s2 + $0xe60] ss:$16 sps:$4 sm:$0xff]   ;;  %v19785_v4 = vld [vmem:[%s20997_s2 + $0xfa8] ss:$16 sps:$4 sm:$0xff]  }
 0xd97   : > { %15228 = vmatprep.subr.bf16.mxu1 %v19715_v1  ;;  %v19790_v1 = vld [vmem:[%s20997_s2 + $0xfc4] ss:$16 sps:$4 sm:$0xff]  }
 0xd98   : > { %14885 = vmatpush1.bf16.msra.mxu0 %v19710_v23  ;;  %v19793_v23 = vld [vmem:[%s20997_s2 + $0xfcc] ss:$16 sps:$4 sm:$0xff]  }
 0xd99   : > { %15229 = vmatpush1.bf16.msra.mxu1 %v19713_v25  ;;  %14886 = vmatprep.subr.bf16.mxu0 %v19718_v39  ;;  %v19788_v25 = vld [vmem:[%s20997_s2 + $0xfc0] ss:$16 sps:$4 sm:$0xff]   ;;  %v19791_v39 = vld [vmem:[%s20997_s2 + $0xfc8] ss:$16 sps:$4 sm:$0xff]  }
 0xd9a   : > { %15230 = vmatprep.subr.bf16.mxu1 %v19721_v34  ;;  %v19796_v34 = vld [vmem:[%s20997_s2 + $0xfe4] ss:$16 sps:$4 sm:$0xff]  }
 0xd9c   : > { %14887 = vmatpush1.bf16.msra.mxu0 %v19716_v16  ;;  %v19799_v16 = vld [vmem:[%s20997_s2 + $0xfec] ss:$16 sps:$4 sm:$0xff]  }
 0xd9d   : > { %15231 = vmatpush1.bf16.msra.mxu1 %v19719_v50  ;;  %14888 = vmatprep.subr.bf16.mxu0 %v19724_v42  ;;  %v19794_v50 = vld [vmem:[%s20997_s2 + $0xfe0] ss:$16 sps:$4 sm:$0xff]   ;;  %v19797_v42 = vld [vmem:[%s20997_s2 + $0xfe8] ss:$16 sps:$4 sm:$0xff]  }
 0xd9e   : > { %15232 = vmatprep.subr.bf16.mxu1 %v19727_v46  ;;  %v11999_v46 = vld [vmem:[%s23792_s26] sm:$0xf] }
 0xda0   : > { %14889 = vmatpush1.bf16.msra.mxu0 %v19722_v29  ;;  %v12004_v29 = vrot.slane %v11999_v46, %v21465_v40 }
 0xda1   : > { %15233 = vmatpush1.bf16.msra.mxu1 %v19725_v55  ;;  %14890 = vmatprep.subr.bf16.mxu0 %v19730_v3  ;;  %v12012_v55 = vrot.slane %v11999_v46, %v21481_v54  ;;  %v12008_v3 = vrot.slane %v11999_v46, %v21470_v58 }
 0xda2   : > { %15234 = vmatprep.subr.bf16.mxu1 %v19733_v7 }
 0xda4   : > { %14891 = vmatpush1.bf16.msra.mxu0 %v19728_v62  ;;  %v12016_v62 = vrot.slane %v11999_v46, %v21504_v5 }
 0xda5   : > { %15235 = vmatpush1.bf16.msra.mxu1 %v19731_v32  ;;  %14892 = vmatprep.subr.bf16.mxu0 %v19736_v21 }
 0xda6   : > { %15236 = vmatprep.subr.bf16.mxu1 %v19739_v12 }
 0xda8   : > { %14893 = vmatpush1.bf16.msra.mxu0 %v19734_v43 }
 0xda9   : > { %15237 = vmatpush1.bf16.msra.mxu1 %v19737_v24  ;;  %14894 = vmatprep.subr.bf16.mxu0 %v19742_v45 }
 0xdaa   : > { %15238 = vmatprep.subr.bf16.mxu1 %v19745_v56 }
 0xdac   : > { %14895 = vmatpush1.bf16.msra.mxu0 %v19740_v31 }
 0xdad   : > { %15239 = vmatpush1.bf16.msra.mxu1 %v19743_v35  ;;  %14896 = vmatprep.subr.bf16.mxu0 %v19748_v57 }
 0xdae   : > { %15240 = vmatprep.subr.bf16.mxu1 %v19751_v8 }
 0xdb0   : > { %14897 = vmatpush1.bf16.msra.mxu0 %v19746_v51 }
 0xdb1   : > { %15241 = vmatpush1.bf16.msra.mxu1 %v19749_v47  ;;  %14898 = vmatprep.subr.bf16.mxu0 %v19754_v53 }
 0xdb2   : > { %15242 = vmatprep.subr.bf16.mxu1 %v19757_v27 }
 0xdb4   : > { %14899 = vmatpush1.bf16.msra.mxu0 %v19752_v37 }
 0xdb5   : > { %15243 = vmatpush1.bf16.msra.mxu1 %v19755_v10  ;;  %14900 = vmatprep.subr.bf16.mxu0 %v19760_v44 }
 0xdb6   : > { %15244 = vmatprep.subr.bf16.mxu1 %v19763_v28 }
 0xdb8   : > { %14901 = vmatpush1.bf16.msra.mxu0 %v19758_v2 }
 0xdb9   : > { %15245 = vmatpush1.bf16.msra.mxu1 %v19761_v41  ;;  %14902 = vmatprep.subr.bf16.mxu0 %v19766_v38 }
 0xdba   : > { %15246 = vmatprep.subr.bf16.mxu1 %v19769_v19 }
 0xdbc   : > { %14903 = vmatpush1.bf16.msra.mxu0 %v19764_v59 }
 0xdbd   : > { %15247 = vmatpush1.bf16.msra.mxu1 %v19767_v48  ;;  %14904 = vmatprep.subr.bf16.mxu0 %v19772_v18 }
 0xdbe   : > { %15248 = vmatprep.subr.bf16.mxu1 %v19775_v14 }
 0xdc0   : > { %14905 = vmatpush1.bf16.msra.mxu0 %v19770_v26 }
 0xdc1   : > { %15249 = vmatpush1.bf16.msra.mxu1 %v19773_v22  ;;  %14906 = vmatprep.subr.bf16.mxu0 %v19778_v60 }
 0xdc2   : > { %15250 = vmatprep.subr.bf16.mxu1 %v19781_v36 }
 0xdc4   : > { %14907 = vmatpush1.bf16.msra.mxu0 %v19776_v17 }
 0xdc5   : > { %15251 = vmatpush1.bf16.msra.mxu1 %v19779_v61  ;;  %14908 = vmatprep.subr.bf16.mxu0 %v19784_v6 }
 0xdc6   : > { %15252 = vmatprep.subr.bf16.mxu1 %v19787_v15 }
 0xdc8   : > { %14909 = vmatpush1.bf16.msra.mxu0 %v19782_v9 }
 0xdc9   : > { %15253 = vmatpush1.bf16.msra.mxu1 %v19785_v4  ;;  %14910 = vmatprep.subr.bf16.mxu0 %v19790_v1 }
 0xdca   : > { %15254 = vmatprep.subr.bf16.mxu1 %v19793_v23 }
 0xdcc   : > { %14911 = vmatpush1.bf16.msra.mxu0 %v19788_v25 }
 0xdcd   : > { %15255 = vmatpush1.bf16.msra.mxu1 %v19791_v39  ;;  %14912 = vmatprep.subr.bf16.mxu0 %v19796_v34 }
 0xdce   : > { %15256 = vmatprep.subr.bf16.mxu1 %v19799_v16 }
 0xdd0   : > { %14913 = vmatpush1.bf16.msra.mxu0 %v19794_v50 }
 0xdd1   : > { %15257 = vmatpush1.bf16.msra.mxu1 %v19797_v42 }
 0xdd3   : > { %14915 = vmatmul.mubr.bf16.vlgmr.msra.gmra.mrb[64].mxu0 %v23133_v30 }
 0xdd4   : > { %15259 = vmatmul.mubr.bf16.vlgmr.msra.gmra.mrb[64].mxu1 %v23133_v30 }
 0xea6   : > { %v14916_v7 = vpop.f32.mrb[64].mxu0 }
 0xea7   : > { %v17989_v32 = vadd.f32 %v14916_v7, %v12004_v29  ;;  %v15260_v21 = vpop.f32.mrb[64].mxu1  ;;  %v14918_v12 = vpop.f32.mrb[65].mxu0 }
 0xea8   : > { %v17993_v43 = vadd.f32 %v15260_v21, %v12012_v55  ;;  %v17990_v24 = vadd.f32 %v14918_v12, %v12008_v3  ;;  %v15262_v45 = vpop.f32.mrb[65].mxu1  ;;  %v14920_v56 = vpop.f32.mrb[66].mxu0  ;;  %v15277_v21 = vld [vmem:[%s23793_s15] sm:$0xf]  ;;  %v15278_v12 = vld [vmem:[%s23794_s13] sm:$0xf] }
 0xea9   : > { %v15269_v30 = vadd.f32 %v17989_v32, %v22322_v33  ;;  %v17991_v31 = vadd.f32 %v14920_v56, %v12004_v29  ;;  %v15264_v35 = vpop.f32.mrb[66].mxu1  ;;  %v14922_v57 = vpop.f32.mrb[67].mxu0  ;;  %v17994_v51 = vadd.f32 %v15262_v45, %v12016_v62  ;;  %v15343_v45 = vrot.slane %v15277_v21, %v21481_v54 }
 0xeaa   : > { %v15270_v8 = vadd.f32 %v17990_v24, %v22318_v49  ;;  %v17995_v47 = vadd.f32 %v15264_v35, %v12012_v55  ;;  %v17992_v53 = vadd.f32 %v14922_v57, %v12008_v3  ;;  %v15266_v27 = vpop.f32.mrb[67].mxu1  ;;  %v15271_v10 = vadd.f32 %v17993_v43, %v22315_v52 }
 0xeab   : > { %v15273_v37 = vadd.f32 %v17991_v31, %v22324_v63  ;;  %v17996_v2 = vadd.f32 %v15266_v27, %v12016_v62  ;;  %v15272_v41 = vadd.f32 %v17994_v51, %v22342_v20  ;;  %v15335_v43 = vrot.slane %v15277_v21, %v21465_v40 }
 0xeac   : > { %v15279_v44 = vadd.f32 %v15270_v8, %v15269_v30  ;;  %v15274_v28 = vadd.f32 %v17992_v53, %v22320_v13  ;;  %v15275_v33 = vadd.f32 %v17995_v47, %v22332_v11  ;;  %v15339_v24 = vrot.slane %v15277_v21, %v21470_v58 }
 0xead   : > { %v15276_v49 = vadd.f32 %v17996_v2, %v22327_v0  ;;  %v15347_v56 = vrot.slane %v15277_v21, %v21504_v5  ;;  %v15364_v31 = vrot.slane %v15278_v12, %v21465_v40  ;;  %v15368_v35 = vrot.slane %v15278_v12, %v21470_v58  ;;  %v15406_v21 = vld [vmem:[%s23796_s24 + $0x28] sm:$0xff] (!%p17551_p0) }
 0xeae   : > { %v15284_v38 = vadd.f32 %v15274_v28, %v15273_v37  ;;  %v15280_v19 = vadd.f32 %v15279_v44, %v15271_v10  ;;  %v15372_v57 = vrot.slane %v15278_v12, %v21481_v54 }
 0xeb0   : > { %v15281_v59 = vadd.f32 %v15280_v19, %v15272_v41  ;;  %v15285_v48 = vadd.f32 %v15284_v38, %v15275_v33 }
 0xeb2   : > { %15282 = vadd.xlane.f32.xlu1 %v15281_v59  ;;  %v15286_v18 = vadd.f32 %v15285_v48, %v15276_v49 }
 0xeb4   : > { %15287 = vadd.xlane.f32.xlu0 %v15286_v18 }
 0xf3f   : > { %v15283_v63 = vpop.xlane.xlu1 %15282 }
 0xf40   : > { %v15289_v14 = vmul.f32 0.001953125, %v15283_v63 }
 0xf41   : > { %v15288_v52 = vpop.xlane.xlu0 %15287 }
 0xf42   : > { %v15291_v26 = vsub.f32 %v15269_v30, %v15289_v14  ;;  %v15292_v22 = vsub.f32 %v15270_v8, %v15289_v14  ;;  %v15290_v13 = vmul.f32 0.001953125, %v15288_v52  ;;  %v15293_v60 = vsub.f32 %v15271_v10, %v15289_v14 }
 0xf43   : > { %v15294_v36 = vsub.f32 %v15272_v41, %v15289_v14  ;;  %v15376_v8 = vrot.slane %v15278_v12, %v21504_v5  ;;  %v15453_v12 = vld [vmem:[%s23796_s24 + $0x1a0] sm:$0xff] (!%p17551_p0) }
 0xf44   : > { %v15295_v20 = vsub.f32 %v15273_v37, %v15290_v13  ;;  %v15296_v17 = vsub.f32 %v15274_v28, %v15290_v13  ;;  %v15299_v11 = vmul.f32 %v15291_v26, %v15291_v26  ;;  %v15300_v61 = vmul.f32 %v15292_v22, %v15292_v22 }
 0xf45   : > { %v15301_v6 = vmul.f32 %v15293_v60, %v15293_v60  ;;  %v15297_v15 = vsub.f32 %v15275_v33, %v15290_v13  ;;  %v15298_v9 = vsub.f32 %v15276_v49, %v15290_v13  ;;  %v15302_v23 = vmul.f32 %v15294_v36, %v15294_v36  ;;  %v15418_v13 = vld [vmem:[%s23796_s24 + $0x88] sm:$0xff] (!%p17551_p0) }
 0xf46   : > { %v15307_v0 = vadd.f32 %v15300_v61, %v15299_v11  ;;  %v15303_v4 = vmul.f32 %v15295_v20, %v15295_v20  ;;  %v15304_v1 = vmul.f32 %v15296_v17, %v15296_v17  ;;  %v15450_v11 = vld [vmem:[%s23796_s24 + $0x188] sm:$0xff] (!%p17551_p0) }
 0xf47   : > { %v15305_v39 = vmul.f32 %v15297_v15, %v15297_v15  ;;  %v15306_v50 = vmul.f32 %v15298_v9, %v15298_v9 }
 0xf48   : > { %v15308_v25 = vadd.f32 %v15307_v0, %v15301_v6  ;;  %v15312_v34 = vadd.f32 %v15304_v1, %v15303_v4  ;;  %v15434_v0 = vld [vmem:[%s23796_s24 + $0x108] sm:$0xff] (!%p17551_p0)  ;;  %v15420_v1 = vld [vmem:[%s23796_s24 + $0x98] sm:$0xff] (!%p17551_p0) }
 0xf4a   : > { %v15309_v16 = vadd.f32 %v15308_v25, %v15302_v23  ;;  %v15313_v42 = vadd.f32 %v15312_v34, %v15305_v39  ;;  %v15403_v23 = vld [vmem:[%s23796_s24 + $0x10] sm:$0xff] (!%p17551_p0)  ;;  %v15404_v25 = vld [vmem:[%s23796_s24 + $0x18] sm:$0xff] (!%p17551_p0) }
 0xf4b   : > { %v17867_v34 = vpack.c.bf16 (!%p17551_p0), %v15404_v25, %v15403_v23  ;;  %v15413_v25 = vld [vmem:[%s23796_s24 + $0x60] sm:$0xff] (!%p17551_p0) }
 0xf4c   : > { %15310 = vadd.xlane.f32.xlu1 %v15309_v16  ;;  %v15314_v46 = vadd.f32 %v15313_v42, %v15306_v50  ;;  %v15451_v16 = vld [vmem:[%s23796_s24 + $0x190] sm:$0xff] (!%p17551_p0)  ;;  %v15452_v50 = vld [vmem:[%s23796_s24 + $0x198] sm:$0xff] (!%p17551_p0) }
 0xf4d   : > { %v15435_v42 = vld [vmem:[%s23796_s24 + $0x110] sm:$0xff] (!%p17551_p0) }
 0xf4e   : > { %15315 = vadd.xlane.f32.xlu0 %v15314_v46  ;;  %v17897_v46 = vpack.c.bf16 (!%p17551_p0), %v15452_v50, %v15451_v16  ;;  %v15446_v50 = vld [vmem:[%s23796_s24 + $0x168] sm:$0xff] (!%p17551_p0) }
 0xfd9   : > { %v15311_v29 = vpop.xlane.xlu1 %15310 }
 0xfda   : > { %v15317_v55 = vmul.f32 0.001953125, %v15311_v29  ;;  %v15436_v29 = vld [vmem:[%s23796_s24 + $0x118] sm:$0xff] (!%p17551_p0) }
 0xfdb   : > { %v15316_v3 = vpop.xlane.xlu0 %15315 }
 0xfdc   : > { %v15319_v7 = vadd.f32 1e-05, %v15317_v55  ;;  %v15318_v62 = vmul.f32 0.001953125, %v15316_v3  ;;  %v15421_v55 = vld [vmem:[%s23796_s24 + $0xa0] sm:$0xff] (!%p17551_p0)  ;;  %v15422_v3 = vld [vmem:[%s23796_s24 + $0xa8] sm:$0xff] (!%p17551_p0) }
 0xfde   : > { %19868 = vrsqrt.f32 %v15319_v7  ;;  %v15320_v32 = vadd.f32 1e-05, %v15318_v62  ;;  %v17899_v7 = vpack.c.bf16 (!%p17551_p0), %v15436_v29, %v15435_v42  ;;  %v17869_v62 = vpack.c.bf16 (!%p17551_p0), %v15422_v3, %v15421_v55  ;;  %v15431_v42 = vld [vmem:[%s23796_s24 + $0xf0] sm:$0xff] (!%p17551_p0)  ;;  %v15464_v55 = vld [vmem:[%s23796_s24 + $0x1f8] sm:$0xff] (!%p17551_p0) }
 0xfdf   : > { %v15463_v29 = vld [vmem:[%s23796_s24 + $0x1f0] sm:$0xff] (!%p17551_p0) }
 0xfe0   : > { %19870 = vrsqrt.f32 %v15320_v32  ;;  %v15405_v32 = vld [vmem:[%s23796_s24 + $0x20] sm:$0xff] (!%p17551_p0) }
 0xfe8   : > { %v19869_v30 = vpop.eup %19868 }
 0xfe9   : > { %v15323_v51 = vmul.f32 %v19869_v30, %v15291_v26  ;;  %v15324_v47 = vmul.f32 %v19869_v30, %v15292_v22  ;;  %v15325_v53 = vmul.f32 %v19869_v30, %v15293_v60  ;;  %v15326_v27 = vmul.f32 %v19869_v30, %v15294_v36  ;;  %v15417_v22 = vld [vmem:[%s23796_s24 + $0x80] sm:$0xff] (!%p17551_p0) }
 0xfea   : > { %v19871_v37 = vpop.eup %19870  ;;  %v15401_v60 = vld [vmem:[%s23796_s24] sm:$0xff] (!%p17551_p0)  ;;  %v17861_v36 = vpack.c.bf16 (!%p17551_p0), %v15418_v13, %v15417_v22 }
 0xfeb   : > { %v15352_v10 = vmul.f32 %v15335_v43, %v15323_v51  ;;  %v15353_v44 = vmul.f32 %v15339_v24, %v15324_v47  ;;  %v15354_v28 = vmul.f32 %v15343_v45, %v15325_v53  ;;  %v15355_v2 = vmul.f32 %v15347_v56, %v15326_v27  ;;  %v15408_v47 = vld [vmem:[%s23796_s24 + $0x38] sm:$0xff] (!%p17551_p0)  ;;  %v15455_v53 = vld [vmem:[%s23796_s24 + $0x1b0] sm:$0xff] (!%p17551_p0) }
 0xfec   : > { %v15327_v41 = vmul.f32 %v19871_v37, %v15295_v20  ;;  %v15328_v33 = vmul.f32 %v19871_v37, %v15296_v17  ;;  %v15329_v38 = vmul.f32 %v19871_v37, %v15297_v15  ;;  %v15330_v19 = vmul.f32 %v19871_v37, %v15298_v9  ;;  %v15402_v20 = vld [vmem:[%s23796_s24 + $0x8] sm:$0xff] (!%p17551_p0)  ;;  %v15449_v17 = vld [vmem:[%s23796_s24 + $0x180] sm:$0xff] (!%p17551_p0)  ;;  %v15419_v9 = vld [vmem:[%s23796_s24 + $0x90] sm:$0xff] (!%p17551_p0)  ;;  %17862 = vmatprep.subr.bf16.mxu0 (!%p17551_p0), %v17861_v36 }
 0xfed   : > { %v23470_v40 = vadd.f32 %v15364_v31, %v15352_v10  ;;  %v15382_v58 = vadd.f32 %v15368_v35, %v15353_v44  ;;  %v23472_v49 = vadd.f32 %v15372_v57, %v15354_v28  ;;  %v15384_v54 = vadd.f32 %v15376_v8, %v15355_v2  ;;  %15400 = sbr.rel (%p17551_p0) target bundleno = 4332 (0x10ec), region = 140  ;;  %v15433_v15 = vld [vmem:[%s23796_s24 + $0x100] sm:$0xff] (!%p17551_p0)  ;;  %v15456_v27 = vld [vmem:[%s23796_s24 + $0x1b8] sm:$0xff] (!%p17551_p0)  ;;  %v15439_v10 = vld [vmem:[%s23796_s24 + $0x130] sm:$0xff] (!%p17551_p0) }
 0xfee   : > { %v15356_v5 = vmul.f32 %v15335_v43, %v15327_v41  ;;  %v15357_v59 = vmul.f32 %v15339_v24, %v15328_v33  ;;  %v15358_v48 = vmul.f32 %v15343_v45, %v15329_v38  ;;  %v15359_v18 = vmul.f32 %v15347_v56, %v15330_v19  ;;  %v15454_v43 = vld [vmem:[%s23796_s24 + $0x1a8] sm:$0xff] (!%p17551_p0)  ;;  %v15437_v24 = vld [vmem:[%s23796_s24 + $0x120] sm:$0xff] (!%p17551_p0)  ;;  %v15440_v44 = vld [vmem:[%s23796_s24 + $0x138] sm:$0xff] (!%p17551_p0) }
 0xfef   : > { %15389 = vst [vmem:[#allocation2] sm:$0xff] %v23470_v40  ;;  %15390 = vst [vmem:[#allocation2 + $0x8] sm:$0xff] %v15382_v58  ;;  %15536 = vmatprep.mubr.f32.mxu0 (!%p17551_p0), %v15382_v58  ;;  %15606 = vmatprep.mubr.f32.mxu1 (!%p17551_p0), %v15384_v54  ;;  %v17863_v61 = vpack.c.bf16 (!%p17551_p0), %v15402_v20, %v15401_v60  ;;  %v17893_v6 = vpack.c.bf16 (!%p17551_p0), %v15450_v11, %v15449_v17  ;;  %v15438_v45 = vld [vmem:[%s23796_s24 + $0x128] sm:$0xff] (!%p17551_p0)  ;;  %v15425_v28 = vld [vmem:[%s23796_s24 + $0xc0] sm:$0xff] (!%p17551_p0) }
 0xff0   : > { %15391 = vst [vmem:[#allocation2 + $0x10] sm:$0xff] %v23472_v49  ;;  %15392 = vst [vmem:[#allocation2 + $0x18] sm:$0xff] %v15384_v54  ;;  %v15385_v63 = vadd.f32 %v15364_v31, %v15356_v5  ;;  %v15386_v14 = vadd.f32 %v15368_v35, %v15357_v59  ;;  %v15387_v52 = vadd.f32 %v15372_v57, %v15358_v48  ;;  %v15423_v31 = vld [vmem:[%s23796_s24 + $0xb0] sm:$0xff] (!%p17551_p0)  ;;  %v15424_v35 = vld [vmem:[%s23796_s24 + $0xb8] sm:$0xff] (!%p17551_p0) }
 0xff1   : > { %v15388_v26 = vadd.f32 %v15376_v8, %v15359_v18  ;;  %v17895_v4 = vpack.c.bf16 (!%p17551_p0), %v15434_v0, %v15433_v15  ;;  %17864 = vmatpush3.bf16.msra.mxu0 (!%p17551_p0), %v17863_v61  ;;  %17894 = vmatprep.subr.bf16.mxu1 (!%p17551_p0), %v17893_v6  ;;  %v17865_v39 = vpack.c.bf16 (!%p17551_p0), %v15420_v1, %v15419_v9  ;;  %v15407_v57 = vld [vmem:[%s23796_s24 + $0x30] sm:$0xff] (!%p17551_p0)  ;;  %v15426_v2 = vld [vmem:[%s23796_s24 + $0xc8] sm:$0xff] (!%p17551_p0)  ;;  %v15457_v33 = vld [vmem:[%s23796_s24 + $0x1c0] sm:$0xff] (!%p17551_p0) }
 0xff2   : > { %15393 = vst [vmem:[#allocation2 + $0x20] sm:$0xff] %v15385_v63  ;;  %15394 = vst [vmem:[#allocation2 + $0x28] sm:$0xff] %v15386_v14  ;;  %v17871_v56 = vpack.c.bf16 (!%p17551_p0), %v15406_v21, %v15405_v32  ;;  %v17901_v30 = vpack.c.bf16 (!%p17551_p0), %v15454_v43, %v15453_v12  ;;  %v17903_v8 = vpack.c.bf16 (!%p17551_p0), %v15438_v45, %v15437_v24  ;;  %v15458_v38 = vld [vmem:[%s23796_s24 + $0x1c8] sm:$0xff] (!%p17551_p0)  ;;  %v15409_v54 = vld [vmem:[%s23796_s24 + $0x40] sm:$0xff] (!%p17551_p0) }
 0xff3   : > { %15395 = vst [vmem:[#allocation2 + $0x30] sm:$0xff] %v15387_v52  ;;  %15396 = vst [vmem:[#allocation2 + $0x38] sm:$0xff] %v15388_v26  ;;  %17896 = vmatpush3.bf16.msra.mxu1 (!%p17551_p0), %v17895_v4  ;;  %17866 = vmatprep.subr.bf16.mxu0 (!%p17551_p0), %v17865_v39  ;;  %v17873_v51 = vpack.c.bf16 (!%p17551_p0), %v15424_v35, %v15423_v31  ;;  %v17905_v37 = vpack.c.bf16 (!%p17551_p0), %v15456_v27, %v15455_v53  ;;  %v15410_v5 = vld [vmem:[%s23796_s24 + $0x48] sm:$0xff] (!%p17551_p0)  ;;  %v15441_v59 = vld [vmem:[%s23796_s24 + $0x140] sm:$0xff] (!%p17551_p0) }
 0xff4   : > { %17898 = vmatprep.subr.bf16.mxu1 %v17897_v46  ;;  %v17875_v41 = vpack.c.bf16 %v15408_v47, %v15407_v57  ;;  %v17907_v19 = vpack.c.bf16 %v15440_v44, %v15439_v10  ;;  %v17877_v58 = vpack.c.bf16 %v15426_v2, %v15425_v28  ;;  %v17909_v48 = vpack.c.bf16 %v15458_v38, %v15457_v33  ;;  %v15442_v18 = vld [vmem:[%s23796_s24 + $0x148] sm:$0xff]  ;;  %v15427_v63 = vld [vmem:[%s23796_s24 + $0xd0] sm:$0xff]  ;;  %v15428_v14 = vld [vmem:[%s23796_s24 + $0xd8] sm:$0xff] }
 0xff5   : > { %17868 = vmatpush3.bf16.msra.mxu0 %v17867_v34  ;;  %v15459_v52 = vld [vmem:[%s23796_s24 + $0x1d0] sm:$0xff]  ;;  %v15460_v26 = vld [vmem:[%s23796_s24 + $0x1d8] sm:$0xff]  ;;  %v17879_v22 = vpack.c.bf16 %v15410_v5, %v15409_v54  ;;  %v17911_v13 = vpack.c.bf16 %v15442_v18, %v15441_v59  ;;  %v17881_v60 = vpack.c.bf16 %v15428_v14, %v15427_v63  ;;  %v15429_v6 = vld [vmem:[%s23796_s24 + $0xe0] sm:$0xff]  ;;  %v17921_v12 = vpack.c.bf16 %v15464_v55, %v15463_v29 }
 0xff6   : > { %17870 = vmatprep.subr.bf16.mxu0 %v17869_v62  ;;  %v15411_v36 = vld [vmem:[%s23796_s24 + $0x50] sm:$0xff]  ;;  %v15412_v20 = vld [vmem:[%s23796_s24 + $0x58] sm:$0xff]  ;;  %v17913_v11 = vpack.c.bf16 %v15460_v26, %v15459_v52  ;;  %v15430_v15 = vld [vmem:[%s23796_s24 + $0xe8] sm:$0xff] }
 0xff7   : > { %17900 = vmatpush3.bf16.msra.mxu1 %v17899_v7  ;;  %v15443_v17 = vld [vmem:[%s23796_s24 + $0x150] sm:$0xff]  ;;  %v15444_v61 = vld [vmem:[%s23796_s24 + $0x158] sm:$0xff]  ;;  %v15461_v0 = vld [vmem:[%s23796_s24 + $0x1e0] sm:$0xff]  ;;  %v17883_v4 = vpack.c.bf16 %v15412_v20, %v15411_v36  ;;  %v17885_v23 = vpack.c.bf16 %v15430_v15, %v15429_v6 }
 0xff8   : > { %17902 = vmatprep.subr.bf16.mxu1 %v17901_v30  ;;  %v15462_v9 = vld [vmem:[%s23796_s24 + $0x1e8] sm:$0xff]  ;;  %v17915_v1 = vpack.c.bf16 %v15444_v61, %v15443_v17  ;;  %v15445_v34 = vld [vmem:[%s23796_s24 + $0x160] sm:$0xff]  ;;  %v15432_v46 = vld [vmem:[%s23796_s24 + $0xf8] sm:$0xff] }
 0xff9   : > { %17872 = vmatpush3.bf16.msra.mxu0 %v17871_v56  ;;  %v15414_v39 = vld [vmem:[%s23796_s24 + $0x68] sm:$0xff]  ;;  %v17917_v16 = vpack.c.bf16 %v15462_v9, %v15461_v0  ;;  %v17919_v7 = vpack.c.bf16 %v15446_v50, %v15445_v34  ;;  %v17889_v62 = vpack.c.bf16 %v15432_v46, %v15431_v42  ;;  %v15415_v32 = vld [vmem:[%s23796_s24 + $0x70] sm:$0xff]  ;;  %v15416_v21 = vld [vmem:[%s23796_s24 + $0x78] sm:$0xff] }
 0xffa   : > { %17874 = vmatprep.subr.bf16.mxu0 %v17873_v51  ;;  %v17887_v3 = vpack.c.bf16 %v15414_v39, %v15413_v25  ;;  %v15447_v43 = vld [vmem:[%s23796_s24 + $0x170] sm:$0xff]  ;;  %v15448_v24 = vld [vmem:[%s23796_s24 + $0x178] sm:$0xff]  ;;  %v17891_v45 = vpack.c.bf16 %v15416_v21, %v15415_v32  ;;  %v17552_v31 = vld [vmem:[#allocation23] ss:$0 sm:$0xff] }
 0xffb   : > { %17904 = vmatpush3.bf16.msra.mxu1 %v17903_v8  ;;  %v17923_v56 = vpack.c.bf16 %v15448_v24, %v15447_v43 }
 0xffc   : > { %17906 = vmatprep.subr.bf16.mxu1 %v17905_v37 }
 0xffd   : > { %17876 = vmatpush3.bf16.msra.mxu0 %v17875_v41 }
 0xffe   : > { %17878 = vmatprep.subr.bf16.mxu0 %v17877_v58 }
 0xfff   : > { %17908 = vmatpush3.bf16.msra.mxu1 %v17907_v19 }
0x1000   : > { %17910 = vmatprep.subr.bf16.mxu1 %v17909_v48 }
0x1001   : > { %17880 = vmatpush3.bf16.msra.mxu0 %v17879_v22 }
0x1002   : > { %17882 = vmatprep.subr.bf16.mxu0 %v17881_v60 }
0x1003   : > { %17912 = vmatpush3.bf16.msra.mxu1 %v17911_v13 }
0x1004   : > { %17914 = vmatprep.subr.bf16.mxu1 %v17913_v11 }
0x1005   : > { %17884 = vmatpush3.bf16.msra.mxu0 %v17883_v4 }
0x1006   : > { %17886 = vmatprep.subr.bf16.mxu0 %v17885_v23 }
0x1007   : > { %17916 = vmatpush3.bf16.msra.mxu1 %v17915_v1 }
0x1008   : > { %17918 = vmatprep.subr.bf16.mxu1 %v17917_v16 }
0x1009   : > { %17888 = vmatpush3.bf16.msra.mxu0 %v17887_v3 }
0x100a   : > { %17890 = vmatprep.subr.bf16.mxu0 %v17889_v62 }
0x100b   : > { %17920 = vmatpush3.bf16.msra.mxu1 %v17919_v7 }
0x100c   : > { %17922 = vmatprep.subr.bf16.mxu1 %v17921_v12 }
0x100d   : > { %17892 = vmatpush3.bf16.msra.mxu0 %v17891_v45 }
0x100f   : > { %17924 = vmatpush3.bf16.msra.mxu1 %v17923_v56 }
0x1010   : > { %15537 = vmatmul.mubr.f32.vlgmr.msra.gmra.mrb[0].mxu0 %v23470_v40 }
0x1012   : > { %15607 = vmatmul.mubr.f32.vlgmr.msra.gmra.mrb[0].mxu1 %v23472_v49 }
0x10e3   : > { %v17663_v30 = vpop.f32.mrb[0].mxu0 }
0x10e4   : > { %v17664_v35 = vpop.f32.mrb[1].mxu0 }
0x10e5   : > { %v17698_v57 = vpop.f32.mrb[0].mxu1  ;;  %v17665_v8 = vadd.f32 %v17664_v35, %v17663_v30 }
0x10e6   : > { %v17699_v51 = vpop.f32.mrb[1].mxu1 }
0x10e7   : > { %v17700_v47 = vadd.f32 %v17699_v51, %v17698_v57  ;;  %v15539_v53 = vadd.f32 %v17665_v8, %v17552_v31 }
0x10e9   : > { %v15609_v27 = vadd.f32 %v17700_v47, %v15539_v53 }
0x10eb   : > { %15613 = vst.msk [vmem:[#allocation24] sm:$0xff] %vm15612_vm3, %v15609_v27 }
0x10ec PF: > { %s23797_s23 = sld [smem:[#allocation35_spill]]  ;;  %s20384_s26 = smov [#allocation24]  }
0x10ed   : > { %s15621_s15 = sshll.u32 %s20384_s26, 4  ;;  %s15622_s15 = int_to_ptr.vmem [resolvable:$true] %s15621_s15 }
0x10ee   : > { %s20268_s13 = scalar_lea.vmem %s15622_s15, 128  ;;  %p20275_p13 = scmp.lt.s32.totalorder %s15622_s15, %s15622_s15 }
0x10ef   : > { %p20269_p7 = scmp.ne.s32.totalorder %s15622_s15, %s20268_s13  ;;  %p20276_p10 = scmp.lt.s32.totalorder %s20268_s13, %s20268_s13 }
0x10f1   : > { %p20277_p11 = por %p20276_p10, %p20275_p13 }
0x10f2   : > { %p18199_p6 = scmp.eq.s32.totalorder %s23797_s23, 5 }
0x10f4   : > { %p20270_p5 = pnand %p20269_p7, %p18199_p6 }
0x10f6   : > { %p20271_p1 = pneg %p20270_p5 }
0x10f8   : > { %p20278_p12 = pnand %p20277_p11, %p20271_p1 }
0x10fa   : > { %20281 = shalt.err (!%p20278_p12)
}
0x10fb   : > { %s23798_s28 = sld [smem:[#allocation45_spill]] }
0x1101   : > { %s20282_s22 = scalar_lea.hbm %s23798_s28, 128 }
0x1102   : > { %p20283_p2 = scmp.ne.s32.totalorder %s23798_s28, %s20282_s22  ;;  %p20288_p8 = scmp.lt.u32.totalorder %s20282_s22, %s23798_s28 }
0x1104   : > { %p20284_p9 = pnand %p20283_p2, %p18199_p6 }
0x1106   : > { %p20285_p4 = pneg %p20284_p9 }
0x1108   : > { %p20290_p3 = pnand %p20288_p8, %p20285_p4 }
0x110a   : > { %20293 = shalt.err (!%p20290_p3)
}
0x110b   : > { %18152 = dma.vmem_to_hbm [thread:$0]  (%p18199_p6), %s15622_s15, 128, %s23798_s28, [#allocation5]  }
0x110c   : > { %20343 = dma.done.wait (%p18199_p6), [#allocation5], 128  }
0x110d   : > { %20345 = vsyncadd (%p18199_p6), [#allocation5], 4294967168 }
0x110e PF: > { %s23799_s21 = sld [smem:[#allocation36_spill]]  ;;  %s23800_s14 = sld [smem:[#allocation34_spill]] }
0x110f   : > { %s23801_s20 = sld [smem:[#allocation37_spill]]  ;;  %s23802_s18 = smov %s20352_s19 }
0x1114   : > { %p44_p0 = scmp.ge.s32.totalorder %s23799_s21, 8   ;;  %s23803_s19 = smov %s23800_s14 }
0x1116   :  { %46 = sbr.rel (!%p44_p0) target bundleno = 24 (0x18), region = 262 }
0x111d   :  { %15634 = vsyncpa [#allocation4], 1 }
0x111e   :  { %15636 = vsyncpa [#allocation4 + $0x1], 1 }
0x111f   :  { %15637 = vsyncpa [#allocation7], 1 }
0x1120   :  { %15639 = vsyncpa [#allocation7 + $0x1], 1 }
0x1121   :  { %15640 = vsyncpa [#allocation10], 1 }
0x1122   :  { %15642 = vsyncpa [#allocation10 + $0x1], 1 }
0x1123   :  { %15643 = vsyncpa [#allocation13], 1 }
0x1124   :  { %15645 = vsyncpa [#allocation13 + $0x1], 1 }
0x1125   :  { %15646 = vsyncpa [#allocation16], 1 }
0x1126   :  { %15648 = vsyncpa [#allocation16 + $0x1], 1 }
0x1127   :  { %15649 = vsyncpa [#allocation19], 1 }
0x1128   :  { %15651 = vsyncpa [#allocation19 + $0x1], 1 }
0x1129   :  { %15652 = vsyncpa [#allocation22], 1 }
0x112a   :  { %15654 = vsyncpa [#allocation22 + $0x1], 1 }
0x112b   :  { %15655 = vsyncpa [#allocation5], 1 }
0x112c   :  { %15657 = vsyncpa [#allocation5 + $0x1], 1 }

</bundles_post_ra>
